<compile_context>
chip_gen: v7x
topology: tpu7x:2x2x1
jax: 0.10.0
libtpu: 0.0.40
codegen_flags: <defaults>
</compile_context>

<pallas_src>
import jax
import jax.numpy as jnp
from jax.experimental import pallas as pl
from jax.experimental.pallas import tpu as pltpu

# ----------------------------- problem sizes -----------------------------------
B = 32             # batch of board states (MCTS leaf batch)
C = 4              # input planes
H = W = 8          # board size
P = H * W          # spatial positions per board (64)
F = 128            # conv trunk filters (lane-dense feature dim)
A = H * W          # one action per cell -> 64 policy logits
VH = 128           # value-head hidden width (padded toward 128 for MXU occupancy)
K_HEAD = P * F     # flattened feature length (8192)
OUT_LANES = 128    # lane-dense head output: lanes [0, A) policy, lane A value
NH = OUT_LANES + VH   # fused head-weight output width: [0:128] policy, [128:256] value hidden
TB = 32            # batch tile -> grid=(1,) at B=32

# Lane-A packing of the value output requires A < OUT_LANES and zero-padded policy cols >= A.
assert A < OUT_LANES


# ----------------------------- Pallas kernel ------------------------------------


def fused_pvnet_kernel(col_ref, cw_ref, cb_ref, hw_ref, hb_ref, vw2_ref, vb2_ref,
                       out_ref, feat_ref, flat_ref):
    """Conv trunk + policy/value heads for one batch tile, fully fused in VMEM.

    col_ref:  (P, TB, 9*C)     bf16  im2col patches, position-major, taps ordered (ky, kx, c)
    cw_ref:   (9*C, F)         bf16  conv weight, rows ordered (ky, kx, c)
    cb_ref:   (1, F)           f32   conv bias
    hw_ref:   (K_HEAD, NH)     bf16  fused head weight: cols [0:128] policy (zero-padded
                                     beyond col A), cols [128:256] value hidden
    hb_ref:   (1, NH)          f32   fused head bias (same column layout)
    vw2_ref:  (1, VH)          f32   value output weight (row vector)
    vb2_ref:  (1, 1)           f32   value output bias (SMEM scalar)
    out_ref:  (TB, OUT_LANES)  f32   lanes [0, A): policy logits, lane A: tanh(value)
    feat_ref: (P*TB, F)        bf16  scratch: conv output, rows ordered (p, b)
    flat_ref: (TB, K_HEAD)     bf16  scratch: flattened activations, lanes ordered (p, f)
    """
    tb = col_ref.shape[1]

    # ---- conv trunk: ONE (P*TB, 9C) x (9C, F) MXU matmul + bias + ReLU ----------
    col = col_ref[...].reshape(P * tb, 9 * C)          # leading-dim merge: layout-free
    feat_ref[...] = jnp.maximum(
        jnp.dot(col, cw_ref[...], preferred_element_type=jnp.float32) + cb_ref[...],
        0.0).astype(feat_ref.dtype)                    # rows ordered (p, b)

    # ---- repack (p,b)-rows / f-lanes  ->  b-rows / (p,f)-lanes -------------------
    # 64 tile-aligned (TB, 128) copies: sublane start multiple of TB, lane start multiple
    # of 128 -> unmasked full-vreg moves, no XLU relayout.
    for p in range(P):
        flat_ref[:, p * F:(p + 1) * F] = feat_ref[p * tb:(p + 1) * tb, :]

    # ---- fused heads: ONE (TB, K_HEAD) x (K_HEAD, 256) MXU matmul ----------------
    acc = jnp.dot(flat_ref[...], hw_ref[...],
                  preferred_element_type=jnp.float32) + hb_ref[...]
    pol = acc[:, :OUT_LANES]                           # policy logits (zero beyond col A)
    hidden = jnp.maximum(acc[:, OUT_LANES:], 0.0)      # value hidden
    # VH -> 1 projection on the VPU/XLU (broadcast-mul + lane reduce); a 1-wide MXU
    # matmul would waste the systolic array.
    v = jnp.tanh(jnp.sum(hidden * vw2_ref[...], axis=-1, keepdims=True) + vb2_ref[0, 0])
    lane = jax.lax.broadcasted_iota(jnp.int32, out_ref.shape, 1)
    out_ref[...] = jnp.where(lane == A, v, pol)        # lane-dense combined store


# ------------------------------- JAX wrapper ------------------------------------


def prepare_params(params):
    """Cast / pad / fuse the f32 parameters into the layouts the kernel consumes (once)."""
    pw_pad = jnp.zeros((K_HEAD, OUT_LANES), jnp.float32).at[:, :A].set(params["pol_w"])
    pb_pad = jnp.zeros((1, OUT_LANES), jnp.float32).at[:, :A].set(params["pol_b"])
    # TODO(synk): on v7x consider fp8 for this 4 MiB fused head weight (kernel is weight-DMA
    # bound); verify against the 3e-2 tolerance before enabling.
    head_w = jnp.concatenate([pw_pad, params["val_w1"]], axis=1)      # (K_HEAD, 256)
    head_b = jnp.concatenate([pb_pad, params["val_b1"]], axis=1)      # (1, 256)
    return {
        "cw": params["conv_w"].reshape(9 * C, F).astype(jnp.bfloat16),   # rows (ky, kx, c)
        "cb": params["conv_b"].astype(jnp.float32),
        "hw": head_w.astype(jnp.bfloat16),
        "hb": head_b.astype(jnp.float32),
        "vw2": params["val_w2"].reshape(1, VH).astype(jnp.float32),
        "vb2": params["val_b2"].reshape(1, 1).astype(jnp.float32),
    }


@jax.jit
def pvnet_forward(x_nchw, prep):
    """Forward pass. Returns (policy_logits (N, A), value (N, 1))."""
    b = x_nchw.shape[0]
    assert b % TB == 0
    # im2col in the wrapper (XLA fuses the pad/transpose/slice chain); position-major layout
    # so the kernel's conv LHS is one contiguous (P*TB, 9C) slab per batch tile.
    x_nhwc = jnp.transpose(x_nchw, (0, 2, 3, 1)).astype(jnp.float32)
    x_pad = jnp.pad(x_nhwc, ((0, 0), (1, 1), (1, 1), (0, 0)))             # (B, H+2, W+2, C)
    taps = [x_pad[:, dy:dy + H, dx:dx + W, :] for dy in range(3) for dx in range(3)]
    col = jnp.stack(taps, axis=3).reshape(b, P, 9 * C)                    # taps (ky, kx, c)
    col_pm = jnp.transpose(col, (1, 0, 2)).astype(jnp.bfloat16)           # (P, B, 9*C)

    out = pl.pallas_call(
        fused_pvnet_kernel,
        out_shape=jax.ShapeDtypeStruct((b, OUT_LANES), jnp.float32),
        grid=(b // TB,),
        in_specs=[
            pl.BlockSpec((P, TB, 9 * C), lambda i: (0, i, 0)),
            pl.BlockSpec((9 * C, F), lambda i: (0, 0)),       # weights: constant index_map,
            pl.BlockSpec((1, F), lambda i: (0, 0)),           # stay VMEM-resident
            pl.BlockSpec((K_HEAD, NH), lambda i: (0, 0)),
            pl.BlockSpec((1, NH), lambda i: (0, 0)),
            pl.BlockSpec((1, VH), lambda i: (0, 0)),
            pl.BlockSpec(memory_space=pltpu.MemorySpace.SMEM),  # scalar value bias
        ],
        out_specs=pl.BlockSpec((TB, OUT_LANES), lambda i: (i, 0)),
        scratch_shapes=[pltpu.VMEM((P * TB, F), jnp.bfloat16),    # conv output
                        pltpu.VMEM((TB, K_HEAD), jnp.bfloat16)],  # flattened activations
        compiler_params=pltpu.CompilerParams(
            dimension_semantics=("parallel",),
            vmem_limit_bytes=32 * 1024 * 1024),
    )(col_pm, prep["cw"], prep["cb"], prep["hw"], prep["hb"], prep["vw2"], prep["vb2"])
    # TODO(synk): on v7x, shard the megacore over the 256-wide head-N dim (disjoint 2 MiB
    # weight halves per core) instead of batch; batch-splitting re-fetches the same weights.
    return out[:, :A], out[:, A:A + 1]


# ------------------------------- reference & test --------------------------------


def init_params(key):
    ks = jax.random.split(key, 7)
    s = 0.05
    return {
        "conv_w": s * jax.random.normal(ks[0], (3, 3, C, F), jnp.float32),   # HWIO
        "conv_b": s * jax.random.normal(ks[1], (1, F), jnp.float32),
        "pol_w": s * jax.random.normal(ks[2], (K_HEAD, A), jnp.float32),
        "pol_b": s * jax.random.normal(ks[3], (1, A), jnp.float32),
        "val_w1": s * jax.random.normal(ks[4], (K_HEAD, VH), jnp.float32),
        "val_b1": s * jax.random.normal(ks[5], (1, VH), jnp.float32),
        "val_w2": s * jax.random.normal(ks[6], (VH, 1), jnp.float32),
        "val_b2": jnp.zeros((1, 1), jnp.float32),
    }


def reference_forward(x_nchw, params):
    """Pure-JAX f32 reference for numerical verification."""
    x = jnp.transpose(x_nchw, (0, 2, 3, 1))
    y = jax.lax.conv_general_dilated(
        x, params["conv_w"], window_strides=(1, 1), padding="SAME",
        dimension_numbers=("NHWC", "HWIO", "NHWC"))
    y = jnp.maximum(y + params["conv_b"].reshape(1, 1, 1, -1), 0.0)
    flat = y.reshape(x.shape[0], -1)                      # (h, w, channel) order
    pol = flat @ params["pol_w"] + params["pol_b"]
    h = jnp.maximum(flat @ params["val_w1"] + params["val_b1"], 0.0)
    val = jnp.tanh(h @ params["val_w2"] + params["val_b2"])
    return pol, val


if __name__ == "__main__":
    key = jax.random.PRNGKey(0)
    k_x, k_p = jax.random.split(key)
    x = jax.random.normal(k_x, (B, C, H, W), jnp.float32)
    params = init_params(k_p)
    prep = prepare_params(params)

    pol, val = pvnet_forward(x, prep)
    jax.block_until_ready((pol, val))

    pol_ref, val_ref = reference_forward(x, params)
    assert pol.shape == (B, A) and val.shape == (B, 1)
    # bf16 matmul operands with f32 accumulation: ~0.5-1% relative error vs the f32 ref.
    assert jnp.allclose(pol, pol_ref, atol=3e-2, rtol=3e-2), float(jnp.max(jnp.abs(pol - pol_ref)))
    assert jnp.allclose(val, val_ref, atol=3e-2, rtol=3e-2), float(jnp.max(jnp.abs(val - val_ref)))

    print("KERNEL_OK")
</pallas_src>

<mosaic_0001>
module attributes {stable_mosaic.version = 11 : i64} {
  func.func @fused_pvnet_kernel(%arg0: i32, %arg1: memref<64x32x36xbf16, #tpu.memory_space<vmem>>, %arg2: memref<36x128xbf16, #tpu.memory_space<vmem>>, %arg3: memref<1x128xf32, #tpu.memory_space<vmem>>, %arg4: memref<8192x256xbf16, #tpu.memory_space<vmem>>, %arg5: memref<1x256xf32, #tpu.memory_space<vmem>>, %arg6: memref<1x128xf32, #tpu.memory_space<vmem>>, %arg7: memref<1x1xf32, #tpu.memory_space<smem>>, %arg8: memref<32x128xf32, #tpu.memory_space<vmem>>, %arg9: memref<2048x128xbf16, #tpu.memory_space<vmem>>, %arg10: memref<32x8192xbf16, #tpu.memory_space<vmem>>) attributes {dimension_semantics = [#tpu.dimension_semantics<parallel>], iteration_bounds = array<i64: 1>, scalar_prefetch = 0 : i64, scratch_operands = 2 : i64, tpu.core_type = #tpu.core_type<tc>, window_params = [{transform_indices = @transform_0, window_bounds = array<i64: 64, 32, 36>}, {pipeline_mode = #tpu.pipeline_mode<synchronous>, transform_indices = @transform_1, window_bounds = array<i64: 36, 128>}, {pipeline_mode = #tpu.pipeline_mode<synchronous>, transform_indices = @transform_2, window_bounds = array<i64: 1, 128>}, {pipeline_mode = #tpu.pipeline_mode<synchronous>, transform_indices = @transform_3, window_bounds = array<i64: 8192, 256>}, {pipeline_mode = #tpu.pipeline_mode<synchronous>, transform_indices = @transform_4, window_bounds = array<i64: 1, 256>}, {pipeline_mode = #tpu.pipeline_mode<synchronous>, transform_indices = @transform_5, window_bounds = array<i64: 1, 128>}, {transform_indices = @transform_6, window_bounds = array<i64: 1, 1>}, {transform_indices = @transform_7, window_bounds = array<i64: 32, 128>}]} {
    %c0 = arith.constant 0 : index
    %c0_0 = arith.constant 0 : index
    %c0_1 = arith.constant 0 : index
    %0 = vector.load %arg1[%c0, %c0_0, %c0_1] : memref<64x32x36xbf16, #tpu.memory_space<vmem>>, vector<64x32x36xbf16>
    %1 = vector.shape_cast %0 : vector<64x32x36xbf16> to vector<2048x36xbf16>
    %c0_2 = arith.constant 0 : index
    %c0_3 = arith.constant 0 : index
    %2 = vector.load %arg2[%c0_2, %c0_3] : memref<36x128xbf16, #tpu.memory_space<vmem>>, vector<36x128xbf16>
    %cst = arith.constant dense<0.000000e+00> : vector<2048x128xf32>
    %3 = tpu.matmul %1, %2, %cst {dimension_numbers = #tpu.dot_dimension_numbers<[1], [0], [0], [1], [0, 0, 1, 1], [], []>} : vector<2048x36xbf16>, vector<36x128xbf16>, vector<2048x128xf32> -> vector<2048x128xf32>
    %c0_4 = arith.constant 0 : index
    %c0_5 = arith.constant 0 : index
    %4 = vector.load %arg3[%c0_4, %c0_5] : memref<1x128xf32, #tpu.memory_space<vmem>>, vector<1x128xf32>
    %5 = vector.broadcast %4 : vector<1x128xf32> to vector<2048x128xf32>
    %6 = arith.addf %3, %5 : vector<2048x128xf32>
    %cst_6 = arith.constant 0.000000e+00 : f32
    %7 = vector.broadcast %cst_6 : f32 to vector<2048x128xf32>
    %8 = arith.maximumf %6, %7 : vector<2048x128xf32>
    %9 = arith.truncf %8 : vector<2048x128xf32> to vector<2048x128xbf16>
    %c0_7 = arith.constant 0 : index
    %c0_8 = arith.constant 0 : index
    %10 = vector.load %arg9[%c0_7, %c0_8] : memref<2048x128xbf16, #tpu.memory_space<vmem>>, vector<2048x128xbf16>
    tpu.vector_store %arg9[%c0_7, %c0_8], %9 {strides = array<i32>} : memref<2048x128xbf16, #tpu.memory_space<vmem>>, vector<2048x128xbf16>,
    %c0_9 = arith.constant 0 : index
    %c0_10 = arith.constant 0 : index
    %11 = vector.load %arg9[%c0_9, %c0_10] : memref<2048x128xbf16, #tpu.memory_space<vmem>>, vector<32x128xbf16>
    %c0_11 = arith.constant 0 : index
    %c0_12 = arith.constant 0 : index
    %12 = vector.load %arg10[%c0_11, %c0_12] : memref<32x8192xbf16, #tpu.memory_space<vmem>>, vector<32x128xbf16>
    tpu.vector_store %arg10[%c0_11, %c0_12], %11 {strides = array<i32>} : memref<32x8192xbf16, #tpu.memory_space<vmem>>, vector<32x128xbf16>,
    %c32 = arith.constant 32 : index
    %c0_13 = arith.constant 0 : index
    %13 = vector.load %arg9[%c32, %c0_13] : memref<2048x128xbf16, #tpu.memory_space<vmem>>, vector<32x128xbf16>
    %c0_14 = arith.constant 0 : index
    %c128 = arith.constant 128 : index
    %14 = vector.load %arg10[%c0_14, %c128] : memref<32x8192xbf16, #tpu.memory_space<vmem>>, vector<32x128xbf16>
    tpu.vector_store %arg10[%c0_14, %c128], %13 {strides = array<i32>} : memref<32x8192xbf16, #tpu.memory_space<vmem>>, vector<32x128xbf16>,
    %c64 = arith.constant 64 : index
    %c0_15 = arith.constant 0 : index
    %15 = vector.load %arg9[%c64, %c0_15] : memref<2048x128xbf16, #tpu.memory_space<vmem>>, vector<32x128xbf16>
    %c0_16 = arith.constant 0 : index
    %c256 = arith.constant 256 : index
    %16 = vector.load %arg10[%c0_16, %c256] : memref<32x8192xbf16, #tpu.memory_space<vmem>>, vector<32x128xbf16>
    tpu.vector_store %arg10[%c0_16, %c256], %15 {strides = array<i32>} : memref<32x8192xbf16, #tpu.memory_space<vmem>>, vector<32x128xbf16>,
    %c96 = arith.constant 96 : index
    %c0_17 = arith.constant 0 : index
    %17 = vector.load %arg9[%c96, %c0_17] : memref<2048x128xbf16, #tpu.memory_space<vmem>>, vector<32x128xbf16>
    %c0_18 = arith.constant 0 : index
    %c384 = arith.constant 384 : index
    %18 = vector.load %arg10[%c0_18, %c384] : memref<32x8192xbf16, #tpu.memory_space<vmem>>, vector<32x128xbf16>
    tpu.vector_store %arg10[%c0_18, %c384], %17 {strides = array<i32>} : memref<32x8192xbf16, #tpu.memory_space<vmem>>, vector<32x128xbf16>,
    %c128_19 = arith.constant 128 : index
    %c0_20 = arith.constant 0 : index
    %19 = vector.load %arg9[%c128_19, %c0_20] : memref<2048x128xbf16, #tpu.memory_space<vmem>>, vector<32x128xbf16>
    %c0_21 = arith.constant 0 : index
    %c512 = arith.constant 512 : index
    %20 = vector.load %arg10[%c0_21, %c512] : memref<32x8192xbf16, #tpu.memory_space<vmem>>, vector<32x128xbf16>
    tpu.vector_store %arg10[%c0_21, %c512], %19 {strides = array<i32>} : memref<32x8192xbf16, #tpu.memory_space<vmem>>, vector<32x128xbf16>,
    %c160 = arith.constant 160 : index
    %c0_22 = arith.constant 0 : index
    %21 = vector.load %arg9[%c160, %c0_22] : memref<2048x128xbf16, #tpu.memory_space<vmem>>, vector<32x128xbf16>
    %c0_23 = arith.constant 0 : index
    %c640 = arith.constant 640 : index
    %22 = vector.load %arg10[%c0_23, %c640] : memref<32x8192xbf16, #tpu.memory_space<vmem>>, vector<32x128xbf16>
    tpu.vector_store %arg10[%c0_23, %c640], %21 {strides = array<i32>} : memref<32x8192xbf16, #tpu.memory_space<vmem>>, vector<32x128xbf16>,
    %c192 = arith.constant 192 : index
    %c0_24 = arith.constant 0 : index
    %23 = vector.load %arg9[%c192, %c0_24] : memref<2048x128xbf16, #tpu.memory_space<vmem>>, vector<32x128xbf16>
    %c0_25 = arith.constant 0 : index
    %c768 = arith.constant 768 : index
    %24 = vector.load %arg10[%c0_25, %c768] : memref<32x8192xbf16, #tpu.memory_space<vmem>>, vector<32x128xbf16>
    tpu.vector_store %arg10[%c0_25, %c768], %23 {strides = array<i32>} : memref<32x8192xbf16, #tpu.memory_space<vmem>>, vector<32x128xbf16>,
    %c224 = arith.constant 224 : index
    %c0_26 = arith.constant 0 : index
    %25 = vector.load %arg9[%c224, %c0_26] : memref<2048x128xbf16, #tpu.memory_space<vmem>>, vector<32x128xbf16>
    %c0_27 = arith.constant 0 : index
    %c896 = arith.constant 896 : index
    %26 = vector.load %arg10[%c0_27, %c896] : memref<32x8192xbf16, #tpu.memory_space<vmem>>, vector<32x128xbf16>
    tpu.vector_store %arg10[%c0_27, %c896], %25 {strides = array<i32>} : memref<32x8192xbf16, #tpu.memory_space<vmem>>, vector<32x128xbf16>,
    %c256_28 = arith.constant 256 : index
    %c0_29 = arith.constant 0 : index
    %27 = vector.load %arg9[%c256_28, %c0_29] : memref<2048x128xbf16, #tpu.memory_space<vmem>>, vector<32x128xbf16>
    %c0_30 = arith.constant 0 : index
    %c1024 = arith.constant 1024 : index
    %28 = vector.load %arg10[%c0_30, %c1024] : memref<32x8192xbf16, #tpu.memory_space<vmem>>, vector<32x128xbf16>
    tpu.vector_store %arg10[%c0_30, %c1024], %27 {strides = array<i32>} : memref<32x8192xbf16, #tpu.memory_space<vmem>>, vector<32x128xbf16>,
    %c288 = arith.constant 288 : index
    %c0_31 = arith.constant 0 : index
    %29 = vector.load %arg9[%c288, %c0_31] : memref<2048x128xbf16, #tpu.memory_space<vmem>>, vector<32x128xbf16>
    %c0_32 = arith.constant 0 : index
    %c1152 = arith.constant 1152 : index
    %30 = vector.load %arg10[%c0_32, %c1152] : memref<32x8192xbf16, #tpu.memory_space<vmem>>, vector<32x128xbf16>
    tpu.vector_store %arg10[%c0_32, %c1152], %29 {strides = array<i32>} : memref<32x8192xbf16, #tpu.memory_space<vmem>>, vector<32x128xbf16>,
    %c320 = arith.constant 320 : index
    %c0_33 = arith.constant 0 : index
    %31 = vector.load %arg9[%c320, %c0_33] : memref<2048x128xbf16, #tpu.memory_space<vmem>>, vector<32x128xbf16>
    %c0_34 = arith.constant 0 : index
    %c1280 = arith.constant 1280 : index
    %32 = vector.load %arg10[%c0_34, %c1280] : memref<32x8192xbf16, #tpu.memory_space<vmem>>, vector<32x128xbf16>
    tpu.vector_store %arg10[%c0_34, %c1280], %31 {strides = array<i32>} : memref<32x8192xbf16, #tpu.memory_space<vmem>>, vector<32x128xbf16>,
    %c352 = arith.constant 352 : index
    %c0_35 = arith.constant 0 : index
    %33 = vector.load %arg9[%c352, %c0_35] : memref<2048x128xbf16, #tpu.memory_space<vmem>>, vector<32x128xbf16>
    %c0_36 = arith.constant 0 : index
    %c1408 = arith.constant 1408 : index
    %34 = vector.load %arg10[%c0_36, %c1408] : memref<32x8192xbf16, #tpu.memory_space<vmem>>, vector<32x128xbf16>
    tpu.vector_store %arg10[%c0_36, %c1408], %33 {strides = array<i32>} : memref<32x8192xbf16, #tpu.memory_space<vmem>>, vector<32x128xbf16>,
    %c384_37 = arith.constant 384 : index
    %c0_38 = arith.constant 0 : index
    %35 = vector.load %arg9[%c384_37, %c0_38] : memref<2048x128xbf16, #tpu.memory_space<vmem>>, vector<32x128xbf16>
    %c0_39 = arith.constant 0 : index
    %c1536 = arith.constant 1536 : index
    %36 = vector.load %arg10[%c0_39, %c1536] : memref<32x8192xbf16, #tpu.memory_space<vmem>>, vector<32x128xbf16>
    tpu.vector_store %arg10[%c0_39, %c1536], %35 {strides = array<i32>} : memref<32x8192xbf16, #tpu.memory_space<vmem>>, vector<32x128xbf16>,
    %c416 = arith.constant 416 : index
    %c0_40 = arith.constant 0 : index
    %37 = vector.load %arg9[%c416, %c0_40] : memref<2048x128xbf16, #tpu.memory_space<vmem>>, vector<32x128xbf16>
    %c0_41 = arith.constant 0 : index
    %c1664 = arith.constant 1664 : index
    %38 = vector.load %arg10[%c0_41, %c1664] : memref<32x8192xbf16, #tpu.memory_space<vmem>>, vector<32x128xbf16>
    tpu.vector_store %arg10[%c0_41, %c1664], %37 {strides = array<i32>} : memref<32x8192xbf16, #tpu.memory_space<vmem>>, vector<32x128xbf16>,
    %c448 = arith.constant 448 : index
    %c0_42 = arith.constant 0 : index
    %39 = vector.load %arg9[%c448, %c0_42] : memref<2048x128xbf16, #tpu.memory_space<vmem>>, vector<32x128xbf16>
    %c0_43 = arith.constant 0 : index
    %c1792 = arith.constant 1792 : index
    %40 = vector.load %arg10[%c0_43, %c1792] : memref<32x8192xbf16, #tpu.memory_space<vmem>>, vector<32x128xbf16>
    tpu.vector_store %arg10[%c0_43, %c1792], %39 {strides = array<i32>} : memref<32x8192xbf16, #tpu.memory_space<vmem>>, vector<32x128xbf16>,
    %c480 = arith.constant 480 : index
    %c0_44 = arith.constant 0 : index
    %41 = vector.load %arg9[%c480, %c0_44] : memref<2048x128xbf16, #tpu.memory_space<vmem>>, vector<32x128xbf16>
    %c0_45 = arith.constant 0 : index
    %c1920 = arith.constant 1920 : index
    %42 = vector.load %arg10[%c0_45, %c1920] : memref<32x8192xbf16, #tpu.memory_space<vmem>>, vector<32x128xbf16>
    tpu.vector_store %arg10[%c0_45, %c1920], %41 {strides = array<i32>} : memref<32x8192xbf16, #tpu.memory_space<vmem>>, vector<32x128xbf16>,
    %c512_46 = arith.constant 512 : index
    %c0_47 = arith.constant 0 : index
    %43 = vector.load %arg9[%c512_46, %c0_47] : memref<2048x128xbf16, #tpu.memory_space<vmem>>, vector<32x128xbf16>
    %c0_48 = arith.constant 0 : index
    %c2048 = arith.constant 2048 : index
    %44 = vector.load %arg10[%c0_48, %c2048] : memref<32x8192xbf16, #tpu.memory_space<vmem>>, vector<32x128xbf16>
    tpu.vector_store %arg10[%c0_48, %c2048], %43 {strides = array<i32>} : memref<32x8192xbf16, #tpu.memory_space<vmem>>, vector<32x128xbf16>,
    %c544 = arith.constant 544 : index
    %c0_49 = arith.constant 0 : index
    %45 = vector.load %arg9[%c544, %c0_49] : memref<2048x128xbf16, #tpu.memory_space<vmem>>, vector<32x128xbf16>
    %c0_50 = arith.constant 0 : index
    %c2176 = arith.constant 2176 : index
    %46 = vector.load %arg10[%c0_50, %c2176] : memref<32x8192xbf16, #tpu.memory_space<vmem>>, vector<32x128xbf16>
    tpu.vector_store %arg10[%c0_50, %c2176], %45 {strides = array<i32>} : memref<32x8192xbf16, #tpu.memory_space<vmem>>, vector<32x128xbf16>,
    %c576 = arith.constant 576 : index
    %c0_51 = arith.constant 0 : index
    %47 = vector.load %arg9[%c576, %c0_51] : memref<2048x128xbf16, #tpu.memory_space<vmem>>, vector<32x128xbf16>
    %c0_52 = arith.constant 0 : index
    %c2304 = arith.constant 2304 : index
    %48 = vector.load %arg10[%c0_52, %c2304] : memref<32x8192xbf16, #tpu.memory_space<vmem>>, vector<32x128xbf16>
    tpu.vector_store %arg10[%c0_52, %c2304], %47 {strides = array<i32>} : memref<32x8192xbf16, #tpu.memory_space<vmem>>, vector<32x128xbf16>,
    %c608 = arith.constant 608 : index
    %c0_53 = arith.constant 0 : index
    %49 = vector.load %arg9[%c608, %c0_53] : memref<2048x128xbf16, #tpu.memory_space<vmem>>, vector<32x128xbf16>
    %c0_54 = arith.constant 0 : index
    %c2432 = arith.constant 2432 : index
    %50 = vector.load %arg10[%c0_54, %c2432] : memref<32x8192xbf16, #tpu.memory_space<vmem>>, vector<32x128xbf16>
    tpu.vector_store %arg10[%c0_54, %c2432], %49 {strides = array<i32>} : memref<32x8192xbf16, #tpu.memory_space<vmem>>, vector<32x128xbf16>,
    %c640_55 = arith.constant 640 : index
    %c0_56 = arith.constant 0 : index
    %51 = vector.load %arg9[%c640_55, %c0_56] : memref<2048x128xbf16, #tpu.memory_space<vmem>>, vector<32x128xbf16>
    %c0_57 = arith.constant 0 : index
    %c2560 = arith.constant 2560 : index
    %52 = vector.load %arg10[%c0_57, %c2560] : memref<32x8192xbf16, #tpu.memory_space<vmem>>, vector<32x128xbf16>
    tpu.vector_store %arg10[%c0_57, %c2560], %51 {strides = array<i32>} : memref<32x8192xbf16, #tpu.memory_space<vmem>>, vector<32x128xbf16>,
    %c672 = arith.constant 672 : index
    %c0_58 = arith.constant 0 : index
    %53 = vector.load %arg9[%c672, %c0_58] : memref<2048x128xbf16, #tpu.memory_space<vmem>>, vector<32x128xbf16>
    %c0_59 = arith.constant 0 : index
    %c2688 = arith.constant 2688 : index
    %54 = vector.load %arg10[%c0_59, %c2688] : memref<32x8192xbf16, #tpu.memory_space<vmem>>, vector<32x128xbf16>
    tpu.vector_store %arg10[%c0_59, %c2688], %53 {strides = array<i32>} : memref<32x8192xbf16, #tpu.memory_space<vmem>>, vector<32x128xbf16>,
    %c704 = arith.constant 704 : index
    %c0_60 = arith.constant 0 : index
    %55 = vector.load %arg9[%c704, %c0_60] : memref<2048x128xbf16, #tpu.memory_space<vmem>>, vector<32x128xbf16>
    %c0_61 = arith.constant 0 : index
    %c2816 = arith.constant 2816 : index
    %56 = vector.load %arg10[%c0_61, %c2816] : memref<32x8192xbf16, #tpu.memory_space<vmem>>, vector<32x128xbf16>
    tpu.vector_store %arg10[%c0_61, %c2816], %55 {strides = array<i32>} : memref<32x8192xbf16, #tpu.memory_space<vmem>>, vector<32x128xbf16>,
    %c736 = arith.constant 736 : index
    %c0_62 = arith.constant 0 : index
    %57 = vector.load %arg9[%c736, %c0_62] : memref<2048x128xbf16, #tpu.memory_space<vmem>>, vector<32x128xbf16>
    %c0_63 = arith.constant 0 : index
    %c2944 = arith.constant 2944 : index
    %58 = vector.load %arg10[%c0_63, %c2944] : memref<32x8192xbf16, #tpu.memory_space<vmem>>, vector<32x128xbf16>
    tpu.vector_store %arg10[%c0_63, %c2944], %57 {strides = array<i32>} : memref<32x8192xbf16, #tpu.memory_space<vmem>>, vector<32x128xbf16>,
    %c768_64 = arith.constant 768 : index
    %c0_65 = arith.constant 0 : index
    %59 = vector.load %arg9[%c768_64, %c0_65] : memref<2048x128xbf16, #tpu.memory_space<vmem>>, vector<32x128xbf16>
    %c0_66 = arith.constant 0 : index
    %c3072 = arith.constant 3072 : index
    %60 = vector.load %arg10[%c0_66, %c3072] : memref<32x8192xbf16, #tpu.memory_space<vmem>>, vector<32x128xbf16>
    tpu.vector_store %arg10[%c0_66, %c3072], %59 {strides = array<i32>} : memref<32x8192xbf16, #tpu.memory_space<vmem>>, vector<32x128xbf16>,
    %c800 = arith.constant 800 : index
    %c0_67 = arith.constant 0 : index
    %61 = vector.load %arg9[%c800, %c0_67] : memref<2048x128xbf16, #tpu.memory_space<vmem>>, vector<32x128xbf16>
    %c0_68 = arith.constant 0 : index
    %c3200 = arith.constant 3200 : index
    %62 = vector.load %arg10[%c0_68, %c3200] : memref<32x8192xbf16, #tpu.memory_space<vmem>>, vector<32x128xbf16>
    tpu.vector_store %arg10[%c0_68, %c3200], %61 {strides = array<i32>} : memref<32x8192xbf16, #tpu.memory_space<vmem>>, vector<32x128xbf16>,
    %c832 = arith.constant 832 : index
    %c0_69 = arith.constant 0 : index
    %63 = vector.load %arg9[%c832, %c0_69] : memref<2048x128xbf16, #tpu.memory_space<vmem>>, vector<32x128xbf16>
    %c0_70 = arith.constant 0 : index
    %c3328 = arith.constant 3328 : index
    %64 = vector.load %arg10[%c0_70, %c3328] : memref<32x8192xbf16, #tpu.memory_space<vmem>>, vector<32x128xbf16>
    tpu.vector_store %arg10[%c0_70, %c3328], %63 {strides = array<i32>} : memref<32x8192xbf16, #tpu.memory_space<vmem>>, vector<32x128xbf16>,
    %c864 = arith.constant 864 : index
    %c0_71 = arith.constant 0 : index
    %65 = vector.load %arg9[%c864, %c0_71] : memref<2048x128xbf16, #tpu.memory_space<vmem>>, vector<32x128xbf16>
    %c0_72 = arith.constant 0 : index
    %c3456 = arith.constant 3456 : index
    %66 = vector.load %arg10[%c0_72, %c3456] : memref<32x8192xbf16, #tpu.memory_space<vmem>>, vector<32x128xbf16>
    tpu.vector_store %arg10[%c0_72, %c3456], %65 {strides = array<i32>} : memref<32x8192xbf16, #tpu.memory_space<vmem>>, vector<32x128xbf16>,
    %c896_73 = arith.constant 896 : index
    %c0_74 = arith.constant 0 : index
    %67 = vector.load %arg9[%c896_73, %c0_74] : memref<2048x128xbf16, #tpu.memory_space<vmem>>, vector<32x128xbf16>
    %c0_75 = arith.constant 0 : index
    %c3584 = arith.constant 3584 : index
    %68 = vector.load %arg10[%c0_75, %c3584] : memref<32x8192xbf16, #tpu.memory_space<vmem>>, vector<32x128xbf16>
    tpu.vector_store %arg10[%c0_75, %c3584], %67 {strides = array<i32>} : memref<32x8192xbf16, #tpu.memory_space<vmem>>, vector<32x128xbf16>,
    %c928 = arith.constant 928 : index
    %c0_76 = arith.constant 0 : index
    %69 = vector.load %arg9[%c928, %c0_76] : memref<2048x128xbf16, #tpu.memory_space<vmem>>, vector<32x128xbf16>
    %c0_77 = arith.constant 0 : index
    %c3712 = arith.constant 3712 : index
    %70 = vector.load %arg10[%c0_77, %c3712] : memref<32x8192xbf16, #tpu.memory_space<vmem>>, vector<32x128xbf16>
    tpu.vector_store %arg10[%c0_77, %c3712], %69 {strides = array<i32>} : memref<32x8192xbf16, #tpu.memory_space<vmem>>, vector<32x128xbf16>,
    %c960 = arith.constant 960 : index
    %c0_78 = arith.constant 0 : index
    %71 = vector.load %arg9[%c960, %c0_78] : memref<2048x128xbf16, #tpu.memory_space<vmem>>, vector<32x128xbf16>
    %c0_79 = arith.constant 0 : index
    %c3840 = arith.constant 3840 : index
    %72 = vector.load %arg10[%c0_79, %c3840] : memref<32x8192xbf16, #tpu.memory_space<vmem>>, vector<32x128xbf16>
    tpu.vector_store %arg10[%c0_79, %c3840], %71 {strides = array<i32>} : memref<32x8192xbf16, #tpu.memory_space<vmem>>, vector<32x128xbf16>,
    %c992 = arith.constant 992 : index
    %c0_80 = arith.constant 0 : index
    %73 = vector.load %arg9[%c992, %c0_80] : memref<2048x128xbf16, #tpu.memory_space<vmem>>, vector<32x128xbf16>
    %c0_81 = arith.constant 0 : index
    %c3968 = arith.constant 3968 : index
    %74 = vector.load %arg10[%c0_81, %c3968] : memref<32x8192xbf16, #tpu.memory_space<vmem>>, vector<32x128xbf16>
    tpu.vector_store %arg10[%c0_81, %c3968], %73 {strides = array<i32>} : memref<32x8192xbf16, #tpu.memory_space<vmem>>, vector<32x128xbf16>,
    %c1024_82 = arith.constant 1024 : index
    %c0_83 = arith.constant 0 : index
    %75 = vector.load %arg9[%c1024_82, %c0_83] : memref<2048x128xbf16, #tpu.memory_space<vmem>>, vector<32x128xbf16>
    %c0_84 = arith.constant 0 : index
    %c4096 = arith.constant 4096 : index
    %76 = vector.load %arg10[%c0_84, %c4096] : memref<32x8192xbf16, #tpu.memory_space<vmem>>, vector<32x128xbf16>
    tpu.vector_store %arg10[%c0_84, %c4096], %75 {strides = array<i32>} : memref<32x8192xbf16, #tpu.memory_space<vmem>>, vector<32x128xbf16>,
    %c1056 = arith.constant 1056 : index
    %c0_85 = arith.constant 0 : index
    %77 = vector.load %arg9[%c1056, %c0_85] : memref<2048x128xbf16, #tpu.memory_space<vmem>>, vector<32x128xbf16>
    %c0_86 = arith.constant 0 : index
    %c4224 = arith.constant 4224 : index
    %78 = vector.load %arg10[%c0_86, %c4224] : memref<32x8192xbf16, #tpu.memory_space<vmem>>, vector<32x128xbf16>
    tpu.vector_store %arg10[%c0_86, %c4224], %77 {strides = array<i32>} : memref<32x8192xbf16, #tpu.memory_space<vmem>>, vector<32x128xbf16>,
    %c1088 = arith.constant 1088 : index
    %c0_87 = arith.constant 0 : index
    %79 = vector.load %arg9[%c1088, %c0_87] : memref<2048x128xbf16, #tpu.memory_space<vmem>>, vector<32x128xbf16>
    %c0_88 = arith.constant 0 : index
    %c4352 = arith.constant 4352 : index
    %80 = vector.load %arg10[%c0_88, %c4352] : memref<32x8192xbf16, #tpu.memory_space<vmem>>, vector<32x128xbf16>
    tpu.vector_store %arg10[%c0_88, %c4352], %79 {strides = array<i32>} : memref<32x8192xbf16, #tpu.memory_space<vmem>>, vector<32x128xbf16>,
    %c1120 = arith.constant 1120 : index
    %c0_89 = arith.constant 0 : index
    %81 = vector.load %arg9[%c1120, %c0_89] : memref<2048x128xbf16, #tpu.memory_space<vmem>>, vector<32x128xbf16>
    %c0_90 = arith.constant 0 : index
    %c4480 = arith.constant 4480 : index
    %82 = vector.load %arg10[%c0_90, %c4480] : memref<32x8192xbf16, #tpu.memory_space<vmem>>, vector<32x128xbf16>
    tpu.vector_store %arg10[%c0_90, %c4480], %81 {strides = array<i32>} : memref<32x8192xbf16, #tpu.memory_space<vmem>>, vector<32x128xbf16>,
    %c1152_91 = arith.constant 1152 : index
    %c0_92 = arith.constant 0 : index
    %83 = vector.load %arg9[%c1152_91, %c0_92] : memref<2048x128xbf16, #tpu.memory_space<vmem>>, vector<32x128xbf16>
    %c0_93 = arith.constant 0 : index
    %c4608 = arith.constant 4608 : index
    %84 = vector.load %arg10[%c0_93, %c4608] : memref<32x8192xbf16, #tpu.memory_space<vmem>>, vector<32x128xbf16>
    tpu.vector_store %arg10[%c0_93, %c4608], %83 {strides = array<i32>} : memref<32x8192xbf16, #tpu.memory_space<vmem>>, vector<32x128xbf16>,
    %c1184 = arith.constant 1184 : index
    %c0_94 = arith.constant 0 : index
    %85 = vector.load %arg9[%c1184, %c0_94] : memref<2048x128xbf16, #tpu.memory_space<vmem>>, vector<32x128xbf16>
    %c0_95 = arith.constant 0 : index
    %c4736 = arith.constant 4736 : index
    %86 = vector.load %arg10[%c0_95, %c4736] : memref<32x8192xbf16, #tpu.memory_space<vmem>>, vector<32x128xbf16>
    tpu.vector_store %arg10[%c0_95, %c4736], %85 {strides = array<i32>} : memref<32x8192xbf16, #tpu.memory_space<vmem>>, vector<32x128xbf16>,
    %c1216 = arith.constant 1216 : index
    %c0_96 = arith.constant 0 : index
    %87 = vector.load %arg9[%c1216, %c0_96] : memref<2048x128xbf16, #tpu.memory_space<vmem>>, vector<32x128xbf16>
    %c0_97 = arith.constant 0 : index
    %c4864 = arith.constant 4864 : index
    %88 = vector.load %arg10[%c0_97, %c4864] : memref<32x8192xbf16, #tpu.memory_space<vmem>>, vector<32x128xbf16>
    tpu.vector_store %arg10[%c0_97, %c4864], %87 {strides = array<i32>} : memref<32x8192xbf16, #tpu.memory_space<vmem>>, vector<32x128xbf16>,
    %c1248 = arith.constant 1248 : index
    %c0_98 = arith.constant 0 : index
    %89 = vector.load %arg9[%c1248, %c0_98] : memref<2048x128xbf16, #tpu.memory_space<vmem>>, vector<32x128xbf16>
    %c0_99 = arith.constant 0 : index
    %c4992 = arith.constant 4992 : index
    %90 = vector.load %arg10[%c0_99, %c4992] : memref<32x8192xbf16, #tpu.memory_space<vmem>>, vector<32x128xbf16>
    tpu.vector_store %arg10[%c0_99, %c4992], %89 {strides = array<i32>} : memref<32x8192xbf16, #tpu.memory_space<vmem>>, vector<32x128xbf16>,
    %c1280_100 = arith.constant 1280 : index
    %c0_101 = arith.constant 0 : index
    %91 = vector.load %arg9[%c1280_100, %c0_101] : memref<2048x128xbf16, #tpu.memory_space<vmem>>, vector<32x128xbf16>
    %c0_102 = arith.constant 0 : index
    %c5120 = arith.constant 5120 : index
    %92 = vector.load %arg10[%c0_102, %c5120] : memref<32x8192xbf16, #tpu.memory_space<vmem>>, vector<32x128xbf16>
    tpu.vector_store %arg10[%c0_102, %c5120], %91 {strides = array<i32>} : memref<32x8192xbf16, #tpu.memory_space<vmem>>, vector<32x128xbf16>,
    %c1312 = arith.constant 1312 : index
    %c0_103 = arith.constant 0 : index
    %93 = vector.load %arg9[%c1312, %c0_103] : memref<2048x128xbf16, #tpu.memory_space<vmem>>, vector<32x128xbf16>
    %c0_104 = arith.constant 0 : index
    %c5248 = arith.constant 5248 : index
    %94 = vector.load %arg10[%c0_104, %c5248] : memref<32x8192xbf16, #tpu.memory_space<vmem>>, vector<32x128xbf16>
    tpu.vector_store %arg10[%c0_104, %c5248], %93 {strides = array<i32>} : memref<32x8192xbf16, #tpu.memory_space<vmem>>, vector<32x128xbf16>,
    %c1344 = arith.constant 1344 : index
    %c0_105 = arith.constant 0 : index
    %95 = vector.load %arg9[%c1344, %c0_105] : memref<2048x128xbf16, #tpu.memory_space<vmem>>, vector<32x128xbf16>
    %c0_106 = arith.constant 0 : index
    %c5376 = arith.constant 5376 : index
    %96 = vector.load %arg10[%c0_106, %c5376] : memref<32x8192xbf16, #tpu.memory_space<vmem>>, vector<32x128xbf16>
    tpu.vector_store %arg10[%c0_106, %c5376], %95 {strides = array<i32>} : memref<32x8192xbf16, #tpu.memory_space<vmem>>, vector<32x128xbf16>,
    %c1376 = arith.constant 1376 : index
    %c0_107 = arith.constant 0 : index
    %97 = vector.load %arg9[%c1376, %c0_107] : memref<2048x128xbf16, #tpu.memory_space<vmem>>, vector<32x128xbf16>
    %c0_108 = arith.constant 0 : index
    %c5504 = arith.constant 5504 : index
    %98 = vector.load %arg10[%c0_108, %c5504] : memref<32x8192xbf16, #tpu.memory_space<vmem>>, vector<32x128xbf16>
    tpu.vector_store %arg10[%c0_108, %c5504], %97 {strides = array<i32>} : memref<32x8192xbf16, #tpu.memory_space<vmem>>, vector<32x128xbf16>,
    %c1408_109 = arith.constant 1408 : index
    %c0_110 = arith.constant 0 : index
    %99 = vector.load %arg9[%c1408_109, %c0_110] : memref<2048x128xbf16, #tpu.memory_space<vmem>>, vector<32x128xbf16>
    %c0_111 = arith.constant 0 : index
    %c5632 = arith.constant 5632 : index
    %100 = vector.load %arg10[%c0_111, %c5632] : memref<32x8192xbf16, #tpu.memory_space<vmem>>, vector<32x128xbf16>
    tpu.vector_store %arg10[%c0_111, %c5632], %99 {strides = array<i32>} : memref<32x8192xbf16, #tpu.memory_space<vmem>>, vector<32x128xbf16>,
    %c1440 = arith.constant 1440 : index
    %c0_112 = arith.constant 0 : index
    %101 = vector.load %arg9[%c1440, %c0_112] : memref<2048x128xbf16, #tpu.memory_space<vmem>>, vector<32x128xbf16>
    %c0_113 = arith.constant 0 : index
    %c5760 = arith.constant 5760 : index
    %102 = vector.load %arg10[%c0_113, %c5760] : memref<32x8192xbf16, #tpu.memory_space<vmem>>, vector<32x128xbf16>
    tpu.vector_store %arg10[%c0_113, %c5760], %101 {strides = array<i32>} : memref<32x8192xbf16, #tpu.memory_space<vmem>>, vector<32x128xbf16>,
    %c1472 = arith.constant 1472 : index
    %c0_114 = arith.constant 0 : index
    %103 = vector.load %arg9[%c1472, %c0_114] : memref<2048x128xbf16, #tpu.memory_space<vmem>>, vector<32x128xbf16>
    %c0_115 = arith.constant 0 : index
    %c5888 = arith.constant 5888 : index
    %104 = vector.load %arg10[%c0_115, %c5888] : memref<32x8192xbf16, #tpu.memory_space<vmem>>, vector<32x128xbf16>
    tpu.vector_store %arg10[%c0_115, %c5888], %103 {strides = array<i32>} : memref<32x8192xbf16, #tpu.memory_space<vmem>>, vector<32x128xbf16>,
    %c1504 = arith.constant 1504 : index
    %c0_116 = arith.constant 0 : index
    %105 = vector.load %arg9[%c1504, %c0_116] : memref<2048x128xbf16, #tpu.memory_space<vmem>>, vector<32x128xbf16>
    %c0_117 = arith.constant 0 : index
    %c6016 = arith.constant 6016 : index
    %106 = vector.load %arg10[%c0_117, %c6016] : memref<32x8192xbf16, #tpu.memory_space<vmem>>, vector<32x128xbf16>
    tpu.vector_store %arg10[%c0_117, %c6016], %105 {strides = array<i32>} : memref<32x8192xbf16, #tpu.memory_space<vmem>>, vector<32x128xbf16>,
    %c1536_118 = arith.constant 1536 : index
    %c0_119 = arith.constant 0 : index
    %107 = vector.load %arg9[%c1536_118, %c0_119] : memref<2048x128xbf16, #tpu.memory_space<vmem>>, vector<32x128xbf16>
    %c0_120 = arith.constant 0 : index
    %c6144 = arith.constant 6144 : index
    %108 = vector.load %arg10[%c0_120, %c6144] : memref<32x8192xbf16, #tpu.memory_space<vmem>>, vector<32x128xbf16>
    tpu.vector_store %arg10[%c0_120, %c6144], %107 {strides = array<i32>} : memref<32x8192xbf16, #tpu.memory_space<vmem>>, vector<32x128xbf16>,
    %c1568 = arith.constant 1568 : index
    %c0_121 = arith.constant 0 : index
    %109 = vector.load %arg9[%c1568, %c0_121] : memref<2048x128xbf16, #tpu.memory_space<vmem>>, vector<32x128xbf16>
    %c0_122 = arith.constant 0 : index
    %c6272 = arith.constant 6272 : index
    %110 = vector.load %arg10[%c0_122, %c6272] : memref<32x8192xbf16, #tpu.memory_space<vmem>>, vector<32x128xbf16>
    tpu.vector_store %arg10[%c0_122, %c6272], %109 {strides = array<i32>} : memref<32x8192xbf16, #tpu.memory_space<vmem>>, vector<32x128xbf16>,
    %c1600 = arith.constant 1600 : index
    %c0_123 = arith.constant 0 : index
    %111 = vector.load %arg9[%c1600, %c0_123] : memref<2048x128xbf16, #tpu.memory_space<vmem>>, vector<32x128xbf16>
    %c0_124 = arith.constant 0 : index
    %c6400 = arith.constant 6400 : index
    %112 = vector.load %arg10[%c0_124, %c6400] : memref<32x8192xbf16, #tpu.memory_space<vmem>>, vector<32x128xbf16>
    tpu.vector_store %arg10[%c0_124, %c6400], %111 {strides = array<i32>} : memref<32x8192xbf16, #tpu.memory_space<vmem>>, vector<32x128xbf16>,
    %c1632 = arith.constant 1632 : index
    %c0_125 = arith.constant 0 : index
    %113 = vector.load %arg9[%c1632, %c0_125] : memref<2048x128xbf16, #tpu.memory_space<vmem>>, vector<32x128xbf16>
    %c0_126 = arith.constant 0 : index
    %c6528 = arith.constant 6528 : index
    %114 = vector.load %arg10[%c0_126, %c6528] : memref<32x8192xbf16, #tpu.memory_space<vmem>>, vector<32x128xbf16>
    tpu.vector_store %arg10[%c0_126, %c6528], %113 {strides = array<i32>} : memref<32x8192xbf16, #tpu.memory_space<vmem>>, vector<32x128xbf16>,
    %c1664_127 = arith.constant 1664 : index
    %c0_128 = arith.constant 0 : index
    %115 = vector.load %arg9[%c1664_127, %c0_128] : memref<2048x128xbf16, #tpu.memory_space<vmem>>, vector<32x128xbf16>
    %c0_129 = arith.constant 0 : index
    %c6656 = arith.constant 6656 : index
    %116 = vector.load %arg10[%c0_129, %c6656] : memref<32x8192xbf16, #tpu.memory_space<vmem>>, vector<32x128xbf16>
    tpu.vector_store %arg10[%c0_129, %c6656], %115 {strides = array<i32>} : memref<32x8192xbf16, #tpu.memory_space<vmem>>, vector<32x128xbf16>,
    %c1696 = arith.constant 1696 : index
    %c0_130 = arith.constant 0 : index
    %117 = vector.load %arg9[%c1696, %c0_130] : memref<2048x128xbf16, #tpu.memory_space<vmem>>, vector<32x128xbf16>
    %c0_131 = arith.constant 0 : index
    %c6784 = arith.constant 6784 : index
    %118 = vector.load %arg10[%c0_131, %c6784] : memref<32x8192xbf16, #tpu.memory_space<vmem>>, vector<32x128xbf16>
    tpu.vector_store %arg10[%c0_131, %c6784], %117 {strides = array<i32>} : memref<32x8192xbf16, #tpu.memory_space<vmem>>, vector<32x128xbf16>,
    %c1728 = arith.constant 1728 : index
    %c0_132 = arith.constant 0 : index
    %119 = vector.load %arg9[%c1728, %c0_132] : memref<2048x128xbf16, #tpu.memory_space<vmem>>, vector<32x128xbf16>
    %c0_133 = arith.constant 0 : index
    %c6912 = arith.constant 6912 : index
    %120 = vector.load %arg10[%c0_133, %c6912] : memref<32x8192xbf16, #tpu.memory_space<vmem>>, vector<32x128xbf16>
    tpu.vector_store %arg10[%c0_133, %c6912], %119 {strides = array<i32>} : memref<32x8192xbf16, #tpu.memory_space<vmem>>, vector<32x128xbf16>,
    %c1760 = arith.constant 1760 : index
    %c0_134 = arith.constant 0 : index
    %121 = vector.load %arg9[%c1760, %c0_134] : memref<2048x128xbf16, #tpu.memory_space<vmem>>, vector<32x128xbf16>
    %c0_135 = arith.constant 0 : index
    %c7040 = arith.constant 7040 : index
    %122 = vector.load %arg10[%c0_135, %c7040] : memref<32x8192xbf16, #tpu.memory_space<vmem>>, vector<32x128xbf16>
    tpu.vector_store %arg10[%c0_135, %c7040], %121 {strides = array<i32>} : memref<32x8192xbf16, #tpu.memory_space<vmem>>, vector<32x128xbf16>,
    %c1792_136 = arith.constant 1792 : index
    %c0_137 = arith.constant 0 : index
    %123 = vector.load %arg9[%c1792_136, %c0_137] : memref<2048x128xbf16, #tpu.memory_space<vmem>>, vector<32x128xbf16>
    %c0_138 = arith.constant 0 : index
    %c7168 = arith.constant 7168 : index
    %124 = vector.load %arg10[%c0_138, %c7168] : memref<32x8192xbf16, #tpu.memory_space<vmem>>, vector<32x128xbf16>
    tpu.vector_store %arg10[%c0_138, %c7168], %123 {strides = array<i32>} : memref<32x8192xbf16, #tpu.memory_space<vmem>>, vector<32x128xbf16>,
    %c1824 = arith.constant 1824 : index
    %c0_139 = arith.constant 0 : index
    %125 = vector.load %arg9[%c1824, %c0_139] : memref<2048x128xbf16, #tpu.memory_space<vmem>>, vector<32x128xbf16>
    %c0_140 = arith.constant 0 : index
    %c7296 = arith.constant 7296 : index
    %126 = vector.load %arg10[%c0_140, %c7296] : memref<32x8192xbf16, #tpu.memory_space<vmem>>, vector<32x128xbf16>
    tpu.vector_store %arg10[%c0_140, %c7296], %125 {strides = array<i32>} : memref<32x8192xbf16, #tpu.memory_space<vmem>>, vector<32x128xbf16>,
    %c1856 = arith.constant 1856 : index
    %c0_141 = arith.constant 0 : index
    %127 = vector.load %arg9[%c1856, %c0_141] : memref<2048x128xbf16, #tpu.memory_space<vmem>>, vector<32x128xbf16>
    %c0_142 = arith.constant 0 : index
    %c7424 = arith.constant 7424 : index
    %128 = vector.load %arg10[%c0_142, %c7424] : memref<32x8192xbf16, #tpu.memory_space<vmem>>, vector<32x128xbf16>
    tpu.vector_store %arg10[%c0_142, %c7424], %127 {strides = array<i32>} : memref<32x8192xbf16, #tpu.memory_space<vmem>>, vector<32x128xbf16>,
    %c1888 = arith.constant 1888 : index
    %c0_143 = arith.constant 0 : index
    %129 = vector.load %arg9[%c1888, %c0_143] : memref<2048x128xbf16, #tpu.memory_space<vmem>>, vector<32x128xbf16>
    %c0_144 = arith.constant 0 : index
    %c7552 = arith.constant 7552 : index
    %130 = vector.load %arg10[%c0_144, %c7552] : memref<32x8192xbf16, #tpu.memory_space<vmem>>, vector<32x128xbf16>
    tpu.vector_store %arg10[%c0_144, %c7552], %129 {strides = array<i32>} : memref<32x8192xbf16, #tpu.memory_space<vmem>>, vector<32x128xbf16>,
    %c1920_145 = arith.constant 1920 : index
    %c0_146 = arith.constant 0 : index
    %131 = vector.load %arg9[%c1920_145, %c0_146] : memref<2048x128xbf16, #tpu.memory_space<vmem>>, vector<32x128xbf16>
    %c0_147 = arith.constant 0 : index
    %c7680 = arith.constant 7680 : index
    %132 = vector.load %arg10[%c0_147, %c7680] : memref<32x8192xbf16, #tpu.memory_space<vmem>>, vector<32x128xbf16>
    tpu.vector_store %arg10[%c0_147, %c7680], %131 {strides = array<i32>} : memref<32x8192xbf16, #tpu.memory_space<vmem>>, vector<32x128xbf16>,
    %c1952 = arith.constant 1952 : index
    %c0_148 = arith.constant 0 : index
    %133 = vector.load %arg9[%c1952, %c0_148] : memref<2048x128xbf16, #tpu.memory_space<vmem>>, vector<32x128xbf16>
    %c0_149 = arith.constant 0 : index
    %c7808 = arith.constant 7808 : index
    %134 = vector.load %arg10[%c0_149, %c7808] : memref<32x8192xbf16, #tpu.memory_space<vmem>>, vector<32x128xbf16>
    tpu.vector_store %arg10[%c0_149, %c7808], %133 {strides = array<i32>} : memref<32x8192xbf16, #tpu.memory_space<vmem>>, vector<32x128xbf16>,
    %c1984 = arith.constant 1984 : index
    %c0_150 = arith.constant 0 : index
    %135 = vector.load %arg9[%c1984, %c0_150] : memref<2048x128xbf16, #tpu.memory_space<vmem>>, vector<32x128xbf16>
    %c0_151 = arith.constant 0 : index
    %c7936 = arith.constant 7936 : index
    %136 = vector.load %arg10[%c0_151, %c7936] : memref<32x8192xbf16, #tpu.memory_space<vmem>>, vector<32x128xbf16>
    tpu.vector_store %arg10[%c0_151, %c7936], %135 {strides = array<i32>} : memref<32x8192xbf16, #tpu.memory_space<vmem>>, vector<32x128xbf16>,
    %c2016 = arith.constant 2016 : index
    %c0_152 = arith.constant 0 : index
    %137 = vector.load %arg9[%c2016, %c0_152] : memref<2048x128xbf16, #tpu.memory_space<vmem>>, vector<32x128xbf16>
    %c0_153 = arith.constant 0 : index
    %c8064 = arith.constant 8064 : index
    %138 = vector.load %arg10[%c0_153, %c8064] : memref<32x8192xbf16, #tpu.memory_space<vmem>>, vector<32x128xbf16>
    tpu.vector_store %arg10[%c0_153, %c8064], %137 {strides = array<i32>} : memref<32x8192xbf16, #tpu.memory_space<vmem>>, vector<32x128xbf16>,
    %c0_154 = arith.constant 0 : index
    %c0_155 = arith.constant 0 : index
    %139 = vector.load %arg10[%c0_154, %c0_155] : memref<32x8192xbf16, #tpu.memory_space<vmem>>, vector<32x8192xbf16>
    %c0_156 = arith.constant 0 : index
    %c0_157 = arith.constant 0 : index
    %140 = vector.load %arg4[%c0_156, %c0_157] : memref<8192x256xbf16, #tpu.memory_space<vmem>>, vector<8192x256xbf16>
    %cst_158 = arith.constant dense<0.000000e+00> : vector<32x256xf32>
    %141 = tpu.matmul %139, %140, %cst_158 {dimension_numbers = #tpu.dot_dimension_numbers<[1], [0], [0], [1], [0, 0, 1, 1], [], []>} : vector<32x8192xbf16>, vector<8192x256xbf16>, vector<32x256xf32> -> vector<32x256xf32>
    %c0_159 = arith.constant 0 : index
    %c0_160 = arith.constant 0 : index
    %142 = vector.load %arg5[%c0_159, %c0_160] : memref<1x256xf32, #tpu.memory_space<vmem>>, vector<1x256xf32>
    %143 = vector.broadcast %142 : vector<1x256xf32> to vector<32x256xf32>
    %144 = arith.addf %141, %143 : vector<32x256xf32>
    %145 = vector.extract_strided_slice %144 {offsets = [0, 0], sizes = [32, 128], strides = [1, 1]} : vector<32x256xf32> to vector<32x128xf32>
    %146 = vector.extract_strided_slice %144 {offsets = [0, 128], sizes = [32, 128], strides = [1, 1]} : vector<32x256xf32> to vector<32x128xf32>
    %cst_161 = arith.constant 0.000000e+00 : f32
    %147 = vector.broadcast %cst_161 : f32 to vector<32x128xf32>
    %148 = arith.maximumf %146, %147 : vector<32x128xf32>
    %c0_162 = arith.constant 0 : index
    %c0_163 = arith.constant 0 : index
    %149 = vector.load %arg6[%c0_162, %c0_163] : memref<1x128xf32, #tpu.memory_space<vmem>>, vector<1x128xf32>
    %150 = vector.broadcast %149 : vector<1x128xf32> to vector<32x128xf32>
    %151 = arith.mulf %148, %150 : vector<32x128xf32>
    %cst_164 = arith.constant dense<0.000000e+00> : vector<32xf32>
    %152 = vector.multi_reduction <add>, %151, %cst_164 [1] : vector<32x128xf32> to vector<32xf32>
    %153 = vector.shape_cast %152 : vector<32xf32> to vector<32x1xf32>
    %c0_165 = arith.constant 0 : index
    %c0_166 = arith.constant 0 : index
    %154 = memref.load %arg7[%c0_165, %c0_166] : memref<1x1xf32, #tpu.memory_space<smem>>
    %155 = vector.broadcast %154 : f32 to vector<32x1xf32>
    %156 = arith.addf %153, %155 : vector<32x1xf32>
    %157 = math.tanh %156 : vector<32x1xf32>
    %158 = tpu.iota {dimensions = array<i32: 1>} : vector<32x128xi32>
    %c64_i32 = arith.constant 64 : i32
    %159 = vector.broadcast %c64_i32 : i32 to vector<32x128xi32>
    %160 = arith.cmpi eq, %158, %159 : vector<32x128xi32>
    %161 = vector.shape_cast %157 : vector<32x1xf32> to vector<32x1xf32>
    %162 = vector.broadcast %161 : vector<32x1xf32> to vector<32x128xf32>
    %163 = arith.select %160, %162, %145 : vector<32x128xi1>, vector<32x128xf32>
    %c0_167 = arith.constant 0 : index
    %c0_168 = arith.constant 0 : index
    %164 = vector.load %arg8[%c0_167, %c0_168] : memref<32x128xf32, #tpu.memory_space<vmem>>, vector<32x128xf32>
    tpu.vector_store %arg8[%c0_167, %c0_168], %163 {strides = array<i32>} : memref<32x128xf32, #tpu.memory_space<vmem>>, vector<32x128xf32>,
    return
  }
  func.func @transform_0(%arg0: i32) -> (i32, i32, i32) {
    %c0_i32 = arith.constant 0 : i32
    %c0_i32_0 = arith.constant 0 : i32
    %c0_i32_1 = arith.constant 0 : i32
    return %c0_i32, %arg0, %c0_i32_0 : i32, i32, i32
  }
  func.func @transform_1(%arg0: i32) -> (i32, i32) {
    %c0_i32 = arith.constant 0 : i32
    %c0_i32_0 = arith.constant 0 : i32
    %c0_i32_1 = arith.constant 0 : i32
    return %c0_i32, %c0_i32_0 : i32, i32
  }
  func.func @transform_2(%arg0: i32) -> (i32, i32) {
    %c0_i32 = arith.constant 0 : i32
    %c0_i32_0 = arith.constant 0 : i32
    %c0_i32_1 = arith.constant 0 : i32
    return %c0_i32, %c0_i32_0 : i32, i32
  }
  func.func @transform_3(%arg0: i32) -> (i32, i32) {
    %c0_i32 = arith.constant 0 : i32
    %c0_i32_0 = arith.constant 0 : i32
    %c0_i32_1 = arith.constant 0 : i32
    return %c0_i32, %c0_i32_0 : i32, i32
  }
  func.func @transform_4(%arg0: i32) -> (i32, i32) {
    %c0_i32 = arith.constant 0 : i32
    %c0_i32_0 = arith.constant 0 : i32
    %c0_i32_1 = arith.constant 0 : i32
    return %c0_i32, %c0_i32_0 : i32, i32
  }
  func.func @transform_5(%arg0: i32) -> (i32, i32) {
    %c0_i32 = arith.constant 0 : i32
    %c0_i32_0 = arith.constant 0 : i32
    %c0_i32_1 = arith.constant 0 : i32
    return %c0_i32, %c0_i32_0 : i32, i32
  }
  func.func @transform_6(%arg0: i32) -> (i32, i32) {
    %c0_i32 = arith.constant 0 : i32
    %c0_i32_0 = arith.constant 0 : i32
    %c0_i32_1 = arith.constant 0 : i32
    return %c0_i32, %c0_i32_0 : i32, i32
  }
  func.func @transform_7(%arg0: i32) -> (i32, i32) {
    %c0_i32 = arith.constant 0 : i32
    %c0_i32_0 = arith.constant 0 : i32
    return %arg0, %c0_i32 : i32, i32
  }
}

</mosaic_0001>

<bundles_post_ra>
// kernel: pvnet_forward.1
= control target key start
LH: loop header
LB: loop body
LE: loop exit
PB: predicated region body
PF: predicated region fallthrough
CT: control target
= control target key end

     0   :  { %13 = vsyncpa [#allocation6], 0  ;;  %s16311_s0 = inlined_call_operand.vmem [shape: bf16[64,32,36], index: 0, kind: input, shape index: {}]   ;;  %s16312_s1 = inlined_call_operand.hbm [shape: bf16[36,128], index: 1, kind: input, shape index: {}]   ;;  %s16313_s2 = inlined_call_operand.hbm [shape: f32[1,128], index: 2, kind: input, shape index: {}]   ;;  %s16314_s3 = inlined_call_operand.hbm [shape: bf16[8192,256], index: 3, kind: input, shape index: {}]   ;;  %s16315_s4 = inlined_call_operand.hbm [shape: f32[1,256], index: 4, kind: input, shape index: {}]   ;;  %s16316_s5 = inlined_call_operand.hbm [shape: f32[1,128], index: 5, kind: input, shape index: {}]   ;;  %s16317_s6 = inlined_call_operand.<no memory space> [shape: f32[1,1], index: 6, kind: input, shape index: {}]   ;;  %s16318_s7 = inlined_call_operand.vmem [shape: f32[32,128], index: 7, kind: output, shape index: {}]  }
   0x1   :  { %14 = vsyncpa [#allocation8], 0 }
   0x2   :  { %15 = vsyncpa [#allocation11], 0  ;;  %s14998_s24 = smov [#allocation7]   ;;  %s14999_s26 = smov [#allocation10]  }
   0x3   :  { %s36_s25 = sshll.u32 %s14998_s24, 4  ;;  %s58_s27 = sshll.u32 %s14999_s26, 4  ;;  %s37_s25 = int_to_ptr.vmem [resolvable:$true] %s36_s25  ;;  %s59_s27 = int_to_ptr.vmem [resolvable:$true] %s58_s27 }
   0x4   :  { %s14882_s30 = scalar_lea.hbm %s16313_s2, 16 }
   0x5   :  { %p14883_p0 = scmp.ne.s32.totalorder %s16313_s2, %s14882_s30  ;;  %p14886_p1 = scmp.lt.u32.totalorder %s14882_s30, %s16313_s2 }
   0x7   :  { %p14888_p2 = pnand %p14886_p1, %p14883_p0 }
   0x9   :  { %14891 = shalt.err (!%p14888_p2)
}
   0xa   :  { %s14892_s12 = scalar_lea.vmem %s37_s25, 16  ;;  %s14896_s13 = scalar_lea.vmem %s37_s25, 32 }
   0xb   :  { %p14893_p3 = scmp.ne.s32.totalorder %s37_s25, %s14892_s12  ;;  %p14897_p4 = scmp.lt.s32.totalorder %s37_s25, %s37_s25 }
   0xc   :  { %p14898_p5 = scmp.lt.s32.totalorder %s14896_s13, %s14892_s12 }
   0xe   :  { %p14899_p6 = por %p14898_p5, %p14897_p4 }
  0x10   :  { %p14900_p7 = pnand %p14899_p6, %p14893_p3 }
  0x12   :  { %14903 = shalt.err (!%p14900_p7)
}
  0x13   :  { %39 = dma.hbm_to_vmem [thread:$0]  %s16313_s2, 16, %s37_s25, [#allocation8]  }
  0x14   :  { %s14904_s18 = scalar_lea.hbm %s16315_s4, 32 }
  0x15   :  { %p14905_p8 = scmp.ne.s32.totalorder %s16315_s4, %s14904_s18  ;;  %p14908_p9 = scmp.lt.u32.totalorder %s14904_s18, %s16315_s4 }
  0x17   :  { %p14910_p10 = pnand %p14908_p9, %p14905_p8 }
  0x19   :  { %14913 = shalt.err (!%p14910_p10)
}
  0x1a   :  { %s14914_s23 = scalar_lea.vmem %s59_s27, 32  ;;  %p14919_p12 = scmp.lt.s32.totalorder %s59_s27, %s59_s27 }
  0x1b   :  { %p14915_p11 = scmp.ne.s32.totalorder %s59_s27, %s14914_s23  ;;  %p14920_p13 = scmp.lt.s32.totalorder %s14914_s23, %s14914_s23 }
  0x1d   :  { %p14921_p0 = por %p14920_p13, %p14919_p12 }
  0x1f   :  { %p14922_p1 = pnand %p14921_p0, %p14915_p11 }
  0x21   :  { %14925 = shalt.err (!%p14922_p1)
}
  0x22   :  { %61 = dma.hbm_to_vmem [thread:$0]  %s16315_s4, 32, %s59_s27, [#allocation11]  }
  0x23   :  { %s15000_s25 = smov [#allocation5]   ;;  %s14926_s30 = scalar_lea.hbm %s16312_s1, 320 }
  0x24   :  { %s23_s26 = sshll.u32 %s15000_s25, 4  ;;  %p14927_p2 = scmp.ne.s32.totalorder %s16312_s1, %s14926_s30  ;;  %s24_s26 = int_to_ptr.vmem [resolvable:$true] %s23_s26 }
  0x25   :  { %p14930_p3 = scmp.lt.u32.totalorder %s14926_s30, %s16312_s1 }
  0x27   :  { %p14932_p4 = pnand %p14930_p3, %p14927_p2 }
  0x29   :  { %14935 = shalt.err (!%p14932_p4)
}
  0x2a   :  { %s14936_s12 = scalar_lea.vmem %s24_s26, 320  ;;  %p14941_p6 = scmp.lt.s32.totalorder %s24_s26, %s24_s26 }
  0x2b   :  { %p14937_p5 = scmp.ne.s32.totalorder %s24_s26, %s14936_s12  ;;  %p14942_p7 = scmp.lt.s32.totalorder %s14936_s12, %s14936_s12 }
  0x2d   :  { %p14943_p8 = por %p14942_p7, %p14941_p6 }
  0x2f   :  { %p14944_p9 = pnand %p14943_p8, %p14937_p5 }
  0x31   :  { %14947 = shalt.err (!%p14944_p9)
}
  0x32   :  { %s15001_s4 = smov 64   ;;  %s15002_s27 = smov 4  }
  0x33   :  { %29 = dma.hbm_to_vmem [thread:$0]  %s16312_s1, 320, %s24_s26, [#allocation6], %s15001_s4, %s15001_s4, %s15002_s27  }
  0x34   :  { %s15003_s15 = smov [#allocation9]   ;;  %s14948_s19 = scalar_lea.hbm %s16314_s3, 131072 }
  0x35   :  { %s45_s16 = sshll.u32 %s15003_s15, 4  ;;  %p14949_p10 = scmp.ne.s32.totalorder %s16314_s3, %s14948_s19  ;;  %s46_s16 = int_to_ptr.vmem [resolvable:$true] %s45_s16 }
  0x36   :  { %p14952_p11 = scmp.lt.u32.totalorder %s14948_s19, %s16314_s3 }
  0x38   :  { %p14954_p12 = pnand %p14952_p11, %p14949_p10 }
  0x3a   :  { %14957 = shalt.err (!%p14954_p12)
}
  0x3b   :  { %s14958_s2 = scalar_lea.vmem %s46_s16, 131072  ;;  %p14963_p0 = scmp.lt.s32.totalorder %s46_s16, %s46_s16 }
  0x3c   :  { %p14959_p13 = scmp.ne.s32.totalorder %s46_s16, %s14958_s2  ;;  %p14964_p1 = scmp.lt.s32.totalorder %s14958_s2, %s14958_s2 }
  0x3e   :  { %p14965_p2 = por %p14964_p1, %p14963_p0 }
  0x40   :  { %p14966_p3 = pnand %p14965_p2, %p14959_p13 }
  0x42   :  { %14969 = shalt.err (!%p14966_p3)
}
  0x43   :  { %s15004_s1 = smov 128   ;;  %s15005_s24 = smov 8  }
  0x44   :  { %51 = dma.hbm_to_vmem [thread:$0]  %s16314_s3, 131072, %s46_s16, [#allocation8], %s15004_s1, %s15004_s1, %s15005_s24  }
  0x45   :  { %s15006_s28 = smov [#allocation12]   ;;  %s14970_s9 = scalar_lea.hbm %s16316_s5, 16 }
  0x46   :  { %s68_s29 = sshll.u32 %s15006_s28, 4  ;;  %p14971_p4 = scmp.ne.s32.totalorder %s16316_s5, %s14970_s9  ;;  %s69_s29 = int_to_ptr.vmem [resolvable:$true] %s68_s29 }
  0x47   :  { %p14974_p5 = scmp.lt.u32.totalorder %s14970_s9, %s16316_s5 }
  0x49   :  { %p14976_p6 = pnand %p14974_p5, %p14971_p4 }
  0x4b   :  { %14979 = shalt.err (!%p14976_p6)
}
  0x4c   :  { %s14980_s27 = scalar_lea.vmem %s69_s29, 16  ;;  %s14984_s3 = scalar_lea.vmem %s69_s29, 32 }
  0x4d   :  { %p14981_p7 = scmp.ne.s32.totalorder %s69_s29, %s14980_s27  ;;  %p14985_p8 = scmp.lt.s32.totalorder %s69_s29, %s69_s29 }
  0x4e   :  { %p14986_p9 = scmp.lt.s32.totalorder %s14984_s3, %s14980_s27 }
  0x50   :  { %p14987_p10 = por %p14986_p9, %p14985_p8 }
  0x52   :  { %p14988_p11 = pnand %p14987_p10, %p14981_p7 }
  0x54   :  { %14991 = shalt.err (!%p14988_p11)
}
  0x55   :  { %71 = dma.hbm_to_vmem [thread:$0]  %s16316_s5, 16, %s69_s29, [#allocation11]  }
  0x56   :  { %14992 = dma.done.wait [#allocation6], 320  }
  0x57   :  { %14993 = vsyncadd [#allocation6], 4294966976 }
  0x58   :  { %14994 = dma.done.wait [#allocation8], 131088  }
  0x59   :  { %14995 = vsyncadd [#allocation8], 4294836208 }
  0x5a   :  { %14996 = dma.done.wait [#allocation11], 48  }
  0x5b   :  { %14997 = vsyncadd [#allocation11], 4294967248  ;;  %v13202_v0 = vld [vmem:[#allocation5] sm:$0xff]   ;;  %v13203_v1 = vld [vmem:[#allocation5 + $0x8] sm:$0xff]   ;;  %vm1013_vm0 = vcmask 293888   ;;  %vm1398_vm1 = vcmask 1041408  }
  0x5c   :  { %12674 = vmatprep.subr.bf16.mxu0 %v13202_v0  ;;  %v13204_v2 = vld [vmem:[#allocation5 + $0x10] ss:$0 sps:$4 sm:$0x33]   ;;  %v13205_v3 = vld [vmem:[%s16311_s0] sm:$0xff]   ;;  %v13206_v5 = vld [vmem:[%s16311_s0 + $0x8] sm:$0xff]  }
  0x5d   :  { %12675 = vmatpush3.bf16.msra.mxu0 %v13202_v0  ;;  %12680 = vmatprep.mubr.msk.bf16.mxu0 %vm1013_vm0, %v13205_v3  ;;  %v1400_v4 = vsel %vm1398_vm1, %v13204_v2, 0  ;;  %v13207_v6 = vld [vmem:[%s16311_s0 + $0x10] sm:$0xff]   ;;  %v13208_v7 = vld [vmem:[%s16311_s0 + $0x18] sm:$0xff]   ;;  %v13209_v8 = vld [vmem:[%s16311_s0 + $0x20] sm:$0xff]  }
  0x5e   :  { %12676 = vmatprep.subr.bf16.mxu0 %v13203_v1  ;;  %v13210_v9 = vld [vmem:[%s16311_s0 + $0x28] sm:$0xff]   ;;  %v13211_v10 = vld [vmem:[%s16311_s0 + $0x30] sm:$0xff]   ;;  %v13212_v11 = vld [vmem:[%s16311_s0 + $0x38] sm:$0xff]  }
  0x5f   :  { %v13213_v12 = vld [vmem:[%s16311_s0 + $0x40] sm:$0xff]   ;;  %v13214_v13 = vld [vmem:[%s16311_s0 + $0x48] sm:$0xff]   ;;  %v13215_v14 = vld [vmem:[%s16311_s0 + $0x50] sm:$0xff]  }
  0x60   :  { %v13216_v15 = vld [vmem:[%s16311_s0 + $0x58] sm:$0xff]   ;;  %v13217_v16 = vld [vmem:[%s16311_s0 + $0x60] sm:$0xff]   ;;  %v13218_v17 = vld [vmem:[%s16311_s0 + $0x68] sm:$0xff]  }
  0x61   :  { %12677 = vmatpush3.bf16.msra.mxu0 %v13203_v1  ;;  %v13219_v18 = vld [vmem:[%s16311_s0 + $0x70] sm:$0xff]   ;;  %v13220_v19 = vld [vmem:[%s16311_s0 + $0x78] sm:$0xff]   ;;  %v13221_v20 = vld [vmem:[%s16311_s0 + $0x80] sm:$0xff]  }
  0x62   :  { %13192 = vmatprep.subr.msk.bf16.mxu0 %vm1398_vm1, %v13204_v2  ;;  %v13222_v21 = vld [vmem:[%s16311_s0 + $0x88] sm:$0xff]   ;;  %v13223_v22 = vld [vmem:[%s16311_s0 + $0x90] sm:$0xff]   ;;  %v13224_v23 = vld [vmem:[%s16311_s0 + $0x98] sm:$0xff]  }
  0x63   :  { %v13225_v24 = vld [vmem:[%s16311_s0 + $0xa0] sm:$0xff]   ;;  %v13226_v25 = vld [vmem:[%s16311_s0 + $0xa8] sm:$0xff]   ;;  %v13227_v26 = vld [vmem:[%s16311_s0 + $0xb0] sm:$0xff]  }
  0x64   :  { %v13228_v27 = vld [vmem:[%s16311_s0 + $0xb8] sm:$0xff]   ;;  %v13229_v28 = vld [vmem:[%s16311_s0 + $0xc0] sm:$0xff]   ;;  %v13230_v29 = vld [vmem:[%s16311_s0 + $0xc8] sm:$0xff]  }
  0x65   :  { %12679 = vmatpush3.bf16.msra.mxu0 %v1400_v4  ;;  %v13231_v30 = vld [vmem:[%s16311_s0 + $0xd0] sm:$0xff]   ;;  %v13232_v31 = vld [vmem:[%s16311_s0 + $0xd8] sm:$0xff]   ;;  %v13233_v32 = vld [vmem:[%s16311_s0 + $0xe0] sm:$0xff]  }
  0x66   :  { %v13234_v33 = vld [vmem:[%s16311_s0 + $0xe8] sm:$0xff]   ;;  %v13235_v34 = vld [vmem:[%s16311_s0 + $0xf0] sm:$0xff]   ;;  %v13236_v35 = vld [vmem:[%s16311_s0 + $0xf8] sm:$0xff]  }
  0x67   :  { %v13237_v36 = vld [vmem:[%s16311_s0 + $0x100] sm:$0xff]   ;;  %v13238_v37 = vld [vmem:[%s16311_s0 + $0x108] sm:$0xff]   ;;  %v13239_v38 = vld [vmem:[%s16311_s0 + $0x110] sm:$0xff]  }
  0x68   :  { %12681 = vmatmul.mubr.msk.bf16.vlgmr.msra.gmra.mrb[0].mxu0 %vm1013_vm0, %v13206_v5  ;;  %v13240_v39 = vld [vmem:[%s16311_s0 + $0x118] sm:$0xff]   ;;  %v13241_v40 = vld [vmem:[%s16311_s0 + $0x120] sm:$0xff]   ;;  %v13242_v41 = vld [vmem:[%s16311_s0 + $0x128] sm:$0xff]  }
  0x69   :  { %12684 = vmatprep.mubr.msk.bf16.mxu0 %vm1013_vm0, %v13207_v6  ;;  %v13243_v42 = vld [vmem:[%s16311_s0 + $0x130] sm:$0xff]   ;;  %v13244_v43 = vld [vmem:[%s16311_s0 + $0x138] sm:$0xff]   ;;  %v13245_v44 = vld [vmem:[%s16311_s0 + $0x140] sm:$0xff]  }
  0x6a   :  { %v13246_v45 = vld [vmem:[%s16311_s0 + $0x148] sm:$0xff]   ;;  %v13247_v46 = vld [vmem:[%s16311_s0 + $0x150] sm:$0xff]   ;;  %v13248_v47 = vld [vmem:[%s16311_s0 + $0x158] sm:$0xff]  }
  0x6b   :  { %v13249_v48 = vld [vmem:[%s16311_s0 + $0x160] sm:$0xff]   ;;  %v13250_v49 = vld [vmem:[%s16311_s0 + $0x168] sm:$0xff]   ;;  %v13251_v50 = vld [vmem:[%s16311_s0 + $0x170] sm:$0xff]  }
  0x6c   :  { %v13252_v51 = vld [vmem:[%s16311_s0 + $0x178] sm:$0xff]   ;;  %v13253_v52 = vld [vmem:[%s16311_s0 + $0x180] sm:$0xff]   ;;  %v13254_v53 = vld [vmem:[%s16311_s0 + $0x188] sm:$0xff]  }
  0x6d   :  { %v13255_v54 = vld [vmem:[%s16311_s0 + $0x190] sm:$0xff]   ;;  %v13256_v55 = vld [vmem:[%s16311_s0 + $0x198] sm:$0xff]   ;;  %v13257_v56 = vld [vmem:[%s16311_s0 + $0x1a0] sm:$0xff]  }
  0x6e   :  { %v13258_v57 = vld [vmem:[%s16311_s0 + $0x1a8] sm:$0xff]   ;;  %v13259_v58 = vld [vmem:[%s16311_s0 + $0x1b0] sm:$0xff]   ;;  %v13260_v60 = vld [vmem:[%s16311_s0 + $0x1b8] sm:$0xff]  }
  0x6f   :  { %v15325_v59 = vld [vmem:[#allocation7] ss:$0 sm:$0xff]  ;;  %v13261_v1 = vld [vmem:[%s16311_s0 + $0x1c0] sm:$0xff]  }
  0x70   :  { %12685 = vmatmul.mubr.msk.bf16.gmra.mrb[4].mxu0 %vm1013_vm0, %v13208_v7 }
  0x71   :  { %12688 = vmatprep.mubr.msk.bf16.mxu0 %vm1013_vm0, %v13209_v8 }
  0x78   :  { %12689 = vmatmul.mubr.msk.bf16.gmra.mrb[8].mxu0 %vm1013_vm0, %v13210_v9 }
  0x79   :  { %12692 = vmatprep.mubr.msk.bf16.mxu0 %vm1013_vm0, %v13211_v10  ;;  %v13262_v10 = vld [vmem:[%s16311_s0 + $0x1c8] sm:$0xff]  }
  0x80   :  { %12693 = vmatmul.mubr.msk.bf16.gmra.mrb[12].mxu0 %vm1013_vm0, %v13212_v11 }
  0x81   :  { %12696 = vmatprep.mubr.msk.bf16.mxu0 %vm1013_vm0, %v13213_v12 }
  0x88   :  { %12697 = vmatmul.mubr.msk.bf16.gmra.mrb[16].mxu0 %vm1013_vm0, %v13214_v13 }
  0x89   :  { %12700 = vmatprep.mubr.msk.bf16.mxu0 %vm1013_vm0, %v13215_v14 }
  0x90   :  { %12701 = vmatmul.mubr.msk.bf16.gmra.mrb[20].mxu0 %vm1013_vm0, %v13216_v15 }
  0x91   :  { %12704 = vmatprep.mubr.msk.bf16.mxu0 %vm1013_vm0, %v13217_v16 }
  0x98   :  { %12705 = vmatmul.mubr.msk.bf16.gmra.mrb[24].mxu0 %vm1013_vm0, %v13218_v17  ;;  %v13263_v17 = vld [vmem:[%s16311_s0 + $0x1d0] sm:$0xff]  }
  0x99   :  { %12708 = vmatprep.mubr.msk.bf16.mxu0 %vm1013_vm0, %v13219_v18 }
  0xa0   :  { %12709 = vmatmul.mubr.msk.bf16.gmra.mrb[28].mxu0 %vm1013_vm0, %v13220_v19 }
  0xa1   :  { %12712 = vmatprep.mubr.msk.bf16.mxu0 %vm1013_vm0, %v13221_v20 }
  0xa8   :  { %12713 = vmatmul.mubr.msk.bf16.gmra.mrb[32].mxu0 %vm1013_vm0, %v13222_v21 }
  0xa9   :  { %12716 = vmatprep.mubr.msk.bf16.mxu0 %vm1013_vm0, %v13223_v22 }
  0xb0   :  { %12717 = vmatmul.mubr.msk.bf16.gmra.mrb[36].mxu0 %vm1013_vm0, %v13224_v23 }
  0xb1   :  { %12720 = vmatprep.mubr.msk.bf16.mxu0 %vm1013_vm0, %v13225_v24 }
  0xb8   :  { %12721 = vmatmul.mubr.msk.bf16.gmra.mrb[40].mxu0 %vm1013_vm0, %v13226_v25 }
  0xb9   :  { %12724 = vmatprep.mubr.msk.bf16.mxu0 %vm1013_vm0, %v13227_v26  ;;  %v13264_v26 = vld [vmem:[%s16311_s0 + $0x1d8] sm:$0xff]  }
  0xc0   :  { %12725 = vmatmul.mubr.msk.bf16.gmra.mrb[44].mxu0 %vm1013_vm0, %v13228_v27 }
  0xc1   :  { %12728 = vmatprep.mubr.msk.bf16.mxu0 %vm1013_vm0, %v13229_v28 }
  0xc8   :  { %12729 = vmatmul.mubr.msk.bf16.gmra.mrb[48].mxu0 %vm1013_vm0, %v13230_v29  ;;  %v13295_v29 = vld [vmem:[#allocation9 + $0xc04] ss:$8 sps:$4 sm:$0xff]  }
  0xc9   :  { %12732 = vmatprep.mubr.msk.bf16.mxu0 %vm1013_vm0, %v13231_v30  ;;  %10147 = vmatprep.subr.bf16.mxu1 %v13295_v29 }
  0xd0   :  { %12733 = vmatmul.mubr.msk.bf16.gmra.mrb[52].mxu0 %vm1013_vm0, %v13232_v31 }
  0xd1   :  { %12736 = vmatprep.mubr.msk.bf16.mxu0 %vm1013_vm0, %v13233_v32 }
  0xd8   :  { %12737 = vmatmul.mubr.msk.bf16.gmra.mrb[56].mxu0 %vm1013_vm0, %v13234_v33  ;;  %v13297_v33 = vld [vmem:[#allocation9 + $0xc00] ss:$8 sps:$4 sm:$0xff]  }
  0xd9   :  { %12740 = vmatprep.mubr.msk.bf16.mxu0 %vm1013_vm0, %v13235_v34  ;;  %10148 = vmatpush1.bf16.msra.mxu1 %v13297_v33 }
  0xe0   :  { %12741 = vmatmul.mubr.msk.bf16.gmra.mrb[60].mxu0 %vm1013_vm0, %v13236_v35 }
  0xe1   :  { %12744 = vmatprep.mubr.msk.bf16.mxu0 %vm1013_vm0, %v13237_v36  ;;  %v13265_v36 = vld [vmem:[%s16311_s0 + $0x1e0] sm:$0xff]  }
  0xe8   :  { %12745 = vmatmul.mubr.msk.bf16.gmra.mrb[64].mxu0 %vm1013_vm0, %v13238_v37 }
  0xe9   :  { %12748 = vmatprep.mubr.msk.bf16.mxu0 %vm1013_vm0, %v13239_v38 }
  0xf0   :  { %12749 = vmatmul.mubr.msk.bf16.gmra.mrb[68].mxu0 %vm1013_vm0, %v13240_v39 }
  0xf1   :  { %12752 = vmatprep.mubr.msk.bf16.mxu0 %vm1013_vm0, %v13241_v40  ;;  %v13300_v40 = vld [vmem:[#allocation9 + $0xc14] ss:$8 sps:$4 sm:$0xff]  }
  0xf2   :  { %10149 = vmatprep.subr.bf16.mxu1 %v13300_v40 }
  0xf8   :  { %12753 = vmatmul.mubr.msk.bf16.gmra.mrb[72].mxu0 %vm1013_vm0, %v13242_v41 }
  0xf9   :  { %12756 = vmatprep.mubr.msk.bf16.mxu0 %vm1013_vm0, %v13243_v42 }
 0x100   :  { %12757 = vmatmul.mubr.msk.bf16.gmra.mrb[76].mxu0 %vm1013_vm0, %v13244_v43  ;;  %v13302_v43 = vld [vmem:[#allocation9 + $0xc10] ss:$8 sps:$4 sm:$0xff]  }
 0x101   :  { %12760 = vmatprep.mubr.msk.bf16.mxu0 %vm1013_vm0, %v13245_v44  ;;  %10150 = vmatpush1.bf16.msra.mxu1 %v13302_v43 }
 0x108   :  { %12761 = vmatmul.mubr.msk.bf16.gmra.mrb[80].mxu0 %vm1013_vm0, %v13246_v45 }
 0x109   :  { %12764 = vmatprep.mubr.msk.bf16.mxu0 %vm1013_vm0, %v13247_v46 }
 0x110   :  { %12765 = vmatmul.mubr.msk.bf16.gmra.mrb[84].mxu0 %vm1013_vm0, %v13248_v47  ;;  %v13266_v47 = vld [vmem:[%s16311_s0 + $0x1e8] sm:$0xff]  }
 0x111   :  { %12768 = vmatprep.mubr.msk.bf16.mxu0 %vm1013_vm0, %v13249_v48 }
 0x118   :  { %12769 = vmatmul.mubr.msk.bf16.gmra.mrb[88].mxu0 %vm1013_vm0, %v13250_v49 }
 0x119   :  { %12772 = vmatprep.mubr.msk.bf16.mxu0 %vm1013_vm0, %v13251_v50  ;;  %v13303_v50 = vld [vmem:[#allocation9 + $0xc24] ss:$8 sps:$4 sm:$0xff]  }
 0x11a   :  { %10151 = vmatprep.subr.bf16.mxu1 %v13303_v50  ;;  %v13272_v50 = vld [vmem:[%s16311_s0 + $0x218] sm:$0xff]  }
 0x120   :  { %12773 = vmatmul.mubr.msk.bf16.gmra.mrb[92].mxu0 %vm1013_vm0, %v13252_v51 }
 0x121   :  { %12776 = vmatprep.mubr.msk.bf16.mxu0 %vm1013_vm0, %v13253_v52 }
 0x128   :  { %12777 = vmatmul.mubr.msk.bf16.gmra.mrb[96].mxu0 %vm1013_vm0, %v13254_v53  ;;  %v13305_v53 = vld [vmem:[#allocation9 + $0xc20] ss:$8 sps:$4 sm:$0xff]  }
 0x129   :  { %12780 = vmatprep.mubr.msk.bf16.mxu0 %vm1013_vm0, %v13255_v54  ;;  %10152 = vmatpush1.bf16.msra.mxu1 %v13305_v53  ;;  %v13327_v53 = vld [vmem:[#allocation9 + $0xc84] ss:$8 sps:$4 sm:$0xff]  }
 0x130   :  { %12781 = vmatmul.mubr.msk.bf16.gmra.mrb[100].mxu0 %vm1013_vm0, %v13256_v55 }
 0x131   :  { %12784 = vmatprep.mubr.msk.bf16.mxu0 %vm1013_vm0, %v13257_v56  ;;  %v13267_v56 = vld [vmem:[%s16311_s0 + $0x1f0] sm:$0xff]  }
 0x138   :  { %12785 = vmatmul.mubr.msk.bf16.gmra.mrb[104].mxu0 %vm1013_vm0, %v13258_v57 }
 0x139   :  { %12788 = vmatprep.mubr.msk.bf16.mxu0 %vm1013_vm0, %v13259_v58 }
 0x13b   :  { %v12682_v61 = vpop.f32.mrb[0].mxu0 }
 0x13c   :  { %v1436_v62 = vpop.f32.mrb[1].mxu0  ;;  %v1445_v63 = vadd.f32 %v12682_v61, %v15325_v59  ;;  %v13308_v61 = vld [vmem:[#allocation9 + $0xc34] ss:$8 sps:$4 sm:$0xff]  }
 0x13d   :  { %v12683_v0 = vpop.f32.mrb[2].mxu0  ;;  %v1437_v2 = vadd.f32 %v15325_v59, %v1436_v62  ;;  %10153 = vmatprep.subr.bf16.mxu1 %v13308_v61 }
 0x13e   :  { %v1439_v3 = vpop.f32.mrb[3].mxu0  ;;  %v1448_v4 = vadd.f32 %v12683_v0, %v15325_v59  ;;  %v2461_v6 = vmax.f32 %v1445_v63, 0.0  ;;  %v13310_v0 = vld [vmem:[#allocation9 + $0xc30] ss:$8 sps:$4 sm:$0xff]  }
 0x13f   :  { %v1440_v5 = vadd.f32 %v15325_v59, %v1439_v3  ;;  %v2459_v8 = vmax.f32 %v1437_v2, 0.0  ;;  %10154 = vmatpush1.bf16.msra.mxu1 %v13310_v0  ;;  %v13332_v0 = vld [vmem:[#allocation9 + $0xc94] ss:$8 sps:$4 sm:$0xff]  }
 0x140   :  { %12789 = vmatmul.mubr.msk.bf16.gmra.mrb[108].mxu0 %vm1013_vm0, %v13260_v60  ;;  %v2462_v7 = vmax.f32 %v1448_v4, 0.0  ;;  %v13268_v4 = vld [vmem:[%s16311_s0 + $0x1f8] sm:$0xff]  }
 0x141   :  { %12792 = vmatprep.mubr.msk.bf16.mxu0 %vm1013_vm0, %v13261_v1  ;;  %v2460_v9 = vmax.f32 %v1440_v5, 0.0 }
 0x142   :  { %v15344_v11 = vpack.c.bf16 %v2462_v7, %v2461_v6  ;;  %v13311_v7 = vld [vmem:[#allocation9 + $0xc44] ss:$8 sps:$4 sm:$0xff]  }
 0x143   :  { %v12686_v12 = vpop.f32.mrb[4].mxu0  ;;  %v15346_v13 = vpack.c.bf16 %v2460_v9, %v2459_v8  ;;  %10155 = vmatprep.subr.bf16.mxu1 %v13311_v7 }
 0x144   :  { %v1452_v14 = vpop.f32.mrb[5].mxu0  ;;  %v1461_v15 = vadd.f32 %v12686_v12, %v15325_v59 }
 0x145   :  { %v12687_v16 = vpop.f32.mrb[6].mxu0  ;;  %v1453_v18 = vadd.f32 %v15325_v59, %v1452_v14 }
 0x146   :  { %v1455_v19 = vpop.f32.mrb[7].mxu0  ;;  %v1464_v20 = vadd.f32 %v12687_v16, %v15325_v59  ;;  %v2465_v22 = vmax.f32 %v1461_v15, 0.0  ;;  %v13269_v15 = vld [vmem:[%s16311_s0 + $0x200] sm:$0xff]  }
 0x147   :  { %v1456_v21 = vadd.f32 %v15325_v59, %v1455_v19  ;;  %v2463_v24 = vmax.f32 %v1453_v18, 0.0  ;;  %v13316_v19 = vld [vmem:[#allocation9 + $0xc54] ss:$8 sps:$4 sm:$0xff]  }
 0x148   :  { %12793 = vmatmul.mubr.msk.bf16.gmra.mrb[112].mxu0 %vm1013_vm0, %v13262_v10  ;;  %v2466_v23 = vmax.f32 %v1464_v20, 0.0  ;;  %v13313_v10 = vld [vmem:[#allocation9 + $0xc40] ss:$8 sps:$4 sm:$0xff]  }
 0x149   :  { %12796 = vmatprep.mubr.msk.bf16.mxu0 %vm1013_vm0, %v13263_v17  ;;  %v2464_v25 = vmax.f32 %v1456_v21, 0.0  ;;  %10156 = vmatpush1.bf16.msra.mxu1 %v13313_v10 }
 0x14a   :  { %v15360_v27 = vpack.c.bf16 %v2466_v23, %v2465_v22  ;;  %v13318_v22 = vld [vmem:[#allocation9 + $0xc50] ss:$8 sps:$4 sm:$0xff]   ;;  %10157 = vmatprep.subr.bf16.mxu1 %v13316_v19 }
 0x14b   :  { %v12690_v28 = vpop.f32.mrb[8].mxu0  ;;  %v15362_v30 = vpack.c.bf16 %v2464_v25, %v2463_v24 }
 0x14c   :  { %v1477_v31 = vadd.f32 %v12690_v28, %v15325_v59  ;;  %v1468_v32 = vpop.f32.mrb[9].mxu0 }
 0x14d   :  { %v1469_v34 = vadd.f32 %v15325_v59, %v1468_v32  ;;  %v12691_v35 = vpop.f32.mrb[10].mxu0  ;;  %10158 = vmatpush1.bf16.msra.mxu1 %v13318_v22 }
 0x14e   :  { %v1480_v37 = vadd.f32 %v12691_v35, %v15325_v59  ;;  %v1471_v38 = vpop.f32.mrb[11].mxu0  ;;  %v2469_v41 = vmax.f32 %v1477_v31, 0.0  ;;  %v13319_v31 = vld [vmem:[#allocation9 + $0xc64] ss:$8 sps:$4 sm:$0xff]  }
 0x14f   :  { %v1472_v39 = vadd.f32 %v15325_v59, %v1471_v38  ;;  %v2467_v44 = vmax.f32 %v1469_v34, 0.0  ;;  %v13321_v34 = vld [vmem:[#allocation9 + $0xc60] ss:$8 sps:$4 sm:$0xff]   ;;  %10159 = vmatprep.subr.bf16.mxu1 %v13319_v31  ;;  %v13342_v31 = vld [vmem:[#allocation9 + $0xcb0] ss:$8 sps:$4 sm:$0xff]  }
 0x150   :  { %v2470_v42 = vmax.f32 %v1480_v37, 0.0  ;;  %12797 = vmatmul.mubr.msk.bf16.gmra.mrb[116].mxu0 %vm1013_vm0, %v13264_v26  ;;  %v13270_v26 = vld [vmem:[%s16311_s0 + $0x208] sm:$0xff]   ;;  %v13271_v37 = vld [vmem:[%s16311_s0 + $0x210] sm:$0xff]  }
 0x151   :  { %v2468_v45 = vmax.f32 %v1472_v39, 0.0  ;;  %12800 = vmatprep.mubr.msk.bf16.mxu0 %vm1013_vm0, %v13265_v36  ;;  %10160 = vmatpush1.bf16.msra.mxu1 %v13321_v34 }
 0x152   :  { %v15373_v46 = vpack.c.bf16 %v2470_v42, %v2469_v41  ;;  %v13324_v41 = vld [vmem:[#allocation9 + $0xc74] ss:$8 sps:$4 sm:$0xff]  }
 0x153   :  { %v15378_v48 = vpack.c.bf16 %v2468_v45, %v2467_v44  ;;  %v12694_v49 = vpop.f32.mrb[12].mxu0  ;;  %v13326_v44 = vld [vmem:[#allocation9 + $0xc70] ss:$8 sps:$4 sm:$0xff]   ;;  %10161 = vmatprep.subr.bf16.mxu1 %v13324_v41  ;;  %v13345_v41 = vld [vmem:[#allocation9 + $0xcc0] ss:$8 sps:$4 sm:$0xff]  }
 0x154   :  { %v1493_v51 = vadd.f32 %v12694_v49, %v15325_v59  ;;  %v1484_v52 = vpop.f32.mrb[13].mxu0 }
 0x155   :  { %v1485_v54 = vadd.f32 %v15325_v59, %v1484_v52  ;;  %v12695_v55 = vpop.f32.mrb[14].mxu0  ;;  %10162 = vmatpush1.bf16.msra.mxu1 %v13326_v44  ;;  %v13277_v44 = vld [vmem:[%s16311_s0 + $0x240] sm:$0xff]  }
 0x156   :  { %v1496_v57 = vadd.f32 %v12695_v55, %v15325_v59  ;;  %v1487_v58 = vpop.f32.mrb[15].mxu0  ;;  %v2473_v62 = vmax.f32 %v1493_v51, 0.0  ;;  %10163 = vmatprep.subr.bf16.mxu1 %v13327_v53 }
 0x157   :  { %v1488_v60 = vadd.f32 %v15325_v59, %v1487_v58  ;;  %v2471_v1 = vmax.f32 %v1485_v54, 0.0 }
 0x158   :  { %v2474_v63 = vmax.f32 %v1496_v57, 0.0  ;;  %12801 = vmatmul.mubr.msk.bf16.gmra.mrb[120].mxu0 %vm1013_vm0, %v13266_v47 }
 0x159   :  { %v2472_v2 = vmax.f32 %v1488_v60, 0.0  ;;  %12804 = vmatprep.mubr.msk.bf16.mxu0 %vm1013_vm0, %v13267_v56  ;;  %v13329_v56 = vld [vmem:[#allocation9 + $0xc80] ss:$8 sps:$4 sm:$0xff]  }
 0x15a   :  { %v15389_v3 = vpack.c.bf16 %v2474_v63, %v2473_v62  ;;  %v13273_v60 = vld [vmem:[%s16311_s0 + $0x220] sm:$0xff]   ;;  %10164 = vmatpush1.bf16.msra.mxu1 %v13329_v56 }
 0x15b   :  { %v15394_v5 = vpack.c.bf16 %v2472_v2, %v2471_v1  ;;  %v12698_v6 = vpop.f32.mrb[16].mxu0  ;;  %10165 = vmatprep.subr.bf16.mxu1 %v13332_v0 }
 0x15c   :  { %v1509_v8 = vadd.f32 %v12698_v6, %v15325_v59  ;;  %v1500_v9 = vpop.f32.mrb[17].mxu0 }
 0x15d   :  { %v1501_v12 = vadd.f32 %v15325_v59, %v1500_v9  ;;  %v12699_v14 = vpop.f32.mrb[18].mxu0  ;;  %v13274_v9 = vld [vmem:[%s16311_s0 + $0x228] sm:$0xff]  }
 0x15e   :  { %v1512_v16 = vadd.f32 %v12699_v14, %v15325_v59  ;;  %v1503_v17 = vpop.f32.mrb[19].mxu0  ;;  %v2477_v20 = vmax.f32 %v1509_v8, 0.0  ;;  %v13335_v14 = vld [vmem:[#allocation9 + $0xca4] ss:$8 sps:$4 sm:$0xff]  }
 0x15f   :  { %v1504_v18 = vadd.f32 %v15325_v59, %v1503_v17  ;;  %v2475_v23 = vmax.f32 %v1501_v12, 0.0  ;;  %v13337_v17 = vld [vmem:[#allocation9 + $0xca0] ss:$8 sps:$4 sm:$0xff]  }
 0x160   :  { %v2478_v21 = vmax.f32 %v1512_v16, 0.0  ;;  %12805 = vmatmul.mubr.msk.bf16.gmra.mrb[124].mxu0 %vm1013_vm0, %v13268_v4  ;;  %v13334_v4 = vld [vmem:[#allocation9 + $0xc90] ss:$8 sps:$4 sm:$0xff]  }
 0x161   :  { %v2476_v24 = vmax.f32 %v1504_v18, 0.0  ;;  %12808 = vmatprep.mubr.msk.bf16.mxu0 %vm1013_vm0, %v13269_v15  ;;  %10166 = vmatpush1.bf16.msra.mxu1 %v13334_v4 }
 0x162   :  { %v15405_v25 = vpack.c.bf16 %v2478_v21, %v2477_v20  ;;  %v13275_v20 = vld [vmem:[%s16311_s0 + $0x230] sm:$0xff]   ;;  %10167 = vmatprep.subr.bf16.mxu1 %v13335_v14 }
 0x163   :  { %v15410_v28 = vpack.c.bf16 %v2476_v24, %v2475_v23  ;;  %v12702_v29 = vpop.f32.mrb[20].mxu0  ;;  %v13340_v24 = vld [vmem:[#allocation9 + $0xcb4] ss:$8 sps:$4 sm:$0xff]  }
 0x164   :  { %v1525_v32 = vadd.f32 %v12702_v29, %v15325_v59  ;;  %v1516_v33 = vpop.f32.mrb[21].mxu0 }
 0x165   :  { %v1517_v35 = vadd.f32 %v15325_v59, %v1516_v33  ;;  %v12703_v36 = vpop.f32.mrb[22].mxu0  ;;  %10168 = vmatpush1.bf16.msra.mxu1 %v13337_v17 }
 0x166   :  { %v1528_v38 = vadd.f32 %v12703_v36, %v15325_v59  ;;  %v1519_v39 = vpop.f32.mrb[23].mxu0  ;;  %v2481_v42 = vmax.f32 %v1525_v32, 0.0  ;;  %10169 = vmatprep.subr.bf16.mxu1 %v13340_v24  ;;  %v13361_v24 = vld [vmem:[#allocation9 + $0x4] ss:$8 sps:$4 sm:$0xff]  }
 0x167   :  { %v1520_v40 = vadd.f32 %v15325_v59, %v1519_v39  ;;  %v2479_v45 = vmax.f32 %v1517_v35, 0.0  ;;  %v13276_v35 = vld [vmem:[%s16311_s0 + $0x238] sm:$0xff]   ;;  %9511 = vmatprep.subr.bf16.mxu0 %v13361_v24 }
 0x168   :  { %v2482_v43 = vmax.f32 %v1528_v38, 0.0  ;;  %12809 = vmatmul.mubr.msk.bf16.gmra.mrb[128].mxu0 %vm1013_vm0, %v13270_v26  ;;  %v13343_v38 = vld [vmem:[#allocation9 + $0xcc4] ss:$8 sps:$4 sm:$0xff]  }
 0x169   :  { %v2480_v47 = vmax.f32 %v1520_v40, 0.0  ;;  %12812 = vmatprep.mubr.msk.bf16.mxu0 %vm1013_vm0, %v13271_v37  ;;  %10170 = vmatpush1.bf16.msra.mxu1 %v13342_v31  ;;  %v13364_v31 = vld [vmem:[#allocation9 + $0xd04] ss:$8 sps:$4 sm:$0xff]  }
 0x16a   :  { %v15421_v49 = vpack.c.bf16 %v2482_v43, %v2481_v42  ;;  %10171 = vmatprep.subr.bf16.mxu1 %v13343_v38 }
 0x16b   :  { %v15426_v51 = vpack.c.bf16 %v2480_v47, %v2479_v45  ;;  %v12706_v52 = vpop.f32.mrb[24].mxu0 }
 0x16c   :  { %v1541_v54 = vadd.f32 %v12706_v52, %v15325_v59  ;;  %v1532_v55 = vpop.f32.mrb[25].mxu0  ;;  %v13348_v52 = vld [vmem:[#allocation9 + $0xcd4] ss:$8 sps:$4 sm:$0xff]  }
 0x16d   :  { %v1533_v57 = vadd.f32 %v15325_v59, %v1532_v55  ;;  %v12707_v58 = vpop.f32.mrb[26].mxu0  ;;  %10172 = vmatpush1.bf16.msra.mxu1 %v13345_v41  ;;  %v13350_v55 = vld [vmem:[#allocation9 + $0xcd0] ss:$8 sps:$4 sm:$0xff]  }
 0x16e   :  { %v1544_v61 = vadd.f32 %v12707_v58, %v15325_v59  ;;  %v1535_v62 = vpop.f32.mrb[27].mxu0  ;;  %v2485_v1 = vmax.f32 %v1541_v54, 0.0  ;;  %10173 = vmatprep.subr.bf16.mxu1 %v13348_v52 }
 0x16f   :  { %v1536_v63 = vadd.f32 %v15325_v59, %v1535_v62  ;;  %v2483_v6 = vmax.f32 %v1533_v57, 0.0 }
 0x170   :  { %v2486_v2 = vmax.f32 %v1544_v61, 0.0  ;;  %12813 = vmatmul.mubr.msk.bf16.gmra.mrb[132].mxu0 %vm1013_vm0, %v13272_v50 }
 0x171   :  { %v2484_v7 = vmax.f32 %v1536_v63, 0.0  ;;  %12816 = vmatprep.mubr.msk.bf16.mxu0 %vm1013_vm0, %v13273_v60  ;;  %v13278_v60 = vld [vmem:[%s16311_s0 + $0x248] sm:$0xff]   ;;  %10174 = vmatpush1.bf16.msra.mxu1 %v13350_v55  ;;  %v13351_v63 = vld [vmem:[#allocation9 + $0xce4] ss:$8 sps:$4 sm:$0xff]  }
 0x172   :  { %v15437_v8 = vpack.c.bf16 %v2486_v2, %v2485_v1  ;;  %v13353_v2 = vld [vmem:[#allocation9 + $0xce0] ss:$8 sps:$4 sm:$0xff]   ;;  %10175 = vmatprep.subr.bf16.mxu1 %v13351_v63 }
 0x173   :  { %v15442_v10 = vpack.c.bf16 %v2484_v7, %v2483_v6  ;;  %v12710_v12 = vpop.f32.mrb[28].mxu0  ;;  %v13279_v7 = vld [vmem:[%s16311_s0 + $0x250] sm:$0xff]  }
 0x174   :  { %v1557_v15 = vadd.f32 %v12710_v12, %v15325_v59  ;;  %v1548_v16 = vpop.f32.mrb[29].mxu0 }
 0x175   :  { %v1549_v18 = vadd.f32 %v15325_v59, %v1548_v16  ;;  %v12711_v19 = vpop.f32.mrb[30].mxu0  ;;  %10176 = vmatpush1.bf16.msra.mxu1 %v13353_v2 }
 0x176   :  { %v1560_v21 = vadd.f32 %v12711_v19, %v15325_v59  ;;  %v1551_v22 = vpop.f32.mrb[31].mxu0  ;;  %v2489_v26 = vmax.f32 %v1557_v15, 0.0  ;;  %v13356_v15 = vld [vmem:[#allocation9 + $0xcf4] ss:$8 sps:$4 sm:$0xff]  }
 0x177   :  { %v1552_v23 = vadd.f32 %v15325_v59, %v1551_v22  ;;  %v2487_v32 = vmax.f32 %v1549_v18, 0.0  ;;  %v13358_v18 = vld [vmem:[#allocation9 + $0xcf0] ss:$8 sps:$4 sm:$0xff]   ;;  %10177 = vmatprep.subr.bf16.mxu1 %v13356_v15  ;;  %v13280_v22 = vld [vmem:[%s16311_s0 + $0x258] sm:$0xff]   ;;  %v15527_v15 = vld [vmem:[#allocation7] ss:$0 sm:$0xff] }
 0x178   :  { %v2490_v29 = vmax.f32 %v1560_v21, 0.0  ;;  %12817 = vmatmul.mubr.msk.bf16.gmra.mrb[136].mxu0 %vm1013_vm0, %v13274_v9 }
 0x179   :  { %v2488_v33 = vmax.f32 %v1552_v23, 0.0  ;;  %12820 = vmatprep.mubr.msk.bf16.mxu0 %vm1013_vm0, %v13275_v20  ;;  %10178 = vmatpush1.bf16.msra.mxu1 %v13358_v18  ;;  %v13359_v23 = vld [vmem:[#allocation9] ss:$8 sps:$4 sm:$0xff]  }
 0x17a   :  { %v15453_v34 = vpack.c.bf16 %v2490_v29, %v2489_v26  ;;  %9512 = vmatpush1.bf16.msra.mxu0 %v13359_v23  ;;  %10200 = vmatprep.subr.bf16.mxu1 %v13364_v31 }
 0x17b   :  { %v15458_v36 = vpack.c.bf16 %v2488_v33, %v2487_v32  ;;  %v12714_v37 = vpop.f32.mrb[32].mxu0 }
 0x17c   :  { %v1573_v39 = vadd.f32 %v12714_v37, %v15325_v59  ;;  %v1564_v40 = vpop.f32.mrb[33].mxu0 }
 0x17d   :  { %v1565_v42 = vadd.f32 %v15325_v59, %v1564_v40  ;;  %v12715_v43 = vpop.f32.mrb[34].mxu0 }
 0x17e   :  { %v1576_v45 = vadd.f32 %v12715_v43, %v15325_v59  ;;  %v1567_v47 = vpop.f32.mrb[35].mxu0  ;;  %v2493_v53 = vmax.f32 %v1573_v39, 0.0 }
 0x17f   :  { %v1568_v50 = vadd.f32 %v15325_v59, %v1567_v47  ;;  %v2491_v56 = vmax.f32 %v1565_v42, 0.0 }
 0x180   :  { %v2494_v54 = vmax.f32 %v1576_v45, 0.0  ;;  %12821 = vmatmul.mubr.msk.bf16.gmra.mrb[140].mxu0 %vm1013_vm0, %v13276_v35  ;;  %v13281_v35 = vld [vmem:[%s16311_s0 + $0x260] sm:$0xff]  }
 0x181   :  { %v2492_v57 = vmax.f32 %v1568_v50, 0.0  ;;  %12824 = vmatprep.mubr.msk.bf16.mxu0 %vm1013_vm0, %v13277_v44 }
 0x182   :  { %v15469_v58 = vpack.c.bf16 %v2494_v54, %v2493_v53  ;;  %v13282_v53 = vld [vmem:[%s16311_s0 + $0x268] sm:$0xff]   ;;  %v13283_v54 = vld [vmem:[%s16311_s0 + $0x270] sm:$0xff]  }
 0x183   :  { %v15474_v61 = vpack.c.bf16 %v2492_v57, %v2491_v56  ;;  %v12718_v62 = vpop.f32.mrb[36].mxu0 }
 0x184   :  { %v1589_v0 = vadd.f32 %v12718_v62, %v15325_v59  ;;  %v1580_v1 = vpop.f32.mrb[37].mxu0 }
 0x185   :  { %v1581_v4 = vadd.f32 %v15325_v59, %v1580_v1  ;;  %v12719_v6 = vpop.f32.mrb[38].mxu0 }
 0x186   :  { %v1592_v9 = vadd.f32 %v12719_v6, %v15325_v59  ;;  %v1583_v12 = vpop.f32.mrb[39].mxu0  ;;  %v2497_v16 = vmax.f32 %v1589_v0, 0.0 }
 0x187   :  { %v1584_v14 = vadd.f32 %v15325_v59, %v1583_v12  ;;  %v2495_v19 = vmax.f32 %v1581_v4, 0.0 }
 0x188   :  { %v2498_v17 = vmax.f32 %v1592_v9, 0.0  ;;  %12825 = vmatmul.mubr.msk.bf16.gmra.mrb[144].mxu0 %vm1013_vm0, %v13278_v60 }
 0x189   :  { %v2496_v20 = vmax.f32 %v1584_v14, 0.0  ;;  %12828 = vmatprep.mubr.msk.bf16.mxu0 %vm1013_vm0, %v13279_v7  ;;  %v13284_v14 = vld [vmem:[%s16311_s0 + $0x278] sm:$0xff]  }
 0x18a   :  { %v15485_v21 = vpack.c.bf16 %v2498_v17, %v2497_v16 }
 0x18b   :  { %v15490_v26 = vpack.c.bf16 %v2496_v20, %v2495_v19  ;;  %v12722_v29 = vpop.f32.mrb[40].mxu0 }
 0x18c   :  { %v1605_v32 = vadd.f32 %v12722_v29, %v15325_v59  ;;  %v1596_v33 = vpop.f32.mrb[41].mxu0 }
 0x18d   :  { %v1597_v37 = vadd.f32 %v15325_v59, %v1596_v33  ;;  %v12723_v38 = vpop.f32.mrb[42].mxu0 }
 0x18e   :  { %v1608_v39 = vadd.f32 %v12723_v38, %v15325_v59  ;;  %v1599_v40 = vpop.f32.mrb[43].mxu0  ;;  %v2501_v42 = vmax.f32 %v1605_v32, 0.0  ;;  %v13286_v38 = vld [vmem:[%s16311_s0 + $0x288] sm:$0xff]  }
 0x18f   :  { %v1600_v41 = vadd.f32 %v15325_v59, %v1599_v40  ;;  %v2499_v44 = vmax.f32 %v1597_v37, 0.0 }
 0x190   :  { %v2502_v43 = vmax.f32 %v1608_v39, 0.0  ;;  %12829 = vmatmul.mubr.msk.bf16.gmra.mrb[148].mxu0 %vm1013_vm0, %v13280_v22  ;;  %v13287_v39 = vld [vmem:[%s16311_s0 + $0x290] sm:$0xff]  }
 0x191   :  { %v2500_v45 = vmax.f32 %v1600_v41, 0.0  ;;  %12832 = vmatprep.mubr.msk.bf16.mxu0 %vm1013_vm0, %v13281_v35 }
 0x192   :  { %v15501_v47 = vpack.c.bf16 %v2502_v43, %v2501_v42 }
 0x193   :  { %v15503_v50 = vpack.c.bf16 %v2500_v45, %v2499_v44  ;;  %v12726_v52 = vpop.f32.mrb[44].mxu0 }
 0x194   :  { %v1621_v55 = vadd.f32 %v12726_v52, %v15325_v59  ;;  %v1612_v56 = vpop.f32.mrb[45].mxu0 }
 0x195   :  { %v1613_v57 = vadd.f32 %v15325_v59, %v1612_v56  ;;  %v12727_v60 = vpop.f32.mrb[46].mxu0 }
 0x196   :  { %v1624_v62 = vadd.f32 %v12727_v60, %v15325_v59  ;;  %v1615_v63 = vpop.f32.mrb[47].mxu0  ;;  %v2505_v1 = vmax.f32 %v1621_v55, 0.0  ;;  %v13396_v60 = vld [vmem:[#allocation9 + $0x14] ss:$8 sps:$4 sm:$0xff]  }
 0x197   :  { %v1616_v0 = vadd.f32 %v15325_v59, %v1615_v63  ;;  %v2503_v4 = vmax.f32 %v1613_v57, 0.0  ;;  %v13285_v59 = vld [vmem:[%s16311_s0 + $0x280] sm:$0xff]   ;;  %9513 = vmatprep.subr.bf16.mxu0 %v13396_v60 }
 0x198   :  { %v2506_v2 = vmax.f32 %v1624_v62, 0.0  ;;  %12833 = vmatmul.mubr.msk.bf16.gmra.mrb[152].mxu0 %vm1013_vm0, %v13282_v53 }
 0x199   :  { %v2504_v6 = vmax.f32 %v1616_v0, 0.0  ;;  %12836 = vmatprep.mubr.msk.bf16.mxu0 %vm1013_vm0, %v13283_v54  ;;  %v13288_v0 = vld [vmem:[%s16311_s0 + $0x298] sm:$0xff]  }
 0x19a   :  { %v15517_v7 = vpack.c.bf16 %v2506_v2, %v2505_v1  ;;  %v13394_v1 = vld [vmem:[#allocation9 + $0x10] ss:$8 sps:$4 sm:$0xff]  }
 0x19b   :  { %v15519_v9 = vpack.c.bf16 %v2504_v6, %v2503_v4  ;;  %v12730_v12 = vpop.f32.mrb[48].mxu0  ;;  %v13289_v6 = vld [vmem:[%s16311_s0 + $0x2a0] sm:$0xff]   ;;  %9514 = vmatpush1.bf16.msra.mxu0 %v13394_v1 }
 0x19c   :  { %v1637_v16 = vadd.f32 %v15527_v15, %v12730_v12  ;;  %v1628_v17 = vpop.f32.mrb[49].mxu0 }
 0x19d   :  { %v1629_v18 = vadd.f32 %v15527_v15, %v1628_v17  ;;  %v12731_v19 = vpop.f32.mrb[50].mxu0  ;;  %v13403_v17 = vld [vmem:[#allocation9 + $0x24] ss:$8 sps:$4 sm:$0xff]  }
 0x19e   :  { %v1640_v20 = vadd.f32 %v15527_v15, %v12731_v19  ;;  %v1631_v22 = vpop.f32.mrb[51].mxu0  ;;  %v2509_v24 = vmax.f32 %v1637_v16, 0.0  ;;  %v13401_v19 = vld [vmem:[#allocation9 + $0x20] ss:$8 sps:$4 sm:$0xff]   ;;  %9515 = vmatprep.subr.bf16.mxu0 %v13403_v17 }
 0x19f   :  { %v1632_v23 = vadd.f32 %v15527_v15, %v1631_v22  ;;  %v2507_v31 = vmax.f32 %v1629_v18, 0.0  ;;  %9516 = vmatpush1.bf16.msra.mxu0 %v13401_v19  ;;  %v13293_v17 = vld [vmem:[%s16311_s0 + $0x2c0] sm:$0xff]  }
 0x1a0   :  { %v2510_v29 = vmax.f32 %v1640_v20, 0.0  ;;  %12837 = vmatmul.mubr.msk.bf16.gmra.mrb[156].mxu0 %vm1013_vm0, %v13284_v14 }
 0x1a1   :  { %v2508_v32 = vmax.f32 %v1632_v23, 0.0  ;;  %12840 = vmatprep.mubr.msk.bf16.mxu0 %vm1013_vm0, %v13285_v59 }
 0x1a2   :  { %v15535_v33 = vpack.c.bf16 %v2510_v29, %v2509_v24 }
 0x1a3   :  { %v15537_v35 = vpack.c.bf16 %v2508_v32, %v2507_v31  ;;  %v12734_v37 = vpop.f32.mrb[52].mxu0  ;;  %v13410_v31 = vld [vmem:[#allocation9 + $0x34] ss:$8 sps:$4 sm:$0xff]  }
 0x1a4   :  { %v1653_v40 = vadd.f32 %v15527_v15, %v12734_v37  ;;  %v1644_v41 = vpop.f32.mrb[53].mxu0  ;;  %9517 = vmatprep.subr.bf16.mxu0 %v13410_v31  ;;  %v13429_v31 = vld [vmem:[#allocation9 + $0x60] ss:$8 sps:$4 sm:$0xff]  }
 0x1a5   :  { %v1645_v42 = vadd.f32 %v15527_v15, %v1644_v41  ;;  %v12735_v43 = vpop.f32.mrb[54].mxu0 }
 0x1a6   :  { %v1656_v44 = vadd.f32 %v15527_v15, %v12735_v43  ;;  %v1647_v45 = vpop.f32.mrb[55].mxu0  ;;  %v2513_v53 = vmax.f32 %v1653_v40, 0.0 }
 0x1a7   :  { %v1648_v52 = vadd.f32 %v15527_v15, %v1647_v45  ;;  %v2511_v55 = vmax.f32 %v1645_v42, 0.0  ;;  %v13291_v42 = vld [vmem:[%s16311_s0 + $0x2b0] sm:$0xff]  }
 0x1a8   :  { %v2514_v54 = vmax.f32 %v1656_v44, 0.0  ;;  %12841 = vmatmul.mubr.msk.bf16.gmra.mrb[160].mxu0 %vm1013_vm0, %v13286_v38  ;;  %v13290_v38 = vld [vmem:[%s16311_s0 + $0x2a8] sm:$0xff]  }
 0x1a9   :  { %v2512_v56 = vmax.f32 %v1648_v52, 0.0  ;;  %12844 = vmatprep.mubr.msk.bf16.mxu0 %vm1013_vm0, %v13287_v39  ;;  %v13408_v39 = vld [vmem:[#allocation9 + $0x30] ss:$8 sps:$4 sm:$0xff]  }
 0x1aa   :  { %v15551_v57 = vpack.c.bf16 %v2514_v54, %v2513_v53  ;;  %9518 = vmatpush1.bf16.msra.mxu0 %v13408_v39  ;;  %v13417_v53 = vld [vmem:[#allocation9 + $0x44] ss:$8 sps:$4 sm:$0xff]  }
 0x1ab   :  { %v15553_v62 = vpack.c.bf16 %v2512_v56, %v2511_v55  ;;  %v12738_v63 = vpop.f32.mrb[56].mxu0  ;;  %v13415_v55 = vld [vmem:[#allocation9 + $0x40] ss:$8 sps:$4 sm:$0xff]   ;;  %9519 = vmatprep.subr.bf16.mxu0 %v13417_v53 }
 0x1ac   :  { %v1669_v2 = vadd.f32 %v15527_v15, %v12738_v63  ;;  %v1660_v4 = vpop.f32.mrb[57].mxu0 }
 0x1ad   :  { %v1661_v12 = vadd.f32 %v15527_v15, %v1660_v4  ;;  %v12739_v14 = vpop.f32.mrb[58].mxu0 }
 0x1ae   :  { %v1672_v59 = vadd.f32 %v15527_v15, %v12739_v14  ;;  %v1663_v16 = vpop.f32.mrb[59].mxu0  ;;  %v2517_v20 = vmax.f32 %v1669_v2, 0.0  ;;  %9520 = vmatpush1.bf16.msra.mxu0 %v13415_v55  ;;  %v13424_v2 = vld [vmem:[#allocation9 + $0x54] ss:$8 sps:$4 sm:$0xff]   ;;  %v13422_v14 = vld [vmem:[#allocation9 + $0x50] ss:$8 sps:$4 sm:$0xff]  }
 0x1af   :  { %v1664_v18 = vadd.f32 %v15527_v15, %v1663_v16  ;;  %v2515_v23 = vmax.f32 %v1661_v12, 0.0  ;;  %v13292_v12 = vld [vmem:[%s16311_s0 + $0x2b8] sm:$0xff]   ;;  %9521 = vmatprep.subr.bf16.mxu0 %v13424_v2  ;;  %v13298_v55 = vld [vmem:[%s16311_s0 + $0x2d0] sm:$0xff]  }
 0x1b0   :  { %v2518_v22 = vmax.f32 %v1672_v59, 0.0  ;;  %12845 = vmatmul.mubr.msk.bf16.gmra.mrb[164].mxu0 %vm1013_vm0, %v13288_v0  ;;  %v13445_v2 = vld [vmem:[#allocation9 + $0x84] ss:$8 sps:$4 sm:$0xff]  }
 0x1b1   :  { %v2516_v24 = vmax.f32 %v1664_v18, 0.0  ;;  %12848 = vmatprep.mubr.msk.bf16.mxu0 %vm1013_vm0, %v13289_v6 }
 0x1b2   :  { %v15567_v29 = vpack.c.bf16 %v2518_v22, %v2517_v20  ;;  %9522 = vmatpush1.bf16.msra.mxu0 %v13422_v14 }
 0x1b3   :  { %v15569_v32 = vpack.c.bf16 %v2516_v24, %v2515_v23  ;;  %v12742_v37 = vpop.f32.mrb[60].mxu0  ;;  %v13431_v23 = vld [vmem:[#allocation9 + $0x64] ss:$8 sps:$4 sm:$0xff]  }
 0x1b4   :  { %v1685_v40 = vadd.f32 %v15527_v15, %v12742_v37  ;;  %v1676_v41 = vpop.f32.mrb[61].mxu0  ;;  %9523 = vmatprep.subr.bf16.mxu0 %v13431_v23  ;;  %v13450_v23 = vld [vmem:[#allocation9 + $0x90] ss:$8 sps:$4 sm:$0xff]  }
 0x1b5   :  { %v1677_v43 = vadd.f32 %v15527_v15, %v1676_v41  ;;  %v12743_v44 = vpop.f32.mrb[62].mxu0 }
 0x1b6   :  { %v1688_v45 = vadd.f32 %v15527_v15, %v12743_v44  ;;  %v1679_v52 = vpop.f32.mrb[63].mxu0  ;;  %v2521_v56 = vmax.f32 %v1685_v40, 0.0  ;;  %9524 = vmatpush1.bf16.msra.mxu0 %v13429_v31 }
 0x1b7   :  { %v1680_v54 = vadd.f32 %v15527_v15, %v1679_v52  ;;  %v2519_v63 = vmax.f32 %v1677_v43, 0.0  ;;  %v13436_v52 = vld [vmem:[#allocation9 + $0x70] ss:$8 sps:$4 sm:$0xff]  }
 0x1b8   :  { %v2522_v60 = vmax.f32 %v1688_v45, 0.0  ;;  %12849 = vmatmul.mubr.msk.bf16.gmra.mrb[168].mxu0 %vm1013_vm0, %v13290_v38  ;;  %v13294_v45 = vld [vmem:[%s16311_s0 + $0x2c8] sm:$0xff]  }
 0x1b9   :  { %v2520_v0 = vmax.f32 %v1680_v54, 0.0  ;;  %12852 = vmatprep.mubr.msk.bf16.mxu0 %vm1013_vm0, %v13291_v42  ;;  %v13438_v42 = vld [vmem:[#allocation9 + $0x74] ss:$8 sps:$4 sm:$0xff]  }
 0x1ba   :  { %v15583_v1 = vpack.c.bf16 %v2522_v60, %v2521_v56  ;;  %9525 = vmatprep.subr.bf16.mxu0 %v13438_v42 }
 0x1bb   :  { %v15585_v4 = vpack.c.bf16 %v2520_v0, %v2519_v63  ;;  %v12746_v6 = vpop.f32.mrb[64].mxu0  ;;  %9526 = vmatpush1.bf16.msra.mxu0 %v13436_v52 }
 0x1bc   :  { %v1701_v59 = vadd.f32 %v15527_v15, %v12746_v6  ;;  %v1692_v16 = vpop.f32.mrb[65].mxu0  ;;  %9527 = vmatprep.subr.bf16.mxu0 %v13445_v2 }
 0x1bd   :  { %v1693_v18 = vadd.f32 %v15527_v15, %v1692_v16  ;;  %v12747_v19 = vpop.f32.mrb[66].mxu0 }
 0x1be   :  { %v1704_v20 = vadd.f32 %v15527_v15, %v12747_v19  ;;  %v1695_v22 = vpop.f32.mrb[67].mxu0  ;;  %v2525_v37 = vmax.f32 %v1701_v59, 0.0  ;;  %v13452_v19 = vld [vmem:[#allocation9 + $0x94] ss:$8 sps:$4 sm:$0xff]  }
 0x1bf   :  { %v1696_v24 = vadd.f32 %v15527_v15, %v1695_v22  ;;  %v2523_v39 = vmax.f32 %v1693_v18, 0.0 }
 0x1c0   :  { %v2526_v38 = vmax.f32 %v1704_v20, 0.0  ;;  %12853 = vmatmul.mubr.msk.bf16.gmra.mrb[172].mxu0 %vm1013_vm0, %v13292_v12  ;;  %v13443_v12 = vld [vmem:[#allocation9 + $0x80] ss:$8 sps:$4 sm:$0xff]  }
 0x1c1   :  { %v2524_v40 = vmax.f32 %v1696_v24, 0.0  ;;  %12856 = vmatprep.mubr.msk.bf16.mxu0 %vm1013_vm0, %v13293_v17  ;;  %9528 = vmatpush1.bf16.msra.mxu0 %v13443_v12  ;;  %v13464_v12 = vld [vmem:[#allocation9 + $0xb0] ss:$8 sps:$4 sm:$0xff]  }
 0x1c2   :  { %v15599_v41 = vpack.c.bf16 %v2526_v38, %v2525_v37  ;;  %v13299_v37 = vld [vmem:[%s16311_s0 + $0x2d8] sm:$0xff]   ;;  %9529 = vmatprep.subr.bf16.mxu0 %v13452_v19 }
 0x1c3   :  { %v15601_v43 = vpack.c.bf16 %v2524_v40, %v2523_v39  ;;  %v12750_v44 = vpop.f32.mrb[68].mxu0  ;;  %v13306_v40 = vld [vmem:[%s16311_s0 + $0x2e0] sm:$0xff]  }
 0x1c4   :  { %v1717_v53 = vadd.f32 %v15527_v15, %v12750_v44  ;;  %v1708_v54 = vpop.f32.mrb[69].mxu0 }
 0x1c5   :  { %v1709_v56 = vadd.f32 %v15527_v15, %v1708_v54  ;;  %v12751_v60 = vpop.f32.mrb[70].mxu0  ;;  %9530 = vmatpush1.bf16.msra.mxu0 %v13450_v23 }
 0x1c6   :  { %v1720_v63 = vadd.f32 %v15527_v15, %v12751_v60  ;;  %v1711_v0 = vpop.f32.mrb[71].mxu0  ;;  %v2529_v14 = vmax.f32 %v1717_v53, 0.0  ;;  %v13457_v53 = vld [vmem:[#allocation9 + $0xa0] ss:$8 sps:$4 sm:$0xff]  }
 0x1c7   :  { %v1712_v6 = vadd.f32 %v15527_v15, %v1711_v0  ;;  %v2527_v16 = vmax.f32 %v1709_v56, 0.0  ;;  %v13466_v0 = vld [vmem:[#allocation9 + $0xb4] ss:$8 sps:$4 sm:$0xff]  }
 0x1c8   :  { %v2530_v59 = vmax.f32 %v1720_v63, 0.0  ;;  %12857 = vmatmul.mubr.msk.bf16.gmra.mrb[176].mxu0 %vm1013_vm0, %v13294_v45  ;;  %v13459_v45 = vld [vmem:[#allocation9 + $0xa4] ss:$8 sps:$4 sm:$0xff]  }
 0x1c9   :  { %v2528_v17 = vmax.f32 %v1712_v6, 0.0  ;;  %12860 = vmatprep.mubr.msk.bf16.mxu0 %vm1013_vm0, %v13298_v55  ;;  %9531 = vmatprep.subr.bf16.mxu0 %v13459_v45 }
 0x1ca   :  { %v15615_v18 = vpack.c.bf16 %v2530_v59, %v2529_v14  ;;  %9532 = vmatpush1.bf16.msra.mxu0 %v13457_v53 }
 0x1cb   :  { %v15617_v20 = vpack.c.bf16 %v2528_v17, %v2527_v16  ;;  %v12754_v22 = vpop.f32.mrb[72].mxu0  ;;  %v13307_v16 = vld [vmem:[%s16311_s0 + $0x2e8] sm:$0xff]   ;;  %9533 = vmatprep.subr.bf16.mxu0 %v13466_v0 }
 0x1cc   :  { %v1733_v24 = vadd.f32 %v15527_v15, %v12754_v22  ;;  %v1724_v31 = vpop.f32.mrb[73].mxu0  ;;  %v13314_v22 = vld [vmem:[%s16311_s0 + $0x2f0] sm:$0xff]  }
 0x1cd   :  { %v1725_v38 = vadd.f32 %v15527_v15, %v1724_v31  ;;  %v12755_v39 = vpop.f32.mrb[74].mxu0  ;;  %v13473_v31 = vld [vmem:[#allocation9 + $0xc4] ss:$8 sps:$4 sm:$0xff]  }
 0x1ce   :  { %v1736_v42 = vadd.f32 %v15527_v15, %v12755_v39  ;;  %v1727_v44 = vpop.f32.mrb[75].mxu0  ;;  %v2533_v54 = vmax.f32 %v1733_v24, 0.0  ;;  %9534 = vmatpush1.bf16.msra.mxu0 %v13464_v12 }
 0x1cf   :  { %v1728_v52 = vadd.f32 %v15527_v15, %v1727_v44  ;;  %v2531_v56 = vmax.f32 %v1725_v38, 0.0  ;;  %v13471_v38 = vld [vmem:[#allocation9 + $0xc0] ss:$8 sps:$4 sm:$0xff]   ;;  %9535 = vmatprep.subr.bf16.mxu0 %v13473_v31 }
 0x1d0   :  { %v2534_v55 = vmax.f32 %v1736_v42, 0.0  ;;  %12861 = vmatmul.mubr.msk.bf16.gmra.mrb[180].mxu0 %vm1013_vm0, %v13299_v37 }
 0x1d1   :  { %v2532_v60 = vmax.f32 %v1728_v52, 0.0  ;;  %12864 = vmatprep.mubr.msk.bf16.mxu0 %vm1013_vm0, %v13306_v40  ;;  %v13480_v52 = vld [vmem:[#allocation9 + $0xd4] ss:$8 sps:$4 sm:$0xff]  }
 0x1d2   :  { %v15631_v63 = vpack.c.bf16 %v2534_v55, %v2533_v54  ;;  %9536 = vmatpush1.bf16.msra.mxu0 %v13471_v38  ;;  %v13315_v55 = vld [vmem:[%s16311_s0 + $0x2f8] sm:$0xff]  }
 0x1d3   :  { %v15633_v2 = vpack.c.bf16 %v2532_v60, %v2531_v56  ;;  %v12758_v6 = vpop.f32.mrb[76].mxu0  ;;  %v13478_v56 = vld [vmem:[#allocation9 + $0xd0] ss:$8 sps:$4 sm:$0xff]   ;;  %9537 = vmatprep.subr.bf16.mxu0 %v13480_v52 }
 0x1d4   :  { %16319 = vst [vmem:[#allocation16_spill] sm:$0xff] %v15631_v63  ;;  %v1749_v14 = vadd.f32 %v15527_v15, %v12758_v6  ;;  %v1740_v59 = vpop.f32.mrb[77].mxu0  ;;  %v13322_v6 = vld [vmem:[%s16311_s0 + $0x300] sm:$0xff]  }
 0x1d5   :  { %16320 = vst [vmem:[#allocation17_spill] sm:$0xff] %v15633_v2  ;;  %v1741_v17 = vadd.f32 %v15527_v15, %v1740_v59  ;;  %v12759_v19 = vpop.f32.mrb[78].mxu0  ;;  %v13492_v52 = vld [vmem:[#allocation9 + $0xf0] ss:$8 sps:$4 sm:$0xff]  }
 0x1d6   :  { %v1752_v23 = vadd.f32 %v15527_v15, %v12759_v19  ;;  %v1743_v24 = vpop.f32.mrb[79].mxu0  ;;  %v2537_v39 = vmax.f32 %v1749_v14, 0.0  ;;  %9538 = vmatpush1.bf16.msra.mxu0 %v13478_v56  ;;  %v13330_v56 = vld [vmem:[%s16311_s0 + $0x310] sm:$0xff]  }
 0x1d7   :  { %v1744_v37 = vadd.f32 %v15527_v15, %v1743_v24  ;;  %v2535_v42 = vmax.f32 %v1741_v17, 0.0  ;;  %v13487_v17 = vld [vmem:[#allocation9 + $0xe4] ss:$8 sps:$4 sm:$0xff]  }
 0x1d8   :  { %v2538_v40 = vmax.f32 %v1752_v23, 0.0  ;;  %12865 = vmatmul.mubr.msk.bf16.gmra.mrb[184].mxu0 %vm1013_vm0, %v13307_v16  ;;  %9539 = vmatprep.subr.bf16.mxu0 %v13487_v17 }
 0x1d9   :  { %v2536_v44 = vmax.f32 %v1744_v37, 0.0  ;;  %12868 = vmatprep.mubr.msk.bf16.mxu0 %vm1013_vm0, %v13314_v22  ;;  %v13485_v22 = vld [vmem:[#allocation9 + $0xe0] ss:$8 sps:$4 sm:$0xff]  }
 0x1da   :  { %v15647_v45 = vpack.c.bf16 %v2538_v40, %v2537_v39  ;;  %9540 = vmatpush1.bf16.msra.mxu0 %v13485_v22  ;;  %v13494_v39 = vld [vmem:[#allocation9 + $0xf4] ss:$8 sps:$4 sm:$0xff]  }
 0x1db   :  { %v15649_v53 = vpack.c.bf16 %v2536_v44, %v2535_v42  ;;  %v12762_v54 = vpop.f32.mrb[80].mxu0  ;;  %v13323_v44 = vld [vmem:[%s16311_s0 + $0x308] sm:$0xff]   ;;  %9541 = vmatprep.subr.bf16.mxu0 %v13494_v39 }
 0x1dc   :  { %16321 = vst [vmem:[#allocation18_spill] sm:$0xff] %v15647_v45  ;;  %v1765_v60 = vadd.f32 %v15527_v15, %v12762_v54  ;;  %v1756_v0 = vpop.f32.mrb[81].mxu0 }
 0x1dd   :  { %v1757_v12 = vadd.f32 %v15527_v15, %v1756_v0  ;;  %v12763_v14 = vpop.f32.mrb[82].mxu0 }
 0x1de   :  { %v1768_v59 = vadd.f32 %v15527_v15, %v12763_v14  ;;  %v1759_v16 = vpop.f32.mrb[83].mxu0  ;;  %v2541_v23 = vmax.f32 %v1765_v60, 0.0  ;;  %9542 = vmatpush1.bf16.msra.mxu0 %v13492_v52  ;;  %v13500_v14 = vld [vmem:[#allocation9 + $0x104] ss:$8 sps:$4 sm:$0xff]  }
 0x1df   :  { %v1760_v19 = vadd.f32 %v15527_v15, %v1759_v16  ;;  %v2539_v31 = vmax.f32 %v1757_v12, 0.0  ;;  %9564 = vmatprep.subr.bf16.mxu0 %v13500_v14 }
 0x1e0   :  { %v2542_v24 = vmax.f32 %v1768_v59, 0.0  ;;  %12869 = vmatmul.mubr.msk.bf16.gmra.mrb[188].mxu0 %vm1013_vm0, %v13315_v55 }
 0x1e1   :  { %v2540_v37 = vmax.f32 %v1760_v19, 0.0  ;;  %12872 = vmatprep.mubr.msk.bf16.mxu0 %vm1013_vm0, %v13322_v6 }
 0x1e2   :  { %v15663_v38 = vpack.c.bf16 %v2542_v24, %v2541_v23 }
 0x1e3   :  { %v15665_v40 = vpack.c.bf16 %v2540_v37, %v2539_v31  ;;  %v12766_v42 = vpop.f32.mrb[84].mxu0 }
 0x1e4   :  { %16322 = vst [vmem:[#allocation19_spill] sm:$0xff] %v15663_v38  ;;  %v1781_v54 = vadd.f32 %v15527_v15, %v12766_v42  ;;  %v1772_v55 = vpop.f32.mrb[85].mxu0  ;;  %v13331_v42 = vld [vmem:[%s16311_s0 + $0x318] sm:$0xff]   ;;  %v15742_v38 = vld [vmem:[#allocation7] ss:$0 sm:$0xff] }
 0x1e5   :  { %16323 = vst [vmem:[#allocation20_spill] sm:$0xff] %v15665_v40  ;;  %v1773_v60 = vadd.f32 %v15527_v15, %v1772_v55  ;;  %v12767_v0 = vpop.f32.mrb[86].mxu0 }
 0x1e6   :  { %v1784_v6 = vadd.f32 %v15527_v15, %v12767_v0  ;;  %v1775_v12 = vpop.f32.mrb[87].mxu0  ;;  %v2545_v16 = vmax.f32 %v1781_v54, 0.0  ;;  %v13338_v54 = vld [vmem:[%s16311_s0 + $0x320] sm:$0xff]  }
 0x1e7   :  { %v1776_v59 = vadd.f32 %v15527_v15, %v1775_v12  ;;  %v2543_v19 = vmax.f32 %v1773_v60, 0.0 }
 0x1e8   :  { %v2546_v17 = vmax.f32 %v1784_v6, 0.0  ;;  %12873 = vmatmul.mubr.msk.bf16.gmra.mrb[192].mxu0 %vm1013_vm0, %v13323_v44 }
 0x1e9   :  { %v2544_v22 = vmax.f32 %v1776_v59, 0.0  ;;  %12876 = vmatprep.mubr.msk.bf16.mxu0 %vm1013_vm0, %v13330_v56 }
 0x1ea   :  { %v15679_v23 = vpack.c.bf16 %v2546_v17, %v2545_v16 }
 0x1eb   :  { %v15681_v24 = vpack.c.bf16 %v2544_v22, %v2543_v19  ;;  %v12770_v31 = vpop.f32.mrb[88].mxu0 }
 0x1ec   :  { %16324 = vst [vmem:[#allocation21_spill] sm:$0xff] %v15679_v23  ;;  %v1797_v37 = vadd.f32 %v15527_v15, %v12770_v31  ;;  %v1788_v39 = vpop.f32.mrb[89].mxu0  ;;  %v13339_v31 = vld [vmem:[%s16311_s0 + $0x328] sm:$0xff]  }
 0x1ed   :  { %16325 = vst [vmem:[#allocation22_spill] sm:$0xff] %v15681_v24  ;;  %v1789_v52 = vadd.f32 %v15527_v15, %v1788_v39  ;;  %v12771_v44 = vpop.f32.mrb[90].mxu0  ;;  %v13397_v24 = vld [vmem:[#allocation9 + $0xd80] ss:$8 sps:$4 sm:$0xff]  }
 0x1ee   :  { %v1800_v55 = vadd.f32 %v15527_v15, %v12771_v44  ;;  %v1791_v56 = vpop.f32.mrb[91].mxu0  ;;  %v2549_v0 = vmax.f32 %v1797_v37, 0.0 }
 0x1ef   :  { %v1792_v60 = vadd.f32 %v15527_v15, %v1791_v56  ;;  %v2547_v12 = vmax.f32 %v1789_v52, 0.0 }
 0x1f0   :  { %v2550_v6 = vmax.f32 %v1800_v55, 0.0  ;;  %12877 = vmatmul.mubr.msk.bf16.gmra.mrb[196].mxu0 %vm1013_vm0, %v13331_v42  ;;  %v13346_v42 = vld [vmem:[%s16311_s0 + $0x330] sm:$0xff]  }
 0x1f1   :  { %v2548_v14 = vmax.f32 %v1792_v60, 0.0  ;;  %12880 = vmatprep.mubr.msk.bf16.mxu0 %vm1013_vm0, %v13338_v54 }
 0x1f2   :  { %v15695_v59 = vpack.c.bf16 %v2550_v6, %v2549_v0 }
 0x1f3   :  { %v15697_v16 = vpack.c.bf16 %v2548_v14, %v2547_v12  ;;  %v12774_v17 = vpop.f32.mrb[92].mxu0 }
 0x1f4   :  { %16326 = vst [vmem:[#allocation23_spill] sm:$0xff] %v15695_v59  ;;  %v1813_v19 = vadd.f32 %v15527_v15, %v12774_v17  ;;  %v1804_v22 = vpop.f32.mrb[93].mxu0 }
 0x1f5   :  { %16327 = vst [vmem:[#allocation24_spill] sm:$0xff] %v15697_v16  ;;  %v1805_v37 = vadd.f32 %v15527_v15, %v1804_v22  ;;  %v12775_v39 = vpop.f32.mrb[94].mxu0  ;;  %v13366_v16 = vld [vmem:[%s16311_s0 + $0x358] sm:$0xff]  }
 0x1f6   :  { %v1816_v52 = vadd.f32 %v15527_v15, %v12775_v39  ;;  %v1807_v44 = vpop.f32.mrb[95].mxu0  ;;  %v2553_v55 = vmax.f32 %v1813_v19, 0.0  ;;  %v13347_v39 = vld [vmem:[%s16311_s0 + $0x338] sm:$0xff]  }
 0x1f7   :  { %v1808_v54 = vadd.f32 %v15527_v15, %v1807_v44  ;;  %v2551_v60 = vmax.f32 %v1805_v37, 0.0 }
 0x1f8   :  { %v2554_v56 = vmax.f32 %v1816_v52, 0.0  ;;  %12881 = vmatmul.mubr.msk.bf16.gmra.mrb[200].mxu0 %vm1013_vm0, %v13339_v31  ;;  %v13354_v31 = vld [vmem:[%s16311_s0 + $0x340] sm:$0xff]  }
 0x1f9   :  { %v2552_v0 = vmax.f32 %v1808_v54, 0.0  ;;  %12884 = vmatprep.mubr.msk.bf16.mxu0 %vm1013_vm0, %v13346_v42 }
 0x1fa   :  { %v15711_v6 = vpack.c.bf16 %v2554_v56, %v2553_v55 }
 0x1fb   :  { %v15713_v12 = vpack.c.bf16 %v2552_v0, %v2551_v60  ;;  %v12778_v14 = vpop.f32.mrb[96].mxu0 }
 0x1fc   :  { %16328 = vst [vmem:[#allocation25_spill] sm:$0xff] %v15711_v6  ;;  %v1829_v17 = vadd.f32 %v15527_v15, %v12778_v14  ;;  %v1820_v22 = vpop.f32.mrb[97].mxu0 }
 0x1fd   :  { %16329 = vst [vmem:[#allocation26_spill] sm:$0xff] %v15713_v12  ;;  %v1821_v19 = vadd.f32 %v15527_v15, %v1820_v22  ;;  %v12779_v52 = vpop.f32.mrb[98].mxu0 }
 0x1fe   :  { %v1832_v37 = vadd.f32 %v15527_v15, %v12779_v52  ;;  %v1823_v42 = vpop.f32.mrb[99].mxu0  ;;  %v2557_v54 = vmax.f32 %v1829_v17, 0.0  ;;  %v13355_v52 = vld [vmem:[%s16311_s0 + $0x348] sm:$0xff]  }
 0x1ff   :  { %v1824_v44 = vadd.f32 %v15527_v15, %v1823_v42  ;;  %v2555_v56 = vmax.f32 %v1821_v19, 0.0 }
 0x200   :  { %v2558_v55 = vmax.f32 %v1832_v37, 0.0  ;;  %12885 = vmatmul.mubr.msk.bf16.gmra.mrb[204].mxu0 %vm1013_vm0, %v13347_v39  ;;  %v13365_v39 = vld [vmem:[%s16311_s0 + $0x350] sm:$0xff]  }
 0x201   :  { %v2556_v60 = vmax.f32 %v1824_v44, 0.0  ;;  %12888 = vmatprep.mubr.msk.bf16.mxu0 %vm1013_vm0, %v13354_v31 }
 0x202   :  { %v2764_v0 = vpack.c.bf16 %v2558_v55, %v2557_v54 }
 0x203   :  { %v2763_v14 = vpack.c.bf16 %v2556_v60, %v2555_v56  ;;  %v12782_v22 = vpop.f32.mrb[100].mxu0 }
 0x204   :  { %v1845_v59 = vadd.f32 %v15527_v15, %v12782_v22  ;;  %v1836_v6 = vpop.f32.mrb[101].mxu0 }
 0x205   :  { %v1837_v42 = vadd.f32 %v15527_v15, %v1836_v6  ;;  %v12783_v17 = vpop.f32.mrb[102].mxu0  ;;  %v13362_v6 = vld [vmem:[#allocation9 + $0xd00] ss:$8 sps:$4 sm:$0xff]  }
 0x206   :  { %v1848_v19 = vadd.f32 %v15527_v15, %v12783_v17  ;;  %v1839_v31 = vpop.f32.mrb[103].mxu0  ;;  %v2561_v44 = vmax.f32 %v1845_v59, 0.0  ;;  %v13369_v17 = vld [vmem:[#allocation9 + $0xd14] ss:$8 sps:$4 sm:$0xff]  }
 0x207   :  { %v1840_v37 = vadd.f32 %v15527_v15, %v1839_v31  ;;  %v2559_v55 = vmax.f32 %v1837_v42, 0.0 }
 0x208   :  { %v2562_v54 = vmax.f32 %v1848_v19, 0.0  ;;  %12889 = vmatmul.mubr.msk.bf16.gmra.mrb[208].mxu0 %vm1013_vm0, %v13355_v52  ;;  %v13373_v52 = vld [vmem:[%s16311_s0 + $0x360] sm:$0xff]  }
 0x209   :  { %v2560_v56 = vmax.f32 %v1840_v37, 0.0  ;;  %12892 = vmatprep.mubr.msk.bf16.mxu0 %vm1013_vm0, %v13365_v39 }
 0x20a   :  { %v2766_v60 = vpack.c.bf16 %v2562_v54, %v2561_v44  ;;  %v13367_v44 = vld [vmem:[#allocation9 + $0xd10] ss:$8 sps:$4 sm:$0xff]  }
 0x20b   :  { %v2765_v22 = vpack.c.bf16 %v2560_v56, %v2559_v55  ;;  %v12786_v12 = vpop.f32.mrb[104].mxu0  ;;  %v13372_v55 = vld [vmem:[#allocation9 + $0xd24] ss:$8 sps:$4 sm:$0xff]  }
 0x20c   :  { %v1861_v15 = vadd.f32 %v15742_v38, %v12786_v12  ;;  %v1852_v59 = vpop.f32.mrb[105].mxu0 }
 0x20d   :  { %10179 = vmatprep.mubr.bf16.mxu1 %v2765_v22  ;;  %v1853_v42 = vadd.f32 %v15742_v38, %v1852_v59  ;;  %v12787_v39 = vpop.f32.mrb[106].mxu0  ;;  %v13370_v59 = vld [vmem:[#allocation9 + $0xd20] ss:$8 sps:$4 sm:$0xff]  }
 0x20e   :  { %10180 = vmatmul.mubr.bf16.vlgmr.msra.gmra.mrb[0].mxu1 %v2763_v14  ;;  %v2565_v19 = vmax.f32 %v1861_v15, 0.0  ;;  %v1864_v31 = vadd.f32 %v15742_v38, %v12787_v39  ;;  %v1855_v37 = vpop.f32.mrb[107].mxu0 }
 0x20f   :  { %10201 = vmatpush1.bf16.msra.mxu1 %v13362_v6  ;;  %10189 = vmatprep.mubr.bf16.mxu1 %v2766_v60  ;;  %v2563_v54 = vmax.f32 %v1853_v42, 0.0  ;;  %v1856_v12 = vadd.f32 %v15742_v38, %v1855_v37  ;;  %v13374_v60 = vld [vmem:[%s16311_s0 + $0x368] sm:$0xff]  }
 0x210   :  { %12893 = vmatmul.mubr.msk.bf16.gmra.mrb[212].mxu0 %vm1013_vm0, %v13366_v16  ;;  %10202 = vmatprep.subr.bf16.mxu1 %v13369_v17  ;;  %v2566_v56 = vmax.f32 %v1864_v31, 0.0  ;;  %v13377_v42 = vld [vmem:[#allocation9 + $0xd34] ss:$8 sps:$4 sm:$0xff]  }
 0x211   :  { %12896 = vmatprep.mubr.msk.bf16.mxu0 %vm1013_vm0, %v13373_v52  ;;  %v2564_v22 = vmax.f32 %v1856_v12, 0.0  ;;  %v13381_v52 = vld [vmem:[%s16311_s0 + $0x370] sm:$0xff]  }
 0x212   :  { %v15753_v14 = vpack.c.bf16 %v2566_v56, %v2565_v19  ;;  %v13380_v56 = vld [vmem:[#allocation9 + $0xd44] ss:$8 sps:$4 sm:$0xff]  }
 0x213   :  { %10203 = vmatpush1.bf16.msra.mxu1 %v13367_v44  ;;  %v15758_v6 = vpack.c.bf16 %v2564_v22, %v2563_v54  ;;  %v12790_v15 = vpop.f32.mrb[108].mxu0  ;;  %v13375_v54 = vld [vmem:[#allocation9 + $0xd30] ss:$8 sps:$4 sm:$0xff]  }
 0x214   :  { %10204 = vmatprep.subr.bf16.mxu1 %v13372_v55  ;;  %v1877_v16 = vadd.f32 %v15742_v38, %v12790_v15  ;;  %v1868_v17 = vpop.f32.mrb[109].mxu0 }
 0x215   :  { %v1869_v39 = vadd.f32 %v15742_v38, %v1868_v17  ;;  %v12791_v19 = vpop.f32.mrb[110].mxu0  ;;  %v13378_v17 = vld [vmem:[#allocation9 + $0xd40] ss:$8 sps:$4 sm:$0xff]  }
 0x216   :  { %10190 = vmatmul.mubr.bf16.gmra.mrb[4].mxu1 %v2764_v0  ;;  %v2569_v31 = vmax.f32 %v1877_v16, 0.0  ;;  %v1880_v37 = vadd.f32 %v15742_v38, %v12791_v19  ;;  %v1871_v44 = vpop.f32.mrb[111].mxu0  ;;  %v13382_v0 = vld [vmem:[%s16311_s0 + $0x378] sm:$0xff]  }
 0x217   :  { %10205 = vmatpush1.bf16.msra.mxu1 %v13370_v59  ;;  %v2567_v12 = vmax.f32 %v1869_v39, 0.0  ;;  %v1872_v55 = vadd.f32 %v15742_v38, %v1871_v44  ;;  %v13385_v39 = vld [vmem:[#allocation9 + $0xd54] ss:$8 sps:$4 sm:$0xff]  }
 0x218   :  { %12897 = vmatmul.mubr.msk.bf16.gmra.mrb[216].mxu0 %vm1013_vm0, %v13374_v60  ;;  %10206 = vmatprep.subr.bf16.mxu1 %v13377_v42  ;;  %v2570_v22 = vmax.f32 %v1880_v37, 0.0 }
 0x219   :  { %12900 = vmatprep.mubr.msk.bf16.mxu0 %vm1013_vm0, %v13381_v52  ;;  %v2568_v15 = vmax.f32 %v1872_v55, 0.0  ;;  %v13389_v52 = vld [vmem:[%s16311_s0 + $0x380] sm:$0xff]  }
 0x21a   :  { %v15769_v23 = vpack.c.bf16 %v2570_v22, %v2569_v31  ;;  %v13388_v22 = vld [vmem:[#allocation9 + $0xd64] ss:$8 sps:$4 sm:$0xff]  }
 0x21b   :  { %10207 = vmatpush1.bf16.msra.mxu1 %v13375_v54  ;;  %v2769_v59 = vpack.c.bf16 %v2568_v15, %v2567_v12  ;;  %v12794_v16 = vpop.f32.mrb[112].mxu0  ;;  %v13383_v12 = vld [vmem:[#allocation9 + $0xd50] ss:$8 sps:$4 sm:$0xff]  }
 0x21c   :  { %10208 = vmatprep.subr.bf16.mxu1 %v13380_v56  ;;  %v1893_v60 = vadd.f32 %v15742_v38, %v12794_v16  ;;  %v1884_v42 = vpop.f32.mrb[113].mxu0  ;;  %v13386_v16 = vld [vmem:[#allocation9 + $0xd60] ss:$8 sps:$4 sm:$0xff]  }
 0x21d   :  { %10232 = vmatprep.mubr.bf16.mxu1 %v2769_v59  ;;  %v1885_v19 = vadd.f32 %v15742_v38, %v1884_v42  ;;  %v12795_v31 = vpop.f32.mrb[114].mxu0 }
 0x21e   :  { %v2573_v37 = vmax.f32 %v1893_v60, 0.0  ;;  %v1896_v44 = vadd.f32 %v15742_v38, %v12795_v31  ;;  %v1887_v54 = vpop.f32.mrb[115].mxu0  ;;  %v13393_v31 = vld [vmem:[#allocation9 + $0xd74] ss:$8 sps:$4 sm:$0xff]  }
 0x21f   :  { %10209 = vmatpush1.bf16.msra.mxu1 %v13378_v17  ;;  %v2571_v55 = vmax.f32 %v1885_v19, 0.0  ;;  %v1888_v56 = vadd.f32 %v15742_v38, %v1887_v54  ;;  %v13390_v17 = vld [vmem:[%s16311_s0 + $0x388] sm:$0xff]  }
 0x220   :  { %12901 = vmatmul.mubr.msk.bf16.gmra.mrb[220].mxu0 %vm1013_vm0, %v13382_v0  ;;  %10210 = vmatprep.subr.bf16.mxu1 %v13385_v39  ;;  %v2574_v15 = vmax.f32 %v1896_v44, 0.0 }
 0x221   :  { %12904 = vmatprep.mubr.msk.bf16.mxu0 %vm1013_vm0, %v13389_v52  ;;  %v2572_v59 = vmax.f32 %v1888_v56, 0.0  ;;  %v13400_v52 = vld [vmem:[%s16311_s0 + $0x390] sm:$0xff]  }
 0x222   :  { %v15783_v42 = vpack.c.bf16 %v2574_v15, %v2573_v37 }
 0x223   :  { %10211 = vmatpush1.bf16.msra.mxu1 %v13383_v12  ;;  %v15788_v60 = vpack.c.bf16 %v2572_v59, %v2571_v55  ;;  %v12798_v19 = vpop.f32.mrb[116].mxu0  ;;  %v13391_v55 = vld [vmem:[#allocation9 + $0xd70] ss:$8 sps:$4 sm:$0xff]   ;;  %v13399_v59 = vld [vmem:[#allocation9 + $0xd84] ss:$8 sps:$4 sm:$0xff]  }
 0x224   :  { %10212 = vmatprep.subr.bf16.mxu1 %v13388_v22  ;;  %v1909_v0 = vadd.f32 %v15742_v38, %v12798_v19  ;;  %v1900_v39 = vpop.f32.mrb[117].mxu0 }
 0x225   :  { %v1901_v37 = vadd.f32 %v15742_v38, %v1900_v39  ;;  %v12799_v44 = vpop.f32.mrb[118].mxu0 }
 0x226   :  { %v2577_v54 = vmax.f32 %v1909_v0, 0.0  ;;  %v1912_v12 = vadd.f32 %v15742_v38, %v12799_v44  ;;  %v1903_v56 = vpop.f32.mrb[119].mxu0  ;;  %v13411_v44 = vld [vmem:[#allocation9 + $0xda0] ss:$8 sps:$4 sm:$0xff]  }
 0x227   :  { %10213 = vmatpush1.bf16.msra.mxu1 %v13386_v16  ;;  %v2575_v15 = vmax.f32 %v1901_v37, 0.0  ;;  %v1904_v22 = vadd.f32 %v15742_v38, %v1903_v56  ;;  %v13404_v16 = vld [vmem:[%s16311_s0 + $0x398] sm:$0xff]   ;;  %v13407_v37 = vld [vmem:[#allocation9 + $0xd94] ss:$8 sps:$4 sm:$0xff]  }
 0x228   :  { %12905 = vmatmul.mubr.msk.bf16.gmra.mrb[224].mxu0 %vm1013_vm0, %v13390_v17  ;;  %10214 = vmatprep.subr.bf16.mxu1 %v13393_v31  ;;  %v2578_v19 = vmax.f32 %v1912_v12, 0.0  ;;  %v13414_v17 = vld [vmem:[%s16311_s0 + $0x3a0] sm:$0xff]   ;;  %v13428_v12 = vld [vmem:[%s16311_s0 + $0x3b0] sm:$0xff]  }
 0x229   :  { %12908 = vmatprep.mubr.msk.bf16.mxu0 %vm1013_vm0, %v13400_v52  ;;  %v2576_v40 = vmax.f32 %v1904_v22, 0.0  ;;  %v13405_v31 = vld [vmem:[#allocation9 + $0xd90] ss:$8 sps:$4 sm:$0xff]   ;;  %v13413_v52 = vld [vmem:[#allocation9 + $0xda4] ss:$8 sps:$4 sm:$0xff]  }
 0x22a   :  { %v15799_v39 = vpack.c.bf16 %v2578_v19, %v2577_v54  ;;  %v13421_v54 = vld [vmem:[#allocation9 + $0xdb4] ss:$8 sps:$4 sm:$0xff]  }
 0x22b   :  { %10215 = vmatpush1.bf16.msra.mxu1 %v13391_v55  ;;  %v15804_v0 = vpack.c.bf16 %v2576_v40, %v2575_v15  ;;  %v13418_v40 = vld [vmem:[%s16311_s0 + $0x3a8] sm:$0xff]   ;;  %v12802_v56 = vpop.f32.mrb[120].mxu0  ;;  %v13427_v55 = vld [vmem:[#allocation9 + $0xdc4] ss:$8 sps:$4 sm:$0xff]  }
 0x22c   :  { %10216 = vmatprep.subr.bf16.mxu1 %v13399_v59  ;;  %v1925_v15 = vadd.f32 %v15742_v38, %v12802_v56  ;;  %v1916_v22 = vpop.f32.mrb[121].mxu0  ;;  %v13425_v59 = vld [vmem:[#allocation9 + $0xdc0] ss:$8 sps:$4 sm:$0xff]  }
 0x22d   :  { %v1917_v19 = vadd.f32 %v15742_v38, %v1916_v22 }
 0x22f   :  { %10217 = vmatpush1.bf16.msra.mxu1 %v13397_v24  ;;  %v13419_v24 = vld [vmem:[#allocation9 + $0xdb0] ss:$8 sps:$4 sm:$0xff]  }
 0x230   :  { %12909 = vmatmul.mubr.msk.bf16.gmra.mrb[228].mxu0 %vm1013_vm0, %v13404_v16  ;;  %10218 = vmatprep.subr.bf16.mxu1 %v13407_v37  ;;  %v12803_v16 = vpop.f32.mrb[122].mxu0  ;;  %v13432_v37 = vld [vmem:[%s16311_s0 + $0x3b8] sm:$0xff]  }
 0x231   :  { %12912 = vmatprep.mubr.msk.bf16.mxu0 %vm1013_vm0, %v13414_v17  ;;  %v2581_v17 = vmax.f32 %v1925_v15, 0.0  ;;  %v13441_v15 = vld [vmem:[#allocation9 + $0xde4] ss:$8 sps:$4 sm:$0xff]  }
 0x233   :  { %10219 = vmatpush1.bf16.msra.mxu1 %v13405_v31  ;;  %v1928_v31 = vadd.f32 %v15742_v38, %v12803_v16 }
 0x234   :  { %10220 = vmatprep.subr.bf16.mxu1 %v13413_v52  ;;  %v1919_v52 = vpop.f32.mrb[123].mxu0 }
 0x235   :  { %v2582_v56 = vmax.f32 %v1928_v31, 0.0  ;;  %v12806_v45 = vpop.f32.mrb[124].mxu0 }
 0x236   :  { %v1932_v16 = vpop.f32.mrb[125].mxu0 }
 0x237   :  { %10221 = vmatpush1.bf16.msra.mxu1 %v13411_v44  ;;  %v13435_v44 = vld [vmem:[#allocation9 + $0xdd4] ss:$8 sps:$4 sm:$0xff]   ;;  %v15829_v63 = vpack.c.bf16 %v2582_v56, %v2581_v17  ;;  %v1933_v31 = vadd.f32 %v15742_v38, %v1932_v16 }
 0x238   :  { %12913 = vmatmul.mubr.msk.bf16.gmra.mrb[232].mxu0 %vm1013_vm0, %v13418_v40  ;;  %10222 = vmatprep.subr.bf16.mxu1 %v13421_v54  ;;  %v2579_v40 = vmax.f32 %v1917_v19, 0.0  ;;  %v1920_v54 = vadd.f32 %v15742_v38, %v1919_v52  ;;  %v1941_v19 = vadd.f32 %v15742_v38, %v12806_v45  ;;  %v13439_v52 = vld [vmem:[#allocation9 + $0xde0] ss:$8 sps:$4 sm:$0xff]  }
 0x239   :  { %12916 = vmatprep.mubr.msk.bf16.mxu0 %vm1013_vm0, %v13428_v12  ;;  %v13442_v12 = vld [vmem:[%s16311_s0 + $0x3c0] sm:$0xff]   ;;  %v2583_v56 = vmax.f32 %v1933_v31, 0.0  ;;  %v13460_v31 = vld [vmem:[%s16311_s0 + $0x3d8] sm:$0xff]  }
 0x23a   :  { %v2580_v22 = vmax.f32 %v1920_v54, 0.0  ;;  %v12807_v54 = vpop.f32.mrb[126].mxu0  ;;  %v2585_v17 = vmax.f32 %v1941_v19, 0.0  ;;  %v13455_v19 = vld [vmem:[#allocation9 + $0xe04] ss:$8 sps:$4 sm:$0xff]  }
 0x23b   :  { %10223 = vmatpush1.bf16.msra.mxu1 %v13419_v24  ;;  %v13433_v24 = vld [vmem:[#allocation9 + $0xdd0] ss:$8 sps:$4 sm:$0xff]  }
 0x23c   :  { %10224 = vmatprep.subr.bf16.mxu1 %v13427_v55  ;;  %v15832_v55 = vpack.c.bf16 %v2580_v22, %v2579_v40  ;;  %v13449_v40 = vld [vmem:[#allocation9 + $0xdf4] ss:$8 sps:$4 sm:$0xff]  }
 0x23f   :  { %10225 = vmatpush1.bf16.msra.mxu1 %v13425_v59  ;;  %v13446_v59 = vld [vmem:[%s16311_s0 + $0x3c8] sm:$0xff]  }
 0x240   :  { %12917 = vmatmul.mubr.msk.bf16.gmra.mrb[236].mxu0 %vm1013_vm0, %v13432_v37  ;;  %10226 = vmatprep.subr.bf16.mxu1 %v13435_v44  ;;  %v1944_v37 = vadd.f32 %v15742_v38, %v12807_v54  ;;  %v1935_v44 = vpop.f32.mrb[127].mxu0 }
 0x241   :  { %12920 = vmatprep.mubr.msk.bf16.mxu0 %vm1013_vm0, %v13442_v12  ;;  %v1936_v45 = vadd.f32 %v15742_v38, %v1935_v44  ;;  %v13456_v12 = vld [vmem:[%s16311_s0 + $0x3d0] sm:$0xff]  }
 0x242   :  { %v2586_v22 = vmax.f32 %v1944_v37, 0.0  ;;  %v13463_v37 = vld [vmem:[#allocation9 + $0xe14] ss:$8 sps:$4 sm:$0xff]   ;;  %v13467_v44 = vld [vmem:[#allocation9 + $0xe20] ss:$8 sps:$4 sm:$0xff]  }
 0x243   :  { %10227 = vmatpush1.bf16.msra.mxu1 %v13433_v24  ;;  %v2584_v16 = vmax.f32 %v1936_v45, 0.0  ;;  %v13447_v24 = vld [vmem:[#allocation9 + $0xdf0] ss:$8 sps:$4 sm:$0xff]   ;;  %v13483_v45 = vld [vmem:[#allocation9 + $0xe44] ss:$8 sps:$4 sm:$0xff]  }
 0x244   :  { %10228 = vmatprep.subr.bf16.mxu1 %v13441_v15  ;;  %v15845_v2 = vpack.c.bf16 %v2586_v22, %v2585_v17  ;;  %v13453_v15 = vld [vmem:[#allocation9 + $0xe00] ss:$8 sps:$4 sm:$0xff]   ;;  %v13469_v17 = vld [vmem:[#allocation9 + $0xe24] ss:$8 sps:$4 sm:$0xff]  }
 0x245   :  { %v15848_v54 = vpack.c.bf16 %v2584_v16, %v2583_v56  ;;  %v13477_v56 = vld [vmem:[#allocation9 + $0xe34] ss:$8 sps:$4 sm:$0xff]   ;;  %v13488_v22 = vld [vmem:[%s16311_s0 + $0x3f8] sm:$0xff]  }
 0x246   :  { %v13491_v16 = vld [vmem:[#allocation9 + $0xe54] ss:$8 sps:$4 sm:$0xff]  }
 0x247   :  { %10229 = vmatpush1.bf16.msra.mxu1 %v13439_v52  ;;  %v13470_v52 = vld [vmem:[%s16311_s0 + $0x3e0] sm:$0xff]  }
 0x248   :  { %12921 = vmatmul.mubr.msk.bf16.gmra.mrb[240].mxu0 %vm1013_vm0, %v13446_v59  ;;  %10230 = vmatprep.subr.bf16.mxu1 %v13449_v40  ;;  %v13461_v59 = vld [vmem:[#allocation9 + $0xe10] ss:$8 sps:$4 sm:$0xff]  }
 0x249   :  { %12924 = vmatprep.mubr.msk.bf16.mxu0 %vm1013_vm0, %v13456_v12  ;;  %v13474_v40 = vld [vmem:[%s16311_s0 + $0x3e8] sm:$0xff]   ;;  %v13481_v12 = vld [vmem:[#allocation9 + $0xe40] ss:$8 sps:$4 sm:$0xff]  }
 0x24b   :  { %10231 = vmatpush1.bf16.msra.mxu1 %v13447_v24  ;;  %v13495_v24 = vld [vmem:[#allocation9 + $0xe60] ss:$8 sps:$4 sm:$0xff]  }
 0x24c   :  { %10253 = vmatprep.subr.bf16.mxu1 %v13455_v19  ;;  %v13503_v19 = vld [vmem:[#allocation9 + $0xe74] ss:$8 sps:$4 sm:$0xff]  }
 0x24e   :  { %10233 = vmatmul.mubr.bf16.vlgmr.msra.gmra.mrb[0].mxu1 %v15758_v6  ;;  %v13475_v6 = vld [vmem:[#allocation9 + $0xe30] ss:$8 sps:$4 sm:$0xff]  }
 0x24f   :  { %10242 = vmatprep.mubr.bf16.mxu1 %v15769_v23  ;;  %10254 = vmatpush1.bf16.msra.mxu1 %v13453_v15  ;;  %v13484_v23 = vld [vmem:[%s16311_s0 + $0x3f0] sm:$0xff]  }
 0x250   :  { %12925 = vmatmul.mubr.msk.bf16.gmra.mrb[244].mxu0 %vm1013_vm0, %v13460_v31  ;;  %10255 = vmatprep.subr.bf16.mxu1 %v13463_v37  ;;  %v13498_v15 = vld [vmem:[#allocation9 + $0x100] ss:$8 sps:$4 sm:$0xff]   ;;  %v13506_v31 = vld [vmem:[#allocation9 + $0x114] ss:$8 sps:$4 sm:$0xff]   ;;  %v13501_v37 = vld [vmem:[#allocation9 + $0xe70] ss:$8 sps:$4 sm:$0xff]  }
 0x251   :  { %12928 = vmatprep.mubr.msk.bf16.mxu0 %vm1013_vm0, %v13470_v52  ;;  %v13509_v52 = vld [vmem:[#allocation9 + $0xe84] ss:$8 sps:$4 sm:$0xff]  }
 0x253   :  { %10256 = vmatpush1.bf16.msra.mxu1 %v13461_v59  ;;  %v13504_v59 = vld [vmem:[#allocation9 + $0x110] ss:$8 sps:$4 sm:$0xff]  }
 0x254   :  { %10257 = vmatprep.subr.bf16.mxu1 %v13469_v17  ;;  %v13512_v17 = vld [vmem:[#allocation9 + $0x124] ss:$8 sps:$4 sm:$0xff]  }
 0x256   :  { %10243 = vmatmul.mubr.bf16.gmra.mrb[4].mxu1 %v15753_v14  ;;  %v13489_v14 = vld [vmem:[#allocation9 + $0xe50] ss:$8 sps:$4 sm:$0xff]  }
 0x257   :  { %10258 = vmatpush1.bf16.msra.mxu1 %v13467_v44  ;;  %10285 = vmatprep.mubr.bf16.mxu1 %v15804_v0  ;;  %v13497_v0 = vld [vmem:[#allocation9 + $0xe64] ss:$8 sps:$4 sm:$0xff]   ;;  %v13515_v44 = vld [vmem:[#allocation9 + $0xe94] ss:$8 sps:$4 sm:$0xff]  }
 0x258   :  { %12929 = vmatmul.mubr.msk.bf16.gmra.mrb[248].mxu0 %vm1013_vm0, %v13474_v40  ;;  %10259 = vmatprep.subr.bf16.mxu1 %v13477_v56  ;;  %v13510_v40 = vld [vmem:[#allocation9 + $0x120] ss:$8 sps:$4 sm:$0xff]   ;;  %v13518_v56 = vld [vmem:[#allocation9 + $0x134] ss:$8 sps:$4 sm:$0xff]  }
 0x259   :  { %12932 = vmatprep.mubr.msk.bf16.mxu0 %vm1013_vm0, %v13484_v23  ;;  %v13513_v23 = vld [vmem:[#allocation9 + $0xe90] ss:$8 sps:$4 sm:$0xff]  }
 0x25b   :  { %10260 = vmatpush1.bf16.msra.mxu1 %v13475_v6  ;;  %v13524_v6 = vld [vmem:[#allocation9 + $0x144] ss:$8 sps:$4 sm:$0xff]  }
 0x25c   :  { %10261 = vmatprep.subr.bf16.mxu1 %v13483_v45  ;;  %v13519_v45 = vld [vmem:[#allocation9 + $0xea0] ss:$8 sps:$4 sm:$0xff]  }
 0x25f   :  { %10262 = vmatpush1.bf16.msra.mxu1 %v13481_v12  ;;  %v13527_v12 = vld [vmem:[#allocation9 + $0xeb4] ss:$8 sps:$4 sm:$0xff]  }
 0x260   :  { %12933 = vmatmul.mubr.msk.bf16.gmra.mrb[252].mxu0 %vm1013_vm0, %v13488_v22  ;;  %10263 = vmatprep.subr.bf16.mxu1 %v13491_v16  ;;  %v13522_v22 = vld [vmem:[#allocation9 + $0x140] ss:$8 sps:$4 sm:$0xff]   ;;  %v13530_v16 = vld [vmem:[#allocation9 + $0x154] ss:$8 sps:$4 sm:$0xff]  }
 0x261   :  { %9543 = vmatprep.mubr.bf16.mxu0 %v15362_v30  ;;  %v13507_v30 = vld [vmem:[#allocation9 + $0xe80] ss:$8 sps:$4 sm:$0xff]  }
 0x263   :  { %10264 = vmatpush1.bf16.msra.mxu1 %v13489_v14  ;;  %v13525_v14 = vld [vmem:[#allocation9 + $0xeb0] ss:$8 sps:$4 sm:$0xff]  }
 0x264   :  { %10265 = vmatprep.subr.bf16.mxu1 %v13497_v0  ;;  %v12810_v0 = vpop.f32.mrb[128].mxu0 }
 0x267   :  { %10266 = vmatpush1.bf16.msra.mxu1 %v13495_v24  ;;  %v1957_v24 = vadd.f32 %v15742_v38, %v12810_v0  ;;  %v15888_v0 = vld [vmem:[#allocation7] ss:$0 sm:$0xff] }
 0x268   :  { %9544 = vmatmul.mubr.bf16.vlgmr.msra.gmra.mrb[0].mxu0 %v15346_v13  ;;  %10267 = vmatprep.subr.bf16.mxu1 %v13503_v19  ;;  %v13521_v13 = vld [vmem:[#allocation9 + $0xea4] ss:$8 sps:$4 sm:$0xff]   ;;  %v1948_v19 = vpop.f32.mrb[129].mxu0 }
 0x269   :  { %9565 = vmatpush1.bf16.msra.mxu0 %v13498_v15  ;;  %9553 = vmatprep.mubr.bf16.mxu0 %v15360_v27  ;;  %v13516_v27 = vld [vmem:[#allocation9 + $0x130] ss:$8 sps:$4 sm:$0xff]   ;;  %v13536_v15 = vld [vmem:[#allocation9 + $0x164] ss:$8 sps:$4 sm:$0xff]  }
 0x26a   :  { %9566 = vmatprep.subr.bf16.mxu0 %v13506_v31  ;;  %v1949_v31 = vadd.f32 %v15742_v38, %v1948_v19 }
 0x26b   :  { %10268 = vmatpush1.bf16.msra.mxu1 %v13501_v37  ;;  %v12811_v37 = vpop.f32.mrb[130].mxu0 }
 0x26c   :  { %10269 = vmatprep.subr.bf16.mxu1 %v13509_v52  ;;  %v13531_v52 = vld [vmem:[#allocation9 + $0xec0] ss:$8 sps:$4 sm:$0xff]  }
 0x26d   :  { %9567 = vmatpush1.bf16.msra.mxu0 %v13504_v59  ;;  %v2589_v59 = vmax.f32 %v1957_v24, 0.0 }
 0x26e   :  { %9568 = vmatprep.subr.bf16.mxu0 %v13512_v17  ;;  %v1960_v17 = vadd.f32 %v15742_v38, %v12811_v37 }
 0x26f   :  { %10270 = vmatpush1.bf16.msra.mxu1 %v13507_v30  ;;  %v1951_v30 = vpop.f32.mrb[131].mxu0 }
 0x270   :  { %9554 = vmatmul.mubr.bf16.gmra.mrb[4].mxu0 %v15344_v11  ;;  %10271 = vmatprep.subr.bf16.mxu1 %v13515_v44  ;;  %v13533_v11 = vld [vmem:[#allocation9 + $0xec4] ss:$8 sps:$4 sm:$0xff]   ;;  %v13539_v44 = vld [vmem:[#allocation9 + $0xed4] ss:$8 sps:$4 sm:$0xff]  }
 0x271   :  { %9569 = vmatpush1.bf16.msra.mxu0 %v13510_v40  ;;  %9596 = vmatprep.mubr.bf16.mxu0 %v15394_v5  ;;  %v13528_v5 = vld [vmem:[#allocation9 + $0x150] ss:$8 sps:$4 sm:$0xff]   ;;  %v2587_v40 = vmax.f32 %v1949_v31, 0.0  ;;  %v13543_v31 = vld [vmem:[#allocation9 + $0xee0] ss:$8 sps:$4 sm:$0xff]  }
 0x272   :  { %9570 = vmatprep.subr.bf16.mxu0 %v13518_v56  ;;  %v1952_v56 = vadd.f32 %v15742_v38, %v1951_v30  ;;  %v13540_v38 = vld [vmem:[#allocation9 + $0x170] ss:$8 sps:$4 sm:$0xff]  }
 0x273   :  { %10272 = vmatpush1.bf16.msra.mxu1 %v13513_v23  ;;  %v13534_v23 = vld [vmem:[#allocation9 + $0x160] ss:$8 sps:$4 sm:$0xff]  }
 0x274   :  { %10273 = vmatprep.subr.bf16.mxu1 %v13521_v13  ;;  %v2590_v13 = vmax.f32 %v1960_v17, 0.0  ;;  %v13551_v17 = vld [vmem:[#allocation9 + $0xef4] ss:$8 sps:$4 sm:$0xff]  }
 0x275   :  { %9571 = vmatpush1.bf16.msra.mxu0 %v13516_v27  ;;  %v13542_v27 = vld [vmem:[#allocation9 + $0x174] ss:$8 sps:$4 sm:$0xff]  }
 0x276   :  { %9572 = vmatprep.subr.bf16.mxu0 %v13524_v6  ;;  %v2588_v6 = vmax.f32 %v1952_v56, 0.0 }
 0x277   :  { %10274 = vmatpush1.bf16.msra.mxu1 %v13519_v45  ;;  %v13537_v45 = vld [vmem:[#allocation9 + $0xed0] ss:$8 sps:$4 sm:$0xff]  }
 0x278   :  { %10275 = vmatprep.subr.bf16.mxu1 %v13527_v12  ;;  %v15884_v12 = vpack.c.bf16 %v2590_v13, %v2589_v59 }
 0x279   :  { %9573 = vmatpush1.bf16.msra.mxu0 %v13522_v22  ;;  %v12814_v22 = vpop.f32.mrb[132].mxu0 }
 0x27a   :  { %9574 = vmatprep.subr.bf16.mxu0 %v13530_v16  ;;  %v13545_v16 = vld [vmem:[#allocation9 + $0xee4] ss:$8 sps:$4 sm:$0xff]   ;;  %v1964_v24 = vpop.f32.mrb[133].mxu0 }
 0x27b   :  { %10276 = vmatpush1.bf16.msra.mxu1 %v13525_v14  ;;  %v15886_v14 = vpack.c.bf16 %v2588_v6, %v2587_v40  ;;  %v1965_v19 = vadd.f32 %v15888_v0, %v1964_v24  ;;  %v13546_v40 = vld [vmem:[#allocation9 + $0x180] ss:$8 sps:$4 sm:$0xff]  }
 0x27c   :  { %10277 = vmatprep.subr.bf16.mxu1 %v13533_v11  ;;  %v1973_v11 = vadd.f32 %v15888_v0, %v12814_v22  ;;  %v13555_v24 = vld [vmem:[#allocation9 + $0xf00] ss:$8 sps:$4 sm:$0xff]  }
 0x27d   :  { %9575 = vmatpush1.bf16.msra.mxu0 %v13528_v5  ;;  %v13548_v5 = vld [vmem:[#allocation9 + $0x184] ss:$8 sps:$4 sm:$0xff]   ;;  %v2591_v30 = vmax.f32 %v1965_v19, 0.0  ;;  %v13566_v19 = vld [vmem:[#allocation9 + $0x1b4] ss:$8 sps:$4 sm:$0xff]  }
 0x27e   :  { %9576 = vmatprep.subr.bf16.mxu0 %v13536_v15  ;;  %v12815_v15 = vpop.f32.mrb[134].mxu0  ;;  %v2593_v37 = vmax.f32 %v1973_v11, 0.0  ;;  %v13560_v11 = vld [vmem:[#allocation9 + $0x1a4] ss:$8 sps:$4 sm:$0xff]  }
 0x27f   :  { %10278 = vmatpush1.bf16.msra.mxu1 %v13531_v52  ;;  %v1976_v52 = vadd.f32 %v15888_v0, %v12815_v15  ;;  %v1967_v59 = vpop.f32.mrb[135].mxu0  ;;  %v13561_v15 = vld [vmem:[#allocation9 + $0xf10] ss:$8 sps:$4 sm:$0xff]  }
 0x280   :  { %10279 = vmatprep.subr.bf16.mxu1 %v13539_v44  ;;  %v1968_v44 = vadd.f32 %v15888_v0, %v1967_v59  ;;  %v13567_v59 = vld [vmem:[#allocation9 + $0xf20] ss:$8 sps:$4 sm:$0xff]  }
 0x281   :  { %9577 = vmatpush1.bf16.msra.mxu0 %v13534_v23  ;;  %v2594_v56 = vmax.f32 %v1976_v52, 0.0  ;;  %v13554_v23 = vld [vmem:[#allocation9 + $0x194] ss:$8 sps:$4 sm:$0xff]   ;;  %v13572_v52 = vld [vmem:[#allocation9 + $0x1c4] ss:$8 sps:$4 sm:$0xff]  }
 0x282   :  { %9578 = vmatprep.subr.bf16.mxu0 %v13542_v27  ;;  %v2592_v13 = vmax.f32 %v1968_v44, 0.0  ;;  %v13549_v27 = vld [vmem:[#allocation9 + $0xef0] ss:$8 sps:$4 sm:$0xff]   ;;  %v13581_v44 = vld [vmem:[#allocation9 + $0xf44] ss:$8 sps:$4 sm:$0xff]  }
 0x283   :  { %10280 = vmatpush1.bf16.msra.mxu1 %v13537_v45  ;;  %v15894_v6 = vpack.c.bf16 %v2594_v56, %v2593_v37  ;;  %v13557_v45 = vld [vmem:[#allocation9 + $0xf04] ss:$8 sps:$4 sm:$0xff]   ;;  %v13564_v37 = vld [vmem:[#allocation9 + $0x1b0] ss:$8 sps:$4 sm:$0xff]  }
 0x284   :  { %10281 = vmatprep.subr.bf16.mxu1 %v13545_v16  ;;  %v15896_v22 = vpack.c.bf16 %v2592_v13, %v2591_v30  ;;  %v13552_v16 = vld [vmem:[#allocation9 + $0x190] ss:$8 sps:$4 sm:$0xff]   ;;  %v13570_v30 = vld [vmem:[#allocation9 + $0x1c0] ss:$8 sps:$4 sm:$0xff]   ;;  %v13584_v56 = vld [vmem:[#allocation9 + $0x1e4] ss:$8 sps:$4 sm:$0xff]  }
 0x285   :  { %9579 = vmatpush1.bf16.msra.mxu0 %v13540_v38  ;;  %v13563_v38 = vld [vmem:[#allocation9 + $0xf14] ss:$8 sps:$4 sm:$0xff]  }
 0x286   :  { %9580 = vmatprep.subr.bf16.mxu0 %v13548_v5  ;;  %v13558_v5 = vld [vmem:[#allocation9 + $0x1a0] ss:$8 sps:$4 sm:$0xff]   ;;  %v13587_v13 = vld [vmem:[#allocation9 + $0xf54] ss:$8 sps:$4 sm:$0xff]  }
 0x287   :  { %10282 = vmatpush1.bf16.msra.mxu1 %v13543_v31  ;;  %v13569_v31 = vld [vmem:[#allocation9 + $0xf24] ss:$8 sps:$4 sm:$0xff]  }
 0x288   :  { %10283 = vmatprep.subr.bf16.mxu1 %v13551_v17  ;;  %v13575_v17 = vld [vmem:[#allocation9 + $0xf34] ss:$8 sps:$4 sm:$0xff]  }
 0x289   :  { %9581 = vmatpush1.bf16.msra.mxu0 %v13546_v40  ;;  %v13576_v40 = vld [vmem:[#allocation9 + $0x1d0] ss:$8 sps:$4 sm:$0xff]  }
 0x28a   :  { %9582 = vmatprep.subr.bf16.mxu0 %v13554_v23  ;;  %v13579_v23 = vld [vmem:[#allocation9 + $0xf40] ss:$8 sps:$4 sm:$0xff]  }
 0x28b   :  { %10284 = vmatpush1.bf16.msra.mxu1 %v13549_v27  ;;  %v13582_v27 = vld [vmem:[#allocation9 + $0x1e0] ss:$8 sps:$4 sm:$0xff]  }
 0x28c   :  { %10306 = vmatprep.subr.bf16.mxu1 %v13557_v45  ;;  %v13585_v45 = vld [vmem:[#allocation9 + $0xf50] ss:$8 sps:$4 sm:$0xff]  }
 0x28d   :  { %9583 = vmatpush1.bf16.msra.mxu0 %v13552_v16  ;;  %v13593_v16 = vld [vmem:[#allocation9 + $0xf64] ss:$8 sps:$4 sm:$0xff]  }
 0x28e   :  { %10286 = vmatmul.mubr.bf16.vlgmr.msra.gmra.mrb[0].mxu1 %v15788_v60  ;;  %9584 = vmatprep.subr.bf16.mxu0 %v13560_v11  ;;  %v13578_v60 = vld [vmem:[#allocation9 + $0x1d4] ss:$8 sps:$4 sm:$0xff]   ;;  %v13596_v11 = vld [vmem:[#allocation9 + $0x204] ss:$8 sps:$4 sm:$0xff]  }
 0x28f   :  { %10295 = vmatprep.mubr.bf16.mxu1 %v15799_v39  ;;  %10307 = vmatpush1.bf16.msra.mxu1 %v13555_v24  ;;  %v13573_v39 = vld [vmem:[#allocation9 + $0xf30] ss:$8 sps:$4 sm:$0xff]   ;;  %v13591_v24 = vld [vmem:[#allocation9 + $0xf60] ss:$8 sps:$4 sm:$0xff]  }
 0x290   :  { %10308 = vmatprep.subr.bf16.mxu1 %v13563_v38  ;;  %v13599_v38 = vld [vmem:[#allocation9 + $0xf74] ss:$8 sps:$4 sm:$0xff]  }
 0x291   :  { %9585 = vmatpush1.bf16.msra.mxu0 %v13558_v5  ;;  %v13594_v5 = vld [vmem:[#allocation9 + $0x200] ss:$8 sps:$4 sm:$0xff]  }
 0x292   :  { %9586 = vmatprep.subr.bf16.mxu0 %v13566_v19  ;;  %v13602_v19 = vld [vmem:[#allocation9 + $0x214] ss:$8 sps:$4 sm:$0xff]  }
 0x293   :  { %10309 = vmatpush1.bf16.msra.mxu1 %v13561_v15  ;;  %v13597_v15 = vld [vmem:[#allocation9 + $0xf70] ss:$8 sps:$4 sm:$0xff]  }
 0x294   :  { %10310 = vmatprep.subr.bf16.mxu1 %v13569_v31  ;;  %v13605_v31 = vld [vmem:[#allocation9 + $0xf84] ss:$8 sps:$4 sm:$0xff]  }
 0x295   :  { %9587 = vmatpush1.bf16.msra.mxu0 %v13564_v37  ;;  %v13600_v37 = vld [vmem:[#allocation9 + $0x210] ss:$8 sps:$4 sm:$0xff]  }
 0x296   :  { %10296 = vmatmul.mubr.bf16.gmra.mrb[4].mxu1 %v15783_v42  ;;  %9588 = vmatprep.subr.bf16.mxu0 %v13572_v52  ;;  %v13590_v42 = vld [vmem:[#allocation9 + $0x1f4] ss:$8 sps:$4 sm:$0xff]   ;;  %v13608_v52 = vld [vmem:[#allocation9 + $0x224] ss:$8 sps:$4 sm:$0xff]  }
 0x297   :  { %10311 = vmatpush1.bf16.msra.mxu1 %v13567_v59  ;;  %10338 = vmatprep.mubr.bf16.mxu1 %v15848_v54  ;;  %v13588_v54 = vld [vmem:[#allocation9 + $0x1f0] ss:$8 sps:$4 sm:$0xff]   ;;  %v13603_v59 = vld [vmem:[#allocation9 + $0xf80] ss:$8 sps:$4 sm:$0xff]  }
 0x298   :  { %10312 = vmatprep.subr.bf16.mxu1 %v13575_v17  ;;  %v13611_v17 = vld [vmem:[#allocation9 + $0xf94] ss:$8 sps:$4 sm:$0xff]  }
 0x299   :  { %9589 = vmatpush1.bf16.msra.mxu0 %v13570_v30  ;;  %v13606_v30 = vld [vmem:[#allocation9 + $0x220] ss:$8 sps:$4 sm:$0xff]  }
 0x29a   :  { %9590 = vmatprep.subr.bf16.mxu0 %v13578_v60  ;;  %v13614_v60 = vld [vmem:[#allocation9 + $0x234] ss:$8 sps:$4 sm:$0xff]  }
 0x29b   :  { %10313 = vmatpush1.bf16.msra.mxu1 %v13573_v39  ;;  %v13609_v39 = vld [vmem:[#allocation9 + $0xf90] ss:$8 sps:$4 sm:$0xff]  }
 0x29c   :  { %10314 = vmatprep.subr.bf16.mxu1 %v13581_v44  ;;  %v13620_v44 = vld [vmem:[#allocation9 + $0x244] ss:$8 sps:$4 sm:$0xff]  }
 0x29d   :  { %9591 = vmatpush1.bf16.msra.mxu0 %v13576_v40  ;;  %v13615_v40 = vld [vmem:[#allocation9 + $0xfa0] ss:$8 sps:$4 sm:$0xff]  }
 0x29e   :  { %9592 = vmatprep.subr.bf16.mxu0 %v13584_v56  ;;  %v13623_v56 = vld [vmem:[#allocation9 + $0xfb4] ss:$8 sps:$4 sm:$0xff]  }
 0x29f   :  { %10315 = vmatpush1.bf16.msra.mxu1 %v13579_v23  ;;  %v13618_v23 = vld [vmem:[#allocation9 + $0x240] ss:$8 sps:$4 sm:$0xff]  }
 0x2a0   :  { %10316 = vmatprep.subr.bf16.mxu1 %v13587_v13  ;;  %v13626_v13 = vld [vmem:[#allocation9 + $0x254] ss:$8 sps:$4 sm:$0xff]  }
 0x2a1   :  { %9593 = vmatpush1.bf16.msra.mxu0 %v13582_v27  ;;  %v13621_v27 = vld [vmem:[#allocation9 + $0xfb0] ss:$8 sps:$4 sm:$0xff]  }
 0x2a2   :  { %9594 = vmatprep.subr.bf16.mxu0 %v13590_v42  ;;  %v12818_v42 = vpop.f32.mrb[136].mxu0 }
 0x2a3   :  { %10317 = vmatpush1.bf16.msra.mxu1 %v13585_v45  ;;  %v1989_v45 = vadd.f32 %v15888_v0, %v12818_v42 }
 0x2a4   :  { %10318 = vmatprep.subr.bf16.mxu1 %v13593_v16  ;;  %v1980_v16 = vpop.f32.mrb[137].mxu0 }
 0x2a5   :  { %9595 = vmatpush1.bf16.msra.mxu0 %v13588_v54  ;;  %v13632_v54 = vld [vmem:[#allocation9 + $0x264] ss:$8 sps:$4 sm:$0xff]  }
 0x2a6   :  { %9617 = vmatprep.subr.bf16.mxu0 %v13596_v11  ;;  %v1981_v11 = vadd.f32 %v15888_v0, %v1980_v16 }
 0x2a7   :  { %10319 = vmatpush1.bf16.msra.mxu1 %v13591_v24  ;;  %v12819_v24 = vpop.f32.mrb[138].mxu0 }
 0x2a8   :  { %9597 = vmatmul.mubr.bf16.vlgmr.msra.gmra.mrb[0].mxu0 %v15378_v48  ;;  %10320 = vmatprep.subr.bf16.mxu1 %v13599_v38  ;;  %v13617_v48 = vld [vmem:[#allocation9 + $0xfa4] ss:$8 sps:$4 sm:$0xff]   ;;  %v13627_v38 = vld [vmem:[#allocation9 + $0xfc0] ss:$8 sps:$4 sm:$0xff]  }
 0x2a9   :  { %9606 = vmatprep.mubr.bf16.mxu0 %v15389_v3  ;;  %9618 = vmatpush1.bf16.msra.mxu0 %v13594_v5  ;;  %v13612_v3 = vld [vmem:[#allocation9 + $0x230] ss:$8 sps:$4 sm:$0xff]   ;;  %v2597_v5 = vmax.f32 %v1989_v45, 0.0  ;;  %v13639_v45 = vld [vmem:[#allocation9 + $0xfe0] ss:$8 sps:$4 sm:$0xff]  }
 0x2aa   :  { %9619 = vmatprep.subr.bf16.mxu0 %v13602_v19  ;;  %v1992_v19 = vadd.f32 %v15888_v0, %v12819_v24 }
 0x2ab   :  { %10321 = vmatpush1.bf16.msra.mxu1 %v13597_v15  ;;  %v1983_v15 = vpop.f32.mrb[139].mxu0 }
 0x2ac   :  { %10322 = vmatprep.subr.bf16.mxu1 %v13605_v31  ;;  %v13635_v31 = vld [vmem:[#allocation9 + $0xfd4] ss:$8 sps:$4 sm:$0xff]  }
 0x2ad   :  { %9620 = vmatpush1.bf16.msra.mxu0 %v13600_v37  ;;  %v2595_v37 = vmax.f32 %v1981_v11, 0.0  ;;  %v13647_v11 = vld [vmem:[#allocation9 + $0xff4] ss:$8 sps:$4 sm:$0xff]  }
 0x2ae   :  { %9621 = vmatprep.subr.bf16.mxu0 %v13608_v52  ;;  %v1984_v52 = vadd.f32 %v15888_v0, %v1983_v15  ;;  %v13650_v15 = vld [vmem:[#allocation9 + $0x294] ss:$8 sps:$4 sm:$0xff]  }
 0x2af   :  { %10323 = vmatpush1.bf16.msra.mxu1 %v13603_v59  ;;  %v13630_v59 = vld [vmem:[#allocation9 + $0x260] ss:$8 sps:$4 sm:$0xff]  }
 0x2b0   :  { %9607 = vmatmul.mubr.bf16.gmra.mrb[4].mxu0 %v15373_v46  ;;  %10324 = vmatprep.subr.bf16.mxu1 %v13611_v17  ;;  %v13629_v46 = vld [vmem:[#allocation9 + $0xfc4] ss:$8 sps:$4 sm:$0xff]   ;;  %v2598_v17 = vmax.f32 %v1992_v19, 0.0 }
 0x2b1   :  { %9622 = vmatpush1.bf16.msra.mxu0 %v13606_v30  ;;  %9649 = vmatprep.mubr.bf16.mxu0 %v15426_v51  ;;  %v13624_v51 = vld [vmem:[#allocation9 + $0x250] ss:$8 sps:$4 sm:$0xff]   ;;  %v13638_v30 = vld [vmem:[#allocation9 + $0x274] ss:$8 sps:$4 sm:$0xff]  }
 0x2b2   :  { %9623 = vmatprep.subr.bf16.mxu0 %v13614_v60  ;;  %v2596_v60 = vmax.f32 %v1984_v52, 0.0 }
 0x2b3   :  { %10325 = vmatpush1.bf16.msra.mxu1 %v13609_v39  ;;  %v13633_v39 = vld [vmem:[#allocation9 + $0xfd0] ss:$8 sps:$4 sm:$0xff]  }
 0x2b4   :  { %10326 = vmatprep.subr.bf16.mxu1 %v13617_v48  ;;  %v15910_v48 = vpack.c.bf16 %v2598_v17, %v2597_v5  ;;  %v13642_v5 = vld [vmem:[#allocation9 + $0x280] ss:$8 sps:$4 sm:$0xff]  }
 0x2b5   :  { %9624 = vmatpush1.bf16.msra.mxu0 %v13612_v3  ;;  %v12822_v3 = vpop.f32.mrb[140].mxu0 }
 0x2b6   :  { %9625 = vmatprep.subr.bf16.mxu0 %v13620_v44  ;;  %v13641_v44 = vld [vmem:[#allocation9 + $0xfe4] ss:$8 sps:$4 sm:$0xff]  }
 0x2b7   :  { %10327 = vmatpush1.bf16.msra.mxu1 %v13615_v40  ;;  %v15912_v40 = vpack.c.bf16 %v2596_v60, %v2595_v37  ;;  %v13645_v37 = vld [vmem:[#allocation9 + $0xff0] ss:$8 sps:$4 sm:$0xff]   ;;  %v13656_v60 = vld [vmem:[#allocation9 + $0x2a4] ss:$8 sps:$4 sm:$0xff]  }
 0x2b8   :  { %10328 = vmatprep.subr.bf16.mxu1 %v13623_v56  ;;  %v2005_v56 = vadd.f32 %v15888_v0, %v12822_v3  ;;  %v13659_v3 = vld [vmem:[#allocation9 + $0x1014] ss:$8 sps:$4 sm:$0xff]  }
 0x2b9   :  { %9626 = vmatpush1.bf16.msra.mxu0 %v13618_v23  ;;  %v13636_v23 = vld [vmem:[#allocation9 + $0x270] ss:$8 sps:$4 sm:$0xff]  }
 0x2ba   :  { %9627 = vmatprep.subr.bf16.mxu0 %v13626_v13  ;;  %v1996_v13 = vpop.f32.mrb[141].mxu0 }
 0x2bb   :  { %10329 = vmatpush1.bf16.msra.mxu1 %v13621_v27  ;;  %v13644_v27 = vld [vmem:[#allocation9 + $0x284] ss:$8 sps:$4 sm:$0xff]   ;;  %v1997_v42 = vadd.f32 %v15888_v0, %v1996_v13 }
 0x2bc   :  { %10330 = vmatprep.subr.bf16.mxu1 %v13629_v46  ;;  %v12823_v46 = vpop.f32.mrb[142].mxu0  ;;  %v13665_v13 = vld [vmem:[#allocation9 + $0x1024] ss:$8 sps:$4 sm:$0xff]  }
 0x2bd   :  { %9628 = vmatpush1.bf16.msra.mxu0 %v13624_v51  ;;  %v2601_v51 = vmax.f32 %v2005_v56, 0.0  ;;  %v2008_v16 = vadd.f32 %v15888_v0, %v12823_v46  ;;  %v2599_v24 = vmax.f32 %v1997_v42, 0.0  ;;  %v13662_v56 = vld [vmem:[#allocation9 + $0x2b4] ss:$8 sps:$4 sm:$0xff]   ;;  %v13668_v42 = vld [vmem:[#allocation9 + $0x2c4] ss:$8 sps:$4 sm:$0xff]  }
 0x2be   :  { %9629 = vmatprep.subr.bf16.mxu0 %v13632_v54  ;;  %v1999_v54 = vpop.f32.mrb[143].mxu0  ;;  %v13663_v46 = vld [vmem:[#allocation9 + $0x1020] ss:$8 sps:$4 sm:$0xff]  }
 0x2bf   :  { %10331 = vmatpush1.bf16.msra.mxu1 %v13627_v38  ;;  %v2000_v38 = vadd.f32 %v15888_v0, %v1999_v54  ;;  %v2602_v19 = vmax.f32 %v2008_v16, 0.0  ;;  %v13677_v16 = vld [vmem:[#allocation9 + $0x1044] ss:$8 sps:$4 sm:$0xff]   ;;  %v13672_v54 = vld [vmem:[#allocation9 + $0x2d0] ss:$8 sps:$4 sm:$0xff]  }
 0x2c0   :  { %10332 = vmatprep.subr.bf16.mxu1 %v13635_v31 }
 0x2c1   :  { %9630 = vmatpush1.bf16.msra.mxu0 %v13630_v59  ;;  %v2600_v31 = vmax.f32 %v2000_v38, 0.0  ;;  %v15918_v52 = vpack.c.bf16 %v2602_v19, %v2601_v51  ;;  %v13653_v59 = vld [vmem:[#allocation9 + $0x1004] ss:$8 sps:$4 sm:$0xff]   ;;  %v13666_v51 = vld [vmem:[#allocation9 + $0x2c0] ss:$8 sps:$4 sm:$0xff]  }
 0x2c2   :  { %9631 = vmatprep.subr.bf16.mxu0 %v13638_v30  ;;  %v13648_v30 = vld [vmem:[#allocation9 + $0x290] ss:$8 sps:$4 sm:$0xff]   ;;  %v13683_v38 = vld [vmem:[#allocation9 + $0x1054] ss:$8 sps:$4 sm:$0xff]  }
 0x2c3   :  { %10333 = vmatpush1.bf16.msra.mxu1 %v13633_v39  ;;  %v15920_v17 = vpack.c.bf16 %v2600_v31, %v2599_v24  ;;  %v13651_v39 = vld [vmem:[#allocation9 + $0x1000] ss:$8 sps:$4 sm:$0xff]   ;;  %v13681_v19 = vld [vmem:[#allocation9 + $0x1050] ss:$8 sps:$4 sm:$0xff]   ;;  %v13692_v31 = vld [vmem:[#allocation9 + $0x304] ss:$8 sps:$4 sm:$0xff]  }
 0x2c4   :  { %10334 = vmatprep.subr.bf16.mxu1 %v13641_v44  ;;  %v13654_v44 = vld [vmem:[#allocation9 + $0x2a0] ss:$8 sps:$4 sm:$0xff]  }
 0x2c5   :  { %9632 = vmatpush1.bf16.msra.mxu0 %v13636_v23  ;;  %v13657_v23 = vld [vmem:[#allocation9 + $0x1010] ss:$8 sps:$4 sm:$0xff]   ;;  %v13675_v24 = vld [vmem:[#allocation9 + $0x1040] ss:$8 sps:$4 sm:$0xff]  }
 0x2c6   :  { %9633 = vmatprep.subr.bf16.mxu0 %v13644_v27  ;;  %v13660_v27 = vld [vmem:[#allocation9 + $0x2b0] ss:$8 sps:$4 sm:$0xff]  }
 0x2c7   :  { %10335 = vmatpush1.bf16.msra.mxu1 %v13639_v45  ;;  %v13671_v45 = vld [vmem:[#allocation9 + $0x1034] ss:$8 sps:$4 sm:$0xff]  }
 0x2c8   :  { %10336 = vmatprep.subr.bf16.mxu1 %v13647_v11  ;;  %v13680_v11 = vld [vmem:[#allocation9 + $0x2e4] ss:$8 sps:$4 sm:$0xff]  }
 0x2c9   :  { %9634 = vmatpush1.bf16.msra.mxu0 %v13642_v5  ;;  %v13678_v5 = vld [vmem:[#allocation9 + $0x2e0] ss:$8 sps:$4 sm:$0xff]  }
 0x2ca   :  { %9635 = vmatprep.subr.bf16.mxu0 %v13650_v15  ;;  %v13689_v15 = vld [vmem:[#allocation9 + $0x1064] ss:$8 sps:$4 sm:$0xff]  }
 0x2cb   :  { %10337 = vmatpush1.bf16.msra.mxu1 %v13645_v37  ;;  %v13687_v37 = vld [vmem:[#allocation9 + $0x1060] ss:$8 sps:$4 sm:$0xff]  }
 0x2cc   :  { %10359 = vmatprep.subr.bf16.mxu1 %v13653_v59  ;;  %v13695_v59 = vld [vmem:[#allocation9 + $0x1074] ss:$8 sps:$4 sm:$0xff]  }
 0x2cd   :  { %9636 = vmatpush1.bf16.msra.mxu0 %v13648_v30  ;;  %v13690_v30 = vld [vmem:[#allocation9 + $0x300] ss:$8 sps:$4 sm:$0xff]  }
 0x2ce   :  { %10339 = vmatmul.mubr.bf16.vlgmr.msra.gmra.mrb[0].mxu1 %v15832_v55  ;;  %9637 = vmatprep.subr.bf16.mxu0 %v13656_v60  ;;  %v13674_v55 = vld [vmem:[#allocation9 + $0x2d4] ss:$8 sps:$4 sm:$0xff]  }
 0x2cf   :  { %10348 = vmatprep.mubr.bf16.mxu1 %v15845_v2  ;;  %10360 = vmatpush1.bf16.msra.mxu1 %v13651_v39  ;;  %v13669_v2 = vld [vmem:[#allocation9 + $0x1030] ss:$8 sps:$4 sm:$0xff]   ;;  %v13698_v60 = vld [vmem:[#allocation9 + $0x314] ss:$8 sps:$4 sm:$0xff]  }
 0x2d0   :  { %10361 = vmatprep.subr.bf16.mxu1 %v13659_v3  ;;  %v13693_v39 = vld [vmem:[#allocation9 + $0x1070] ss:$8 sps:$4 sm:$0xff]   ;;  %v13701_v3 = vld [vmem:[#allocation9 + $0x1084] ss:$8 sps:$4 sm:$0xff]  }
 0x2d1   :  { %9638 = vmatpush1.bf16.msra.mxu0 %v13654_v44  ;;  %v13696_v44 = vld [vmem:[#allocation9 + $0x310] ss:$8 sps:$4 sm:$0xff]  }
 0x2d2   :  { %9639 = vmatprep.subr.bf16.mxu0 %v13662_v56  ;;  %v13704_v56 = vld [vmem:[#allocation9 + $0x324] ss:$8 sps:$4 sm:$0xff]  }
 0x2d3   :  { %10362 = vmatpush1.bf16.msra.mxu1 %v13657_v23  ;;  %v13699_v23 = vld [vmem:[#allocation9 + $0x1080] ss:$8 sps:$4 sm:$0xff]  }
 0x2d4   :  { %10363 = vmatprep.subr.bf16.mxu1 %v13665_v13  ;;  %v13707_v13 = vld [vmem:[#allocation9 + $0x1094] ss:$8 sps:$4 sm:$0xff]  }
 0x2d5   :  { %9640 = vmatpush1.bf16.msra.mxu0 %v13660_v27  ;;  %v13702_v27 = vld [vmem:[#allocation9 + $0x320] ss:$8 sps:$4 sm:$0xff]  }
 0x2d6   :  { %10349 = vmatmul.mubr.bf16.gmra.mrb[4].mxu1 %v15829_v63  ;;  %9641 = vmatprep.subr.bf16.mxu0 %v13668_v42  ;;  %v13686_v63 = vld [vmem:[#allocation9 + $0x2f4] ss:$8 sps:$4 sm:$0xff]  }
 0x2d7   :  { %10364 = vmatpush1.bf16.msra.mxu1 %v13663_v46  ;;  %10391 = vmatprep.mubr.bf16.mxu1 %v15896_v22  ;;  %v13684_v22 = vld [vmem:[#allocation9 + $0x2f0] ss:$8 sps:$4 sm:$0xff]   ;;  %v13710_v42 = vld [vmem:[#allocation9 + $0x334] ss:$8 sps:$4 sm:$0xff]  }
 0x2d8   :  { %10365 = vmatprep.subr.bf16.mxu1 %v13671_v45  ;;  %v13705_v46 = vld [vmem:[#allocation9 + $0x1090] ss:$8 sps:$4 sm:$0xff]   ;;  %v13716_v45 = vld [vmem:[#allocation9 + $0x344] ss:$8 sps:$4 sm:$0xff]  }
 0x2d9   :  { %9642 = vmatpush1.bf16.msra.mxu0 %v13666_v51  ;;  %v13711_v51 = vld [vmem:[#allocation9 + $0x10a0] ss:$8 sps:$4 sm:$0xff]  }
 0x2da   :  { %9643 = vmatprep.subr.bf16.mxu0 %v13674_v55  ;;  %v13719_v55 = vld [vmem:[#allocation9 + $0x10b4] ss:$8 sps:$4 sm:$0xff]  }
 0x2db   :  { %10366 = vmatpush1.bf16.msra.mxu1 %v13669_v2  ;;  %v13714_v2 = vld [vmem:[#allocation9 + $0x340] ss:$8 sps:$4 sm:$0xff]  }
 0x2dc   :  { %10367 = vmatprep.subr.bf16.mxu1 %v13677_v16  ;;  %v13722_v16 = vld [vmem:[#allocation9 + $0x354] ss:$8 sps:$4 sm:$0xff]  }
 0x2dd   :  { %9644 = vmatpush1.bf16.msra.mxu0 %v13672_v54  ;;  %v13717_v54 = vld [vmem:[#allocation9 + $0x10b0] ss:$8 sps:$4 sm:$0xff]  }
 0x2de   :  { %9645 = vmatprep.subr.bf16.mxu0 %v13680_v11  ;;  %v12826_v11 = vpop.f32.mrb[144].mxu0 }
 0x2df   :  { %10368 = vmatpush1.bf16.msra.mxu1 %v13675_v24  ;;  %v2021_v24 = vadd.f32 %v15888_v0, %v12826_v11 }
 0x2e0   :  { %10369 = vmatprep.subr.bf16.mxu1 %v13683_v38  ;;  %v2012_v38 = vpop.f32.mrb[145].mxu0 }
 0x2e1   :  { %9646 = vmatpush1.bf16.msra.mxu0 %v13678_v5  ;;  %v13728_v5 = vld [vmem:[#allocation9 + $0x364] ss:$8 sps:$4 sm:$0xff]  }
 0x2e2   :  { %9647 = vmatprep.subr.bf16.mxu0 %v13686_v63  ;;  %v2013_v63 = vadd.f32 %v15888_v0, %v2012_v38 }
 0x2e3   :  { %10370 = vmatpush1.bf16.msra.mxu1 %v13681_v19  ;;  %v12827_v19 = vpop.f32.mrb[146].mxu0 }
 0x2e4   :  { %10371 = vmatprep.subr.bf16.mxu1 %v13689_v15  ;;  %v13723_v15 = vld [vmem:[#allocation9 + $0x10c0] ss:$8 sps:$4 sm:$0xff]  }
 0x2e5   :  { %9648 = vmatpush1.bf16.msra.mxu0 %v13684_v22  ;;  %v2605_v22 = vmax.f32 %v2021_v24, 0.0  ;;  %v13743_v24 = vld [vmem:[#allocation9 + $0x10f4] ss:$8 sps:$4 sm:$0xff]  }
 0x2e6   :  { %9670 = vmatprep.subr.bf16.mxu0 %v13692_v31  ;;  %v2024_v31 = vadd.f32 %v15888_v0, %v12827_v19  ;;  %v13746_v19 = vld [vmem:[#allocation9 + $0x394] ss:$8 sps:$4 sm:$0xff]  }
 0x2e7   :  { %10372 = vmatpush1.bf16.msra.mxu1 %v13687_v37  ;;  %v2015_v37 = vpop.f32.mrb[147].mxu0 }
 0x2e8   :  { %9650 = vmatmul.mubr.bf16.vlgmr.msra.gmra.mrb[0].mxu0 %v15410_v28  ;;  %10373 = vmatprep.subr.bf16.mxu1 %v13695_v59  ;;  %v13713_v28 = vld [vmem:[#allocation9 + $0x10a4] ss:$8 sps:$4 sm:$0xff]   ;;  %v13731_v59 = vld [vmem:[#allocation9 + $0x10d4] ss:$8 sps:$4 sm:$0xff]  }
 0x2e9   :  { %9659 = vmatprep.mubr.bf16.mxu0 %v15421_v49  ;;  %9671 = vmatpush1.bf16.msra.mxu0 %v13690_v30  ;;  %v13708_v49 = vld [vmem:[#allocation9 + $0x330] ss:$8 sps:$4 sm:$0xff]   ;;  %v2603_v30 = vmax.f32 %v2013_v63, 0.0 }
 0x2ea   :  { %9672 = vmatprep.subr.bf16.mxu0 %v13698_v60  ;;  %v2016_v60 = vadd.f32 %v15888_v0, %v2015_v37  ;;  %v13749_v37 = vld [vmem:[#allocation9 + $0x1104] ss:$8 sps:$4 sm:$0xff]  }
 0x2eb   :  { %10374 = vmatpush1.bf16.msra.mxu1 %v13693_v39  ;;  %v13726_v39 = vld [vmem:[#allocation9 + $0x360] ss:$8 sps:$4 sm:$0xff]  }
 0x2ec   :  { %10375 = vmatprep.subr.bf16.mxu1 %v13701_v3  ;;  %v2606_v3 = vmax.f32 %v2024_v31, 0.0 }
 0x2ed   :  { %9673 = vmatpush1.bf16.msra.mxu0 %v13696_v44  ;;  %v13734_v44 = vld [vmem:[#allocation9 + $0x374] ss:$8 sps:$4 sm:$0xff]  }
 0x2ee   :  { %9674 = vmatprep.subr.bf16.mxu0 %v13704_v56  ;;  %v2604_v56 = vmax.f32 %v2016_v60, 0.0  ;;  %v13752_v60 = vld [vmem:[#allocation9 + $0x3a4] ss:$8 sps:$4 sm:$0xff]  }
 0x2ef   :  { %10376 = vmatpush1.bf16.msra.mxu1 %v13699_v23  ;;  %v13729_v23 = vld [vmem:[#allocation9 + $0x10d0] ss:$8 sps:$4 sm:$0xff]  }
 0x2f0   :  { %9660 = vmatmul.mubr.bf16.gmra.mrb[4].mxu0 %v15405_v25  ;;  %10377 = vmatprep.subr.bf16.mxu1 %v13707_v13  ;;  %v13725_v25 = vld [vmem:[#allocation9 + $0x10c4] ss:$8 sps:$4 sm:$0xff]   ;;  %v15934_v13 = vpack.c.bf16 %v2606_v3, %v2605_v22  ;;  %v13741_v22 = vld [vmem:[#allocation9 + $0x10f0] ss:$8 sps:$4 sm:$0xff]   ;;  %v13755_v3 = vld [vmem:[#allocation9 + $0x1114] ss:$8 sps:$4 sm:$0xff]  }
 0x2f1   :  { %9675 = vmatpush1.bf16.msra.mxu0 %v13702_v27  ;;  %9702 = vmatprep.mubr.bf16.mxu0 %v15458_v36  ;;  %v13720_v36 = vld [vmem:[#allocation9 + $0x350] ss:$8 sps:$4 sm:$0xff]   ;;  %v12830_v27 = vpop.f32.mrb[148].mxu0 }
 0x2f2   :  { %9676 = vmatprep.subr.bf16.mxu0 %v13710_v42  ;;  %v13737_v42 = vld [vmem:[#allocation9 + $0x10e4] ss:$8 sps:$4 sm:$0xff]  }
 0x2f3   :  { %10378 = vmatpush1.bf16.msra.mxu1 %v13705_v46  ;;  %v15936_v46 = vpack.c.bf16 %v2604_v56, %v2603_v30  ;;  %v13744_v30 = vld [vmem:[#allocation9 + $0x390] ss:$8 sps:$4 sm:$0xff]   ;;  %v13758_v56 = vld [vmem:[#allocation9 + $0x3b4] ss:$8 sps:$4 sm:$0xff]  }
 0x2f4   :  { %10379 = vmatprep.subr.bf16.mxu1 %v13713_v28  ;;  %v2037_v28 = vadd.f32 %v15888_v0, %v12830_v27  ;;  %v13761_v27 = vld [vmem:[#allocation9 + $0x1124] ss:$8 sps:$4 sm:$0xff]  }
 0x2f5   :  { %9677 = vmatpush1.bf16.msra.mxu0 %v13708_v49  ;;  %v13732_v49 = vld [vmem:[#allocation9 + $0x370] ss:$8 sps:$4 sm:$0xff]  }
 0x2f6   :  { %9678 = vmatprep.subr.bf16.mxu0 %v13716_v45  ;;  %v2028_v45 = vpop.f32.mrb[149].mxu0 }
 0x2f7   :  { %10380 = vmatpush1.bf16.msra.mxu1 %v13711_v51  ;;  %v13740_v51 = vld [vmem:[#allocation9 + $0x384] ss:$8 sps:$4 sm:$0xff]  }
 0x2f8   :  { %10381 = vmatprep.subr.bf16.mxu1 %v13719_v55  ;;  %v2029_v55 = vadd.f32 %v15888_v0, %v2028_v45  ;;  %v13767_v45 = vld [vmem:[#allocation9 + $0x1134] ss:$8 sps:$4 sm:$0xff]  }
 0x2f9   :  { %9679 = vmatpush1.bf16.msra.mxu0 %v13714_v2  ;;  %v12831_v2 = vpop.f32.mrb[150].mxu0 }
 0x2fa   :  { %9680 = vmatprep.subr.bf16.mxu0 %v13722_v16  ;;  %v13735_v16 = vld [vmem:[#allocation9 + $0x10e0] ss:$8 sps:$4 sm:$0xff]   ;;  %v2040_v11 = vadd.f32 %v15888_v0, %v12831_v2  ;;  %v13768_v2 = vld [vmem:[#allocation9 + $0x3d0] ss:$8 sps:$4 sm:$0xff]  }
 0x2fb   :  { %10382 = vmatpush1.bf16.msra.mxu1 %v13717_v54  ;;  %v2609_v54 = vmax.f32 %v2037_v28, 0.0  ;;  %v13764_v28 = vld [vmem:[#allocation9 + $0x3c4] ss:$8 sps:$4 sm:$0xff]  }
 0x2fc   :  { %10383 = vmatprep.subr.bf16.mxu1 %v13725_v25  ;;  %v2031_v25 = vpop.f32.mrb[151].mxu0  ;;  %v2610_v63 = vmax.f32 %v2040_v11, 0.0  ;;  %v13779_v11 = vld [vmem:[#allocation9 + $0x1154] ss:$8 sps:$4 sm:$0xff]  }
 0x2fd   :  { %9681 = vmatpush1.bf16.msra.mxu0 %v13720_v36  ;;  %v2607_v36 = vmax.f32 %v2029_v55, 0.0  ;;  %v2032_v38 = vadd.f32 %v15888_v0, %v2031_v25  ;;  %v13773_v55 = vld [vmem:[#allocation9 + $0x1144] ss:$8 sps:$4 sm:$0xff]   ;;  %v13774_v25 = vld [vmem:[#allocation9 + $0x3e0] ss:$8 sps:$4 sm:$0xff]  }
 0x2fe   :  { %9682 = vmatprep.subr.bf16.mxu0 %v13728_v5  ;;  %v13738_v5 = vld [vmem:[#allocation9 + $0x380] ss:$8 sps:$4 sm:$0xff]   ;;  %v15942_v31 = vpack.c.bf16 %v2610_v63, %v2609_v54  ;;  %v13791_v63 = vld [vmem:[#allocation9 + $0x1174] ss:$8 sps:$4 sm:$0xff]  }
 0x2ff   :  { %10384 = vmatpush1.bf16.msra.mxu1 %v13723_v15  ;;  %v2608_v15 = vmax.f32 %v2032_v38, 0.0  ;;  %v13771_v54 = vld [vmem:[#allocation9 + $0x1140] ss:$8 sps:$4 sm:$0xff]   ;;  %v13788_v38 = vld [vmem:[#allocation9 + $0x404] ss:$8 sps:$4 sm:$0xff]  }
 0x300   :  { %10385 = vmatprep.subr.bf16.mxu1 %v13731_v59 }
 0x301   :  { %9683 = vmatpush1.bf16.msra.mxu0 %v13726_v39  ;;  %v15944_v59 = vpack.c.bf16 %v2608_v15, %v2607_v36  ;;  %v13747_v39 = vld [vmem:[#allocation9 + $0x1100] ss:$8 sps:$4 sm:$0xff]   ;;  %v13785_v36 = vld [vmem:[#allocation9 + $0x1164] ss:$8 sps:$4 sm:$0xff]   ;;  %v13794_v15 = vld [vmem:[#allocation9 + $0x414] ss:$8 sps:$4 sm:$0xff]  }
 0x302   :  { %9684 = vmatprep.subr.bf16.mxu0 %v13734_v44  ;;  %v13750_v44 = vld [vmem:[#allocation9 + $0x3a0] ss:$8 sps:$4 sm:$0xff]  }
 0x303   :  { %10386 = vmatpush1.bf16.msra.mxu1 %v13729_v23  ;;  %v13753_v23 = vld [vmem:[#allocation9 + $0x1110] ss:$8 sps:$4 sm:$0xff]  }
 0x304   :  { %10387 = vmatprep.subr.bf16.mxu1 %v13737_v42  ;;  %v13756_v42 = vld [vmem:[#allocation9 + $0x3b0] ss:$8 sps:$4 sm:$0xff]  }
 0x305   :  { %9685 = vmatpush1.bf16.msra.mxu0 %v13732_v49  ;;  %v13759_v49 = vld [vmem:[#allocation9 + $0x1120] ss:$8 sps:$4 sm:$0xff]  }
 0x306   :  { %9686 = vmatprep.subr.bf16.mxu0 %v13740_v51  ;;  %v13762_v51 = vld [vmem:[#allocation9 + $0x3c0] ss:$8 sps:$4 sm:$0xff]  }
 0x307   :  { %10388 = vmatpush1.bf16.msra.mxu1 %v13735_v16  ;;  %v13776_v16 = vld [vmem:[#allocation9 + $0x3e4] ss:$8 sps:$4 sm:$0xff]  }
 0x308   :  { %10389 = vmatprep.subr.bf16.mxu1 %v13743_v24  ;;  %v13777_v24 = vld [vmem:[#allocation9 + $0x1150] ss:$8 sps:$4 sm:$0xff]  }
 0x309   :  { %9687 = vmatpush1.bf16.msra.mxu0 %v13738_v5  ;;  %v13783_v5 = vld [vmem:[#allocation9 + $0x1160] ss:$8 sps:$4 sm:$0xff]  }
 0x30a   :  { %9688 = vmatprep.subr.bf16.mxu0 %v13746_v19  ;;  %v13786_v19 = vld [vmem:[#allocation9 + $0x400] ss:$8 sps:$4 sm:$0xff]  }
 0x30b   :  { %10390 = vmatpush1.bf16.msra.mxu1 %v13741_v22  ;;  %v13789_v22 = vld [vmem:[#allocation9 + $0x1170] ss:$8 sps:$4 sm:$0xff]  }
 0x30c   :  { %10412 = vmatprep.subr.bf16.mxu1 %v13749_v37  ;;  %v13797_v37 = vld [vmem:[#allocation9 + $0x1184] ss:$8 sps:$4 sm:$0xff]  }
 0x30d   :  { %9689 = vmatpush1.bf16.msra.mxu0 %v13744_v30  ;;  %v13792_v30 = vld [vmem:[#allocation9 + $0x410] ss:$8 sps:$4 sm:$0xff]  }
 0x30e   :  { %10392 = vmatmul.mubr.bf16.vlgmr.msra.gmra.mrb[0].mxu1 %v15886_v14  ;;  %9690 = vmatprep.subr.bf16.mxu0 %v13752_v60  ;;  %v13770_v14 = vld [vmem:[#allocation9 + $0x3d4] ss:$8 sps:$4 sm:$0xff]   ;;  %v13800_v60 = vld [vmem:[#allocation9 + $0x424] ss:$8 sps:$4 sm:$0xff]  }
 0x30f   :  { %10401 = vmatprep.mubr.bf16.mxu1 %v15894_v6  ;;  %10413 = vmatpush1.bf16.msra.mxu1 %v13747_v39  ;;  %v13765_v6 = vld [vmem:[#allocation9 + $0x1130] ss:$8 sps:$4 sm:$0xff]   ;;  %v13795_v39 = vld [vmem:[#allocation9 + $0x1180] ss:$8 sps:$4 sm:$0xff]  }
 0x310   :  { %10414 = vmatprep.subr.bf16.mxu1 %v13755_v3  ;;  %v13803_v3 = vld [vmem:[#allocation9 + $0x1194] ss:$8 sps:$4 sm:$0xff]  }
 0x311   :  { %9691 = vmatpush1.bf16.msra.mxu0 %v13750_v44  ;;  %v13798_v44 = vld [vmem:[#allocation9 + $0x420] ss:$8 sps:$4 sm:$0xff]  }
 0x312   :  { %9692 = vmatprep.subr.bf16.mxu0 %v13758_v56  ;;  %v13806_v56 = vld [vmem:[#allocation9 + $0x434] ss:$8 sps:$4 sm:$0xff]  }
 0x313   :  { %10415 = vmatpush1.bf16.msra.mxu1 %v13753_v23  ;;  %v13801_v23 = vld [vmem:[#allocation9 + $0x1190] ss:$8 sps:$4 sm:$0xff]  }
 0x314   :  { %10416 = vmatprep.subr.bf16.mxu1 %v13761_v27  ;;  %v13812_v27 = vld [vmem:[#allocation9 + $0x444] ss:$8 sps:$4 sm:$0xff]  }
 0x315   :  { %9693 = vmatpush1.bf16.msra.mxu0 %v13756_v42  ;;  %v13807_v42 = vld [vmem:[#allocation9 + $0x11a0] ss:$8 sps:$4 sm:$0xff]  }
 0x316   :  { %10402 = vmatmul.mubr.bf16.gmra.mrb[4].mxu1 %v15884_v12  ;;  %9694 = vmatprep.subr.bf16.mxu0 %v13764_v28  ;;  %v13782_v12 = vld [vmem:[#allocation9 + $0x3f4] ss:$8 sps:$4 sm:$0xff]  }
 0x317   :  { %10417 = vmatpush1.bf16.msra.mxu1 %v13759_v49  ;;  %10444 = vmatprep.mubr.bf16.mxu1 %v15920_v17  ;;  %v13780_v17 = vld [vmem:[#allocation9 + $0x3f0] ss:$8 sps:$4 sm:$0xff]   ;;  %v13815_v28 = vld [vmem:[#allocation9 + $0x11b4] ss:$8 sps:$4 sm:$0xff]   ;;  %v13810_v49 = vld [vmem:[#allocation9 + $0x440] ss:$8 sps:$4 sm:$0xff]  }
 0x318   :  { %10418 = vmatprep.subr.bf16.mxu1 %v13767_v45  ;;  %v13818_v45 = vld [vmem:[#allocation9 + $0x454] ss:$8 sps:$4 sm:$0xff]  }
 0x319   :  { %9695 = vmatpush1.bf16.msra.mxu0 %v13762_v51  ;;  %v13813_v51 = vld [vmem:[#allocation9 + $0x11b0] ss:$8 sps:$4 sm:$0xff]  }
 0x31a   :  { %9696 = vmatprep.subr.bf16.mxu0 %v13770_v14  ;;  %v12834_v14 = vpop.f32.mrb[152].mxu0 }
 0x31b   :  { %10419 = vmatpush1.bf16.msra.mxu1 %v13765_v6  ;;  %v2053_v6 = vadd.f32 %v15888_v0, %v12834_v14 }
 0x31c   :  { %10420 = vmatprep.subr.bf16.mxu1 %v13773_v55  ;;  %v2044_v55 = vpop.f32.mrb[153].mxu0 }
 0x31d   :  { %9697 = vmatpush1.bf16.msra.mxu0 %v13768_v2  ;;  %v13824_v2 = vld [vmem:[#allocation9 + $0x464] ss:$8 sps:$4 sm:$0xff]  }
 0x31e   :  { %9698 = vmatprep.subr.bf16.mxu0 %v13776_v16  ;;  %v2045_v16 = vadd.f32 %v15888_v0, %v2044_v55 }
 0x31f   :  { %10421 = vmatpush1.bf16.msra.mxu1 %v13771_v54  ;;  %v12835_v54 = vpop.f32.mrb[154].mxu0 }
 0x320   :  { %10422 = vmatprep.subr.bf16.mxu1 %v13779_v11  ;;  %v13819_v11 = vld [vmem:[#allocation9 + $0x11c0] ss:$8 sps:$4 sm:$0xff]  }
 0x321   :  { %9699 = vmatpush1.bf16.msra.mxu0 %v13774_v25  ;;  %v2613_v25 = vmax.f32 %v2053_v6, 0.0 }
 0x322   :  { %9700 = vmatprep.subr.bf16.mxu0 %v13782_v12  ;;  %v2056_v12 = vadd.f32 %v15888_v0, %v12835_v54  ;;  %v13845_v54 = vld [vmem:[#allocation9 + $0x1204] ss:$8 sps:$4 sm:$0xff]  }
 0x323   :  { %10423 = vmatpush1.bf16.msra.mxu1 %v13777_v24  ;;  %v2047_v24 = vpop.f32.mrb[155].mxu0 }
 0x324   :  { %10424 = vmatprep.subr.bf16.mxu1 %v13785_v36  ;;  %v13827_v36 = vld [vmem:[#allocation9 + $0x11d4] ss:$8 sps:$4 sm:$0xff]  }
 0x325   :  { %9701 = vmatpush1.bf16.msra.mxu0 %v13780_v17  ;;  %v2611_v17 = vmax.f32 %v2045_v16, 0.0 }
 0x326   :  { %9723 = vmatprep.subr.bf16.mxu0 %v13788_v38  ;;  %v2048_v38 = vadd.f32 %v15888_v0, %v2047_v24  ;;  %v13828_v0 = vld [vmem:[#allocation9 + $0x470] ss:$8 sps:$4 sm:$0xff]   ;;  %v13843_v24 = vld [vmem:[#allocation9 + $0x1200] ss:$8 sps:$4 sm:$0xff]  }
 0x327   :  { %10425 = vmatpush1.bf16.msra.mxu1 %v13783_v5  ;;  %v13822_v5 = vld [vmem:[#allocation9 + $0x460] ss:$8 sps:$4 sm:$0xff]  }
 0x328   :  { %9703 = vmatmul.mubr.bf16.vlgmr.msra.gmra.mrb[0].mxu0 %v15442_v10  ;;  %10426 = vmatprep.subr.bf16.mxu1 %v13791_v63  ;;  %v13809_v10 = vld [vmem:[#allocation9 + $0x11a4] ss:$8 sps:$4 sm:$0xff]   ;;  %v2614_v63 = vmax.f32 %v2056_v12, 0.0 }
 0x329   :  { %9712 = vmatprep.mubr.bf16.mxu0 %v15453_v34  ;;  %9724 = vmatpush1.bf16.msra.mxu0 %v13786_v19  ;;  %v13804_v34 = vld [vmem:[#allocation9 + $0x430] ss:$8 sps:$4 sm:$0xff]   ;;  %v13830_v19 = vld [vmem:[#allocation9 + $0x474] ss:$8 sps:$4 sm:$0xff]   ;;  %v13848_v12 = vld [vmem:[#allocation9 + $0x4a4] ss:$8 sps:$4 sm:$0xff]  }
 0x32a   :  { %9725 = vmatprep.subr.bf16.mxu0 %v13794_v15  ;;  %v2612_v15 = vmax.f32 %v2048_v38, 0.0  ;;  %v13854_v38 = vld [vmem:[#allocation9 + $0x4b4] ss:$8 sps:$4 sm:$0xff]  }
 0x32b   :  { %10427 = vmatpush1.bf16.msra.mxu1 %v13789_v22  ;;  %v13825_v22 = vld [vmem:[#allocation9 + $0x11d0] ss:$8 sps:$4 sm:$0xff]  }
 0x32c   :  { %10428 = vmatprep.subr.bf16.mxu1 %v13797_v37  ;;  %v15958_v37 = vpack.c.bf16 %v2614_v63, %v2613_v25  ;;  %v13840_v25 = vld [vmem:[#allocation9 + $0x490] ss:$8 sps:$4 sm:$0xff]   ;;  %v13857_v63 = vld [vmem:[#allocation9 + $0x1224] ss:$8 sps:$4 sm:$0xff]  }
 0x32d   :  { %9726 = vmatpush1.bf16.msra.mxu0 %v13792_v30  ;;  %v12838_v30 = vpop.f32.mrb[156].mxu0 }
 0x32e   :  { %9727 = vmatprep.subr.bf16.mxu0 %v13800_v60  ;;  %v13833_v60 = vld [vmem:[#allocation9 + $0x11e4] ss:$8 sps:$4 sm:$0xff]  }
 0x32f   :  { %10429 = vmatpush1.bf16.msra.mxu1 %v13795_v39  ;;  %v15960_v39 = vpack.c.bf16 %v2612_v15, %v2611_v17  ;;  %v13846_v17 = vld [vmem:[#allocation9 + $0x4a0] ss:$8 sps:$4 sm:$0xff]   ;;  %v13860_v15 = vld [vmem:[#allocation9 + $0x4c4] ss:$8 sps:$4 sm:$0xff]  }
 0x330   :  { %9713 = vmatmul.mubr.bf16.gmra.mrb[4].mxu0 %v15437_v8  ;;  %10430 = vmatprep.subr.bf16.mxu1 %v13803_v3  ;;  %v13821_v8 = vld [vmem:[#allocation9 + $0x11c4] ss:$8 sps:$4 sm:$0xff]   ;;  %v15962_v3 = vld [vmem:[#allocation7] ss:$0 sm:$0xff] }
 0x331   :  { %9728 = vmatpush1.bf16.msra.mxu0 %v13798_v44  ;;  %9755 = vmatprep.mubr.bf16.mxu0 %v15490_v26  ;;  %v13816_v26 = vld [vmem:[#allocation9 + $0x450] ss:$8 sps:$4 sm:$0xff]   ;;  %v2069_v44 = vadd.f32 %v15962_v3, %v12838_v30  ;;  %v13863_v30 = vld [vmem:[#allocation9 + $0x1234] ss:$8 sps:$4 sm:$0xff]  }
 0x332   :  { %9729 = vmatprep.subr.bf16.mxu0 %v13806_v56  ;;  %v2060_v56 = vpop.f32.mrb[157].mxu0 }
 0x333   :  { %10431 = vmatpush1.bf16.msra.mxu1 %v13801_v23  ;;  %v13836_v23 = vld [vmem:[#allocation9 + $0x484] ss:$8 sps:$4 sm:$0xff]  }
 0x334   :  { %10432 = vmatprep.subr.bf16.mxu1 %v13809_v10  ;;  %v2061_v10 = vadd.f32 %v15962_v3, %v2060_v56  ;;  %v13872_v56 = vld [vmem:[#allocation9 + $0x4e4] ss:$8 sps:$4 sm:$0xff]  }
 0x335   :  { %9730 = vmatpush1.bf16.msra.mxu0 %v13804_v34  ;;  %v12839_v34 = vpop.f32.mrb[158].mxu0 }
 0x336   :  { %9731 = vmatprep.subr.bf16.mxu0 %v13812_v27  ;;  %v13831_v27 = vld [vmem:[#allocation9 + $0x11e0] ss:$8 sps:$4 sm:$0xff]  }
 0x337   :  { %10433 = vmatpush1.bf16.msra.mxu1 %v13807_v42  ;;  %v2617_v42 = vmax.f32 %v2069_v44, 0.0  ;;  %v13869_v44 = vld [vmem:[#allocation9 + $0x1244] ss:$8 sps:$4 sm:$0xff]  }
 0x338   :  { %10434 = vmatprep.subr.bf16.mxu1 %v13815_v28  ;;  %v2072_v28 = vadd.f32 %v15962_v3, %v12839_v34  ;;  %v13870_v34 = vld [vmem:[#allocation9 + $0x4e0] ss:$8 sps:$4 sm:$0xff]  }
 0x339   :  { %9732 = vmatpush1.bf16.msra.mxu0 %v13810_v49  ;;  %v2063_v49 = vpop.f32.mrb[159].mxu0 }
 0x33a   :  { %9733 = vmatprep.subr.bf16.mxu0 %v13818_v45  ;;  %v13839_v45 = vld [vmem:[#allocation9 + $0x11f4] ss:$8 sps:$4 sm:$0xff]   ;;  %v2064_v14 = vadd.f32 %v15962_v3, %v2063_v49  ;;  %v2618_v6 = vmax.f32 %v2072_v28, 0.0  ;;  %v13884_v28 = vld [vmem:[#allocation9 + $0x504] ss:$8 sps:$4 sm:$0xff]  }
 0x33b   :  { %10435 = vmatpush1.bf16.msra.mxu1 %v13813_v51  ;;  %v2615_v51 = vmax.f32 %v2061_v10, 0.0  ;;  %v13875_v10 = vld [vmem:[#allocation9 + $0x1254] ss:$8 sps:$4 sm:$0xff]   ;;  %v13879_v49 = vld [vmem:[#allocation9 + $0x1260] ss:$8 sps:$4 sm:$0xff]  }
 0x33c   :  { %10436 = vmatprep.subr.bf16.mxu1 %v13821_v8  ;;  %v13834_v8 = vld [vmem:[#allocation9 + $0x480] ss:$8 sps:$4 sm:$0xff]   ;;  %v2616_v55 = vmax.f32 %v2064_v14, 0.0  ;;  %v15968_v16 = vpack.c.bf16 %v2618_v6, %v2617_v42  ;;  %v13881_v42 = vld [vmem:[#allocation9 + $0x1264] ss:$8 sps:$4 sm:$0xff]  }
 0x33d   :  { %9734 = vmatpush1.bf16.msra.mxu0 %v13816_v26  ;;  %v13842_v26 = vld [vmem:[#allocation9 + $0x494] ss:$8 sps:$4 sm:$0xff]   ;;  %v13893_v6 = vld [vmem:[#allocation9 + $0x1284] ss:$8 sps:$4 sm:$0xff]  }
 0x33e   :  { %9735 = vmatprep.subr.bf16.mxu0 %v13824_v2  ;;  %v13837_v2 = vld [vmem:[#allocation9 + $0x11f0] ss:$8 sps:$4 sm:$0xff]   ;;  %v13890_v14 = vld [vmem:[#allocation9 + $0x514] ss:$8 sps:$4 sm:$0xff]  }
 0x33f   :  { %10437 = vmatpush1.bf16.msra.mxu1 %v13819_v11  ;;  %v15970_v11 = vpack.c.bf16 %v2616_v55, %v2615_v51  ;;  %v13882_v51 = vld [vmem:[#allocation9 + $0x500] ss:$8 sps:$4 sm:$0xff]   ;;  %v13896_v55 = vld [vmem:[#allocation9 + $0x524] ss:$8 sps:$4 sm:$0xff]  }
 0x340   :  { %10438 = vmatprep.subr.bf16.mxu1 %v13827_v36  ;;  %v13851_v36 = vld [vmem:[#allocation9 + $0x1214] ss:$8 sps:$4 sm:$0xff]  }
 0x341   :  { %9736 = vmatpush1.bf16.msra.mxu0 %v13822_v5  ;;  %v13849_v5 = vld [vmem:[#allocation9 + $0x1210] ss:$8 sps:$4 sm:$0xff]  }
 0x342   :  { %9737 = vmatprep.subr.bf16.mxu0 %v13830_v19  ;;  %v13852_v19 = vld [vmem:[#allocation9 + $0x4b0] ss:$8 sps:$4 sm:$0xff]  }
 0x343   :  { %10439 = vmatpush1.bf16.msra.mxu1 %v13825_v22  ;;  %v13855_v22 = vld [vmem:[#allocation9 + $0x1220] ss:$8 sps:$4 sm:$0xff]  }
 0x344   :  { %10440 = vmatprep.subr.bf16.mxu1 %v13833_v60  ;;  %v13858_v60 = vld [vmem:[#allocation9 + $0x4c0] ss:$8 sps:$4 sm:$0xff]  }
 0x345   :  { %9738 = vmatpush1.bf16.msra.mxu0 %v13828_v0  ;;  %v13864_v0 = vld [vmem:[#allocation9 + $0x4d0] ss:$8 sps:$4 sm:$0xff]  }
 0x346   :  { %9739 = vmatprep.subr.bf16.mxu0 %v13836_v23  ;;  %v13867_v23 = vld [vmem:[#allocation9 + $0x1240] ss:$8 sps:$4 sm:$0xff]  }
 0x347   :  { %10441 = vmatpush1.bf16.msra.mxu1 %v13831_v27  ;;  %v13873_v27 = vld [vmem:[#allocation9 + $0x1250] ss:$8 sps:$4 sm:$0xff]  }
 0x348   :  { %10442 = vmatprep.subr.bf16.mxu1 %v13839_v45  ;;  %v13887_v45 = vld [vmem:[#allocation9 + $0x1274] ss:$8 sps:$4 sm:$0xff]  }
 0x349   :  { %9740 = vmatpush1.bf16.msra.mxu0 %v13834_v8  ;;  %v13885_v8 = vld [vmem:[#allocation9 + $0x1270] ss:$8 sps:$4 sm:$0xff]  }
 0x34a   :  { %9741 = vmatprep.subr.bf16.mxu0 %v13842_v26  ;;  %v13888_v26 = vld [vmem:[#allocation9 + $0x510] ss:$8 sps:$4 sm:$0xff]  }
 0x34b   :  { %10443 = vmatpush1.bf16.msra.mxu1 %v13837_v2  ;;  %v13891_v2 = vld [vmem:[#allocation9 + $0x1280] ss:$8 sps:$4 sm:$0xff]  }
 0x34c   :  { %10465 = vmatprep.subr.bf16.mxu1 %v13845_v54  ;;  %v13899_v54 = vld [vmem:[#allocation9 + $0x1294] ss:$8 sps:$4 sm:$0xff]  }
 0x34d   :  { %9742 = vmatpush1.bf16.msra.mxu0 %v13840_v25  ;;  %v13894_v25 = vld [vmem:[#allocation9 + $0x520] ss:$8 sps:$4 sm:$0xff]  }
 0x34e   :  { %10445 = vmatmul.mubr.bf16.vlgmr.msra.gmra.mrb[0].mxu1 %v15912_v40  ;;  %9743 = vmatprep.subr.bf16.mxu0 %v13848_v12  ;;  %v13866_v40 = vld [vmem:[#allocation9 + $0x4d4] ss:$8 sps:$4 sm:$0xff]  }
 0x34f   :  { %10454 = vmatprep.mubr.bf16.mxu1 %v15918_v52  ;;  %10466 = vmatpush1.bf16.msra.mxu1 %v13843_v24  ;;  %v13861_v52 = vld [vmem:[#allocation9 + $0x1230] ss:$8 sps:$4 sm:$0xff]   ;;  %v13902_v12 = vld [vmem:[#allocation9 + $0x534] ss:$8 sps:$4 sm:$0xff]  }
 0x350   :  { %10467 = vmatprep.subr.bf16.mxu1 %v13851_v36  ;;  %v13897_v24 = vld [vmem:[#allocation9 + $0x1290] ss:$8 sps:$4 sm:$0xff]   ;;  %v13908_v36 = vld [vmem:[#allocation9 + $0x544] ss:$8 sps:$4 sm:$0xff]  }
 0x351   :  { %9744 = vmatpush1.bf16.msra.mxu0 %v13846_v17  ;;  %v13903_v17 = vld [vmem:[#allocation9 + $0x12a0] ss:$8 sps:$4 sm:$0xff]  }
 0x352   :  { %9745 = vmatprep.subr.bf16.mxu0 %v13854_v38  ;;  %v13911_v38 = vld [vmem:[#allocation9 + $0x12b4] ss:$8 sps:$4 sm:$0xff]  }
 0x353   :  { %10468 = vmatpush1.bf16.msra.mxu1 %v13849_v5  ;;  %v13906_v5 = vld [vmem:[#allocation9 + $0x540] ss:$8 sps:$4 sm:$0xff]  }
 0x354   :  { %10469 = vmatprep.subr.bf16.mxu1 %v13857_v63  ;;  %v13914_v63 = vld [vmem:[#allocation9 + $0x554] ss:$8 sps:$4 sm:$0xff]  }
 0x355   :  { %9746 = vmatpush1.bf16.msra.mxu0 %v13852_v19  ;;  %v13909_v19 = vld [vmem:[#allocation9 + $0x12b0] ss:$8 sps:$4 sm:$0xff]  }
 0x356   :  { %10455 = vmatmul.mubr.bf16.gmra.mrb[4].mxu1 %v15910_v48  ;;  %9747 = vmatprep.subr.bf16.mxu0 %v13860_v15  ;;  %v13878_v48 = vld [vmem:[#allocation9 + $0x4f4] ss:$8 sps:$4 sm:$0xff]   ;;  %v12842_v15 = vpop.f32.mrb[160].mxu0 }
 0x357   :  { %10470 = vmatpush1.bf16.msra.mxu1 %v13855_v22  ;;  %10497 = vmatprep.mubr.bf16.mxu1 %v15944_v59  ;;  %v13876_v59 = vld [vmem:[#allocation9 + $0x4f0] ss:$8 sps:$4 sm:$0xff]   ;;  %v2085_v22 = vadd.f32 %v15962_v3, %v12842_v15 }
 0x358   :  { %10471 = vmatprep.subr.bf16.mxu1 %v13863_v30  ;;  %v2076_v30 = vpop.f32.mrb[161].mxu0 }
 0x359   :  { %9748 = vmatpush1.bf16.msra.mxu0 %v13858_v60  ;;  %v13920_v60 = vld [vmem:[#allocation9 + $0x564] ss:$8 sps:$4 sm:$0xff]  }
 0x35a   :  { %9749 = vmatprep.subr.bf16.mxu0 %v13866_v40  ;;  %v2077_v40 = vadd.f32 %v15962_v3, %v2076_v30 }
 0x35b   :  { %10472 = vmatpush1.bf16.msra.mxu1 %v13861_v52  ;;  %v12843_v52 = vpop.f32.mrb[162].mxu0 }
 0x35c   :  { %10473 = vmatprep.subr.bf16.mxu1 %v13869_v44  ;;  %v13915_v44 = vld [vmem:[#allocation9 + $0x12c0] ss:$8 sps:$4 sm:$0xff]  }
 0x35d   :  { %9750 = vmatpush1.bf16.msra.mxu0 %v13864_v0  ;;  %v2621_v0 = vmax.f32 %v2085_v22, 0.0 }
 0x35e   :  { %9751 = vmatprep.subr.bf16.mxu0 %v13872_v56  ;;  %v2088_v56 = vadd.f32 %v15962_v3, %v12843_v52  ;;  %v13939_v52 = vld [vmem:[#allocation9 + $0x1300] ss:$8 sps:$4 sm:$0xff]  }
 0x35f   :  { %10474 = vmatpush1.bf16.msra.mxu1 %v13867_v23  ;;  %v2079_v23 = vpop.f32.mrb[163].mxu0 }
 0x360   :  { %10475 = vmatprep.subr.bf16.mxu1 %v13875_v10  ;;  %v13923_v10 = vld [vmem:[#allocation9 + $0x12d4] ss:$8 sps:$4 sm:$0xff]  }
 0x361   :  { %9752 = vmatpush1.bf16.msra.mxu0 %v13870_v34  ;;  %v2619_v34 = vmax.f32 %v2077_v40, 0.0  ;;  %v13944_v40 = vld [vmem:[#allocation9 + $0x5a4] ss:$8 sps:$4 sm:$0xff]  }
 0x362   :  { %9753 = vmatprep.subr.bf16.mxu0 %v13878_v48  ;;  %v2080_v48 = vadd.f32 %v15962_v3, %v2079_v23  ;;  %v13945_v23 = vld [vmem:[#allocation9 + $0x1310] ss:$8 sps:$4 sm:$0xff]  }
 0x363   :  { %10476 = vmatpush1.bf16.msra.mxu1 %v13873_v27  ;;  %v13918_v27 = vld [vmem:[#allocation9 + $0x560] ss:$8 sps:$4 sm:$0xff]  }
 0x364   :  { %10477 = vmatprep.subr.bf16.mxu1 %v13881_v42  ;;  %v2622_v42 = vmax.f32 %v2088_v56, 0.0  ;;  %v13950_v56 = vld [vmem:[#allocation9 + $0x5b4] ss:$8 sps:$4 sm:$0xff]  }
 0x365   :  { %9754 = vmatpush1.bf16.msra.mxu0 %v13876_v59  ;;  %v13926_v59 = vld [vmem:[#allocation9 + $0x574] ss:$8 sps:$4 sm:$0xff]  }
 0x366   :  { %9776 = vmatprep.subr.bf16.mxu0 %v13884_v28  ;;  %v2620_v28 = vmax.f32 %v2080_v48, 0.0  ;;  %v13956_v48 = vld [vmem:[#allocation9 + $0x5c4] ss:$8 sps:$4 sm:$0xff]  }
 0x367   :  { %10478 = vmatpush1.bf16.msra.mxu1 %v13879_v49  ;;  %v13921_v49 = vld [vmem:[#allocation9 + $0x12d0] ss:$8 sps:$4 sm:$0xff]  }
 0x368   :  { %9756 = vmatmul.mubr.bf16.vlgmr.msra.gmra.mrb[0].mxu0 %v15474_v61  ;;  %10479 = vmatprep.subr.bf16.mxu1 %v13887_v45  ;;  %v13905_v61 = vld [vmem:[#allocation9 + $0x12a4] ss:$8 sps:$4 sm:$0xff]   ;;  %v15984_v45 = vpack.c.bf16 %v2622_v42, %v2621_v0  ;;  %v13942_v0 = vld [vmem:[#allocation9 + $0x5a0] ss:$8 sps:$4 sm:$0xff]   ;;  %v13959_v42 = vld [vmem:[#allocation9 + $0x1334] ss:$8 sps:$4 sm:$0xff]  }
 0x369   :  { %9765 = vmatprep.mubr.bf16.mxu0 %v15485_v21  ;;  %9777 = vmatpush1.bf16.msra.mxu0 %v13882_v51  ;;  %v13900_v21 = vld [vmem:[#allocation9 + $0x530] ss:$8 sps:$4 sm:$0xff]   ;;  %v12846_v51 = vpop.f32.mrb[164].mxu0 }
 0x36a   :  { %9778 = vmatprep.subr.bf16.mxu0 %v13890_v14  ;;  %v13929_v14 = vld [vmem:[#allocation9 + $0x12e4] ss:$8 sps:$4 sm:$0xff]  }
 0x36b   :  { %10480 = vmatpush1.bf16.msra.mxu1 %v13885_v8  ;;  %v15986_v8 = vpack.c.bf16 %v2620_v28, %v2619_v34  ;;  %v13948_v34 = vld [vmem:[#allocation9 + $0x5b0] ss:$8 sps:$4 sm:$0xff]   ;;  %v13965_v28 = vld [vmem:[#allocation9 + $0x1344] ss:$8 sps:$4 sm:$0xff]  }
 0x36c   :  { %10481 = vmatprep.subr.bf16.mxu1 %v13893_v6  ;;  %v2101_v6 = vadd.f32 %v15962_v3, %v12846_v51  ;;  %v13968_v51 = vld [vmem:[#allocation9 + $0x5e4] ss:$8 sps:$4 sm:$0xff]  }
 0x36d   :  { %9779 = vmatpush1.bf16.msra.mxu0 %v13888_v26  ;;  %v13924_v26 = vld [vmem:[#allocation9 + $0x570] ss:$8 sps:$4 sm:$0xff]  }
 0x36e   :  { %9780 = vmatprep.subr.bf16.mxu0 %v13896_v55  ;;  %v2092_v55 = vpop.f32.mrb[165].mxu0 }
 0x36f   :  { %10482 = vmatpush1.bf16.msra.mxu1 %v13891_v2  ;;  %v13932_v2 = vld [vmem:[#allocation9 + $0x584] ss:$8 sps:$4 sm:$0xff]  }
 0x370   :  { %9766 = vmatmul.mubr.bf16.gmra.mrb[4].mxu0 %v15469_v58  ;;  %10483 = vmatprep.subr.bf16.mxu1 %v13899_v54  ;;  %v13917_v58 = vld [vmem:[#allocation9 + $0x12c4] ss:$8 sps:$4 sm:$0xff]   ;;  %v2093_v54 = vadd.f32 %v15962_v3, %v2092_v55  ;;  %v13969_v55 = vld [vmem:[#allocation9 + $0x1350] ss:$8 sps:$4 sm:$0xff]  }
 0x371   :  { %9781 = vmatpush1.bf16.msra.mxu0 %v13894_v25  ;;  %9808 = vmatprep.mubr.bf16.mxu0 %v15519_v9  ;;  %v13912_v9 = vld [vmem:[#allocation9 + $0x550] ss:$8 sps:$4 sm:$0xff]   ;;  %v12847_v25 = vpop.f32.mrb[166].mxu0 }
 0x372   :  { %9782 = vmatprep.subr.bf16.mxu0 %v13902_v12  ;;  %v13927_v12 = vld [vmem:[#allocation9 + $0x12e0] ss:$8 sps:$4 sm:$0xff]  }
 0x373   :  { %10484 = vmatpush1.bf16.msra.mxu1 %v13897_v24  ;;  %v2625_v24 = vmax.f32 %v2101_v6, 0.0  ;;  %v13971_v6 = vld [vmem:[#allocation9 + $0x1354] ss:$8 sps:$4 sm:$0xff]  }
 0x374   :  { %10485 = vmatprep.subr.bf16.mxu1 %v13905_v61  ;;  %v2104_v61 = vadd.f32 %v15962_v3, %v12847_v25  ;;  %v13975_v25 = vld [vmem:[#allocation9 + $0x1360] ss:$8 sps:$4 sm:$0xff]  }
 0x375   :  { %9783 = vmatpush1.bf16.msra.mxu0 %v13900_v21  ;;  %v2095_v21 = vpop.f32.mrb[167].mxu0 }
 0x376   :  { %9784 = vmatprep.subr.bf16.mxu0 %v13908_v36  ;;  %v13935_v36 = vld [vmem:[#allocation9 + $0x12f4] ss:$8 sps:$4 sm:$0xff]  }
 0x377   :  { %10486 = vmatpush1.bf16.msra.mxu1 %v13903_v17  ;;  %v2623_v17 = vmax.f32 %v2093_v54, 0.0  ;;  %v13980_v54 = vld [vmem:[#allocation9 + $0x604] ss:$8 sps:$4 sm:$0xff]  }
 0x378   :  { %10487 = vmatprep.subr.bf16.mxu1 %v13911_v38  ;;  %v2096_v38 = vadd.f32 %v15962_v3, %v2095_v21  ;;  %v13981_v21 = vld [vmem:[#allocation9 + $0x1370] ss:$8 sps:$4 sm:$0xff]  }
 0x379   :  { %9785 = vmatpush1.bf16.msra.mxu0 %v13906_v5  ;;  %v13930_v5 = vld [vmem:[#allocation9 + $0x580] ss:$8 sps:$4 sm:$0xff]  }
 0x37a   :  { %9786 = vmatprep.subr.bf16.mxu0 %v13914_v63  ;;  %v2626_v63 = vmax.f32 %v2104_v61, 0.0  ;;  %v2624_v15 = vmax.f32 %v2096_v38, 0.0  ;;  %v13986_v61 = vld [vmem:[#allocation9 + $0x614] ss:$8 sps:$4 sm:$0xff]   ;;  %v13992_v38 = vld [vmem:[#allocation9 + $0x624] ss:$8 sps:$4 sm:$0xff]  }
 0x37b   :  { %10488 = vmatpush1.bf16.msra.mxu1 %v13909_v19  ;;  %v13938_v19 = vld [vmem:[#allocation9 + $0x594] ss:$8 sps:$4 sm:$0xff]  }
 0x37c   :  { %10489 = vmatprep.subr.bf16.mxu1 %v13917_v58  ;;  %v13933_v58 = vld [vmem:[#allocation9 + $0x12f0] ss:$8 sps:$4 sm:$0xff]   ;;  %v15992_v22 = vpack.c.bf16 %v2626_v63, %v2625_v24  ;;  %v15994_v30 = vpack.c.bf16 %v2624_v15, %v2623_v17  ;;  %v13978_v24 = vld [vmem:[#allocation9 + $0x600] ss:$8 sps:$4 sm:$0xff]   ;;  %v12850_v63 = vpop.f32.mrb[168].mxu0 }
 0x37d   :  { %9787 = vmatpush1.bf16.msra.mxu0 %v13912_v9  ;;  %v13941_v9 = vld [vmem:[#allocation9 + $0x1304] ss:$8 sps:$4 sm:$0xff]   ;;  %v13984_v17 = vld [vmem:[#allocation9 + $0x610] ss:$8 sps:$4 sm:$0xff]   ;;  %v2117_v15 = vadd.f32 %v15962_v3, %v12850_v63  ;;  %v14019_v63 = vld [vmem:[#allocation9 + $0x13d4] ss:$8 sps:$4 sm:$0xff]  }
 0x37e   :  { %9788 = vmatprep.subr.bf16.mxu0 %v13920_v60  ;;  %v13936_v60 = vld [vmem:[#allocation9 + $0x590] ss:$8 sps:$4 sm:$0xff]  }
 0x37f   :  { %10490 = vmatpush1.bf16.msra.mxu1 %v13915_v44  ;;  %v13947_v44 = vld [vmem:[#allocation9 + $0x1314] ss:$8 sps:$4 sm:$0xff]  }
 0x380   :  { %10491 = vmatprep.subr.bf16.mxu1 %v13923_v10  ;;  %v13953_v10 = vld [vmem:[#allocation9 + $0x1324] ss:$8 sps:$4 sm:$0xff]  }
 0x381   :  { %9789 = vmatpush1.bf16.msra.mxu0 %v13918_v27  ;;  %v13951_v27 = vld [vmem:[#allocation9 + $0x1320] ss:$8 sps:$4 sm:$0xff]  }
 0x382   :  { %9790 = vmatprep.subr.bf16.mxu0 %v13926_v59  ;;  %v13954_v59 = vld [vmem:[#allocation9 + $0x5c0] ss:$8 sps:$4 sm:$0xff]  }
 0x383   :  { %10492 = vmatpush1.bf16.msra.mxu1 %v13921_v49  ;;  %v13960_v49 = vld [vmem:[#allocation9 + $0x5d0] ss:$8 sps:$4 sm:$0xff]  }
 0x384   :  { %10493 = vmatprep.subr.bf16.mxu1 %v13929_v14  ;;  %v13963_v14 = vld [vmem:[#allocation9 + $0x1340] ss:$8 sps:$4 sm:$0xff]  }
 0x385   :  { %9791 = vmatpush1.bf16.msra.mxu0 %v13924_v26  ;;  %v13966_v26 = vld [vmem:[#allocation9 + $0x5e0] ss:$8 sps:$4 sm:$0xff]  }
 0x386   :  { %9792 = vmatprep.subr.bf16.mxu0 %v13932_v2  ;;  %v13977_v2 = vld [vmem:[#allocation9 + $0x1364] ss:$8 sps:$4 sm:$0xff]  }
 0x387   :  { %10494 = vmatpush1.bf16.msra.mxu1 %v13927_v12  ;;  %v13983_v12 = vld [vmem:[#allocation9 + $0x1374] ss:$8 sps:$4 sm:$0xff]  }
 0x388   :  { %10495 = vmatprep.subr.bf16.mxu1 %v13935_v36  ;;  %v13989_v36 = vld [vmem:[#allocation9 + $0x1384] ss:$8 sps:$4 sm:$0xff]  }
 0x389   :  { %9793 = vmatpush1.bf16.msra.mxu0 %v13930_v5  ;;  %v13987_v5 = vld [vmem:[#allocation9 + $0x1380] ss:$8 sps:$4 sm:$0xff]  }
 0x38a   :  { %9794 = vmatprep.subr.bf16.mxu0 %v13938_v19  ;;  %v13995_v19 = vld [vmem:[#allocation9 + $0x1394] ss:$8 sps:$4 sm:$0xff]  }
 0x38b   :  { %10496 = vmatpush1.bf16.msra.mxu1 %v13933_v58  ;;  %v13990_v58 = vld [vmem:[#allocation9 + $0x620] ss:$8 sps:$4 sm:$0xff]  }
 0x38c   :  { %10518 = vmatprep.subr.bf16.mxu1 %v13941_v9  ;;  %v2108_v9 = vpop.f32.mrb[169].mxu0 }
 0x38d   :  { %9795 = vmatpush1.bf16.msra.mxu0 %v13936_v60  ;;  %v2109_v60 = vadd.f32 %v15962_v3, %v2108_v9 }
 0x38e   :  { %10498 = vmatmul.mubr.bf16.vlgmr.msra.gmra.mrb[0].mxu1 %v15936_v46  ;;  %9796 = vmatprep.subr.bf16.mxu0 %v13944_v40  ;;  %v13962_v46 = vld [vmem:[#allocation9 + $0x5d4] ss:$8 sps:$4 sm:$0xff]   ;;  %v12851_v40 = vpop.f32.mrb[170].mxu0 }
 0x38f   :  { %10507 = vmatprep.mubr.bf16.mxu1 %v15942_v31  ;;  %10519 = vmatpush1.bf16.msra.mxu1 %v13939_v52  ;;  %v13957_v31 = vld [vmem:[#allocation9 + $0x1330] ss:$8 sps:$4 sm:$0xff]   ;;  %v2629_v52 = vmax.f32 %v2117_v15, 0.0 }
 0x390   :  { %10520 = vmatprep.subr.bf16.mxu1 %v13947_v44  ;;  %v2120_v44 = vadd.f32 %v15962_v3, %v12851_v40 }
 0x391   :  { %9797 = vmatpush1.bf16.msra.mxu0 %v13942_v0  ;;  %v2111_v0 = vpop.f32.mrb[171].mxu0 }
 0x392   :  { %9798 = vmatprep.subr.bf16.mxu0 %v13950_v56  ;;  %v14001_v56 = vld [vmem:[#allocation9 + $0x13a4] ss:$8 sps:$4 sm:$0xff]  }
 0x393   :  { %10521 = vmatpush1.bf16.msra.mxu1 %v13945_v23  ;;  %v2627_v23 = vmax.f32 %v2109_v60, 0.0 }
 0x394   :  { %10522 = vmatprep.subr.bf16.mxu1 %v13953_v10  ;;  %v2112_v10 = vadd.f32 %v15962_v3, %v2111_v0 }
 0x395   :  { %9799 = vmatpush1.bf16.msra.mxu0 %v13948_v34  ;;  %v13996_v34 = vld [vmem:[#allocation9 + $0x630] ss:$8 sps:$4 sm:$0xff]  }
 0x396   :  { %10508 = vmatmul.mubr.bf16.gmra.mrb[4].mxu1 %v15934_v13  ;;  %9800 = vmatprep.subr.bf16.mxu0 %v13956_v48  ;;  %v13974_v13 = vld [vmem:[#allocation9 + $0x5f4] ss:$8 sps:$4 sm:$0xff]   ;;  %v2630_v48 = vmax.f32 %v2120_v44, 0.0 }
 0x397   :  { %10523 = vmatpush1.bf16.msra.mxu1 %v13951_v27  ;;  %10550 = vmatprep.mubr.bf16.mxu1 %v15970_v11  ;;  %v13972_v11 = vld [vmem:[#allocation9 + $0x5f0] ss:$8 sps:$4 sm:$0xff]   ;;  %v14004_v27 = vld [vmem:[#allocation9 + $0x644] ss:$8 sps:$4 sm:$0xff]  }
 0x398   :  { %10524 = vmatprep.subr.bf16.mxu1 %v13959_v42  ;;  %v2628_v42 = vmax.f32 %v2112_v10, 0.0 }
 0x399   :  { %9801 = vmatpush1.bf16.msra.mxu0 %v13954_v59  ;;  %v13999_v59 = vld [vmem:[#allocation9 + $0x13a0] ss:$8 sps:$4 sm:$0xff]  }
 0x39a   :  { %9802 = vmatprep.subr.bf16.mxu0 %v13962_v46  ;;  %v16008_v46 = vpack.c.bf16 %v2630_v48, %v2629_v52 }
 0x39b   :  { %10525 = vmatpush1.bf16.msra.mxu1 %v13957_v31  ;;  %v12854_v31 = vpop.f32.mrb[172].mxu0 }
 0x39c   :  { %10526 = vmatprep.subr.bf16.mxu1 %v13965_v28  ;;  %v16010_v28 = vpack.c.bf16 %v2628_v42, %v2627_v23 }
 0x39d   :  { %9803 = vmatpush1.bf16.msra.mxu0 %v13960_v49  ;;  %v2133_v49 = vadd.f32 %v15962_v3, %v12854_v31 }
 0x39e   :  { %9804 = vmatprep.subr.bf16.mxu0 %v13968_v51  ;;  %v14002_v51 = vld [vmem:[#allocation9 + $0x640] ss:$8 sps:$4 sm:$0xff]  }
 0x39f   :  { %10527 = vmatpush1.bf16.msra.mxu1 %v13963_v14  ;;  %v2124_v14 = vpop.f32.mrb[173].mxu0 }
 0x3a0   :  { %10528 = vmatprep.subr.bf16.mxu1 %v13971_v6  ;;  %v2125_v6 = vadd.f32 %v15962_v3, %v2124_v14 }
 0x3a1   :  { %9805 = vmatpush1.bf16.msra.mxu0 %v13966_v26  ;;  %v12855_v26 = vpop.f32.mrb[174].mxu0 }
 0x3a2   :  { %9806 = vmatprep.subr.bf16.mxu0 %v13974_v13  ;;  %v14005_v13 = vld [vmem:[#allocation9 + $0x13b0] ss:$8 sps:$4 sm:$0xff]  }
 0x3a3   :  { %10529 = vmatpush1.bf16.msra.mxu1 %v13969_v55  ;;  %v2633_v55 = vmax.f32 %v2133_v49, 0.0  ;;  %v14031_v49 = vld [vmem:[#allocation9 + $0x13f4] ss:$8 sps:$4 sm:$0xff]  }
 0x3a4   :  { %10530 = vmatprep.subr.bf16.mxu1 %v13977_v2  ;;  %v2136_v2 = vadd.f32 %v15962_v3, %v12855_v26  ;;  %v14034_v26 = vld [vmem:[#allocation9 + $0x694] ss:$8 sps:$4 sm:$0xff]  }
 0x3a5   :  { %9807 = vmatpush1.bf16.msra.mxu0 %v13972_v11  ;;  %v2127_v11 = vpop.f32.mrb[175].mxu0 }
 0x3a6   :  { %9829 = vmatprep.subr.bf16.mxu0 %v13980_v54  ;;  %v14013_v54 = vld [vmem:[#allocation9 + $0x13c4] ss:$8 sps:$4 sm:$0xff]  }
 0x3a7   :  { %10531 = vmatpush1.bf16.msra.mxu1 %v13975_v25  ;;  %v2631_v25 = vmax.f32 %v2125_v6, 0.0 }
 0x3a8   :  { %9809 = vmatmul.mubr.bf16.vlgmr.msra.gmra.mrb[0].mxu0 %v15503_v50  ;;  %10532 = vmatprep.subr.bf16.mxu1 %v13983_v12  ;;  %v13998_v50 = vld [vmem:[#allocation9 + $0x634] ss:$8 sps:$4 sm:$0xff]   ;;  %v2128_v12 = vadd.f32 %v15962_v3, %v2127_v11 }
 0x3a9   :  { %9818 = vmatprep.mubr.bf16.mxu0 %v15517_v7  ;;  %9830 = vmatpush1.bf16.msra.mxu0 %v13978_v24  ;;  %v13993_v7 = vld [vmem:[#allocation9 + $0x1390] ss:$8 sps:$4 sm:$0xff]  }
 0x3aa   :  { %9831 = vmatprep.subr.bf16.mxu0 %v13986_v61  ;;  %v14008_v24 = vld [vmem:[#allocation9 + $0x650] ss:$8 sps:$4 sm:$0xff]   ;;  %v2634_v61 = vmax.f32 %v2136_v2, 0.0 }
 0x3ab   :  { %10533 = vmatpush1.bf16.msra.mxu1 %v13981_v21  ;;  %v14016_v21 = vld [vmem:[#allocation9 + $0x664] ss:$8 sps:$4 sm:$0xff]   ;;  %v14029_v2 = vld [vmem:[#allocation9 + $0x13f0] ss:$8 sps:$4 sm:$0xff]  }
 0x3ac   :  { %10534 = vmatprep.subr.bf16.mxu1 %v13989_v36  ;;  %v2632_v36 = vmax.f32 %v2128_v12, 0.0  ;;  %v14037_v12 = vld [vmem:[#allocation9 + $0x1404] ss:$8 sps:$4 sm:$0xff]  }
 0x3ad   :  { %9832 = vmatpush1.bf16.msra.mxu0 %v13984_v17  ;;  %v14011_v17 = vld [vmem:[#allocation9 + $0x13c0] ss:$8 sps:$4 sm:$0xff]  }
 0x3ae   :  { %9833 = vmatprep.subr.bf16.mxu0 %v13992_v38  ;;  %v16016_v38 = vpack.c.bf16 %v2634_v61, %v2633_v55 }
 0x3af   :  { %10535 = vmatpush1.bf16.msra.mxu1 %v13987_v5  ;;  %v12858_v5 = vpop.f32.mrb[176].mxu0 }
 0x3b0   :  { %9819 = vmatmul.mubr.bf16.gmra.mrb[4].mxu0 %v15501_v47  ;;  %10536 = vmatprep.subr.bf16.mxu1 %v13995_v19  ;;  %v14007_v47 = vld [vmem:[#allocation9 + $0x13b4] ss:$8 sps:$4 sm:$0xff]   ;;  %v16018_v19 = vpack.c.bf16 %v2632_v36, %v2631_v25  ;;  %v2149_v15 = vadd.f32 %v15962_v3, %v12858_v5  ;;  %v2140_v9 = vpop.f32.mrb[177].mxu0 }
 0x3b1   :  { %9834 = vmatpush1.bf16.msra.mxu0 %v13990_v58  ;;  %9861 = vmatprep.mubr.bf16.mxu0 %v15553_v62  ;;  %v14010_v62 = vld [vmem:[#allocation9 + $0x654] ss:$8 sps:$4 sm:$0xff]   ;;  %v14014_v58 = vld [vmem:[#allocation9 + $0x660] ss:$8 sps:$4 sm:$0xff]   ;;  %v2141_v60 = vadd.f32 %v15962_v3, %v2140_v9  ;;  %v12859_v40 = vpop.f32.mrb[178].mxu0 }
 0x3b2   :  { %9835 = vmatprep.subr.bf16.mxu0 %v13998_v50  ;;  %v14022_v50 = vld [vmem:[#allocation9 + $0x674] ss:$8 sps:$4 sm:$0xff]   ;;  %v2637_v52 = vmax.f32 %v2149_v15, 0.0  ;;  %v2152_v44 = vadd.f32 %v15962_v3, %v12859_v40  ;;  %v2143_v0 = vpop.f32.mrb[179].mxu0  ;;  %v14038_v40 = vld [vmem:[#allocation9 + $0x6a0] ss:$8 sps:$4 sm:$0xff]  }
 0x3b3   :  { %10537 = vmatpush1.bf16.msra.mxu1 %v13993_v7  ;;  %v14017_v7 = vld [vmem:[#allocation9 + $0x13d0] ss:$8 sps:$4 sm:$0xff]   ;;  %v2635_v23 = vmax.f32 %v2141_v60, 0.0  ;;  %v2144_v10 = vadd.f32 %v15962_v3, %v2143_v0  ;;  %v14043_v9 = vld [vmem:[#allocation9 + $0x1414] ss:$8 sps:$4 sm:$0xff]  }
 0x3b4   :  { %10538 = vmatprep.subr.bf16.mxu1 %v14001_v56  ;;  %v14025_v56 = vld [vmem:[#allocation9 + $0x13e4] ss:$8 sps:$4 sm:$0xff]   ;;  %v2638_v48 = vmax.f32 %v2152_v44, 0.0 }
 0x3b5   :  { %9836 = vmatpush1.bf16.msra.mxu0 %v13996_v34  ;;  %v14020_v34 = vld [vmem:[#allocation9 + $0x670] ss:$8 sps:$4 sm:$0xff]   ;;  %v2636_v42 = vmax.f32 %v2144_v10, 0.0 }
 0x3b6   :  { %9837 = vmatprep.subr.bf16.mxu0 %v14004_v27  ;;  %v14028_v27 = vld [vmem:[#allocation9 + $0x684] ss:$8 sps:$4 sm:$0xff]   ;;  %v16024_v31 = vpack.c.bf16 %v2638_v48, %v2637_v52  ;;  %v14046_v52 = vld [vmem:[#allocation9 + $0x6b4] ss:$8 sps:$4 sm:$0xff]  }
 0x3b7   :  { %10539 = vmatpush1.bf16.msra.mxu1 %v13999_v59  ;;  %v14023_v59 = vld [vmem:[#allocation9 + $0x13e0] ss:$8 sps:$4 sm:$0xff]   ;;  %v14049_v48 = vld [vmem:[#allocation9 + $0x1424] ss:$8 sps:$4 sm:$0xff]  }
 0x3b8   :  { %10540 = vmatprep.subr.bf16.mxu1 %v14007_v47  ;;  %v12862_v47 = vpop.f32.mrb[180].mxu0 }
 0x3b9   :  { %9838 = vmatpush1.bf16.msra.mxu0 %v14002_v51  ;;  %v16026_v51 = vpack.c.bf16 %v2636_v42, %v2635_v23  ;;  %v2165_v14 = vadd.f32 %v15962_v3, %v12862_v47  ;;  %v2156_v6 = vpop.f32.mrb[181].mxu0  ;;  %v14052_v47 = vld [vmem:[#allocation9 + $0x6c4] ss:$8 sps:$4 sm:$0xff]  }
 0x3ba   :  { %9839 = vmatprep.subr.bf16.mxu0 %v14010_v62  ;;  %v14026_v62 = vld [vmem:[#allocation9 + $0x680] ss:$8 sps:$4 sm:$0xff]   ;;  %v12863_v55 = vpop.f32.mrb[182].mxu0 }
 0x3bb   :  { %10541 = vmatpush1.bf16.msra.mxu1 %v14005_v13  ;;  %v2157_v13 = vadd.f32 %v15962_v3, %v2156_v6  ;;  %v2641_v11 = vmax.f32 %v2165_v14, 0.0  ;;  %v2159_v25 = vpop.f32.mrb[183].mxu0  ;;  %v14047_v14 = vld [vmem:[#allocation9 + $0x1420] ss:$8 sps:$4 sm:$0xff]   ;;  %v14055_v6 = vld [vmem:[#allocation9 + $0x1434] ss:$8 sps:$4 sm:$0xff]  }
 0x3bc   :  { %10542 = vmatprep.subr.bf16.mxu1 %v14013_v54  ;;  %v2168_v54 = vadd.f32 %v15962_v3, %v12863_v55  ;;  %v2160_v61 = vadd.f32 %v15962_v3, %v2159_v25  ;;  %v14050_v55 = vld [vmem:[#allocation9 + $0x6c0] ss:$8 sps:$4 sm:$0xff]  }
 0x3bd   :  { %9840 = vmatpush1.bf16.msra.mxu0 %v14008_v24  ;;  %v2639_v24 = vmax.f32 %v2157_v13, 0.0 }
 0x3be   :  { %9841 = vmatprep.subr.bf16.mxu0 %v14016_v21  ;;  %v14032_v21 = vld [vmem:[#allocation9 + $0x690] ss:$8 sps:$4 sm:$0xff]   ;;  %v2642_v36 = vmax.f32 %v2168_v54, 0.0  ;;  %v2640_v5 = vmax.f32 %v2160_v61, 0.0 }
 0x3bf   :  { %10543 = vmatpush1.bf16.msra.mxu1 %v14011_v17  ;;  %v14040_v17 = vld [vmem:[#allocation9 + $0x6a4] ss:$8 sps:$4 sm:$0xff]  }
 0x3c0   :  { %10544 = vmatprep.subr.bf16.mxu1 %v14019_v63  ;;  %v14035_v63 = vld [vmem:[#allocation9 + $0x1400] ss:$8 sps:$4 sm:$0xff]   ;;  %v16032_v15 = vpack.c.bf16 %v2642_v36, %v2641_v11  ;;  %v14058_v11 = vld [vmem:[#allocation9 + $0x6d4] ss:$8 sps:$4 sm:$0xff]   ;;  %v14061_v36 = vld [vmem:[#allocation9 + $0x1444] ss:$8 sps:$4 sm:$0xff]  }
 0x3c1   :  { %9842 = vmatpush1.bf16.msra.mxu0 %v14014_v58  ;;  %v12866_v58 = vpop.f32.mrb[184].mxu0 }
 0x3c2   :  { %9843 = vmatprep.subr.bf16.mxu0 %v14022_v50  ;;  %v16034_v50 = vpack.c.bf16 %v2640_v5, %v2639_v24  ;;  %v2181_v60 = vadd.f32 %v15962_v3, %v12866_v58  ;;  %v14064_v58 = vld [vmem:[#allocation9 + $0x6e4] ss:$8 sps:$4 sm:$0xff]  }
 0x3c3   :  { %10545 = vmatpush1.bf16.msra.mxu1 %v14017_v7  ;;  %v2172_v7 = vpop.f32.mrb[185].mxu0 }
 0x3c4   :  { %10546 = vmatprep.subr.bf16.mxu1 %v14025_v56  ;;  %v2173_v44 = vadd.f32 %v15962_v3, %v2172_v7  ;;  %v12867_v0 = vpop.f32.mrb[186].mxu0  ;;  %v14041_v56 = vld [vmem:[#allocation9 + $0x1410] ss:$8 sps:$4 sm:$0xff]   ;;  %v2645_v23 = vmax.f32 %v2181_v60, 0.0  ;;  %v14059_v60 = vld [vmem:[#allocation9 + $0x1440] ss:$8 sps:$4 sm:$0xff]  }
 0x3c5   :  { %9844 = vmatpush1.bf16.msra.mxu0 %v14020_v34  ;;  %v2184_v10 = vadd.f32 %v15962_v3, %v12867_v0  ;;  %v2175_v34 = vpop.f32.mrb[187].mxu0  ;;  %v14067_v7 = vld [vmem:[#allocation9 + $0x1454] ss:$8 sps:$4 sm:$0xff]   ;;  %v14062_v0 = vld [vmem:[#allocation9 + $0x6e0] ss:$8 sps:$4 sm:$0xff]  }
 0x3c6   :  { %9845 = vmatprep.subr.bf16.mxu0 %v14028_v27  ;;  %v2643_v27 = vmax.f32 %v2173_v44, 0.0  ;;  %v2176_v42 = vadd.f32 %v15962_v3, %v2175_v34 }
 0x3c7   :  { %10547 = vmatpush1.bf16.msra.mxu1 %v14023_v59  ;;  %v2646_v59 = vmax.f32 %v2184_v10, 0.0 }
 0x3c8   :  { %10548 = vmatprep.subr.bf16.mxu1 %v14031_v49  ;;  %v2644_v49 = vmax.f32 %v2176_v42, 0.0 }
 0x3c9   :  { %9846 = vmatpush1.bf16.msra.mxu0 %v14026_v62  ;;  %v12870_v62 = vpop.f32.mrb[188].mxu0 }
 0x3ca   :  { %9847 = vmatprep.subr.bf16.mxu0 %v14034_v26  ;;  %v16044_v26 = vpack.c.bf16 %v2644_v49, %v2643_v27  ;;  %v2197_v13 = vadd.f32 %v15962_v3, %v12870_v62 }
 0x3cb   :  { %10549 = vmatpush1.bf16.msra.mxu1 %v14029_v2  ;;  %v2188_v2 = vpop.f32.mrb[189].mxu0 }
 0x3cc   :  { %10571 = vmatprep.subr.bf16.mxu1 %v14037_v12  ;;  %v2189_v54 = vadd.f32 %v15962_v3, %v2188_v2  ;;  %v12871_v25 = vpop.f32.mrb[190].mxu0  ;;  %v14053_v12 = vld [vmem:[#allocation9 + $0x1430] ss:$8 sps:$4 sm:$0xff]   ;;  %v2649_v24 = vmax.f32 %v2197_v13, 0.0 }
 0x3cd   :  { %9848 = vmatpush1.bf16.msra.mxu0 %v14032_v21  ;;  %v2200_v61 = vadd.f32 %v15962_v3, %v12871_v25  ;;  %v2191_v21 = vpop.f32.mrb[191].mxu0 }
 0x3ce   :  { %10551 = vmatmul.mubr.bf16.vlgmr.msra.gmra.mrb[0].mxu1 %v15960_v39  ;;  %9849 = vmatprep.subr.bf16.mxu0 %v14040_v17  ;;  %v14044_v39 = vld [vmem:[#allocation9 + $0x6b0] ss:$8 sps:$4 sm:$0xff]   ;;  %v2647_v17 = vmax.f32 %v2189_v54, 0.0  ;;  %v2192_v5 = vadd.f32 %v15962_v3, %v2191_v21  ;;  %v14079_v54 = vld [vmem:[#allocation9 + $0x1474] ss:$8 sps:$4 sm:$0xff]  }
 0x3cf   :  { %10560 = vmatprep.mubr.bf16.mxu1 %v15968_v16  ;;  %10572 = vmatpush1.bf16.msra.mxu1 %v14035_v63  ;;  %v16042_v16 = vpack.c.bf16 %v2646_v59, %v2645_v23  ;;  %v2650_v63 = vmax.f32 %v2200_v61, 0.0  ;;  %v14070_v23 = vld [vmem:[#allocation9 + $0x6f4] ss:$8 sps:$4 sm:$0xff]   ;;  %v14073_v59 = vld [vmem:[#allocation9 + $0x1464] ss:$8 sps:$4 sm:$0xff]  }
 0x3d0   :  { %10573 = vmatprep.subr.bf16.mxu1 %v14043_v9  ;;  %v2648_v9 = vmax.f32 %v2192_v5, 0.0  ;;  %v14082_v21 = vld [vmem:[#allocation9 + $0x714] ss:$8 sps:$4 sm:$0xff]   ;;  %v14077_v5 = vld [vmem:[#allocation9 + $0x1470] ss:$8 sps:$4 sm:$0xff]  }
 0x3d1   :  { %9850 = vmatpush1.bf16.msra.mxu0 %v14038_v40  ;;  %v16052_v40 = vpack.c.bf16 %v2650_v63, %v2649_v24  ;;  %v14074_v24 = vld [vmem:[#allocation9 + $0x700] ss:$8 sps:$4 sm:$0xff]  }
 0x3d2   :  { %9851 = vmatprep.subr.bf16.mxu0 %v14046_v52  ;;  %v16054_v52 = vpack.c.bf16 %v2648_v9, %v2647_v17  ;;  %v14085_v9 = vld [vmem:[#allocation9 + $0x1484] ss:$8 sps:$4 sm:$0xff]  }
 0x3d3   :  { %10574 = vmatpush1.bf16.msra.mxu1 %v14041_v56 }
 0x3d4   :  { %10575 = vmatprep.subr.bf16.mxu1 %v14049_v48  ;;  %v14065_v48 = vld [vmem:[#allocation9 + $0x1450] ss:$8 sps:$4 sm:$0xff]  }
 0x3d5   :  { %9852 = vmatpush1.bf16.msra.mxu0 %v14044_v39 }
 0x3d6   :  { %10561 = vmatmul.mubr.bf16.gmra.mrb[4].mxu1 %v15958_v37  ;;  %9853 = vmatprep.subr.bf16.mxu0 %v14052_v47  ;;  %v14056_v37 = vld [vmem:[#allocation9 + $0x6d0] ss:$8 sps:$4 sm:$0xff]  }
 0x3d7   :  { %10576 = vmatpush1.bf16.msra.mxu1 %v14047_v14  ;;  %10603 = vmatprep.mubr.bf16.mxu1 %v15994_v30  ;;  %v12874_v30 = vpop.f32.mrb[192].mxu0  ;;  %v14068_v14 = vld [vmem:[#allocation9 + $0x6f0] ss:$8 sps:$4 sm:$0xff]  }
 0x3d8   :  { %10577 = vmatprep.subr.bf16.mxu1 %v14055_v6  ;;  %v2213_v44 = vadd.f32 %v15962_v3, %v12874_v30  ;;  %v2204_v56 = vpop.f32.mrb[193].mxu0  ;;  %v14076_v6 = vld [vmem:[#allocation9 + $0x704] ss:$8 sps:$4 sm:$0xff]  }
 0x3d9   :  { %9854 = vmatpush1.bf16.msra.mxu0 %v14050_v55  ;;  %v2205_v10 = vadd.f32 %v15962_v3, %v2204_v56  ;;  %v12875_v34 = vpop.f32.mrb[194].mxu0  ;;  %v14071_v55 = vld [vmem:[#allocation9 + $0x1460] ss:$8 sps:$4 sm:$0xff]  }
 0x3da   :  { %9855 = vmatprep.subr.bf16.mxu0 %v14058_v11  ;;  %v2653_v27 = vmax.f32 %v2213_v44, 0.0  ;;  %v2216_v42 = vadd.f32 %v15962_v3, %v12875_v34  ;;  %v2207_v39 = vpop.f32.mrb[195].mxu0 }
 0x3db   :  { %10578 = vmatpush1.bf16.msra.mxu1 %v14053_v12  ;;  %v2651_v47 = vmax.f32 %v2205_v10, 0.0  ;;  %v2208_v49 = vadd.f32 %v15962_v3, %v2207_v39  ;;  %v12878_v11 = vpop.f32.mrb[196].mxu0  ;;  %v14094_v39 = vld [vmem:[#allocation9 + $0x734] ss:$8 sps:$4 sm:$0xff]  }
 0x3dc   :  { %10579 = vmatprep.subr.bf16.mxu1 %v14061_v36  ;;  %v2654_v62 = vmax.f32 %v2216_v42, 0.0  ;;  %v2229_v12 = vadd.f32 %v15962_v3, %v12878_v11  ;;  %v2220_v61 = vpop.f32.mrb[197].mxu0 }
 0x3dd   :  { %9856 = vmatpush1.bf16.msra.mxu0 %v14056_v37  ;;  %v2652_v13 = vmax.f32 %v2208_v49, 0.0  ;;  %v2221_v36 = vadd.f32 %v15962_v3, %v2220_v61  ;;  %v12879_v17 = vpop.f32.mrb[198].mxu0  ;;  %v14089_v49 = vld [vmem:[#allocation9 + $0x1490] ss:$8 sps:$4 sm:$0xff]  }
 0x3de   :  { %9857 = vmatprep.subr.bf16.mxu0 %v14064_v58  ;;  %v16060_v2 = vpack.c.bf16 %v2654_v62, %v2653_v27  ;;  %v2657_v37 = vmax.f32 %v2229_v12, 0.0  ;;  %v2232_v63 = vadd.f32 %v15962_v3, %v12879_v17  ;;  %v2223_v58 = vpop.f32.mrb[199].mxu0  ;;  %v16074_v27 = vld [vmem:[#allocation7] ss:$0 sm:$0xff] }
 0x3df   :  { %10580 = vmatpush1.bf16.msra.mxu1 %v14059_v60  ;;  %v16062_v25 = vpack.c.bf16 %v2652_v13, %v2651_v47  ;;  %v2655_v60 = vmax.f32 %v2221_v36, 0.0  ;;  %v2224_v30 = vadd.f32 %v15962_v3, %v2223_v58  ;;  %v12882_v34 = vpop.f32.mrb[200].mxu0  ;;  %v14097_v13 = vld [vmem:[#allocation9 + $0x14a4] ss:$8 sps:$4 sm:$0xff]  }
 0x3e0   :  { %10581 = vmatprep.subr.bf16.mxu1 %v14067_v7  ;;  %v14080_v7 = vld [vmem:[#allocation9 + $0x710] ss:$8 sps:$4 sm:$0xff]   ;;  %v2658_v44 = vmax.f32 %v2232_v63, 0.0  ;;  %v2245_v3 = vadd.f32 %v16074_v27, %v12882_v34  ;;  %v2236_v42 = vpop.f32.mrb[201].mxu0  ;;  %v14098_v63 = vld [vmem:[#allocation9 + $0x740] ss:$8 sps:$4 sm:$0xff]  }
 0x3e1   :  { %9858 = vmatpush1.bf16.msra.mxu0 %v14062_v0  ;;  %v14088_v0 = vld [vmem:[#allocation9 + $0x724] ss:$8 sps:$4 sm:$0xff]   ;;  %v2656_v56 = vmax.f32 %v2224_v30, 0.0  ;;  %v12883_v47 = vpop.f32.mrb[202].mxu0  ;;  %v14101_v30 = vld [vmem:[#allocation9 + $0x14b0] ss:$8 sps:$4 sm:$0xff]  }
 0x3e2   :  { %9859 = vmatprep.subr.bf16.mxu0 %v14070_v23  ;;  %v14083_v23 = vld [vmem:[#allocation9 + $0x1480] ss:$8 sps:$4 sm:$0xff]   ;;  %v16070_v10 = vpack.c.bf16 %v2658_v44, %v2657_v37  ;;  %v2248_v62 = vadd.f32 %v16074_v27, %v12883_v47 }
 0x3e3   :  { %10582 = vmatpush1.bf16.msra.mxu1 %v14065_v48  ;;  %v16072_v48 = vpack.c.bf16 %v2656_v56, %v2655_v60  ;;  %v14109_v56 = vld [vmem:[#allocation9 + $0x14c4] ss:$8 sps:$4 sm:$0xff]  }
 0x3e4   :  { %10583 = vmatprep.subr.bf16.mxu1 %v14073_v59  ;;  %v2237_v59 = vadd.f32 %v16074_v27, %v2236_v42  ;;  %v2662_v12 = vmax.f32 %v2248_v62, 0.0 }
 0x3e5   :  { %9860 = vmatpush1.bf16.msra.mxu0 %v14068_v14  ;;  %v2661_v14 = vmax.f32 %v2245_v3, 0.0 }
 0x3e6   :  { %9882 = vmatprep.subr.bf16.mxu0 %v14076_v6  ;;  %v2239_v6 = vpop.f32.mrb[203].mxu0 }
 0x3e7   :  { %10584 = vmatpush1.bf16.msra.mxu1 %v14071_v55  ;;  %v2659_v55 = vmax.f32 %v2237_v59, 0.0  ;;  %v2240_v11 = vadd.f32 %v16074_v27, %v2239_v6  ;;  %v16082_v36 = vpack.c.bf16 %v2662_v12, %v2661_v14  ;;  %v12886_v17 = vpop.f32.mrb[204].mxu0  ;;  %v14110_v6 = vld [vmem:[#allocation9 + $0x760] ss:$8 sps:$4 sm:$0xff]   ;;  %v14113_v12 = vld [vmem:[#allocation9 + $0x14d0] ss:$8 sps:$4 sm:$0xff]  }
 0x3e8   :  { %9862 = vmatmul.mubr.bf16.vlgmr.msra.gmra.mrb[0].mxu0 %v15537_v35  ;;  %10585 = vmatprep.subr.bf16.mxu1 %v14079_v54  ;;  %v14091_v35 = vld [vmem:[#allocation9 + $0x1494] ss:$8 sps:$4 sm:$0xff]   ;;  %v14092_v54 = vld [vmem:[#allocation9 + $0x730] ss:$8 sps:$4 sm:$0xff]   ;;  %v2261_v37 = vadd.f32 %v16074_v27, %v12886_v17  ;;  %v2252_v58 = vpop.f32.mrb[205].mxu0 }
 0x3e9   :  { %9871 = vmatprep.mubr.bf16.mxu0 %v15551_v57  ;;  %9883 = vmatpush1.bf16.msra.mxu0 %v14074_v24  ;;  %v14086_v57 = vld [vmem:[#allocation9 + $0x720] ss:$8 sps:$4 sm:$0xff]   ;;  %v14100_v24 = vld [vmem:[#allocation9 + $0x744] ss:$8 sps:$4 sm:$0xff]   ;;  %v2660_v61 = vmax.f32 %v2240_v11, 0.0  ;;  %v12887_v60 = vpop.f32.mrb[206].mxu0 }
 0x3ea   :  { %9884 = vmatprep.subr.bf16.mxu0 %v14082_v21  ;;  %v14095_v21 = vld [vmem:[#allocation9 + $0x14a0] ss:$8 sps:$4 sm:$0xff]   ;;  %v2264_v44 = vadd.f32 %v16074_v27, %v12887_v60  ;;  %v14121_v17 = vld [vmem:[#allocation9 + $0x14e4] ss:$8 sps:$4 sm:$0xff]  }
 0x3eb   :  { %10586 = vmatpush1.bf16.msra.mxu1 %v14077_v5  ;;  %v16084_v5 = vpack.c.bf16 %v2660_v61, %v2659_v55  ;;  %v14118_v55 = vld [vmem:[#allocation9 + $0x774] ss:$8 sps:$4 sm:$0xff]   ;;  %v14119_v60 = vld [vmem:[#allocation9 + $0x14e0] ss:$8 sps:$4 sm:$0xff]  }
 0x3ec   :  { %10587 = vmatprep.subr.bf16.mxu1 %v14085_v9  ;;  %v2253_v9 = vadd.f32 %v16074_v27, %v2252_v58  ;;  %v2666_v3 = vmax.f32 %v2264_v44, 0.0  ;;  %v14127_v44 = vld [vmem:[#allocation9 + $0x14f4] ss:$8 sps:$4 sm:$0xff]  }
 0x3ed   :  { %9885 = vmatpush1.bf16.msra.mxu0 %v14080_v7  ;;  %v2665_v7 = vmax.f32 %v2261_v37, 0.0 }
 0x3ee   :  { %9886 = vmatprep.subr.bf16.mxu0 %v14088_v0  ;;  %v2255_v0 = vpop.f32.mrb[207].mxu0 }
 0x3ef   :  { %10588 = vmatpush1.bf16.msra.mxu1 %v14083_v23  ;;  %v2663_v23 = vmax.f32 %v2253_v9, 0.0  ;;  %v2256_v34 = vadd.f32 %v16074_v27, %v2255_v0  ;;  %v16090_v59 = vpack.c.bf16 %v2666_v3, %v2665_v7  ;;  %v12890_v47 = vpop.f32.mrb[208].mxu0 }
 0x3f0   :  { %9872 = vmatmul.mubr.bf16.gmra.mrb[4].mxu0 %v15535_v33  ;;  %10589 = vmatprep.subr.bf16.mxu1 %v14091_v35  ;;  %v14103_v33 = vld [vmem:[#allocation9 + $0x14b4] ss:$8 sps:$4 sm:$0xff]   ;;  %v14104_v35 = vld [vmem:[#allocation9 + $0x750] ss:$8 sps:$4 sm:$0xff]   ;;  %v2277_v62 = vadd.f32 %v16074_v27, %v12890_v47 }
 0x3f1   :  { %9887 = vmatpush1.bf16.msra.mxu0 %v14086_v57  ;;  %9914 = vmatprep.mubr.bf16.mxu0 %v15585_v4  ;;  %v14106_v4 = vld [vmem:[#allocation9 + $0x754] ss:$8 sps:$4 sm:$0xff]   ;;  %v14112_v57 = vld [vmem:[#allocation9 + $0x764] ss:$8 sps:$4 sm:$0xff]   ;;  %v2664_v42 = vmax.f32 %v2256_v34, 0.0 }
 0x3f2   :  { %9888 = vmatprep.subr.bf16.mxu0 %v14094_v39  ;;  %v14107_v39 = vld [vmem:[#allocation9 + $0x14c0] ss:$8 sps:$4 sm:$0xff]  }
 0x3f3   :  { %10590 = vmatpush1.bf16.msra.mxu1 %v14089_v49  ;;  %v14115_v49 = vld [vmem:[#allocation9 + $0x14d4] ss:$8 sps:$4 sm:$0xff]   ;;  %v16092_v14 = vpack.c.bf16 %v2664_v42, %v2663_v23  ;;  %v14122_v23 = vld [vmem:[#allocation9 + $0x780] ss:$8 sps:$4 sm:$0xff]   ;;  %v14125_v42 = vld [vmem:[#allocation9 + $0x14f0] ss:$8 sps:$4 sm:$0xff]  }
 0x3f4   :  { %10591 = vmatprep.subr.bf16.mxu1 %v14097_v13  ;;  %v2268_v13 = vpop.f32.mrb[209].mxu0 }
 0x3f5   :  { %9889 = vmatpush1.bf16.msra.mxu0 %v14092_v54  ;;  %v2269_v11 = vadd.f32 %v16074_v27, %v2268_v13  ;;  %v12891_v54 = vpop.f32.mrb[210].mxu0 }
 0x3f6   :  { %9890 = vmatprep.subr.bf16.mxu0 %v14100_v24  ;;  %v2669_v24 = vmax.f32 %v2277_v62, 0.0  ;;  %v2280_v61 = vadd.f32 %v16074_v27, %v12891_v54  ;;  %v14133_v62 = vld [vmem:[#allocation9 + $0x1504] ss:$8 sps:$4 sm:$0xff]  }
 0x3f7   :  { %10592 = vmatpush1.bf16.msra.mxu1 %v14095_v21  ;;  %v2271_v21 = vpop.f32.mrb[211].mxu0  ;;  %v14136_v54 = vld [vmem:[#allocation9 + $0x7a4] ss:$8 sps:$4 sm:$0xff]  }
 0x3f8   :  { %10593 = vmatprep.subr.bf16.mxu1 %v14103_v33  ;;  %v2667_v33 = vmax.f32 %v2269_v11, 0.0  ;;  %v2272_v37 = vadd.f32 %v16074_v27, %v2271_v21  ;;  %v2670_v58 = vmax.f32 %v2280_v61, 0.0  ;;  %v12894_v7 = vpop.f32.mrb[212].mxu0 }
 0x3f9   :  { %9891 = vmatpush1.bf16.msra.mxu0 %v14098_v63  ;;  %v14116_v63 = vld [vmem:[#allocation9 + $0x770] ss:$8 sps:$4 sm:$0xff]   ;;  %v2284_v34 = vpop.f32.mrb[213].mxu0 }
 0x3fa   :  { %9892 = vmatprep.subr.bf16.mxu0 %v14106_v4  ;;  %v14124_v4 = vld [vmem:[#allocation9 + $0x784] ss:$8 sps:$4 sm:$0xff]   ;;  %v2668_v9 = vmax.f32 %v2272_v37, 0.0  ;;  %v2285_v3 = vadd.f32 %v16074_v27, %v2284_v34 }
 0x3fb   :  { %10594 = vmatpush1.bf16.msra.mxu1 %v14101_v30  ;;  %v16098_v30 = vpack.c.bf16 %v2670_v58, %v2669_v24  ;;  %v14131_v24 = vld [vmem:[#allocation9 + $0x1500] ss:$8 sps:$4 sm:$0xff]   ;;  %v14145_v34 = vld [vmem:[#allocation9 + $0x1524] ss:$8 sps:$4 sm:$0xff]  }
 0x3fc   :  { %10595 = vmatprep.subr.bf16.mxu1 %v14109_v56  ;;  %v16100_v0 = vpack.c.bf16 %v2668_v9, %v2667_v33  ;;  %v2293_v56 = vadd.f32 %v16074_v27, %v12894_v7  ;;  %v14137_v7 = vld [vmem:[#allocation9 + $0x1510] ss:$8 sps:$4 sm:$0xff]  }
 0x3fd   :  { %9893 = vmatpush1.bf16.msra.mxu0 %v14104_v35  ;;  %v14130_v35 = vld [vmem:[#allocation9 + $0x794] ss:$8 sps:$4 sm:$0xff]  }
 0x3fe   :  { %9894 = vmatprep.subr.bf16.mxu0 %v14112_v57  ;;  %v12895_v57 = vpop.f32.mrb[214].mxu0 }
 0x3ff   :  { %10596 = vmatpush1.bf16.msra.mxu1 %v14107_v39  ;;  %v2673_v39 = vmax.f32 %v2293_v56, 0.0  ;;  %v2296_v47 = vadd.f32 %v16074_v27, %v12895_v57 }
 0x400   :  { %10597 = vmatprep.subr.bf16.mxu1 %v14115_v49  ;;  %v2287_v49 = vpop.f32.mrb[215].mxu0 }
 0x401   :  { %9895 = vmatpush1.bf16.msra.mxu0 %v14110_v6  ;;  %v2671_v6 = vmax.f32 %v2285_v3, 0.0  ;;  %v2288_v13 = vadd.f32 %v16074_v27, %v2287_v49  ;;  %v2674_v11 = vmax.f32 %v2296_v47, 0.0  ;;  %v12898_v21 = vpop.f32.mrb[216].mxu0  ;;  %v14143_v47 = vld [vmem:[#allocation9 + $0x1520] ss:$8 sps:$4 sm:$0xff]  }
 0x402   :  { %9896 = vmatprep.subr.bf16.mxu0 %v14118_v55  ;;  %v14128_v55 = vld [vmem:[#allocation9 + $0x790] ss:$8 sps:$4 sm:$0xff]   ;;  %v2309_v37 = vadd.f32 %v16074_v27, %v12898_v21  ;;  %v2300_v58 = vpop.f32.mrb[217].mxu0 }
 0x403   :  { %10598 = vmatpush1.bf16.msra.mxu1 %v14113_v12  ;;  %v2672_v12 = vmax.f32 %v2288_v13, 0.0  ;;  %v16106_v61 = vpack.c.bf16 %v2674_v11, %v2673_v39  ;;  %v2301_v9 = vadd.f32 %v16074_v27, %v2300_v58  ;;  %v14149_v21 = vld [vmem:[#allocation9 + $0x1530] ss:$8 sps:$4 sm:$0xff]   ;;  %v14157_v58 = vld [vmem:[#allocation9 + $0x1544] ss:$8 sps:$4 sm:$0xff]  }
 0x404   :  { %10599 = vmatprep.subr.bf16.mxu1 %v14121_v17  ;;  %v14139_v17 = vld [vmem:[#allocation9 + $0x1514] ss:$8 sps:$4 sm:$0xff]  }
 0x405   :  { %9897 = vmatpush1.bf16.msra.mxu0 %v14116_v63  ;;  %v16108_v33 = vpack.c.bf16 %v2672_v12, %v2671_v6  ;;  %v14134_v63 = vld [vmem:[#allocation9 + $0x7a0] ss:$8 sps:$4 sm:$0xff]  }
 0x406   :  { %9898 = vmatprep.subr.bf16.mxu0 %v14124_v4  ;;  %v14142_v4 = vld [vmem:[#allocation9 + $0x7b4] ss:$8 sps:$4 sm:$0xff]  }
 0x407   :  { %10600 = vmatpush1.bf16.msra.mxu1 %v14119_v60  ;;  %v12899_v60 = vpop.f32.mrb[218].mxu0 }
 0x408   :  { %10601 = vmatprep.subr.bf16.mxu1 %v14127_v44  ;;  %v2677_v44 = vmax.f32 %v2309_v37, 0.0  ;;  %v2312_v56 = vadd.f32 %v16074_v27, %v12899_v60 }
 0x409   :  { %9899 = vmatpush1.bf16.msra.mxu0 %v14122_v23  ;;  %v2303_v23 = vpop.f32.mrb[219].mxu0 }
 0x40a   :  { %9900 = vmatprep.subr.bf16.mxu0 %v14130_v35  ;;  %v2675_v35 = vmax.f32 %v2301_v9, 0.0  ;;  %v2304_v3 = vadd.f32 %v16074_v27, %v2303_v23  ;;  %v2678_v57 = vmax.f32 %v2312_v56, 0.0  ;;  %v12902_v49 = vpop.f32.mrb[220].mxu0  ;;  %v14155_v56 = vld [vmem:[#allocation9 + $0x1540] ss:$8 sps:$4 sm:$0xff]  }
 0x40b   :  { %10602 = vmatpush1.bf16.msra.mxu1 %v14125_v42  ;;  %v14148_v42 = vld [vmem:[#allocation9 + $0x7c4] ss:$8 sps:$4 sm:$0xff]   ;;  %v2325_v13 = vadd.f32 %v16074_v27, %v12902_v49  ;;  %v2316_v11 = vpop.f32.mrb[221].mxu0  ;;  %v14161_v49 = vld [vmem:[#allocation9 + $0x1550] ss:$8 sps:$4 sm:$0xff]  }
 0x40c   :  { %10624 = vmatprep.subr.bf16.mxu1 %v14133_v62  ;;  %v2676_v39 = vmax.f32 %v2304_v3, 0.0  ;;  %v14151_v62 = vld [vmem:[#allocation9 + $0x1534] ss:$8 sps:$4 sm:$0xff]   ;;  %v2317_v12 = vadd.f32 %v16074_v27, %v2316_v11  ;;  %v14169_v11 = vld [vmem:[#allocation9 + $0x1564] ss:$8 sps:$4 sm:$0xff]  }
 0x40d   :  { %9901 = vmatpush1.bf16.msra.mxu0 %v14128_v55  ;;  %v14146_v55 = vld [vmem:[#allocation9 + $0x7c0] ss:$8 sps:$4 sm:$0xff]  }
 0x40e   :  { %10604 = vmatmul.mubr.bf16.vlgmr.msra.gmra.mrb[0].mxu1 %v15986_v8  ;;  %9902 = vmatprep.subr.bf16.mxu0 %v14136_v54  ;;  %v14140_v8 = vld [vmem:[#allocation9 + $0x7b0] ss:$8 sps:$4 sm:$0xff]   ;;  %v16118_v6 = vpack.c.bf16 %v2676_v39, %v2675_v35  ;;  %v14154_v54 = vld [vmem:[#allocation9 + $0x7d4] ss:$8 sps:$4 sm:$0xff]  }
 0x40f   :  { %10613 = vmatprep.mubr.bf16.mxu1 %v15992_v22  ;;  %10625 = vmatpush1.bf16.msra.mxu1 %v14131_v24  ;;  %v16116_v22 = vpack.c.bf16 %v2678_v57, %v2677_v44  ;;  %v12903_v24 = vpop.f32.mrb[222].mxu0 }
 0x410   :  { %10626 = vmatprep.subr.bf16.mxu1 %v14139_v17  ;;  %v2681_v17 = vmax.f32 %v2325_v13, 0.0  ;;  %v2328_v37 = vadd.f32 %v16074_v27, %v12903_v24  ;;  %v14164_v24 = vld [vmem:[#allocation9 + $0x7f0] ss:$8 sps:$4 sm:$0xff]  }
 0x411   :  { %9903 = vmatpush1.bf16.msra.mxu0 %v14134_v63  ;;  %v2319_v63 = vpop.f32.mrb[223].mxu0 }
 0x412   :  { %9904 = vmatprep.subr.bf16.mxu0 %v14142_v4  ;;  %v2679_v4 = vmax.f32 %v2317_v12, 0.0  ;;  %v2320_v9 = vadd.f32 %v16074_v27, %v2319_v63  ;;  %v2682_v60 = vmax.f32 %v2328_v37, 0.0  ;;  %v14167_v63 = vld [vmem:[#allocation9 + $0x1560] ss:$8 sps:$4 sm:$0xff]  }
 0x413   :  { %10627 = vmatpush1.bf16.msra.mxu1 %v14137_v7  ;;  %v14160_v7 = vld [vmem:[#allocation9 + $0x7e4] ss:$8 sps:$4 sm:$0xff]  }
 0x414   :  { %10628 = vmatprep.subr.bf16.mxu1 %v14145_v34  ;;  %v2680_v44 = vmax.f32 %v2320_v9, 0.0  ;;  %v16126_v23 = vpack.c.bf16 %v2682_v60, %v2681_v17  ;;  %v14163_v34 = vld [vmem:[#allocation9 + $0x1554] ss:$8 sps:$4 sm:$0xff]   ;;  %v14172_v17 = vld [vmem:[#allocation9 + $0x804] ss:$8 sps:$4 sm:$0xff]  }
 0x415   :  { %9905 = vmatpush1.bf16.msra.mxu0 %v14140_v8  ;;  %v14158_v8 = vld [vmem:[#allocation9 + $0x7e0] ss:$8 sps:$4 sm:$0xff]   ;;  %v14175_v9 = vld [vmem:[#allocation9 + $0x1574] ss:$8 sps:$4 sm:$0xff]  }
 0x416   :  { %10614 = vmatmul.mubr.bf16.gmra.mrb[4].mxu1 %v15984_v45  ;;  %9906 = vmatprep.subr.bf16.mxu0 %v14148_v42  ;;  %v14152_v45 = vld [vmem:[#allocation9 + $0x7d0] ss:$8 sps:$4 sm:$0xff]   ;;  %v16128_v35 = vpack.c.bf16 %v2680_v44, %v2679_v4  ;;  %v14166_v42 = vld [vmem:[#allocation9 + $0x7f4] ss:$8 sps:$4 sm:$0xff]  }
 0x417   :  { %10629 = vmatpush1.bf16.msra.mxu1 %v14143_v47  ;;  %10656 = vmatprep.mubr.bf16.mxu1 %v16018_v19  ;;  %v12906_v19 = vpop.f32.mrb[224].mxu0 }
 0x418   :  { %10630 = vmatprep.subr.bf16.mxu1 %v14151_v62  ;;  %v2341_v3 = vadd.f32 %v16074_v27, %v12906_v19  ;;  %v2332_v57 = vpop.f32.mrb[225].mxu0 }
 0x419   :  { %9907 = vmatpush1.bf16.msra.mxu0 %v14146_v55  ;;  %v2333_v39 = vadd.f32 %v16074_v27, %v2332_v57  ;;  %v12907_v47 = vpop.f32.mrb[226].mxu0 }
 0x41a   :  { %9908 = vmatprep.subr.bf16.mxu0 %v14154_v54  ;;  %v2685_v62 = vmax.f32 %v2341_v3, 0.0  ;;  %v2344_v13 = vadd.f32 %v16074_v27, %v12907_v47  ;;  %v2335_v55 = vpop.f32.mrb[227].mxu0  ;;  %v14173_v3 = vld [vmem:[#allocation9 + $0x1570] ss:$8 sps:$4 sm:$0xff]  }
 0x41b   :  { %10631 = vmatpush1.bf16.msra.mxu1 %v14149_v21  ;;  %v2683_v54 = vmax.f32 %v2333_v39, 0.0  ;;  %v2336_v12 = vadd.f32 %v16074_v27, %v2335_v55  ;;  %v12910_v4 = vpop.f32.mrb[228].mxu0  ;;  %v14181_v39 = vld [vmem:[#allocation9 + $0x1584] ss:$8 sps:$4 sm:$0xff]  }
 0x41c   :  { %10632 = vmatprep.subr.bf16.mxu1 %v14157_v58  ;;  %v2686_v21 = vmax.f32 %v2344_v13, 0.0  ;;  %v2357_v60 = vadd.f32 %v16074_v27, %v12910_v4  ;;  %v2348_v44 = vpop.f32.mrb[229].mxu0  ;;  %v14184_v55 = vld [vmem:[#allocation9 + $0x824] ss:$8 sps:$4 sm:$0xff]  }
 0x41d   :  { %9909 = vmatpush1.bf16.msra.mxu0 %v14152_v45  ;;  %v2684_v37 = vmax.f32 %v2336_v12, 0.0  ;;  %v2349_v19 = vadd.f32 %v16074_v27, %v2348_v44 }
 0x41e   :  { %9910 = vmatprep.subr.bf16.mxu0 %v14160_v7  ;;  %v16134_v58 = vpack.c.bf16 %v2686_v21, %v2685_v62  ;;  %v14170_v7 = vld [vmem:[#allocation9 + $0x800] ss:$8 sps:$4 sm:$0xff]   ;;  %v14176_v62 = vld [vmem:[#allocation9 + $0x810] ss:$8 sps:$4 sm:$0xff]  }
 0x41f   :  { %10633 = vmatpush1.bf16.msra.mxu1 %v14155_v56  ;;  %v16136_v45 = vpack.c.bf16 %v2684_v37, %v2683_v54  ;;  %v14178_v56 = vld [vmem:[#allocation9 + $0x814] ss:$8 sps:$4 sm:$0xff]   ;;  %v2687_v47 = vmax.f32 %v2349_v19, 0.0  ;;  %v14179_v54 = vld [vmem:[#allocation9 + $0x1580] ss:$8 sps:$4 sm:$0xff]  }
 0x420   :  { %10634 = vmatprep.subr.bf16.mxu1 %v14163_v34  ;;  %v12911_v34 = vpop.f32.mrb[230].mxu0  ;;  %v14182_v37 = vld [vmem:[#allocation9 + $0x820] ss:$8 sps:$4 sm:$0xff]   ;;  %v14193_v19 = vld [vmem:[#allocation9 + $0x15a4] ss:$8 sps:$4 sm:$0xff]  }
 0x421   :  { %9911 = vmatpush1.bf16.msra.mxu0 %v14158_v8  ;;  %v2689_v8 = vmax.f32 %v2357_v60, 0.0  ;;  %v2360_v57 = vadd.f32 %v16074_v27, %v12911_v34  ;;  %v14185_v60 = vld [vmem:[#allocation9 + $0x1590] ss:$8 sps:$4 sm:$0xff]  }
 0x422   :  { %9912 = vmatprep.subr.bf16.mxu0 %v14166_v42  ;;  %v2351_v42 = vpop.f32.mrb[231].mxu0 }
 0x423   :  { %10635 = vmatpush1.bf16.msra.mxu1 %v14161_v49  ;;  %v2352_v49 = vadd.f32 %v16074_v27, %v2351_v42  ;;  %v2690_v13 = vmax.f32 %v2360_v57, 0.0  ;;  %v14196_v42 = vld [vmem:[#allocation9 + $0x844] ss:$8 sps:$4 sm:$0xff]  }
 0x424   :  { %10636 = vmatprep.subr.bf16.mxu1 %v14169_v11 }
 0x425   :  { %9913 = vmatpush1.bf16.msra.mxu0 %v14164_v24  ;;  %v2688_v11 = vmax.f32 %v2352_v49, 0.0  ;;  %v16144_v12 = vpack.c.bf16 %v2690_v13, %v2689_v8  ;;  %v12914_v24 = vpop.f32.mrb[232].mxu0  ;;  %v14188_v8 = vld [vmem:[#allocation9 + $0x830] ss:$8 sps:$4 sm:$0xff]  }
 0x426   :  { %9935 = vmatprep.subr.bf16.mxu0 %v14172_v17  ;;  %v2373_v17 = vadd.f32 %v16074_v27, %v12914_v24 }
 0x427   :  { %10637 = vmatpush1.bf16.msra.mxu1 %v14167_v63  ;;  %v16146_v21 = vpack.c.bf16 %v2688_v11, %v2687_v47  ;;  %v14190_v63 = vld [vmem:[#allocation9 + $0x834] ss:$8 sps:$4 sm:$0xff]   ;;  %v14191_v47 = vld [vmem:[#allocation9 + $0x15a0] ss:$8 sps:$4 sm:$0xff]  }
 0x428   :  { %9915 = vmatmul.mubr.bf16.vlgmr.msra.gmra.mrb[0].mxu0 %v15569_v32  ;;  %10638 = vmatprep.subr.bf16.mxu1 %v14175_v9  ;;  %v14187_v32 = vld [vmem:[#allocation9 + $0x1594] ss:$8 sps:$4 sm:$0xff]   ;;  %v14194_v11 = vld [vmem:[#allocation9 + $0x840] ss:$8 sps:$4 sm:$0xff]  }
 0x429   :  { %9924 = vmatprep.mubr.bf16.mxu0 %v15583_v1  ;;  %9936 = vmatpush1.bf16.msra.mxu0 %v14170_v7  ;;  %v2364_v1 = vpop.f32.mrb[233].mxu0  ;;  %v2693_v7 = vmax.f32 %v2373_v17, 0.0  ;;  %v14197_v17 = vld [vmem:[#allocation9 + $0x15b0] ss:$8 sps:$4 sm:$0xff]  }
 0x42a   :  { %9937 = vmatprep.subr.bf16.mxu0 %v14178_v56  ;;  %v2365_v4 = vadd.f32 %v16074_v27, %v2364_v1  ;;  %v12915_v9 = vpop.f32.mrb[234].mxu0 }
 0x42b   :  { %10639 = vmatpush1.bf16.msra.mxu1 %v14173_v3  ;;  %v2376_v44 = vadd.f32 %v16074_v27, %v12915_v9  ;;  %v2367_v56 = vpop.f32.mrb[235].mxu0 }
 0x42c   :  { %10640 = vmatprep.subr.bf16.mxu1 %v14181_v39  ;;  %v2691_v34 = vmax.f32 %v2365_v4, 0.0  ;;  %v2368_v3 = vadd.f32 %v16074_v27, %v2367_v56  ;;  %v14205_v4 = vld [vmem:[#allocation9 + $0x15c4] ss:$8 sps:$4 sm:$0xff]  }
 0x42d   :  { %9938 = vmatpush1.bf16.msra.mxu0 %v14176_v62  ;;  %v2694_v57 = vmax.f32 %v2376_v44, 0.0  ;;  %v12918_v62 = vpop.f32.mrb[236].mxu0  ;;  %v14208_v56 = vld [vmem:[#allocation9 + $0x864] ss:$8 sps:$4 sm:$0xff]  }
 0x42e   :  { %9939 = vmatprep.subr.bf16.mxu0 %v14184_v55  ;;  %v2692_v39 = vmax.f32 %v2368_v3, 0.0  ;;  %v2389_v55 = vadd.f32 %v16074_v27, %v12918_v62 }
 0x42f   :  { %10641 = vmatpush1.bf16.msra.mxu1 %v14179_v54  ;;  %v16154_v49 = vpack.c.bf16 %v2694_v57, %v2693_v7  ;;  %v2380_v54 = vpop.f32.mrb[237].mxu0  ;;  %v14200_v7 = vld [vmem:[#allocation9 + $0x850] ss:$8 sps:$4 sm:$0xff]   ;;  %v14211_v57 = vld [vmem:[#allocation9 + $0x15d4] ss:$8 sps:$4 sm:$0xff]  }
 0x430   :  { %9925 = vmatmul.mubr.bf16.gmra.mrb[4].mxu0 %v15567_v29  ;;  %10642 = vmatprep.subr.bf16.mxu1 %v14187_v32  ;;  %v14199_v29 = vld [vmem:[#allocation9 + $0x15b4] ss:$8 sps:$4 sm:$0xff]   ;;  %v16156_v13 = vpack.c.bf16 %v2692_v39, %v2691_v34  ;;  %v2381_v24 = vadd.f32 %v16074_v27, %v2380_v54  ;;  %v12919_v32 = vpop.f32.mrb[238].mxu0  ;;  %v14203_v34 = vld [vmem:[#allocation9 + $0x15c0] ss:$8 sps:$4 sm:$0xff]  }
 0x431   :  { %9940 = vmatpush1.bf16.msra.mxu0 %v14182_v37  ;;  %9967 = vmatprep.mubr.bf16.mxu0 %v15617_v20  ;;  %v14202_v20 = vld [vmem:[#allocation9 + $0x854] ss:$8 sps:$4 sm:$0xff]   ;;  %v2697_v37 = vmax.f32 %v2389_v55, 0.0  ;;  %v2392_v1 = vadd.f32 %v16074_v27, %v12919_v32  ;;  %v14209_v54 = vld [vmem:[#allocation9 + $0x15d0] ss:$8 sps:$4 sm:$0xff]  }
 0x432   :  { %9941 = vmatprep.subr.bf16.mxu0 %v14190_v63  ;;  %v2383_v63 = vpop.f32.mrb[239].mxu0  ;;  %v2695_v9 = vmax.f32 %v2381_v24, 0.0 }
 0x433   :  { %10643 = vmatpush1.bf16.msra.mxu1 %v14185_v60  ;;  %v2384_v60 = vadd.f32 %v16074_v27, %v2383_v63  ;;  %v2698_v44 = vmax.f32 %v2392_v1, 0.0  ;;  %v14212_v63 = vld [vmem:[#allocation9 + $0x870] ss:$8 sps:$4 sm:$0xff]  }
 0x434   :  { %10644 = vmatprep.subr.bf16.mxu1 %v14193_v19 }
 0x435   :  { %9942 = vmatpush1.bf16.msra.mxu0 %v14188_v8  ;;  %v2696_v19 = vmax.f32 %v2384_v60, 0.0  ;;  %v16162_v3 = vpack.c.bf16 %v2698_v44, %v2697_v37  ;;  %v12922_v8 = vpop.f32.mrb[240].mxu0 }
 0x436   :  { %9943 = vmatprep.subr.bf16.mxu0 %v14196_v42  ;;  %v2405_v39 = vadd.f32 %v16074_v27, %v12922_v8  ;;  %v2396_v62 = vpop.f32.mrb[241].mxu0 }
 0x437   :  { %10645 = vmatpush1.bf16.msra.mxu1 %v14191_v47  ;;  %v16164_v42 = vpack.c.bf16 %v2696_v19, %v2695_v9  ;;  %v14206_v47 = vld [vmem:[#allocation9 + $0x860] ss:$8 sps:$4 sm:$0xff]   ;;  %v2397_v55 = vadd.f32 %v16074_v27, %v2396_v62  ;;  %v14220_v9 = vld [vmem:[#allocation9 + $0x884] ss:$8 sps:$4 sm:$0xff]   ;;  %v14223_v19 = vld [vmem:[#allocation9 + $0x15f4] ss:$8 sps:$4 sm:$0xff]  }
 0x438   :  { %10646 = vmatprep.subr.bf16.mxu1 %v14199_v29  ;;  %v14214_v29 = vld [vmem:[#allocation9 + $0x874] ss:$8 sps:$4 sm:$0xff]  }
 0x439   :  { %9944 = vmatpush1.bf16.msra.mxu0 %v14194_v11  ;;  %v12923_v11 = vpop.f32.mrb[242].mxu0  ;;  %v2699_v37 = vmax.f32 %v2397_v55, 0.0  ;;  %v14221_v55 = vld [vmem:[#allocation9 + $0x15f0] ss:$8 sps:$4 sm:$0xff]  }
 0x43a   :  { %9945 = vmatprep.subr.bf16.mxu0 %v14202_v20  ;;  %v2701_v20 = vmax.f32 %v2405_v39, 0.0  ;;  %v2408_v24 = vadd.f32 %v16074_v27, %v12923_v11  ;;  %v2399_v32 = vpop.f32.mrb[243].mxu0 }
 0x43b   :  { %10647 = vmatpush1.bf16.msra.mxu1 %v14197_v17  ;;  %v14217_v17 = vld [vmem:[#allocation9 + $0x15e4] ss:$8 sps:$4 sm:$0xff]   ;;  %v2400_v1 = vadd.f32 %v16074_v27, %v2399_v32 }
 0x43c   :  { %10648 = vmatprep.subr.bf16.mxu1 %v14205_v4  ;;  %v2702_v4 = vmax.f32 %v2408_v24, 0.0  ;;  %v14229_v24 = vld [vmem:[#allocation9 + $0x1604] ss:$8 sps:$4 sm:$0xff]  }
 0x43d   :  { %9946 = vmatpush1.bf16.msra.mxu0 %v14200_v7  ;;  %v2700_v60 = vmax.f32 %v2400_v1, 0.0  ;;  %v14215_v7 = vld [vmem:[#allocation9 + $0x15e0] ss:$8 sps:$4 sm:$0xff]  }
 0x43e   :  { %9947 = vmatprep.subr.bf16.mxu0 %v14208_v56  ;;  %v16170_v44 = vpack.c.bf16 %v2702_v4, %v2701_v20  ;;  %v12926_v56 = vpop.f32.mrb[244].mxu0 }
 0x43f   :  { %10649 = vmatpush1.bf16.msra.mxu1 %v14203_v34  ;;  %v16172_v34 = vpack.c.bf16 %v2700_v60, %v2699_v37  ;;  %v2421_v8 = vadd.f32 %v16074_v27, %v12926_v56  ;;  %v2412_v39 = vpop.f32.mrb[245].mxu0  ;;  %v14224_v37 = vld [vmem:[#allocation9 + $0x890] ss:$8 sps:$4 sm:$0xff]   ;;  %v14235_v56 = vld [vmem:[#allocation9 + $0x1614] ss:$8 sps:$4 sm:$0xff]  }
 0x440   :  { %10650 = vmatprep.subr.bf16.mxu1 %v14211_v57  ;;  %v14218_v57 = vld [vmem:[#allocation9 + $0x880] ss:$8 sps:$4 sm:$0xff]   ;;  %v2413_v62 = vadd.f32 %v16074_v27, %v2412_v39 }
 0x441   :  { %9948 = vmatpush1.bf16.msra.mxu0 %v14206_v47  ;;  %v14226_v47 = vld [vmem:[#allocation9 + $0x894] ss:$8 sps:$4 sm:$0xff]   ;;  %v2705_v11 = vmax.f32 %v2421_v8, 0.0  ;;  %v14230_v39 = vld [vmem:[#allocation9 + $0x8a0] ss:$8 sps:$4 sm:$0xff]  }
 0x442   :  { %9949 = vmatprep.subr.bf16.mxu0 %v14214_v29  ;;  %v12927_v29 = vpop.f32.mrb[246].mxu0  ;;  %v2703_v32 = vmax.f32 %v2413_v62, 0.0 }
 0x443   :  { %10651 = vmatpush1.bf16.msra.mxu1 %v14209_v54  ;;  %v2424_v54 = vadd.f32 %v16074_v27, %v12927_v29  ;;  %v2415_v20 = vpop.f32.mrb[247].mxu0 }
 0x444   :  { %10652 = vmatprep.subr.bf16.mxu1 %v14217_v17  ;;  %v2416_v17 = vadd.f32 %v16074_v27, %v2415_v20 }
 0x445   :  { %9950 = vmatpush1.bf16.msra.mxu0 %v14212_v63  ;;  %v2706_v1 = vmax.f32 %v2424_v54, 0.0  ;;  %v14232_v63 = vld [vmem:[#allocation9 + $0x8a4] ss:$8 sps:$4 sm:$0xff]  }
 0x446   :  { %9951 = vmatprep.subr.bf16.mxu0 %v14220_v9  ;;  %v2704_v4 = vmax.f32 %v2416_v17, 0.0  ;;  %v14227_v9 = vld [vmem:[#allocation9 + $0x1600] ss:$8 sps:$4 sm:$0xff]  }
 0x447   :  { %10653 = vmatpush1.bf16.msra.mxu1 %v14215_v7  ;;  %v16178_v60 = vpack.c.bf16 %v2706_v1, %v2705_v11  ;;  %v12930_v7 = vpop.f32.mrb[248].mxu0  ;;  %v14244_v1 = vld [vmem:[#allocation9 + $0x8c4] ss:$8 sps:$4 sm:$0xff]  }
 0x448   :  { %10654 = vmatprep.subr.bf16.mxu1 %v14223_v19  ;;  %v16180_v8 = vpack.c.bf16 %v2704_v4, %v2703_v32  ;;  %v2437_v19 = vadd.f32 %v16074_v27, %v12930_v7  ;;  %v2428_v62 = vpop.f32.mrb[249].mxu0  ;;  %v14239_v4 = vld [vmem:[#allocation9 + $0x1620] ss:$8 sps:$4 sm:$0xff]   ;;  %v14247_v7 = vld [vmem:[#allocation9 + $0x1634] ss:$8 sps:$4 sm:$0xff]  }
 0x449   :  { %9952 = vmatpush1.bf16.msra.mxu0 %v14218_v57  ;;  %v14238_v57 = vld [vmem:[#allocation9 + $0x8b4] ss:$8 sps:$4 sm:$0xff]   ;;  %v12931_v29 = vpop.f32.mrb[250].mxu0 }
 0x44a   :  { %9953 = vmatprep.subr.bf16.mxu0 %v14226_v47  ;;  %v2429_v47 = vadd.f32 %v16074_v27, %v2428_v62  ;;  %v2709_v11 = vmax.f32 %v2437_v19, 0.0  ;;  %v2440_v54 = vadd.f32 %v16074_v27, %v12931_v29  ;;  %v2431_v20 = vpop.f32.mrb[251].mxu0  ;;  %v14242_v62 = vld [vmem:[#allocation9 + $0x8c0] ss:$8 sps:$4 sm:$0xff]  }
 0x44b   :  { %10655 = vmatpush1.bf16.msra.mxu1 %v14221_v55  ;;  %v14233_v55 = vld [vmem:[#allocation9 + $0x1610] ss:$8 sps:$4 sm:$0xff]   ;;  %v2432_v17 = vadd.f32 %v16074_v27, %v2431_v20 }
 0x44c   :  { %10677 = vmatprep.subr.bf16.mxu1 %v14229_v24  ;;  %v14241_v24 = vld [vmem:[#allocation9 + $0x1624] ss:$8 sps:$4 sm:$0xff]   ;;  %v2707_v32 = vmax.f32 %v2429_v47, 0.0 }
 0x44d   :  { %9954 = vmatpush1.bf16.msra.mxu0 %v14224_v37  ;;  %v2710_v37 = vmax.f32 %v2440_v54, 0.0 }
 0x44e   :  { %10657 = vmatmul.mubr.bf16.vlgmr.msra.gmra.mrb[0].mxu1 %v16010_v28  ;;  %9955 = vmatprep.subr.bf16.mxu0 %v14232_v63  ;;  %v14236_v28 = vld [vmem:[#allocation9 + $0x8b0] ss:$8 sps:$4 sm:$0xff]   ;;  %v2708_v63 = vmax.f32 %v2432_v17, 0.0 }
 0x44f   :  { %10666 = vmatprep.mubr.bf16.mxu1 %v16016_v38  ;;  %10678 = vmatpush1.bf16.msra.mxu1 %v14227_v9  ;;  %v16188_v38 = vpack.c.bf16 %v2710_v37, %v2709_v11  ;;  %v12934_v9 = vpop.f32.mrb[252].mxu0  ;;  %v14256_v37 = vld [vmem:[#allocation9 + $0x8e4] ss:$8 sps:$4 sm:$0xff]  }
 0x450   :  { %10679 = vmatprep.subr.bf16.mxu1 %v14235_v56  ;;  %v16190_v19 = vpack.c.bf16 %v2708_v63, %v2707_v32  ;;  %v2453_v56 = vadd.f32 %v16074_v27, %v12934_v9  ;;  %v2444_v47 = vpop.f32.mrb[253].mxu0  ;;  %v14251_v63 = vld [vmem:[#allocation9 + $0x1640] ss:$8 sps:$4 sm:$0xff]  }
 0x451   :  { %9956 = vmatpush1.bf16.msra.mxu0 %v14230_v39  ;;  %v14250_v39 = vld [vmem:[#allocation9 + $0x8d4] ss:$8 sps:$4 sm:$0xff]   ;;  %v12935_v29 = vpop.f32.mrb[254].mxu0 }
 0x452   :  { %9957 = vmatprep.subr.bf16.mxu0 %v14238_v57  ;;  %v2445_v57 = vadd.f32 %v16074_v27, %v2444_v47  ;;  %v2713_v11 = vmax.f32 %v2453_v56, 0.0  ;;  %v2456_v54 = vadd.f32 %v16074_v27, %v12935_v29  ;;  %v2447_v20 = vpop.f32.mrb[255].mxu0  ;;  %v14262_v56 = vld [vmem:[#allocation9 + $0x8f4] ss:$8 sps:$4 sm:$0xff]   ;;  %v14260_v47 = vld [vmem:[#allocation9 + $0x8f0] ss:$8 sps:$4 sm:$0xff]  }
 0x453   :  { %10680 = vmatpush1.bf16.msra.mxu1 %v14233_v55  ;;  %v14245_v55 = vld [vmem:[#allocation9 + $0x1630] ss:$8 sps:$4 sm:$0xff]   ;;  %v2448_v17 = vadd.f32 %v16074_v27, %v2447_v20  ;;  %v14271_v29 = vld [vmem:[#allocation9 + $0x1674] ss:$8 sps:$4 sm:$0xff]   ;;  %v14277_v20 = vld [vmem:[#allocation9 + $0x1684] ss:$8 sps:$4 sm:$0xff]  }
 0x454   :  { %10681 = vmatprep.subr.bf16.mxu1 %v14241_v24  ;;  %v14253_v24 = vld [vmem:[#allocation9 + $0x1644] ss:$8 sps:$4 sm:$0xff]   ;;  %v2711_v32 = vmax.f32 %v2445_v57, 0.0  ;;  %v14257_v27 = vld [vmem:[#allocation9 + $0x1650] ss:$8 sps:$4 sm:$0xff]  }
 0x455   :  { %9958 = vmatpush1.bf16.msra.mxu0 %v14236_v28  ;;  %v2714_v28 = vmax.f32 %v2456_v54, 0.0  ;;  %v14263_v57 = vld [vmem:[#allocation9 + $0x1660] ss:$8 sps:$4 sm:$0xff]   ;;  %v14269_v54 = vld [vmem:[#allocation9 + $0x1670] ss:$8 sps:$4 sm:$0xff]  }
 0x456   :  { %10667 = vmatmul.mubr.bf16.gmra.mrb[4].mxu1 %v16008_v46  ;;  %9959 = vmatprep.subr.bf16.mxu0 %v14244_v1  ;;  %v14248_v46 = vld [vmem:[#allocation9 + $0x8d0] ss:$8 sps:$4 sm:$0xff]   ;;  %v2712_v1 = vmax.f32 %v2448_v17, 0.0  ;;  %v14275_v17 = vld [vmem:[#allocation9 + $0x1680] ss:$8 sps:$4 sm:$0xff]  }
 0x457   :  { %10682 = vmatpush1.bf16.msra.mxu1 %v14239_v4  ;;  %10709 = vmatprep.mubr.bf16.mxu1 %v16034_v50  ;;  %v16198_v4 = vpack.c.bf16 %v2714_v28, %v2713_v11  ;;  %v14259_v50 = vld [vmem:[#allocation9 + $0x1654] ss:$8 sps:$4 sm:$0xff]   ;;  %v14278_v28 = vld [vmem:[#allocation9 + $0x920] ss:$8 sps:$4 sm:$0xff]  }
 0x458   :  { %10683 = vmatprep.subr.bf16.mxu1 %v14247_v7  ;;  %v16200_v9 = vpack.c.bf16 %v2712_v1, %v2711_v32  ;;  %v14254_v7 = vld [vmem:[#allocation9 + $0x8e0] ss:$8 sps:$4 sm:$0xff]   ;;  %v14274_v11 = vld [vmem:[#allocation9 + $0x914] ss:$8 sps:$4 sm:$0xff]   ;;  %v14280_v32 = vld [vmem:[#allocation9 + $0x924] ss:$8 sps:$4 sm:$0xff]  }
 0x459   :  { %9960 = vmatpush1.bf16.msra.mxu0 %v14242_v62  ;;  %v14265_v62 = vld [vmem:[#allocation9 + $0x1664] ss:$8 sps:$4 sm:$0xff]   ;;  %v14281_v1 = vld [vmem:[#allocation9 + $0x1690] ss:$8 sps:$4 sm:$0xff]  }
 0x45a   :  { %9961 = vmatprep.subr.bf16.mxu0 %v14250_v39  ;;  %v14268_v39 = vld [vmem:[#allocation9 + $0x904] ss:$8 sps:$4 sm:$0xff]  }
 0x45b   :  { %10684 = vmatpush1.bf16.msra.mxu1 %v14245_v55  ;;  %v14266_v55 = vld [vmem:[#allocation9 + $0x900] ss:$8 sps:$4 sm:$0xff]  }
 0x45c   :  { %10685 = vmatprep.subr.bf16.mxu1 %v14253_v24  ;;  %v14272_v24 = vld [vmem:[#allocation9 + $0x910] ss:$8 sps:$4 sm:$0xff]  }
 0x45d   :  { %9962 = vmatpush1.bf16.msra.mxu0 %v14248_v46  ;;  %v14283_v46 = vld [vmem:[#allocation9 + $0x1694] ss:$8 sps:$4 sm:$0xff]  }
 0x45e   :  { %9963 = vmatprep.subr.bf16.mxu0 %v14256_v37  ;;  %v14286_v37 = vld [vmem:[#allocation9 + $0x934] ss:$8 sps:$4 sm:$0xff]  }
 0x45f   :  { %10686 = vmatpush1.bf16.msra.mxu1 %v14251_v63  ;;  %v14292_v63 = vld [vmem:[#allocation9 + $0x944] ss:$8 sps:$4 sm:$0xff]  }
 0x460   :  { %10687 = vmatprep.subr.bf16.mxu1 %v14259_v50  ;;  %v14287_v50 = vld [vmem:[#allocation9 + $0x16a0] ss:$8 sps:$4 sm:$0xff]  }
 0x461   :  { %9964 = vmatpush1.bf16.msra.mxu0 %v14254_v7  ;;  %v14295_v7 = vld [vmem:[#allocation9 + $0x16b4] ss:$8 sps:$4 sm:$0xff]  }
 0x462   :  { %9965 = vmatprep.subr.bf16.mxu0 %v14262_v56  ;;  %v14290_v56 = vld [vmem:[#allocation9 + $0x940] ss:$8 sps:$4 sm:$0xff]  }
 0x463   :  { %10688 = vmatpush1.bf16.msra.mxu1 %v14257_v27  ;;  %v14298_v27 = vld [vmem:[#allocation9 + $0x954] ss:$8 sps:$4 sm:$0xff]  }
 0x464   :  { %10689 = vmatprep.subr.bf16.mxu1 %v14265_v62  ;;  %v14293_v62 = vld [vmem:[#allocation9 + $0x16b0] ss:$8 sps:$4 sm:$0xff]  }
 0x465   :  { %9966 = vmatpush1.bf16.msra.mxu0 %v14260_v47  ;;  %v14296_v47 = vld [vmem:[#allocation9 + $0x950] ss:$8 sps:$4 sm:$0xff]  }
 0x466   :  { %9988 = vmatprep.subr.bf16.mxu0 %v14268_v39  ;;  %v14304_v39 = vld [vmem:[#allocation9 + $0x964] ss:$8 sps:$4 sm:$0xff]  }
 0x467   :  { %10690 = vmatpush1.bf16.msra.mxu1 %v14263_v57  ;;  %v14307_v57 = vld [vmem:[#allocation9 + $0x16d4] ss:$8 sps:$4 sm:$0xff]  }
 0x468   :  { %9968 = vmatmul.mubr.bf16.vlgmr.msra.gmra.mrb[0].mxu0 %v15601_v43  ;;  %10691 = vmatprep.subr.bf16.mxu1 %v14271_v29  ;;  %v14289_v43 = vld [vmem:[#allocation9 + $0x16a4] ss:$8 sps:$4 sm:$0xff]   ;;  %v14302_v29 = vld [vmem:[#allocation9 + $0x960] ss:$8 sps:$4 sm:$0xff]  }
 0x469   :  { %9977 = vmatprep.mubr.bf16.mxu0 %v15615_v18  ;;  %9989 = vmatpush1.bf16.msra.mxu0 %v14266_v55  ;;  %v14284_v18 = vld [vmem:[#allocation9 + $0x930] ss:$8 sps:$4 sm:$0xff]   ;;  %v14310_v55 = vld [vmem:[#allocation9 + $0x974] ss:$8 sps:$4 sm:$0xff]  }
 0x46a   :  { %9990 = vmatprep.subr.bf16.mxu0 %v14274_v11  ;;  %v14305_v11 = vld [vmem:[#allocation9 + $0x16d0] ss:$8 sps:$4 sm:$0xff]  }
 0x46b   :  { %10692 = vmatpush1.bf16.msra.mxu1 %v14269_v54  ;;  %v14313_v54 = vld [vmem:[#allocation9 + $0x16e4] ss:$8 sps:$4 sm:$0xff]  }
 0x46c   :  { %10693 = vmatprep.subr.bf16.mxu1 %v14277_v20  ;;  %v14308_v20 = vld [vmem:[#allocation9 + $0x970] ss:$8 sps:$4 sm:$0xff]  }
 0x46d   :  { %9991 = vmatpush1.bf16.msra.mxu0 %v14272_v24  ;;  %v14316_v24 = vld [vmem:[#allocation9 + $0x984] ss:$8 sps:$4 sm:$0xff]  }
 0x46e   :  { %9992 = vmatprep.subr.bf16.mxu0 %v14280_v32  ;;  %v14311_v32 = vld [vmem:[#allocation9 + $0x16e0] ss:$8 sps:$4 sm:$0xff]  }
 0x46f   :  { %10694 = vmatpush1.bf16.msra.mxu1 %v14275_v17  ;;  %v14319_v17 = vld [vmem:[#allocation9 + $0x16f4] ss:$8 sps:$4 sm:$0xff]  }
 0x470   :  { %9978 = vmatmul.mubr.bf16.gmra.mrb[4].mxu0 %v15599_v41  ;;  %10695 = vmatprep.subr.bf16.mxu1 %v14283_v46  ;;  %v14301_v41 = vld [vmem:[#allocation9 + $0x16c4] ss:$8 sps:$4 sm:$0xff]   ;;  %v14314_v46 = vld [vmem:[#allocation9 + $0x980] ss:$8 sps:$4 sm:$0xff]  }
 0x471   :  { %9993 = vmatpush1.bf16.msra.mxu0 %v14278_v28  ;;  %10020 = vmatprep.mubr.bf16.mxu0 %v15649_v53  ;;  %v14299_v53 = vld [vmem:[#allocation9 + $0x16c0] ss:$8 sps:$4 sm:$0xff]   ;;  %v14322_v28 = vld [vmem:[#allocation9 + $0x994] ss:$8 sps:$4 sm:$0xff]  }
 0x472   :  { %9994 = vmatprep.subr.bf16.mxu0 %v14286_v37  ;;  %v14317_v37 = vld [vmem:[#allocation9 + $0x16f0] ss:$8 sps:$4 sm:$0xff]  }
 0x473   :  { %10696 = vmatpush1.bf16.msra.mxu1 %v14281_v1  ;;  %v14325_v1 = vld [vmem:[#allocation9 + $0x1704] ss:$8 sps:$4 sm:$0xff]  }
 0x474   :  { %10697 = vmatprep.subr.bf16.mxu1 %v14289_v43  ;;  %v14320_v43 = vld [vmem:[#allocation9 + $0x990] ss:$8 sps:$4 sm:$0xff]  }
 0x475   :  { %9995 = vmatpush1.bf16.msra.mxu0 %v14284_v18  ;;  %v14328_v18 = vld [vmem:[#allocation9 + $0x9a4] ss:$8 sps:$4 sm:$0xff]  }
 0x476   :  { %9996 = vmatprep.subr.bf16.mxu0 %v14292_v63  ;;  %v14323_v63 = vld [vmem:[#allocation9 + $0x1700] ss:$8 sps:$4 sm:$0xff]  }
 0x477   :  { %10698 = vmatpush1.bf16.msra.mxu1 %v14287_v50  ;;  %v14331_v50 = vld [vmem:[#allocation9 + $0x1714] ss:$8 sps:$4 sm:$0xff]  }
 0x478   :  { %10699 = vmatprep.subr.bf16.mxu1 %v14295_v7  ;;  %v14326_v7 = vld [vmem:[#allocation9 + $0x9a0] ss:$8 sps:$4 sm:$0xff]  }
 0x479   :  { %9997 = vmatpush1.bf16.msra.mxu0 %v14290_v56  ;;  %v14334_v56 = vld [vmem:[#allocation9 + $0x9b4] ss:$8 sps:$4 sm:$0xff]  }
 0x47a   :  { %9998 = vmatprep.subr.bf16.mxu0 %v14298_v27  ;;  %v14329_v27 = vld [vmem:[#allocation9 + $0x1710] ss:$8 sps:$4 sm:$0xff]  }
 0x47b   :  { %10700 = vmatpush1.bf16.msra.mxu1 %v14293_v62  ;;  %v14337_v62 = vld [vmem:[#allocation9 + $0x1724] ss:$8 sps:$4 sm:$0xff]  }
 0x47c   :  { %10701 = vmatprep.subr.bf16.mxu1 %v14301_v41  ;;  %v14332_v41 = vld [vmem:[#allocation9 + $0x9b0] ss:$8 sps:$4 sm:$0xff]  }
 0x47d   :  { %9999 = vmatpush1.bf16.msra.mxu0 %v14296_v47  ;;  %v14340_v47 = vld [vmem:[#allocation9 + $0x9c4] ss:$8 sps:$4 sm:$0xff]  }
 0x47e   :  { %10000 = vmatprep.subr.bf16.mxu0 %v14304_v39  ;;  %v14335_v39 = vld [vmem:[#allocation9 + $0x1720] ss:$8 sps:$4 sm:$0xff]  }
 0x47f   :  { %10702 = vmatpush1.bf16.msra.mxu1 %v14299_v53  ;;  %v14343_v53 = vld [vmem:[#allocation9 + $0x1734] ss:$8 sps:$4 sm:$0xff]  }
 0x480   :  { %10703 = vmatprep.subr.bf16.mxu1 %v14307_v57  ;;  %v14338_v57 = vld [vmem:[#allocation9 + $0x9c0] ss:$8 sps:$4 sm:$0xff]  }
 0x481   :  { %10001 = vmatpush1.bf16.msra.mxu0 %v14302_v29  ;;  %v14349_v29 = vld [vmem:[#allocation9 + $0x1744] ss:$8 sps:$4 sm:$0xff]  }
 0x482   :  { %10002 = vmatprep.subr.bf16.mxu0 %v14310_v55  ;;  %v14344_v55 = vld [vmem:[#allocation9 + $0x9d0] ss:$8 sps:$4 sm:$0xff]  }
 0x483   :  { %10704 = vmatpush1.bf16.msra.mxu1 %v14305_v11  ;;  %v14352_v11 = vld [vmem:[#allocation9 + $0x9e4] ss:$8 sps:$4 sm:$0xff]  }
 0x484   :  { %10705 = vmatprep.subr.bf16.mxu1 %v14313_v54  ;;  %v14347_v54 = vld [vmem:[#allocation9 + $0x1740] ss:$8 sps:$4 sm:$0xff]  }
 0x485   :  { %10003 = vmatpush1.bf16.msra.mxu0 %v14308_v20  ;;  %v14355_v20 = vld [vmem:[#allocation9 + $0x1754] ss:$8 sps:$4 sm:$0xff]  }
 0x486   :  { %10004 = vmatprep.subr.bf16.mxu0 %v14316_v24  ;;  %v14350_v24 = vld [vmem:[#allocation9 + $0x9e0] ss:$8 sps:$4 sm:$0xff]  }
 0x487   :  { %10706 = vmatpush1.bf16.msra.mxu1 %v14311_v32  ;;  %v14353_v32 = vld [vmem:[#allocation9 + $0x1750] ss:$8 sps:$4 sm:$0xff]  }
 0x488   :  { %10707 = vmatprep.subr.bf16.mxu1 %v14319_v17  ;;  %v14361_v17 = vld [vmem:[#allocation9 + $0x1764] ss:$8 sps:$4 sm:$0xff]  }
 0x489   :  { %10005 = vmatpush1.bf16.msra.mxu0 %v14314_v46  ;;  %v14364_v46 = vld [vmem:[#allocation9 + $0xa04] ss:$8 sps:$4 sm:$0xff]  }
 0x48a   :  { %10006 = vmatprep.subr.bf16.mxu0 %v14322_v28  ;;  %v14359_v28 = vld [vmem:[#allocation9 + $0x1760] ss:$8 sps:$4 sm:$0xff]  }
 0x48b   :  { %10708 = vmatpush1.bf16.msra.mxu1 %v14317_v37  ;;  %v14367_v37 = vld [vmem:[#allocation9 + $0x1774] ss:$8 sps:$4 sm:$0xff]  }
 0x48c   :  { %10730 = vmatprep.subr.bf16.mxu1 %v14325_v1  ;;  %v14362_v1 = vld [vmem:[#allocation9 + $0xa00] ss:$8 sps:$4 sm:$0xff]  }
 0x48d   :  { %10007 = vmatpush1.bf16.msra.mxu0 %v14320_v43  ;;  %v14370_v43 = vld [vmem:[#allocation9 + $0xa14] ss:$8 sps:$4 sm:$0xff]  }
 0x48e   :  { %10710 = vmatmul.mubr.bf16.vlgmr.msra.gmra.mrb[0].mxu1 %v16026_v51  ;;  %10008 = vmatprep.subr.bf16.mxu0 %v14328_v18  ;;  %v14346_v51 = vld [vmem:[#allocation9 + $0x9d4] ss:$8 sps:$4 sm:$0xff]   ;;  %v14365_v18 = vld [vmem:[#allocation9 + $0x1770] ss:$8 sps:$4 sm:$0xff]  }
 0x48f   :  { %10719 = vmatprep.mubr.bf16.mxu1 %v16032_v15  ;;  %10731 = vmatpush1.bf16.msra.mxu1 %v14323_v63  ;;  %v14341_v15 = vld [vmem:[#allocation9 + $0x1730] ss:$8 sps:$4 sm:$0xff]  }
 0x490   :  { %10732 = vmatprep.subr.bf16.mxu1 %v14331_v50  ;;  %v16330_v63 = vld [vmem:[#allocation17_spill] sm:$0xff] }
 0x491   :  { %10009 = vmatpush1.bf16.msra.mxu0 %v14326_v7  ;;  %v14373_v50 = vld [vmem:[#allocation9 + $0x1784] ss:$8 sps:$4 sm:$0xff]   ;;  %v16331_v7 = vld [vmem:[#allocation18_spill] sm:$0xff] }
 0x492   :  { %10010 = vmatprep.subr.bf16.mxu0 %v14334_v56  ;;  %v14368_v56 = vld [vmem:[#allocation9 + $0xa10] ss:$8 sps:$4 sm:$0xff]  }
 0x493   :  { %10733 = vmatpush1.bf16.msra.mxu1 %v14329_v27  ;;  %v14376_v27 = vld [vmem:[#allocation9 + $0xa24] ss:$8 sps:$4 sm:$0xff]  }
 0x494   :  { %10734 = vmatprep.subr.bf16.mxu1 %v14337_v62  ;;  %v14371_v62 = vld [vmem:[#allocation9 + $0x1780] ss:$8 sps:$4 sm:$0xff]  }
 0x495   :  { %10011 = vmatpush1.bf16.msra.mxu0 %v14332_v41  ;;  %v14379_v41 = vld [vmem:[#allocation9 + $0x1794] ss:$8 sps:$4 sm:$0xff]  }
 0x496   :  { %10720 = vmatmul.mubr.bf16.gmra.mrb[4].mxu1 %v16024_v31  ;;  %10012 = vmatprep.subr.bf16.mxu0 %v14340_v47  ;;  %v14358_v31 = vld [vmem:[#allocation9 + $0x9f4] ss:$8 sps:$4 sm:$0xff]   ;;  %v14374_v47 = vld [vmem:[#allocation9 + $0xa20] ss:$8 sps:$4 sm:$0xff]  }
 0x497   :  { %10735 = vmatpush1.bf16.msra.mxu1 %v14335_v39  ;;  %10762 = vmatprep.mubr.bf16.mxu1 %v16054_v52  ;;  %v14356_v52 = vld [vmem:[#allocation9 + $0x9f0] ss:$8 sps:$4 sm:$0xff]   ;;  %v14382_v39 = vld [vmem:[#allocation9 + $0xa34] ss:$8 sps:$4 sm:$0xff]  }
 0x498   :  { %10736 = vmatprep.subr.bf16.mxu1 %v14343_v53  ;;  %v14377_v53 = vld [vmem:[#allocation9 + $0x1790] ss:$8 sps:$4 sm:$0xff]  }
 0x499   :  { %10013 = vmatpush1.bf16.msra.mxu0 %v14338_v57  ;;  %v16332_v57 = vld [vmem:[#allocation16_spill] sm:$0xff] }
 0x49a   :  { %10014 = vmatprep.subr.bf16.mxu0 %v14346_v51  ;;  %v14385_v51 = vld [vmem:[#allocation9 + $0x17a4] ss:$8 sps:$4 sm:$0xff]  }
 0x49b   :  { %10737 = vmatpush1.bf16.msra.mxu1 %v14341_v15  ;;  %v16333_v15 = vld [vmem:[#allocation22_spill] sm:$0xff] }
 0x49c   :  { %10738 = vmatprep.subr.bf16.mxu1 %v14349_v29  ;;  %v14380_v29 = vld [vmem:[#allocation9 + $0xa30] ss:$8 sps:$4 sm:$0xff]  }
 0x49d   :  { %10015 = vmatpush1.bf16.msra.mxu0 %v14344_v55  ;;  %v14388_v55 = vld [vmem:[#allocation9 + $0xa44] ss:$8 sps:$4 sm:$0xff]  }
 0x49e   :  { %10016 = vmatprep.subr.bf16.mxu0 %v14352_v11  ;;  %v14383_v11 = vld [vmem:[#allocation9 + $0x17a0] ss:$8 sps:$4 sm:$0xff]  }
 0x49f   :  { %10739 = vmatpush1.bf16.msra.mxu1 %v14347_v54  ;;  %v14391_v54 = vld [vmem:[#allocation9 + $0x17b4] ss:$8 sps:$4 sm:$0xff]  }
 0x4a0   :  { %10740 = vmatprep.subr.bf16.mxu1 %v14355_v20  ;;  %v14386_v20 = vld [vmem:[#allocation9 + $0xa40] ss:$8 sps:$4 sm:$0xff]  }
 0x4a1   :  { %10017 = vmatpush1.bf16.msra.mxu0 %v14350_v24  ;;  %v14394_v24 = vld [vmem:[#allocation9 + $0xa54] ss:$8 sps:$4 sm:$0xff]  }
 0x4a2   :  { %10018 = vmatprep.subr.bf16.mxu0 %v14358_v31  ;;  %v14389_v31 = vld [vmem:[#allocation9 + $0x17b0] ss:$8 sps:$4 sm:$0xff]  }
 0x4a3   :  { %10741 = vmatpush1.bf16.msra.mxu1 %v14353_v32  ;;  %v14397_v32 = vld [vmem:[#allocation9 + $0x17c4] ss:$8 sps:$4 sm:$0xff]  }
 0x4a4   :  { %10742 = vmatprep.subr.bf16.mxu1 %v14361_v17  ;;  %v14392_v17 = vld [vmem:[#allocation9 + $0xa50] ss:$8 sps:$4 sm:$0xff]  }
 0x4a5   :  { %10019 = vmatpush1.bf16.msra.mxu0 %v14356_v52  ;;  %v14400_v52 = vld [vmem:[#allocation9 + $0xa64] ss:$8 sps:$4 sm:$0xff]  }
 0x4a6   :  { %10041 = vmatprep.subr.bf16.mxu0 %v14364_v46  ;;  %v14395_v46 = vld [vmem:[#allocation9 + $0x17c0] ss:$8 sps:$4 sm:$0xff]  }
 0x4a7   :  { %10743 = vmatpush1.bf16.msra.mxu1 %v14359_v28  ;;  %v14403_v28 = vld [vmem:[#allocation9 + $0x17d4] ss:$8 sps:$4 sm:$0xff]  }
 0x4a8   :  { %10021 = vmatmul.mubr.bf16.vlgmr.msra.gmra.mrb[0].mxu0 %v16330_v63  ;;  %10744 = vmatprep.subr.bf16.mxu1 %v14367_v37  ;;  %v14398_v37 = vld [vmem:[#allocation9 + $0xa60] ss:$8 sps:$4 sm:$0xff]   ;;  %v14404_v63 = vld [vmem:[#allocation9 + $0xa70] ss:$8 sps:$4 sm:$0xff]  }
 0x4a9   :  { %10030 = vmatprep.mubr.bf16.mxu0 %v16331_v7  ;;  %10042 = vmatpush1.bf16.msra.mxu0 %v14362_v1  ;;  %v14406_v1 = vld [vmem:[#allocation9 + $0xa74] ss:$8 sps:$4 sm:$0xff]   ;;  %v14407_v7 = vld [vmem:[#allocation9 + $0x17e0] ss:$8 sps:$4 sm:$0xff]  }
 0x4aa   :  { %10043 = vmatprep.subr.bf16.mxu0 %v14370_v43  ;;  %v14401_v43 = vld [vmem:[#allocation9 + $0x17d0] ss:$8 sps:$4 sm:$0xff]  }
 0x4ab   :  { %10745 = vmatpush1.bf16.msra.mxu1 %v14365_v18  ;;  %v14409_v18 = vld [vmem:[#allocation9 + $0x17e4] ss:$8 sps:$4 sm:$0xff]  }
 0x4ac   :  { %10746 = vmatprep.subr.bf16.mxu1 %v14373_v50  ;;  %v14412_v50 = vld [vmem:[#allocation9 + $0xa84] ss:$8 sps:$4 sm:$0xff]  }
 0x4ad   :  { %10044 = vmatpush1.bf16.msra.mxu0 %v14368_v56  ;;  %v14415_v56 = vld [vmem:[#allocation9 + $0x17f4] ss:$8 sps:$4 sm:$0xff]  }
 0x4ae   :  { %10045 = vmatprep.subr.bf16.mxu0 %v14376_v27  ;;  %v14410_v27 = vld [vmem:[#allocation9 + $0xa80] ss:$8 sps:$4 sm:$0xff]  }
 0x4af   :  { %10747 = vmatpush1.bf16.msra.mxu1 %v14371_v62  ;;  %v14418_v62 = vld [vmem:[#allocation9 + $0xa94] ss:$8 sps:$4 sm:$0xff]  }
 0x4b0   :  { %10031 = vmatmul.mubr.bf16.gmra.mrb[4].mxu0 %v16332_v57  ;;  %10748 = vmatprep.subr.bf16.mxu1 %v14379_v41  ;;  %v14413_v41 = vld [vmem:[#allocation9 + $0x17f0] ss:$8 sps:$4 sm:$0xff]   ;;  %v14419_v57 = vld [vmem:[#allocation9 + $0x1800] ss:$8 sps:$4 sm:$0xff]  }
 0x4b1   :  { %10046 = vmatpush1.bf16.msra.mxu0 %v14374_v47  ;;  %10073 = vmatprep.mubr.bf16.mxu0 %v16333_v15  ;;  %v14421_v47 = vld [vmem:[#allocation9 + $0x1804] ss:$8 sps:$4 sm:$0xff]   ;;  %v14422_v15 = vld [vmem:[#allocation9 + $0xaa0] ss:$8 sps:$4 sm:$0xff]  }
 0x4b2   :  { %10047 = vmatprep.subr.bf16.mxu0 %v14382_v39  ;;  %v14416_v39 = vld [vmem:[#allocation9 + $0xa90] ss:$8 sps:$4 sm:$0xff]  }
 0x4b3   :  { %10749 = vmatpush1.bf16.msra.mxu1 %v14377_v53  ;;  %v14424_v53 = vld [vmem:[#allocation9 + $0xaa4] ss:$8 sps:$4 sm:$0xff]  }
 0x4b4   :  { %10750 = vmatprep.subr.bf16.mxu1 %v14385_v51  ;;  %v14427_v51 = vld [vmem:[#allocation9 + $0x1814] ss:$8 sps:$4 sm:$0xff]  }
 0x4b5   :  { %10048 = vmatpush1.bf16.msra.mxu0 %v14380_v29  ;;  %v14430_v29 = vld [vmem:[#allocation9 + $0xab4] ss:$8 sps:$4 sm:$0xff]  }
 0x4b6   :  { %10049 = vmatprep.subr.bf16.mxu0 %v14388_v55  ;;  %v14425_v55 = vld [vmem:[#allocation9 + $0x1810] ss:$8 sps:$4 sm:$0xff]  }
 0x4b7   :  { %10751 = vmatpush1.bf16.msra.mxu1 %v14383_v11  ;;  %v14433_v11 = vld [vmem:[#allocation9 + $0x1824] ss:$8 sps:$4 sm:$0xff]  }
 0x4b8   :  { %10752 = vmatprep.subr.bf16.mxu1 %v14391_v54  ;;  %v14428_v54 = vld [vmem:[#allocation9 + $0xab0] ss:$8 sps:$4 sm:$0xff]  }
 0x4b9   :  { %10050 = vmatpush1.bf16.msra.mxu0 %v14386_v20  ;;  %v14436_v20 = vld [vmem:[#allocation9 + $0xac4] ss:$8 sps:$4 sm:$0xff]  }
 0x4ba   :  { %10051 = vmatprep.subr.bf16.mxu0 %v14394_v24  ;;  %v14431_v24 = vld [vmem:[#allocation9 + $0x1820] ss:$8 sps:$4 sm:$0xff]  }
 0x4bb   :  { %10753 = vmatpush1.bf16.msra.mxu1 %v14389_v31  ;;  %v14439_v31 = vld [vmem:[#allocation9 + $0x1834] ss:$8 sps:$4 sm:$0xff]  }
 0x4bc   :  { %10754 = vmatprep.subr.bf16.mxu1 %v14397_v32  ;;  %v14434_v32 = vld [vmem:[#allocation9 + $0xac0] ss:$8 sps:$4 sm:$0xff]  }
 0x4bd   :  { %10052 = vmatpush1.bf16.msra.mxu0 %v14392_v17  ;;  %v14445_v17 = vld [vmem:[#allocation9 + $0x1844] ss:$8 sps:$4 sm:$0xff]  }
 0x4be   :  { %10053 = vmatprep.subr.bf16.mxu0 %v14400_v52  ;;  %v14440_v52 = vld [vmem:[#allocation9 + $0xad0] ss:$8 sps:$4 sm:$0xff]  }
 0x4bf   :  { %10755 = vmatpush1.bf16.msra.mxu1 %v14395_v46  ;;  %v14448_v46 = vld [vmem:[#allocation9 + $0xae4] ss:$8 sps:$4 sm:$0xff]  }
 0x4c0   :  { %10756 = vmatprep.subr.bf16.mxu1 %v14403_v28  ;;  %v14443_v28 = vld [vmem:[#allocation9 + $0x1840] ss:$8 sps:$4 sm:$0xff]  }
 0x4c1   :  { %10054 = vmatpush1.bf16.msra.mxu0 %v14398_v37  ;;  %v14451_v37 = vld [vmem:[#allocation9 + $0x1854] ss:$8 sps:$4 sm:$0xff]  }
 0x4c2   :  { %10055 = vmatprep.subr.bf16.mxu0 %v14406_v1  ;;  %v14446_v1 = vld [vmem:[#allocation9 + $0xae0] ss:$8 sps:$4 sm:$0xff]  }
 0x4c3   :  { %10757 = vmatpush1.bf16.msra.mxu1 %v14401_v43  ;;  %v14449_v43 = vld [vmem:[#allocation9 + $0x1850] ss:$8 sps:$4 sm:$0xff]  }
 0x4c4   :  { %10758 = vmatprep.subr.bf16.mxu1 %v14409_v18  ;;  %v14457_v18 = vld [vmem:[#allocation9 + $0x1864] ss:$8 sps:$4 sm:$0xff]  }
 0x4c5   :  { %10056 = vmatpush1.bf16.msra.mxu0 %v14404_v63  ;;  %v14460_v63 = vld [vmem:[#allocation9 + $0xb04] ss:$8 sps:$4 sm:$0xff]  }
 0x4c6   :  { %10057 = vmatprep.subr.bf16.mxu0 %v14412_v50  ;;  %v14455_v50 = vld [vmem:[#allocation9 + $0x1860] ss:$8 sps:$4 sm:$0xff]  }
 0x4c7   :  { %10759 = vmatpush1.bf16.msra.mxu1 %v14407_v7  ;;  %v14463_v7 = vld [vmem:[#allocation9 + $0x1874] ss:$8 sps:$4 sm:$0xff]  }
 0x4c8   :  { %10760 = vmatprep.subr.bf16.mxu1 %v14415_v56  ;;  %v14458_v56 = vld [vmem:[#allocation9 + $0xb00] ss:$8 sps:$4 sm:$0xff]  }
 0x4c9   :  { %10058 = vmatpush1.bf16.msra.mxu0 %v14410_v27  ;;  %v14466_v27 = vld [vmem:[#allocation9 + $0xb14] ss:$8 sps:$4 sm:$0xff]  }
 0x4ca   :  { %10059 = vmatprep.subr.bf16.mxu0 %v14418_v62  ;;  %v14461_v62 = vld [vmem:[#allocation9 + $0x1870] ss:$8 sps:$4 sm:$0xff]  }
 0x4cb   :  { %10761 = vmatpush1.bf16.msra.mxu1 %v14413_v41  ;;  %v16334_v41 = vld [vmem:[#allocation20_spill] sm:$0xff] }
 0x4cc   :  { %10783 = vmatprep.subr.bf16.mxu1 %v14421_v47  ;;  %v14469_v47 = vld [vmem:[#allocation9 + $0x1884] ss:$8 sps:$4 sm:$0xff]  }
 0x4cd   :  { %10060 = vmatpush1.bf16.msra.mxu0 %v14416_v39  ;;  %v16335_v39 = vld [vmem:[#allocation21_spill] sm:$0xff] }
 0x4ce   :  { %10763 = vmatmul.mubr.bf16.vlgmr.msra.gmra.mrb[0].mxu1 %v16044_v26  ;;  %10061 = vmatprep.subr.bf16.mxu0 %v14424_v53  ;;  %v14442_v26 = vld [vmem:[#allocation9 + $0xad4] ss:$8 sps:$4 sm:$0xff]   ;;  %v14464_v53 = vld [vmem:[#allocation9 + $0xb10] ss:$8 sps:$4 sm:$0xff]  }
 0x4cf   :  { %10772 = vmatprep.mubr.bf16.mxu1 %v16052_v40  ;;  %10784 = vmatpush1.bf16.msra.mxu1 %v14419_v57  ;;  %v14437_v40 = vld [vmem:[#allocation9 + $0x1830] ss:$8 sps:$4 sm:$0xff]   ;;  %v14472_v57 = vld [vmem:[#allocation9 + $0xb24] ss:$8 sps:$4 sm:$0xff]  }
 0x4d0   :  { %10785 = vmatprep.subr.bf16.mxu1 %v14427_v51  ;;  %v14467_v51 = vld [vmem:[#allocation9 + $0x1880] ss:$8 sps:$4 sm:$0xff]  }
 0x4d1   :  { %10062 = vmatpush1.bf16.msra.mxu0 %v14422_v15  ;;  %v14475_v15 = vld [vmem:[#allocation9 + $0x1894] ss:$8 sps:$4 sm:$0xff]  }
 0x4d2   :  { %10063 = vmatprep.subr.bf16.mxu0 %v14430_v29  ;;  %v14470_v29 = vld [vmem:[#allocation9 + $0xb20] ss:$8 sps:$4 sm:$0xff]  }
 0x4d3   :  { %10786 = vmatpush1.bf16.msra.mxu1 %v14425_v55  ;;  %v14478_v55 = vld [vmem:[#allocation9 + $0xb34] ss:$8 sps:$4 sm:$0xff]  }
 0x4d4   :  { %10787 = vmatprep.subr.bf16.mxu1 %v14433_v11  ;;  %v14473_v11 = vld [vmem:[#allocation9 + $0x1890] ss:$8 sps:$4 sm:$0xff]  }
 0x4d5   :  { %10064 = vmatpush1.bf16.msra.mxu0 %v14428_v54  ;;  %v16336_v54 = vld [vmem:[#allocation19_spill] sm:$0xff] }
 0x4d6   :  { %10773 = vmatmul.mubr.bf16.gmra.mrb[4].mxu1 %v16042_v16  ;;  %10065 = vmatprep.subr.bf16.mxu0 %v14436_v20  ;;  %v14454_v16 = vld [vmem:[#allocation9 + $0xaf4] ss:$8 sps:$4 sm:$0xff]   ;;  %v14481_v20 = vld [vmem:[#allocation9 + $0x18a4] ss:$8 sps:$4 sm:$0xff]  }
 0x4d7   :  { %10788 = vmatpush1.bf16.msra.mxu1 %v14431_v24  ;;  %10815 = vmatprep.mubr.bf16.mxu1 %v16072_v48  ;;  %v14452_v48 = vld [vmem:[#allocation9 + $0xaf0] ss:$8 sps:$4 sm:$0xff]  }
 0x4d8   :  { %10789 = vmatprep.subr.bf16.mxu1 %v14439_v31  ;;  %v16337_v24 = vld [vmem:[#allocation26_spill] sm:$0xff] }
 0x4d9   :  { %10066 = vmatpush1.bf16.msra.mxu0 %v14434_v32  ;;  %v14476_v31 = vld [vmem:[#allocation9 + $0xb30] ss:$8 sps:$4 sm:$0xff]   ;;  %v14484_v32 = vld [vmem:[#allocation9 + $0xb44] ss:$8 sps:$4 sm:$0xff]  }
 0x4da   :  { %10067 = vmatprep.subr.bf16.mxu0 %v14442_v26  ;;  %v14479_v26 = vld [vmem:[#allocation9 + $0x18a0] ss:$8 sps:$4 sm:$0xff]  }
 0x4db   :  { %10790 = vmatpush1.bf16.msra.mxu1 %v14437_v40  ;;  %v14487_v40 = vld [vmem:[#allocation9 + $0x18b4] ss:$8 sps:$4 sm:$0xff]  }
 0x4dc   :  { %10791 = vmatprep.subr.bf16.mxu1 %v14445_v17  ;;  %v14482_v17 = vld [vmem:[#allocation9 + $0xb40] ss:$8 sps:$4 sm:$0xff]  }
 0x4dd   :  { %10068 = vmatpush1.bf16.msra.mxu0 %v14440_v52  ;;  %v14490_v52 = vld [vmem:[#allocation9 + $0xb54] ss:$8 sps:$4 sm:$0xff]  }
 0x4de   :  { %10069 = vmatprep.subr.bf16.mxu0 %v14448_v46  ;;  %v14485_v46 = vld [vmem:[#allocation9 + $0x18b0] ss:$8 sps:$4 sm:$0xff]  }
 0x4df   :  { %10792 = vmatpush1.bf16.msra.mxu1 %v14443_v28  ;;  %v14493_v28 = vld [vmem:[#allocation9 + $0x18c4] ss:$8 sps:$4 sm:$0xff]  }
 0x4e0   :  { %10793 = vmatprep.subr.bf16.mxu1 %v14451_v37  ;;  %v14488_v37 = vld [vmem:[#allocation9 + $0xb50] ss:$8 sps:$4 sm:$0xff]  }
 0x4e1   :  { %10070 = vmatpush1.bf16.msra.mxu0 %v14446_v1  ;;  %v14496_v1 = vld [vmem:[#allocation9 + $0xb64] ss:$8 sps:$4 sm:$0xff]  }
 0x4e2   :  { %10071 = vmatprep.subr.bf16.mxu0 %v14454_v16  ;;  %v14491_v16 = vld [vmem:[#allocation9 + $0x18c0] ss:$8 sps:$4 sm:$0xff]  }
 0x4e3   :  { %10794 = vmatpush1.bf16.msra.mxu1 %v14449_v43  ;;  %v14499_v43 = vld [vmem:[#allocation9 + $0x18d4] ss:$8 sps:$4 sm:$0xff]  }
 0x4e4   :  { %10795 = vmatprep.subr.bf16.mxu1 %v14457_v18  ;;  %v14494_v18 = vld [vmem:[#allocation9 + $0xb60] ss:$8 sps:$4 sm:$0xff]  }
 0x4e5   :  { %10072 = vmatpush1.bf16.msra.mxu0 %v14452_v48  ;;  %v14502_v48 = vld [vmem:[#allocation9 + $0xb74] ss:$8 sps:$4 sm:$0xff]  }
 0x4e6   :  { %10094 = vmatprep.subr.bf16.mxu0 %v14460_v63  ;;  %v14497_v63 = vld [vmem:[#allocation9 + $0x18d0] ss:$8 sps:$4 sm:$0xff]  }
 0x4e7   :  { %10796 = vmatpush1.bf16.msra.mxu1 %v14455_v50  ;;  %v14505_v50 = vld [vmem:[#allocation9 + $0x18e4] ss:$8 sps:$4 sm:$0xff]  }
 0x4e8   :  { %10074 = vmatmul.mubr.bf16.vlgmr.msra.gmra.mrb[0].mxu0 %v16334_v41  ;;  %10797 = vmatprep.subr.bf16.mxu1 %v14463_v7  ;;  %v14500_v7 = vld [vmem:[#allocation9 + $0xb70] ss:$8 sps:$4 sm:$0xff]   ;;  %v14506_v41 = vld [vmem:[#allocation9 + $0xb80] ss:$8 sps:$4 sm:$0xff]  }
 0x4e9   :  { %10083 = vmatprep.mubr.bf16.mxu0 %v16335_v39  ;;  %10095 = vmatpush1.bf16.msra.mxu0 %v14458_v56  ;;  %v14508_v56 = vld [vmem:[#allocation9 + $0xb84] ss:$8 sps:$4 sm:$0xff]   ;;  %v14509_v39 = vld [vmem:[#allocation9 + $0x18f0] ss:$8 sps:$4 sm:$0xff]  }
 0x4ea   :  { %10096 = vmatprep.subr.bf16.mxu0 %v14466_v27  ;;  %v14503_v27 = vld [vmem:[#allocation9 + $0x18e0] ss:$8 sps:$4 sm:$0xff]  }
 0x4eb   :  { %10798 = vmatpush1.bf16.msra.mxu1 %v14461_v62  ;;  %v14511_v62 = vld [vmem:[#allocation9 + $0x18f4] ss:$8 sps:$4 sm:$0xff]  }
 0x4ec   :  { %10799 = vmatprep.subr.bf16.mxu1 %v14469_v47  ;;  %v14514_v47 = vld [vmem:[#allocation9 + $0xb94] ss:$8 sps:$4 sm:$0xff]  }
 0x4ed   :  { %10097 = vmatpush1.bf16.msra.mxu0 %v14464_v53  ;;  %v14517_v53 = vld [vmem:[#allocation9 + $0x1904] ss:$8 sps:$4 sm:$0xff]  }
 0x4ee   :  { %10098 = vmatprep.subr.bf16.mxu0 %v14472_v57  ;;  %v14512_v57 = vld [vmem:[#allocation9 + $0xb90] ss:$8 sps:$4 sm:$0xff]  }
 0x4ef   :  { %10800 = vmatpush1.bf16.msra.mxu1 %v14467_v51  ;;  %v14520_v51 = vld [vmem:[#allocation9 + $0xba4] ss:$8 sps:$4 sm:$0xff]  }
 0x4f0   :  { %10084 = vmatmul.mubr.bf16.gmra.mrb[4].mxu0 %v16336_v54  ;;  %10801 = vmatprep.subr.bf16.mxu1 %v14475_v15  ;;  %v14515_v15 = vld [vmem:[#allocation9 + $0x1900] ss:$8 sps:$4 sm:$0xff]   ;;  %v14521_v54 = vld [vmem:[#allocation9 + $0x1910] ss:$8 sps:$4 sm:$0xff]  }
 0x4f1   :  { %10099 = vmatpush1.bf16.msra.mxu0 %v14470_v29  ;;  %10126 = vmatprep.mubr.bf16.mxu0 %v16337_v24  ;;  %v14523_v29 = vld [vmem:[#allocation9 + $0x1914] ss:$8 sps:$4 sm:$0xff]   ;;  %v14524_v24 = vld [vmem:[#allocation9 + $0xbb0] ss:$8 sps:$4 sm:$0xff]  }
 0x4f2   :  { %10100 = vmatprep.subr.bf16.mxu0 %v14478_v55  ;;  %v14518_v55 = vld [vmem:[#allocation9 + $0xba0] ss:$8 sps:$4 sm:$0xff]  }
 0x4f3   :  { %10802 = vmatpush1.bf16.msra.mxu1 %v14473_v11  ;;  %v14526_v11 = vld [vmem:[#allocation9 + $0xbb4] ss:$8 sps:$4 sm:$0xff]  }
 0x4f4   :  { %10803 = vmatprep.subr.bf16.mxu1 %v14481_v20  ;;  %v14529_v20 = vld [vmem:[#allocation9 + $0x1924] ss:$8 sps:$4 sm:$0xff]  }
 0x4f5   :  { %10101 = vmatpush1.bf16.msra.mxu0 %v14476_v31  ;;  %v14532_v31 = vld [vmem:[#allocation9 + $0xbc4] ss:$8 sps:$4 sm:$0xff]  }
 0x4f6   :  { %10102 = vmatprep.subr.bf16.mxu0 %v14484_v32  ;;  %v14527_v32 = vld [vmem:[#allocation9 + $0x1920] ss:$8 sps:$4 sm:$0xff]  }
 0x4f7   :  { %10804 = vmatpush1.bf16.msra.mxu1 %v14479_v26  ;;  %v14535_v26 = vld [vmem:[#allocation9 + $0x1934] ss:$8 sps:$4 sm:$0xff]  }
 0x4f8   :  { %10805 = vmatprep.subr.bf16.mxu1 %v14487_v40  ;;  %v14530_v40 = vld [vmem:[#allocation9 + $0xbc0] ss:$8 sps:$4 sm:$0xff]  }
 0x4f9   :  { %10103 = vmatpush1.bf16.msra.mxu0 %v14482_v17  ;;  %v14541_v17 = vld [vmem:[#allocation9 + $0x1944] ss:$8 sps:$4 sm:$0xff]  }
 0x4fa   :  { %10104 = vmatprep.subr.bf16.mxu0 %v14490_v52  ;;  %v14536_v52 = vld [vmem:[#allocation9 + $0xbd0] ss:$8 sps:$4 sm:$0xff]  }
 0x4fb   :  { %10806 = vmatpush1.bf16.msra.mxu1 %v14485_v46  ;;  %v14544_v46 = vld [vmem:[#allocation9 + $0xbe4] ss:$8 sps:$4 sm:$0xff]  }
 0x4fc   :  { %10807 = vmatprep.subr.bf16.mxu1 %v14493_v28  ;;  %v14539_v28 = vld [vmem:[#allocation9 + $0x1940] ss:$8 sps:$4 sm:$0xff]  }
 0x4fd   :  { %10105 = vmatpush1.bf16.msra.mxu0 %v14488_v37  ;;  %v14547_v37 = vld [vmem:[#allocation9 + $0x1954] ss:$8 sps:$4 sm:$0xff]  }
 0x4fe   :  { %10106 = vmatprep.subr.bf16.mxu0 %v14496_v1  ;;  %v14542_v1 = vld [vmem:[#allocation9 + $0xbe0] ss:$8 sps:$4 sm:$0xff]  }
 0x4ff   :  { %10808 = vmatpush1.bf16.msra.mxu1 %v14491_v16  ;;  %v14545_v16 = vld [vmem:[#allocation9 + $0x1950] ss:$8 sps:$4 sm:$0xff]  }
 0x500   :  { %10809 = vmatprep.subr.bf16.mxu1 %v14499_v43  ;;  %v14553_v43 = vld [vmem:[#allocation9 + $0x1964] ss:$8 sps:$4 sm:$0xff]  }
 0x501   :  { %10107 = vmatpush1.bf16.msra.mxu0 %v14494_v18  ;;  %v14551_v18 = vld [vmem:[#allocation9 + $0x1960] ss:$8 sps:$4 sm:$0xff]  }
 0x502   :  { %10108 = vmatprep.subr.bf16.mxu0 %v14502_v48  ;;  %v14556_v48 = vld [vmem:[#allocation9 + $0x1974] ss:$8 sps:$4 sm:$0xff]  }
 0x503   :  { %10810 = vmatpush1.bf16.msra.mxu1 %v14497_v63  ;;  %v14554_v63 = vld [vmem:[#allocation9 + $0x1970] ss:$8 sps:$4 sm:$0xff]  }
 0x504   :  { %10811 = vmatprep.subr.bf16.mxu1 %v14505_v50  ;;  %v16338_v50 = vld [vmem:[#allocation24_spill] sm:$0xff] }
 0x505   :  { %10109 = vmatpush1.bf16.msra.mxu0 %v14500_v7  ;;  %v14559_v7 = vld [vmem:[#allocation9 + $0x1984] ss:$8 sps:$4 sm:$0xff]  }
 0x506   :  { %10110 = vmatprep.subr.bf16.mxu0 %v14508_v56  ;;  %v16339_v56 = vld [vmem:[#allocation25_spill] sm:$0xff] }
 0x507   :  { %10812 = vmatpush1.bf16.msra.mxu1 %v14503_v27  ;;  %v14557_v27 = vld [vmem:[#allocation9 + $0x1980] ss:$8 sps:$4 sm:$0xff]  }
 0x508   :  { %10813 = vmatprep.subr.bf16.mxu1 %v14511_v62  ;;  %v14562_v62 = vld [vmem:[#allocation9 + $0x1994] ss:$8 sps:$4 sm:$0xff]  }
 0x509   :  { %10111 = vmatpush1.bf16.msra.mxu0 %v14506_v41  ;;  %v14560_v41 = vld [vmem:[#allocation9 + $0x1990] ss:$8 sps:$4 sm:$0xff]  }
 0x50a   :  { %10112 = vmatprep.subr.bf16.mxu0 %v14514_v47  ;;  %v16340_v47 = vld [vmem:[#allocation23_spill] sm:$0xff] }
 0x50b   :  { %10814 = vmatpush1.bf16.msra.mxu1 %v14509_v39  ;;  %v14565_v39 = vld [vmem:[#allocation9 + $0x19a4] ss:$8 sps:$4 sm:$0xff]  }
 0x50c   :  { %10836 = vmatprep.subr.bf16.mxu1 %v14517_v53  ;;  %v14563_v53 = vld [vmem:[#allocation9 + $0x19a0] ss:$8 sps:$4 sm:$0xff]  }
 0x50d   :  { %10113 = vmatpush1.bf16.msra.mxu0 %v14512_v57  ;;  %v14568_v57 = vld [vmem:[#allocation9 + $0x19b4] ss:$8 sps:$4 sm:$0xff]  }
 0x50e   :  { %10816 = vmatmul.mubr.bf16.vlgmr.msra.gmra.mrb[0].mxu1 %v16062_v25  ;;  %10114 = vmatprep.subr.bf16.mxu0 %v14520_v51  ;;  %v14538_v25 = vld [vmem:[#allocation9 + $0xbd4] ss:$8 sps:$4 sm:$0xff]   ;;  %v14566_v51 = vld [vmem:[#allocation9 + $0x19b0] ss:$8 sps:$4 sm:$0xff]  }
 0x50f   :  { %10825 = vmatprep.mubr.bf16.mxu1 %v16070_v10  ;;  %10837 = vmatpush1.bf16.msra.mxu1 %v14515_v15  ;;  %v14533_v10 = vld [vmem:[#allocation9 + $0x1930] ss:$8 sps:$4 sm:$0xff]   ;;  %v14571_v15 = vld [vmem:[#allocation9 + $0x19c4] ss:$8 sps:$4 sm:$0xff]  }
 0x510   :  { %10838 = vmatprep.subr.bf16.mxu1 %v14523_v29  ;;  %v14569_v29 = vld [vmem:[#allocation9 + $0x19c0] ss:$8 sps:$4 sm:$0xff]  }
 0x511   :  { %10115 = vmatpush1.bf16.msra.mxu0 %v14518_v55  ;;  %v14574_v55 = vld [vmem:[#allocation9 + $0x19d4] ss:$8 sps:$4 sm:$0xff]  }
 0x512   :  { %10116 = vmatprep.subr.bf16.mxu0 %v14526_v11  ;;  %v14572_v11 = vld [vmem:[#allocation9 + $0x19d0] ss:$8 sps:$4 sm:$0xff]  }
 0x513   :  { %10839 = vmatpush1.bf16.msra.mxu1 %v14521_v54  ;;  %v14577_v54 = vld [vmem:[#allocation9 + $0x19e4] ss:$8 sps:$4 sm:$0xff]  }
 0x514   :  { %10840 = vmatprep.subr.bf16.mxu1 %v14529_v20  ;;  %v14575_v20 = vld [vmem:[#allocation9 + $0x19e0] ss:$8 sps:$4 sm:$0xff]  }
 0x515   :  { %10117 = vmatpush1.bf16.msra.mxu0 %v14524_v24  ;;  %v14580_v24 = vld [vmem:[#allocation9 + $0x19f4] ss:$8 sps:$4 sm:$0xff]  }
 0x516   :  { %10826 = vmatmul.mubr.bf16.gmra.mrb[4].mxu1 %v16060_v2  ;;  %10118 = vmatprep.subr.bf16.mxu0 %v14532_v31  ;;  %v14550_v2 = vld [vmem:[#allocation9 + $0xbf4] ss:$8 sps:$4 sm:$0xff]   ;;  %v14578_v31 = vld [vmem:[#allocation9 + $0x19f0] ss:$8 sps:$4 sm:$0xff]  }
 0x517   :  { %10841 = vmatpush1.bf16.msra.mxu1 %v14527_v32  ;;  %10868 = vmatprep.mubr.bf16.mxu1 %v16092_v14  ;;  %v14548_v14 = vld [vmem:[#allocation9 + $0xbf0] ss:$8 sps:$4 sm:$0xff]   ;;  %v14583_v32 = vld [vmem:[#allocation9 + $0x1a04] ss:$8 sps:$4 sm:$0xff]  }
 0x518   :  { %10842 = vmatprep.subr.bf16.mxu1 %v14535_v26  ;;  %v14581_v26 = vld [vmem:[#allocation9 + $0x1a00] ss:$8 sps:$4 sm:$0xff]  }
 0x519   :  { %10119 = vmatpush1.bf16.msra.mxu0 %v14530_v40  ;;  %v14586_v40 = vld [vmem:[#allocation9 + $0x1a14] ss:$8 sps:$4 sm:$0xff]  }
 0x51a   :  { %10120 = vmatprep.subr.bf16.mxu0 %v14538_v25  ;;  %v14584_v25 = vld [vmem:[#allocation9 + $0x1a10] ss:$8 sps:$4 sm:$0xff]  }
 0x51b   :  { %10843 = vmatpush1.bf16.msra.mxu1 %v14533_v10  ;;  %v14589_v10 = vld [vmem:[#allocation9 + $0x1a24] ss:$8 sps:$4 sm:$0xff]  }
 0x51c   :  { %10844 = vmatprep.subr.bf16.mxu1 %v14541_v17  ;;  %v14587_v17 = vld [vmem:[#allocation9 + $0x1a20] ss:$8 sps:$4 sm:$0xff]  }
 0x51d   :  { %10121 = vmatpush1.bf16.msra.mxu0 %v14536_v52  ;;  %v14592_v52 = vld [vmem:[#allocation9 + $0x1a34] ss:$8 sps:$4 sm:$0xff]  }
 0x51e   :  { %10122 = vmatprep.subr.bf16.mxu0 %v14544_v46  ;;  %v14590_v46 = vld [vmem:[#allocation9 + $0x1a30] ss:$8 sps:$4 sm:$0xff]  }
 0x51f   :  { %10845 = vmatpush1.bf16.msra.mxu1 %v14539_v28  ;;  %v14595_v28 = vld [vmem:[#allocation9 + $0x1a44] ss:$8 sps:$4 sm:$0xff]  }
 0x520   :  { %10846 = vmatprep.subr.bf16.mxu1 %v14547_v37  ;;  %v14596_v37 = vld [vmem:[#allocation9 + $0x1a50] ss:$8 sps:$4 sm:$0xff]  }
 0x521   :  { %10123 = vmatpush1.bf16.msra.mxu0 %v14542_v1  ;;  %v14601_v1 = vld [vmem:[#allocation9 + $0x1a64] ss:$8 sps:$4 sm:$0xff]  }
 0x522   :  { %10124 = vmatprep.subr.bf16.mxu0 %v14550_v2  ;;  %v14599_v2 = vld [vmem:[#allocation9 + $0x1a60] ss:$8 sps:$4 sm:$0xff]  }
 0x523   :  { %10847 = vmatpush1.bf16.msra.mxu1 %v14545_v16  ;;  %v14604_v16 = vld [vmem:[#allocation9 + $0x1a74] ss:$8 sps:$4 sm:$0xff]  }
 0x524   :  { %10848 = vmatprep.subr.bf16.mxu1 %v14553_v43  ;;  %v14607_v43 = vld [vmem:[#allocation9 + $0x1a84] ss:$8 sps:$4 sm:$0xff]  }
 0x525   :  { %10125 = vmatpush1.bf16.msra.mxu0 %v14548_v14  ;;  %v14610_v14 = vld [vmem:[#allocation9 + $0x1a94] ss:$8 sps:$4 sm:$0xff]  }
 0x527   :  { %10849 = vmatpush1.bf16.msra.mxu1 %v14551_v18  ;;  %v14608_v18 = vld [vmem:[#allocation9 + $0x1a90] ss:$8 sps:$4 sm:$0xff]  }
 0x528   :  { %10127 = vmatmul.mubr.bf16.vlgmr.msra.gmra.mrb[0].mxu0 %v16338_v50  ;;  %10850 = vmatprep.subr.bf16.mxu1 %v14556_v48  ;;  %v14613_v48 = vld [vmem:[#allocation9 + $0x1aa4] ss:$8 sps:$4 sm:$0xff]   ;;  %v14616_v50 = vld [vmem:[#allocation9 + $0x1ab4] ss:$8 sps:$4 sm:$0xff]  }
 0x529   :  { %10136 = vmatprep.mubr.bf16.mxu0 %v16339_v56 }
 0x52b   :  { %10851 = vmatpush1.bf16.msra.mxu1 %v14554_v63  ;;  %v14611_v63 = vld [vmem:[#allocation9 + $0x1aa0] ss:$8 sps:$4 sm:$0xff]  }
 0x52c   :  { %10852 = vmatprep.subr.bf16.mxu1 %v14559_v7  ;;  %v4381_v7 = vlaneseq }
 0x52e   :  { %v16234_v56 = vshrl.u32 %v4381_v7, 7 }
 0x52f   :  { %10853 = vmatpush1.bf16.msra.mxu1 %v14557_v27  ;;  %v14614_v27 = vld [vmem:[#allocation9 + $0x1ab0] ss:$8 sps:$4 sm:$0xff]  }
 0x530   :  { %10137 = vmatmul.mubr.bf16.gmra.mrb[4].mxu0 %v16340_v47  ;;  %10854 = vmatprep.subr.bf16.mxu1 %v14562_v62  ;;  %v14619_v62 = vld [vmem:[#allocation9 + $0x1ac4] ss:$8 sps:$4 sm:$0xff]   ;;  %v4383_v47 = vsub.s32 0, %v16234_v56 }
 0x533   :  { %10855 = vmatpush1.bf16.msra.mxu1 %v14560_v41  ;;  %v16236_v41 = vld [vmem:[#allocation10] sm:$0x3] }
 0x534   :  { %10856 = vmatprep.subr.bf16.mxu1 %v14565_v39  ;;  %v16240_v39 = vrot.slane %v16236_v41, %v4383_v47  ;;  %v14677_v47 = vld [vmem:[#allocation9 + $0x1c00] ss:$8 sps:$4 sm:$0xff]  }
 0x537   :  { %10857 = vmatpush1.bf16.msra.mxu1 %v14563_v53  ;;  %v14617_v53 = vld [vmem:[#allocation9 + $0x1ac0] ss:$8 sps:$4 sm:$0xff]  }
 0x538   :  { %10858 = vmatprep.subr.bf16.mxu1 %v14568_v57  ;;  %v14622_v57 = vld [vmem:[#allocation9 + $0x1ad4] ss:$8 sps:$4 sm:$0xff]  }
 0x53b   :  { %10859 = vmatpush1.bf16.msra.mxu1 %v14566_v51  ;;  %v14620_v51 = vld [vmem:[#allocation9 + $0x1ad0] ss:$8 sps:$4 sm:$0xff]  }
 0x53c   :  { %10860 = vmatprep.subr.bf16.mxu1 %v14571_v15  ;;  %v14625_v15 = vld [vmem:[#allocation9 + $0x1ae4] ss:$8 sps:$4 sm:$0xff]  }
 0x53f   :  { %10861 = vmatpush1.bf16.msra.mxu1 %v14569_v29  ;;  %v14623_v29 = vld [vmem:[#allocation9 + $0x1ae0] ss:$8 sps:$4 sm:$0xff]  }
 0x540   :  { %10862 = vmatprep.subr.bf16.mxu1 %v14574_v55  ;;  %v14628_v55 = vld [vmem:[#allocation9 + $0x1af4] ss:$8 sps:$4 sm:$0xff]  }
 0x543   :  { %10863 = vmatpush1.bf16.msra.mxu1 %v14572_v11  ;;  %v14626_v11 = vld [vmem:[#allocation9 + $0x1af0] ss:$8 sps:$4 sm:$0xff]  }
 0x544   :  { %10864 = vmatprep.subr.bf16.mxu1 %v14577_v54  ;;  %v14631_v54 = vld [vmem:[#allocation9 + $0x1b04] ss:$8 sps:$4 sm:$0xff]  }
 0x547   :  { %10865 = vmatpush1.bf16.msra.mxu1 %v14575_v20  ;;  %v14629_v20 = vld [vmem:[#allocation9 + $0x1b00] ss:$8 sps:$4 sm:$0xff]  }
 0x548   :  { %10866 = vmatprep.subr.bf16.mxu1 %v14580_v24  ;;  %v14634_v24 = vld [vmem:[#allocation9 + $0x1b14] ss:$8 sps:$4 sm:$0xff]  }
 0x54b   :  { %10867 = vmatpush1.bf16.msra.mxu1 %v14578_v31  ;;  %v14632_v31 = vld [vmem:[#allocation9 + $0x1b10] ss:$8 sps:$4 sm:$0xff]  }
 0x54c   :  { %10889 = vmatprep.subr.bf16.mxu1 %v14583_v32  ;;  %v14637_v32 = vld [vmem:[#allocation9 + $0x1b24] ss:$8 sps:$4 sm:$0xff]  }
 0x54e   :  { %10869 = vmatmul.mubr.bf16.vlgmr.msra.gmra.mrb[0].mxu1 %v16084_v5  ;;  %v14593_v5 = vld [vmem:[#allocation9 + $0x1a40] ss:$8 sps:$4 sm:$0xff]  }
 0x54f   :  { %10878 = vmatprep.mubr.bf16.mxu1 %v16090_v59  ;;  %10890 = vmatpush1.bf16.msra.mxu1 %v14581_v26  ;;  %v14598_v59 = vld [vmem:[#allocation9 + $0x1a54] ss:$8 sps:$4 sm:$0xff]   ;;  %v14635_v26 = vld [vmem:[#allocation9 + $0x1b20] ss:$8 sps:$4 sm:$0xff]  }
 0x550   :  { %10891 = vmatprep.subr.bf16.mxu1 %v14586_v40  ;;  %v14640_v40 = vld [vmem:[#allocation9 + $0x1b34] ss:$8 sps:$4 sm:$0xff]  }
 0x553   :  { %10892 = vmatpush1.bf16.msra.mxu1 %v14584_v25  ;;  %v14638_v25 = vld [vmem:[#allocation9 + $0x1b30] ss:$8 sps:$4 sm:$0xff]  }
 0x554   :  { %10893 = vmatprep.subr.bf16.mxu1 %v14589_v10  ;;  %v14643_v10 = vld [vmem:[#allocation9 + $0x1b44] ss:$8 sps:$4 sm:$0xff]  }
 0x556   :  { %10879 = vmatmul.mubr.bf16.gmra.mrb[4].mxu1 %v16082_v36  ;;  %v14602_v36 = vld [vmem:[#allocation9 + $0x1a70] ss:$8 sps:$4 sm:$0xff]  }
 0x557   :  { %10894 = vmatpush1.bf16.msra.mxu1 %v14587_v17  ;;  %10921 = vmatprep.mubr.bf16.mxu1 %v16108_v33  ;;  %v14605_v33 = vld [vmem:[#allocation9 + $0x1a80] ss:$8 sps:$4 sm:$0xff]   ;;  %v14644_v17 = vld [vmem:[#allocation9 + $0x1b50] ss:$8 sps:$4 sm:$0xff]  }
 0x558   :  { %10895 = vmatprep.subr.bf16.mxu1 %v14592_v52  ;;  %v14649_v52 = vld [vmem:[#allocation9 + $0x1b64] ss:$8 sps:$4 sm:$0xff]  }
 0x55b   :  { %10896 = vmatpush1.bf16.msra.mxu1 %v14590_v46  ;;  %v14647_v46 = vld [vmem:[#allocation9 + $0x1b60] ss:$8 sps:$4 sm:$0xff]  }
 0x55c   :  { %10897 = vmatprep.subr.bf16.mxu1 %v14595_v28  ;;  %v14652_v28 = vld [vmem:[#allocation9 + $0x1b74] ss:$8 sps:$4 sm:$0xff]  }
 0x55f   :  { %10898 = vmatpush1.bf16.msra.mxu1 %v14593_v5  ;;  %v14655_v5 = vld [vmem:[#allocation9 + $0x1b84] ss:$8 sps:$4 sm:$0xff]  }
 0x560   :  { %10899 = vmatprep.subr.bf16.mxu1 %v14598_v59  ;;  %v14658_v59 = vld [vmem:[#allocation9 + $0x1b94] ss:$8 sps:$4 sm:$0xff]  }
 0x563   :  { %10900 = vmatpush1.bf16.msra.mxu1 %v14596_v37  ;;  %v14656_v37 = vld [vmem:[#allocation9 + $0x1b90] ss:$8 sps:$4 sm:$0xff]  }
 0x564   :  { %10901 = vmatprep.subr.bf16.mxu1 %v14601_v1  ;;  %v14661_v1 = vld [vmem:[#allocation9 + $0x1ba4] ss:$8 sps:$4 sm:$0xff]  }
 0x567   :  { %10902 = vmatpush1.bf16.msra.mxu1 %v14599_v2  ;;  %v14659_v2 = vld [vmem:[#allocation9 + $0x1ba0] ss:$8 sps:$4 sm:$0xff]  }
 0x568   :  { %10903 = vmatprep.subr.bf16.mxu1 %v14604_v16  ;;  %v14664_v16 = vld [vmem:[#allocation9 + $0x1bb4] ss:$8 sps:$4 sm:$0xff]  }
 0x56b   :  { %10904 = vmatpush1.bf16.msra.mxu1 %v14602_v36  ;;  %v14662_v36 = vld [vmem:[#allocation9 + $0x1bb0] ss:$8 sps:$4 sm:$0xff]  }
 0x56c   :  { %10905 = vmatprep.subr.bf16.mxu1 %v14607_v43  ;;  %v14667_v43 = vld [vmem:[#allocation9 + $0x1bc4] ss:$8 sps:$4 sm:$0xff]  }
 0x56f   :  { %10906 = vmatpush1.bf16.msra.mxu1 %v14605_v33  ;;  %v14665_v33 = vld [vmem:[#allocation9 + $0x1bc0] ss:$8 sps:$4 sm:$0xff]  }
 0x570   :  { %10907 = vmatprep.subr.bf16.mxu1 %v14610_v14  ;;  %v14670_v14 = vld [vmem:[#allocation9 + $0x1bd4] ss:$8 sps:$4 sm:$0xff]  }
 0x573   :  { %10908 = vmatpush1.bf16.msra.mxu1 %v14608_v18  ;;  %v14668_v18 = vld [vmem:[#allocation9 + $0x1bd0] ss:$8 sps:$4 sm:$0xff]  }
 0x574   :  { %10909 = vmatprep.subr.bf16.mxu1 %v14613_v48  ;;  %v14673_v48 = vld [vmem:[#allocation9 + $0x1be4] ss:$8 sps:$4 sm:$0xff]  }
 0x577   :  { %10910 = vmatpush1.bf16.msra.mxu1 %v14611_v63  ;;  %v14671_v63 = vld [vmem:[#allocation9 + $0x1be0] ss:$8 sps:$4 sm:$0xff]  }
 0x578   :  { %10911 = vmatprep.subr.bf16.mxu1 %v14616_v50  ;;  %v14676_v50 = vld [vmem:[#allocation9 + $0x1bf4] ss:$8 sps:$4 sm:$0xff]  }
 0x57b   :  { %10912 = vmatpush1.bf16.msra.mxu1 %v14614_v27  ;;  %v14674_v27 = vld [vmem:[#allocation9 + $0x1bf0] ss:$8 sps:$4 sm:$0xff]  }
 0x57c   :  { %10913 = vmatprep.subr.bf16.mxu1 %v14619_v62  ;;  %v14679_v62 = vld [vmem:[#allocation9 + $0x1c04] ss:$8 sps:$4 sm:$0xff]  }
 0x57f   :  { %10914 = vmatpush1.bf16.msra.mxu1 %v14617_v53  ;;  %v14682_v53 = vld [vmem:[#allocation9 + $0x1c14] ss:$8 sps:$4 sm:$0xff]  }
 0x580   :  { %10915 = vmatprep.subr.bf16.mxu1 %v14622_v57  ;;  %v14680_v57 = vld [vmem:[#allocation9 + $0x1c10] ss:$8 sps:$4 sm:$0xff]  }
 0x583   :  { %10916 = vmatpush1.bf16.msra.mxu1 %v14620_v51  ;;  %v14685_v51 = vld [vmem:[#allocation9 + $0x1c24] ss:$8 sps:$4 sm:$0xff]  }
 0x584   :  { %10917 = vmatprep.subr.bf16.mxu1 %v14625_v15  ;;  %v14683_v15 = vld [vmem:[#allocation9 + $0x1c20] ss:$8 sps:$4 sm:$0xff]  }
 0x587   :  { %10918 = vmatpush1.bf16.msra.mxu1 %v14623_v29  ;;  %v14688_v29 = vld [vmem:[#allocation9 + $0x1c34] ss:$8 sps:$4 sm:$0xff]  }
 0x588   :  { %10919 = vmatprep.subr.bf16.mxu1 %v14628_v55  ;;  %v14686_v55 = vld [vmem:[#allocation9 + $0x1c30] ss:$8 sps:$4 sm:$0xff]  }
 0x58b   :  { %10920 = vmatpush1.bf16.msra.mxu1 %v14626_v11  ;;  %v14691_v11 = vld [vmem:[#allocation9 + $0x1c44] ss:$8 sps:$4 sm:$0xff]  }
 0x58c   :  { %10942 = vmatprep.subr.bf16.mxu1 %v14631_v54  ;;  %v14692_v54 = vld [vmem:[#allocation9 + $0x1c50] ss:$8 sps:$4 sm:$0xff]  }
 0x58e   :  { %10922 = vmatmul.mubr.bf16.vlgmr.msra.gmra.mrb[0].mxu1 %v16100_v0  ;;  %v14641_v0 = vld [vmem:[#allocation9 + $0x1b40] ss:$8 sps:$4 sm:$0xff]  }
 0x58f   :  { %10931 = vmatprep.mubr.bf16.mxu1 %v16106_v61  ;;  %10943 = vmatpush1.bf16.msra.mxu1 %v14629_v20  ;;  %v14646_v61 = vld [vmem:[#allocation9 + $0x1b54] ss:$8 sps:$4 sm:$0xff]   ;;  %v14697_v20 = vld [vmem:[#allocation9 + $0x1c64] ss:$8 sps:$4 sm:$0xff]  }
 0x590   :  { %10944 = vmatprep.subr.bf16.mxu1 %v14634_v24  ;;  %v14695_v24 = vld [vmem:[#allocation9 + $0x1c60] ss:$8 sps:$4 sm:$0xff]  }
 0x593   :  { %10945 = vmatpush1.bf16.msra.mxu1 %v14632_v31  ;;  %v14700_v31 = vld [vmem:[#allocation9 + $0x1c74] ss:$8 sps:$4 sm:$0xff]  }
 0x594   :  { %10946 = vmatprep.subr.bf16.mxu1 %v14637_v32  ;;  %v14703_v32 = vld [vmem:[#allocation9 + $0x1c84] ss:$8 sps:$4 sm:$0xff]  }
 0x596   :  { %10932 = vmatmul.mubr.bf16.gmra.mrb[4].mxu1 %v16098_v30  ;;  %v14650_v30 = vld [vmem:[#allocation9 + $0x1b70] ss:$8 sps:$4 sm:$0xff]  }
 0x597   :  { %10947 = vmatpush1.bf16.msra.mxu1 %v14635_v26  ;;  %10974 = vmatprep.mubr.bf16.mxu1 %v16128_v35  ;;  %v14653_v35 = vld [vmem:[#allocation9 + $0x1b80] ss:$8 sps:$4 sm:$0xff]   ;;  %v14706_v26 = vld [vmem:[#allocation9 + $0x1c94] ss:$8 sps:$4 sm:$0xff]  }
 0x598   :  { %10948 = vmatprep.subr.bf16.mxu1 %v14640_v40  ;;  %v14704_v40 = vld [vmem:[#allocation9 + $0x1c90] ss:$8 sps:$4 sm:$0xff]  }
 0x59b   :  { %10949 = vmatpush1.bf16.msra.mxu1 %v14638_v25  ;;  %v14709_v25 = vld [vmem:[#allocation9 + $0x1ca4] ss:$8 sps:$4 sm:$0xff]  }
 0x59c   :  { %10950 = vmatprep.subr.bf16.mxu1 %v14643_v10  ;;  %v14707_v10 = vld [vmem:[#allocation9 + $0x1ca0] ss:$8 sps:$4 sm:$0xff]  }
 0x59f   :  { %10951 = vmatpush1.bf16.msra.mxu1 %v14641_v0  ;;  %v14712_v0 = vld [vmem:[#allocation9 + $0x1cb4] ss:$8 sps:$4 sm:$0xff]  }
 0x5a0   :  { %10952 = vmatprep.subr.bf16.mxu1 %v14646_v61  ;;  %v14710_v61 = vld [vmem:[#allocation9 + $0x1cb0] ss:$8 sps:$4 sm:$0xff]  }
 0x5a3   :  { %10953 = vmatpush1.bf16.msra.mxu1 %v14644_v17  ;;  %v14715_v17 = vld [vmem:[#allocation9 + $0x1cc4] ss:$8 sps:$4 sm:$0xff]  }
 0x5a4   :  { %10954 = vmatprep.subr.bf16.mxu1 %v14649_v52 }
 0x5a7   :  { %10955 = vmatpush1.bf16.msra.mxu1 %v14647_v46  ;;  %v14713_v46 = vld [vmem:[#allocation9 + $0x1cc0] ss:$8 sps:$4 sm:$0xff]  }
 0x5a8   :  { %10956 = vmatprep.subr.bf16.mxu1 %v14652_v28 }
 0x5ab   :  { %10957 = vmatpush1.bf16.msra.mxu1 %v14650_v30 }
 0x5ac   :  { %10958 = vmatprep.subr.bf16.mxu1 %v14655_v5  ;;  %v14718_v5 = vld [vmem:[#allocation9 + $0x1cd4] ss:$8 sps:$4 sm:$0xff]  }
 0x5af   :  { %10959 = vmatpush1.bf16.msra.mxu1 %v14653_v35 }
 0x5b0   :  { %10960 = vmatprep.subr.bf16.mxu1 %v14658_v59 }
 0x5b3   :  { %10961 = vmatpush1.bf16.msra.mxu1 %v14656_v37 }
 0x5b4   :  { %10962 = vmatprep.subr.bf16.mxu1 %v14661_v1  ;;  %v14716_v1 = vld [vmem:[#allocation9 + $0x1cd0] ss:$8 sps:$4 sm:$0xff]  }
 0x5b7   :  { %10963 = vmatpush1.bf16.msra.mxu1 %v14659_v2  ;;  %v14721_v2 = vld [vmem:[#allocation9 + $0x1ce4] ss:$8 sps:$4 sm:$0xff]  }
 0x5b8   :  { %10964 = vmatprep.subr.bf16.mxu1 %v14664_v16 }
 0x5bb   :  { %10965 = vmatpush1.bf16.msra.mxu1 %v14662_v36  ;;  %v14719_v36 = vld [vmem:[#allocation9 + $0x1ce0] ss:$8 sps:$4 sm:$0xff]  }
 0x5bc   :  { %10966 = vmatprep.subr.bf16.mxu1 %v14667_v43 }
 0x5bf   :  { %10967 = vmatpush1.bf16.msra.mxu1 %v14665_v33 }
 0x5c0   :  { %10968 = vmatprep.subr.bf16.mxu1 %v14670_v14  ;;  %v14724_v14 = vld [vmem:[#allocation9 + $0x1cf4] ss:$8 sps:$4 sm:$0xff]  }
 0x5c3   :  { %10969 = vmatpush1.bf16.msra.mxu1 %v14668_v18 }
 0x5c4   :  { %10970 = vmatprep.subr.bf16.mxu1 %v14673_v48 }
 0x5c7   :  { %10971 = vmatpush1.bf16.msra.mxu1 %v14671_v63 }
 0x5c8   :  { %10972 = vmatprep.subr.bf16.mxu1 %v14676_v50  ;;  %v14722_v50 = vld [vmem:[#allocation9 + $0x1cf0] ss:$8 sps:$4 sm:$0xff]  }
 0x5cb   :  { %10973 = vmatpush1.bf16.msra.mxu1 %v14674_v27  ;;  %v14727_v27 = vld [vmem:[#allocation9 + $0x1d04] ss:$8 sps:$4 sm:$0xff]  }
 0x5cc   :  { %10995 = vmatprep.subr.bf16.mxu1 %v14679_v62  ;;  %v14725_v62 = vld [vmem:[#allocation9 + $0x1d00] ss:$8 sps:$4 sm:$0xff]  }
 0x5ce   :  { %10975 = vmatmul.mubr.bf16.vlgmr.msra.gmra.mrb[0].mxu1 %v16118_v6  ;;  %v14689_v6 = vld [vmem:[#allocation9 + $0x1c40] ss:$8 sps:$4 sm:$0xff]  }
 0x5cf   :  { %10984 = vmatprep.mubr.bf16.mxu1 %v16126_v23  ;;  %10996 = vmatpush1.bf16.msra.mxu1 %v14677_v47  ;;  %v14694_v23 = vld [vmem:[#allocation9 + $0x1c54] ss:$8 sps:$4 sm:$0xff]  }
 0x5d0   :  { %10997 = vmatprep.subr.bf16.mxu1 %v14682_v53  ;;  %v14730_v47 = vld [vmem:[#allocation9 + $0x1d14] ss:$8 sps:$4 sm:$0xff]   ;;  %v14728_v53 = vld [vmem:[#allocation9 + $0x1d10] ss:$8 sps:$4 sm:$0xff]  }
 0x5d3   :  { %10998 = vmatpush1.bf16.msra.mxu1 %v14680_v57  ;;  %v14733_v57 = vld [vmem:[#allocation9 + $0x1d24] ss:$8 sps:$4 sm:$0xff]  }
 0x5d4   :  { %10999 = vmatprep.subr.bf16.mxu1 %v14685_v51  ;;  %v14736_v51 = vld [vmem:[#allocation9 + $0x1d34] ss:$8 sps:$4 sm:$0xff]  }
 0x5d6   :  { %10985 = vmatmul.mubr.bf16.gmra.mrb[4].mxu1 %v16116_v22  ;;  %v14698_v22 = vld [vmem:[#allocation9 + $0x1c70] ss:$8 sps:$4 sm:$0xff]  }
 0x5d7   :  { %11000 = vmatpush1.bf16.msra.mxu1 %v14683_v15  ;;  %11027 = vmatprep.mubr.bf16.mxu1 %v16146_v21  ;;  %v14701_v21 = vld [vmem:[#allocation9 + $0x1c80] ss:$8 sps:$4 sm:$0xff]   ;;  %v14734_v15 = vld [vmem:[#allocation9 + $0x1d30] ss:$8 sps:$4 sm:$0xff]  }
 0x5d8   :  { %11001 = vmatprep.subr.bf16.mxu1 %v14688_v29  ;;  %v14739_v29 = vld [vmem:[#allocation9 + $0x1d44] ss:$8 sps:$4 sm:$0xff]  }
 0x5db   :  { %11002 = vmatpush1.bf16.msra.mxu1 %v14686_v55  ;;  %v14740_v55 = vld [vmem:[#allocation9 + $0x1d50] ss:$8 sps:$4 sm:$0xff]  }
 0x5dc   :  { %11003 = vmatprep.subr.bf16.mxu1 %v14691_v11  ;;  %v14745_v11 = vld [vmem:[#allocation9 + $0x1d64] ss:$8 sps:$4 sm:$0xff]  }
 0x5df   :  { %11004 = vmatpush1.bf16.msra.mxu1 %v14689_v6  ;;  %v14743_v6 = vld [vmem:[#allocation9 + $0x1d60] ss:$8 sps:$4 sm:$0xff]  }
 0x5e0   :  { %11005 = vmatprep.subr.bf16.mxu1 %v14694_v23  ;;  %v14748_v23 = vld [vmem:[#allocation9 + $0x1d74] ss:$8 sps:$4 sm:$0xff]  }
 0x5e3   :  { %11006 = vmatpush1.bf16.msra.mxu1 %v14692_v54  ;;  %v14751_v54 = vld [vmem:[#allocation9 + $0x1d84] ss:$8 sps:$4 sm:$0xff]  }
 0x5e4   :  { %11007 = vmatprep.subr.bf16.mxu1 %v14697_v20  ;;  %v14754_v20 = vld [vmem:[#allocation9 + $0x1d94] ss:$8 sps:$4 sm:$0xff]  }
 0x5e7   :  { %11008 = vmatpush1.bf16.msra.mxu1 %v14695_v24  ;;  %v14752_v24 = vld [vmem:[#allocation9 + $0x1d90] ss:$8 sps:$4 sm:$0xff]  }
 0x5e8   :  { %11009 = vmatprep.subr.bf16.mxu1 %v14700_v31  ;;  %v14757_v31 = vld [vmem:[#allocation9 + $0x1da4] ss:$8 sps:$4 sm:$0xff]  }
 0x5eb   :  { %11010 = vmatpush1.bf16.msra.mxu1 %v14698_v22  ;;  %v14755_v22 = vld [vmem:[#allocation9 + $0x1da0] ss:$8 sps:$4 sm:$0xff]  }
 0x5ec   :  { %11011 = vmatprep.subr.bf16.mxu1 %v14703_v32  ;;  %v14760_v32 = vld [vmem:[#allocation9 + $0x1db4] ss:$8 sps:$4 sm:$0xff]  }
 0x5ef   :  { %11012 = vmatpush1.bf16.msra.mxu1 %v14701_v21  ;;  %v14758_v21 = vld [vmem:[#allocation9 + $0x1db0] ss:$8 sps:$4 sm:$0xff]  }
 0x5f0   :  { %11013 = vmatprep.subr.bf16.mxu1 %v14706_v26  ;;  %v14763_v26 = vld [vmem:[#allocation9 + $0x1dc4] ss:$8 sps:$4 sm:$0xff]  }
 0x5f3   :  { %11014 = vmatpush1.bf16.msra.mxu1 %v14704_v40  ;;  %v14761_v40 = vld [vmem:[#allocation9 + $0x1dc0] ss:$8 sps:$4 sm:$0xff]  }
 0x5f4   :  { %11015 = vmatprep.subr.bf16.mxu1 %v14709_v25  ;;  %v14766_v25 = vld [vmem:[#allocation9 + $0x1dd4] ss:$8 sps:$4 sm:$0xff]  }
 0x5f7   :  { %11016 = vmatpush1.bf16.msra.mxu1 %v14707_v10  ;;  %v14764_v10 = vld [vmem:[#allocation9 + $0x1dd0] ss:$8 sps:$4 sm:$0xff]  }
 0x5f8   :  { %11017 = vmatprep.subr.bf16.mxu1 %v14712_v0  ;;  %v14769_v0 = vld [vmem:[#allocation9 + $0x1de4] ss:$8 sps:$4 sm:$0xff]  }
 0x5fb   :  { %v10128_v52 = vpop.f32.mrb[0].mxu0  ;;  %11018 = vmatpush1.bf16.msra.mxu1 %v14710_v61  ;;  %v14767_v61 = vld [vmem:[#allocation9 + $0x1de0] ss:$8 sps:$4 sm:$0xff]  }
 0x5fc   :  { %v16251_v28 = vadd.f32 %v10128_v52, %v16240_v39  ;;  %v16253_v30 = vpop.f32.mrb[1].mxu0  ;;  %11019 = vmatprep.subr.bf16.mxu1 %v14715_v17  ;;  %v14772_v17 = vld [vmem:[#allocation9 + $0x1df4] ss:$8 sps:$4 sm:$0xff]   ;;  %v14770_v52 = vld [vmem:[#allocation9 + $0x1df0] ss:$8 sps:$4 sm:$0xff]  }
 0x5fd   :  { %v10132_v35 = vpop.f32.mrb[2].mxu0 }
 0x5fe   :  { %v16256_v59 = vadd.f32 %v10132_v35, %v16240_v39  ;;  %v16258_v37 = vpop.f32.mrb[3].mxu0  ;;  %v14778_v35 = vld [vmem:[#allocation9 + $0x1e14] ss:$8 sps:$4 sm:$0xff]  }
 0x5ff   :  { %11020 = vmatpush1.bf16.msra.mxu1 %v14713_v46  ;;  %v14775_v46 = vld [vmem:[#allocation9 + $0x1e04] ss:$8 sps:$4 sm:$0xff]  }
 0x600   :  { %11021 = vmatprep.subr.bf16.mxu1 %v14718_v5  ;;  %v14773_v5 = vld [vmem:[#allocation9 + $0x1e00] ss:$8 sps:$4 sm:$0xff]  }
 0x603   :  { %v10138_v16 = vpop.f32.mrb[4].mxu0  ;;  %11022 = vmatpush1.bf16.msra.mxu1 %v14716_v1  ;;  %v14776_v1 = vld [vmem:[#allocation9 + $0x1e10] ss:$8 sps:$4 sm:$0xff]  }
 0x604   :  { %v16261_v43 = vadd.f32 %v10138_v16, %v16240_v39  ;;  %v16263_v33 = vpop.f32.mrb[5].mxu0  ;;  %11023 = vmatprep.subr.bf16.mxu1 %v14721_v2  ;;  %v14781_v2 = vld [vmem:[#allocation9 + $0x1e24] ss:$8 sps:$4 sm:$0xff]   ;;  %v14779_v16 = vld [vmem:[#allocation9 + $0x1e20] ss:$8 sps:$4 sm:$0xff]  }
 0x605   :  { %v10142_v18 = vpop.f32.mrb[6].mxu0 }
 0x606   :  { %v16266_v48 = vadd.f32 %v10142_v18, %v16240_v39  ;;  %v16268_v63 = vpop.f32.mrb[7].mxu0  ;;  %v14731_v39 = vld [vmem:[#allocation9 + $0x1d20] ss:$8 sps:$4 sm:$0xff]   ;;  %v14787_v18 = vld [vmem:[#allocation9 + $0x1e44] ss:$8 sps:$4 sm:$0xff]  }
 0x607   :  { %11024 = vmatpush1.bf16.msra.mxu1 %v14719_v36  ;;  %v14784_v36 = vld [vmem:[#allocation9 + $0x1e34] ss:$8 sps:$4 sm:$0xff]  }
 0x608   :  { %11025 = vmatprep.subr.bf16.mxu1 %v14724_v14  ;;  %v14782_v14 = vld [vmem:[#allocation9 + $0x1e30] ss:$8 sps:$4 sm:$0xff]  }
 0x60b   :  { %11026 = vmatpush1.bf16.msra.mxu1 %v14722_v50  ;;  %v14788_v50 = vld [vmem:[#allocation9 + $0x1e50] ss:$8 sps:$4 sm:$0xff]  }
 0x60c   :  { %11048 = vmatprep.subr.bf16.mxu1 %v14727_v27  ;;  %v14793_v27 = vld [vmem:[#allocation9 + $0x1e64] ss:$8 sps:$4 sm:$0xff]  }
 0x60e   :  { %11028 = vmatmul.mubr.bf16.vlgmr.msra.gmra.mrb[0].mxu1 %v16136_v45  ;;  %v14737_v45 = vld [vmem:[#allocation9 + $0x1d40] ss:$8 sps:$4 sm:$0xff]  }
 0x60f   :  { %11037 = vmatprep.mubr.bf16.mxu1 %v16144_v12  ;;  %11049 = vmatpush1.bf16.msra.mxu1 %v14725_v62  ;;  %v14742_v12 = vld [vmem:[#allocation9 + $0x1d54] ss:$8 sps:$4 sm:$0xff]   ;;  %v14791_v62 = vld [vmem:[#allocation9 + $0x1e60] ss:$8 sps:$4 sm:$0xff]  }
 0x610   :  { %11050 = vmatprep.subr.bf16.mxu1 %v14730_v47  ;;  %v14796_v47 = vld [vmem:[#allocation9 + $0x1e74] ss:$8 sps:$4 sm:$0xff]  }
 0x613   :  { %11051 = vmatpush1.bf16.msra.mxu1 %v14728_v53  ;;  %v14799_v53 = vld [vmem:[#allocation9 + $0x1e84] ss:$8 sps:$4 sm:$0xff]  }
 0x614   :  { %11052 = vmatprep.subr.bf16.mxu1 %v14733_v57  ;;  %v14802_v57 = vld [vmem:[#allocation9 + $0x1e94] ss:$8 sps:$4 sm:$0xff]  }
 0x616   :  { %11038 = vmatmul.mubr.bf16.gmra.mrb[4].mxu1 %v16134_v58  ;;  %v14746_v58 = vld [vmem:[#allocation9 + $0x1d70] ss:$8 sps:$4 sm:$0xff]  }
 0x617   :  { %11053 = vmatpush1.bf16.msra.mxu1 %v14731_v39  ;;  %11080 = vmatprep.mubr.bf16.mxu1 %v16164_v42  ;;  %v14749_v42 = vld [vmem:[#allocation9 + $0x1d80] ss:$8 sps:$4 sm:$0xff]   ;;  %v14800_v39 = vld [vmem:[#allocation9 + $0x1e90] ss:$8 sps:$4 sm:$0xff]  }
 0x618   :  { %11054 = vmatprep.subr.bf16.mxu1 %v14736_v51  ;;  %v14805_v51 = vld [vmem:[#allocation9 + $0x1ea4] ss:$8 sps:$4 sm:$0xff]  }
 0x61b   :  { %11055 = vmatpush1.bf16.msra.mxu1 %v14734_v15  ;;  %v14803_v15 = vld [vmem:[#allocation9 + $0x1ea0] ss:$8 sps:$4 sm:$0xff]  }
 0x61c   :  { %11056 = vmatprep.subr.bf16.mxu1 %v14739_v29  ;;  %v14808_v29 = vld [vmem:[#allocation9 + $0x1eb4] ss:$8 sps:$4 sm:$0xff]  }
 0x61f   :  { %11057 = vmatpush1.bf16.msra.mxu1 %v14737_v45  ;;  %v14806_v45 = vld [vmem:[#allocation9 + $0x1eb0] ss:$8 sps:$4 sm:$0xff]  }
 0x620   :  { %11058 = vmatprep.subr.bf16.mxu1 %v14742_v12  ;;  %v14811_v12 = vld [vmem:[#allocation9 + $0x1ec4] ss:$8 sps:$4 sm:$0xff]  }
 0x623   :  { %11059 = vmatpush1.bf16.msra.mxu1 %v14740_v55  ;;  %v14809_v55 = vld [vmem:[#allocation9 + $0x1ec0] ss:$8 sps:$4 sm:$0xff]  }
 0x624   :  { %11060 = vmatprep.subr.bf16.mxu1 %v14745_v11  ;;  %v14814_v11 = vld [vmem:[#allocation9 + $0x1ed4] ss:$8 sps:$4 sm:$0xff]  }
 0x627   :  { %11061 = vmatpush1.bf16.msra.mxu1 %v14743_v6  ;;  %v14812_v6 = vld [vmem:[#allocation9 + $0x1ed0] ss:$8 sps:$4 sm:$0xff]  }
 0x628   :  { %11062 = vmatprep.subr.bf16.mxu1 %v14748_v23  ;;  %v14817_v23 = vld [vmem:[#allocation9 + $0x1ee4] ss:$8 sps:$4 sm:$0xff]  }
 0x62b   :  { %11063 = vmatpush1.bf16.msra.mxu1 %v14746_v58  ;;  %v14815_v58 = vld [vmem:[#allocation9 + $0x1ee0] ss:$8 sps:$4 sm:$0xff]  }
 0x62c   :  { %11064 = vmatprep.subr.bf16.mxu1 %v14751_v54  ;;  %v14820_v54 = vld [vmem:[#allocation9 + $0x1ef4] ss:$8 sps:$4 sm:$0xff]  }
 0x62f   :  { %11065 = vmatpush1.bf16.msra.mxu1 %v14749_v42  ;;  %v14818_v42 = vld [vmem:[#allocation9 + $0x1ef0] ss:$8 sps:$4 sm:$0xff]  }
 0x630   :  { %11066 = vmatprep.subr.bf16.mxu1 %v14754_v20  ;;  %v14823_v20 = vld [vmem:[#allocation9 + $0x1f04] ss:$8 sps:$4 sm:$0xff]  }
 0x633   :  { %11067 = vmatpush1.bf16.msra.mxu1 %v14752_v24  ;;  %v14821_v24 = vld [vmem:[#allocation9 + $0x1f00] ss:$8 sps:$4 sm:$0xff]  }
 0x634   :  { %11068 = vmatprep.subr.bf16.mxu1 %v14757_v31  ;;  %v14826_v31 = vld [vmem:[#allocation9 + $0x1f14] ss:$8 sps:$4 sm:$0xff]  }
 0x637   :  { %11069 = vmatpush1.bf16.msra.mxu1 %v14755_v22  ;;  %v14824_v22 = vld [vmem:[#allocation9 + $0x1f10] ss:$8 sps:$4 sm:$0xff]  }
 0x638   :  { %11070 = vmatprep.subr.bf16.mxu1 %v14760_v32  ;;  %v14829_v32 = vld [vmem:[#allocation9 + $0x1f24] ss:$8 sps:$4 sm:$0xff]  }
 0x63b   :  { %11071 = vmatpush1.bf16.msra.mxu1 %v14758_v21  ;;  %v14827_v21 = vld [vmem:[#allocation9 + $0x1f20] ss:$8 sps:$4 sm:$0xff]  }
 0x63c   :  { %11072 = vmatprep.subr.bf16.mxu1 %v14763_v26  ;;  %v14832_v26 = vld [vmem:[#allocation9 + $0x1f34] ss:$8 sps:$4 sm:$0xff]  }
 0x63f   :  { %11073 = vmatpush1.bf16.msra.mxu1 %v14761_v40  ;;  %v14830_v40 = vld [vmem:[#allocation9 + $0x1f30] ss:$8 sps:$4 sm:$0xff]  }
 0x640   :  { %11074 = vmatprep.subr.bf16.mxu1 %v14766_v25  ;;  %v14835_v25 = vld [vmem:[#allocation9 + $0x1f44] ss:$8 sps:$4 sm:$0xff]  }
 0x643   :  { %11075 = vmatpush1.bf16.msra.mxu1 %v14764_v10  ;;  %v14836_v10 = vld [vmem:[#allocation9 + $0x1f50] ss:$8 sps:$4 sm:$0xff]  }
 0x644   :  { %11076 = vmatprep.subr.bf16.mxu1 %v14769_v0  ;;  %v14841_v0 = vld [vmem:[#allocation9 + $0x1f64] ss:$8 sps:$4 sm:$0xff]  }
 0x647   :  { %11077 = vmatpush1.bf16.msra.mxu1 %v14767_v61  ;;  %v14839_v61 = vld [vmem:[#allocation9 + $0x1f60] ss:$8 sps:$4 sm:$0xff]  }
 0x648   :  { %11078 = vmatprep.subr.bf16.mxu1 %v14772_v17  ;;  %v14844_v17 = vld [vmem:[#allocation9 + $0x1f74] ss:$8 sps:$4 sm:$0xff]  }
 0x64b   :  { %11079 = vmatpush1.bf16.msra.mxu1 %v14770_v52  ;;  %v14847_v52 = vld [vmem:[#allocation9 + $0x1f84] ss:$8 sps:$4 sm:$0xff]  }
 0x64c   :  { %11101 = vmatprep.subr.bf16.mxu1 %v14775_v46  ;;  %v14850_v46 = vld [vmem:[#allocation9 + $0x1f94] ss:$8 sps:$4 sm:$0xff]  }
 0x64e   :  { %11081 = vmatmul.mubr.bf16.vlgmr.msra.gmra.mrb[0].mxu1 %v16156_v13  ;;  %v14785_v13 = vld [vmem:[#allocation9 + $0x1e40] ss:$8 sps:$4 sm:$0xff]  }
 0x64f   :  { %11090 = vmatprep.mubr.bf16.mxu1 %v16162_v3  ;;  %11102 = vmatpush1.bf16.msra.mxu1 %v14773_v5  ;;  %v14790_v3 = vld [vmem:[#allocation9 + $0x1e54] ss:$8 sps:$4 sm:$0xff]   ;;  %v14848_v5 = vld [vmem:[#allocation9 + $0x1f90] ss:$8 sps:$4 sm:$0xff]  }
 0x650   :  { %11103 = vmatprep.subr.bf16.mxu1 %v14778_v35  ;;  %v14853_v35 = vld [vmem:[#allocation9 + $0x1fa4] ss:$8 sps:$4 sm:$0xff]  }
 0x653   :  { %11104 = vmatpush1.bf16.msra.mxu1 %v14776_v1  ;;  %v14851_v1 = vld [vmem:[#allocation9 + $0x1fa0] ss:$8 sps:$4 sm:$0xff]  }
 0x654   :  { %11105 = vmatprep.subr.bf16.mxu1 %v14781_v2  ;;  %v14856_v2 = vld [vmem:[#allocation9 + $0x1fb4] ss:$8 sps:$4 sm:$0xff]  }
 0x656   :  { %11091 = vmatmul.mubr.bf16.gmra.mrb[4].mxu1 %v16154_v49  ;;  %v14794_v49 = vld [vmem:[#allocation9 + $0x1e70] ss:$8 sps:$4 sm:$0xff]  }
 0x657   :  { %11106 = vmatpush1.bf16.msra.mxu1 %v14779_v16  ;;  %11133 = vmatprep.mubr.bf16.mxu1 %v16180_v8  ;;  %v14797_v8 = vld [vmem:[#allocation9 + $0x1e80] ss:$8 sps:$4 sm:$0xff]   ;;  %v14854_v16 = vld [vmem:[#allocation9 + $0x1fb0] ss:$8 sps:$4 sm:$0xff]  }
 0x658   :  { %11107 = vmatprep.subr.bf16.mxu1 %v14784_v36  ;;  %v14859_v36 = vld [vmem:[#allocation9 + $0x1fc4] ss:$8 sps:$4 sm:$0xff]  }
 0x65b   :  { %11108 = vmatpush1.bf16.msra.mxu1 %v14782_v14  ;;  %v14857_v14 = vld [vmem:[#allocation9 + $0x1fc0] ss:$8 sps:$4 sm:$0xff]  }
 0x65c   :  { %11109 = vmatprep.subr.bf16.mxu1 %v14787_v18  ;;  %v14862_v18 = vld [vmem:[#allocation9 + $0x1fd4] ss:$8 sps:$4 sm:$0xff]  }
 0x65f   :  { %11110 = vmatpush1.bf16.msra.mxu1 %v14785_v13  ;;  %v14860_v13 = vld [vmem:[#allocation9 + $0x1fd0] ss:$8 sps:$4 sm:$0xff]  }
 0x660   :  { %11111 = vmatprep.subr.bf16.mxu1 %v14790_v3  ;;  %v14865_v3 = vld [vmem:[#allocation9 + $0x1fe4] ss:$8 sps:$4 sm:$0xff]  }
 0x663   :  { %11112 = vmatpush1.bf16.msra.mxu1 %v14788_v50  ;;  %v14863_v50 = vld [vmem:[#allocation9 + $0x1fe0] ss:$8 sps:$4 sm:$0xff]  }
 0x664   :  { %11113 = vmatprep.subr.bf16.mxu1 %v14793_v27  ;;  %v14868_v27 = vld [vmem:[#allocation9 + $0x1ff4] ss:$8 sps:$4 sm:$0xff]  }
 0x667   :  { %11114 = vmatpush1.bf16.msra.mxu1 %v14791_v62  ;;  %v14866_v62 = vld [vmem:[#allocation9 + $0x1ff0] ss:$8 sps:$4 sm:$0xff]  }
 0x668   :  { %11115 = vmatprep.subr.bf16.mxu1 %v14796_v47  ;;  %v4387_v47 = vsub.s32 1, %v16234_v56 }
 0x66b   :  { %11116 = vmatpush1.bf16.msra.mxu1 %v14794_v49  ;;  %v4388_v49 = vrot.slane %v16236_v41, %v4387_v47 }
 0x66c   :  { %11117 = vmatprep.subr.bf16.mxu1 %v14799_v53 }
 0x66d   :  { %v12938_v53 = vadd.f32 %v16253_v30, %v4388_v49  ;;  %v12946_v41 = vadd.f32 %v16263_v33, %v4388_v49 }
 0x66f   :  { %11118 = vmatpush1.bf16.msra.mxu1 %v14797_v8 }
 0x670   :  { %11119 = vmatprep.subr.bf16.mxu1 %v14802_v57 }
 0x673   :  { %11120 = vmatpush1.bf16.msra.mxu1 %v14800_v39 }
 0x674   :  { %11121 = vmatprep.subr.bf16.mxu1 %v14805_v51  ;;  %v12942_v51 = vadd.f32 %v16258_v37, %v4388_v49 }
 0x677   :  { %11122 = vmatpush1.bf16.msra.mxu1 %v14803_v15 }
 0x678   :  { %11123 = vmatprep.subr.bf16.mxu1 %v14808_v29 }
 0x67b   :  { %11124 = vmatpush1.bf16.msra.mxu1 %v14806_v45 }
 0x67c   :  { %11125 = vmatprep.subr.bf16.mxu1 %v14811_v12 }
 0x67f   :  { %11126 = vmatpush1.bf16.msra.mxu1 %v14809_v55 }
 0x680   :  { %11127 = vmatprep.subr.bf16.mxu1 %v14814_v11 }
 0x683   :  { %11128 = vmatpush1.bf16.msra.mxu1 %v14812_v6  ;;  %v12950_v6 = vadd.f32 %v16268_v63, %v4388_v49 }
 0x684   :  { %11129 = vmatprep.subr.bf16.mxu1 %v14817_v23 }
 0x687   :  { %11130 = vmatpush1.bf16.msra.mxu1 %v14815_v58 }
 0x688   :  { %11131 = vmatprep.subr.bf16.mxu1 %v14820_v54 }
 0x68b   :  { %11132 = vmatpush1.bf16.msra.mxu1 %v14818_v42 }
 0x68c   :  { %11154 = vmatprep.subr.bf16.mxu1 %v14823_v20 }
 0x68e   :  { %11134 = vmatmul.mubr.bf16.vlgmr.msra.gmra.mrb[0].mxu1 %v16172_v34  ;;  %v14833_v34 = vld [vmem:[#allocation9 + $0x1f40] ss:$8 sps:$4 sm:$0xff]  }
 0x68f   :  { %11143 = vmatprep.mubr.bf16.mxu1 %v16178_v60  ;;  %11155 = vmatpush1.bf16.msra.mxu1 %v14821_v24  ;;  %v14838_v60 = vld [vmem:[#allocation9 + $0x1f54] ss:$8 sps:$4 sm:$0xff]  }
 0x690   :  { %11156 = vmatprep.subr.bf16.mxu1 %v14826_v31 }
 0x693   :  { %11157 = vmatpush1.bf16.msra.mxu1 %v14824_v22 }
 0x694   :  { %11158 = vmatprep.subr.bf16.mxu1 %v14829_v32 }
 0x696   :  { %11144 = vmatmul.mubr.bf16.gmra.mrb[4].mxu1 %v16170_v44  ;;  %v14842_v44 = vld [vmem:[#allocation9 + $0x1f70] ss:$8 sps:$4 sm:$0xff]  }
 0x697   :  { %11159 = vmatpush1.bf16.msra.mxu1 %v14827_v21  ;;  %11186 = vmatprep.mubr.bf16.mxu1 %v16200_v9  ;;  %v14845_v9 = vld [vmem:[#allocation9 + $0x1f80] ss:$8 sps:$4 sm:$0xff]  }
 0x698   :  { %11160 = vmatprep.subr.bf16.mxu1 %v14832_v26 }
 0x69b   :  { %11161 = vmatpush1.bf16.msra.mxu1 %v14830_v40 }
 0x69c   :  { %11162 = vmatprep.subr.bf16.mxu1 %v14835_v25 }
 0x69f   :  { %11163 = vmatpush1.bf16.msra.mxu1 %v14833_v34 }
 0x6a0   :  { %11164 = vmatprep.subr.bf16.mxu1 %v14838_v60 }
 0x6a3   :  { %11165 = vmatpush1.bf16.msra.mxu1 %v14836_v10 }
 0x6a4   :  { %11166 = vmatprep.subr.bf16.mxu1 %v14841_v0 }
 0x6a7   :  { %11167 = vmatpush1.bf16.msra.mxu1 %v14839_v61 }
 0x6a8   :  { %11168 = vmatprep.subr.bf16.mxu1 %v14844_v17 }
 0x6ab   :  { %11169 = vmatpush1.bf16.msra.mxu1 %v14842_v44 }
 0x6ac   :  { %11170 = vmatprep.subr.bf16.mxu1 %v14847_v52 }
 0x6af   :  { %11171 = vmatpush1.bf16.msra.mxu1 %v14845_v9 }
 0x6b0   :  { %11172 = vmatprep.subr.bf16.mxu1 %v14850_v46 }
 0x6b3   :  { %11173 = vmatpush1.bf16.msra.mxu1 %v14848_v5 }
 0x6b4   :  { %11174 = vmatprep.subr.bf16.mxu1 %v14853_v35 }
 0x6b7   :  { %11175 = vmatpush1.bf16.msra.mxu1 %v14851_v1 }
 0x6b8   :  { %11176 = vmatprep.subr.bf16.mxu1 %v14856_v2 }
 0x6bb   :  { %11177 = vmatpush1.bf16.msra.mxu1 %v14854_v16 }
 0x6bc   :  { %11178 = vmatprep.subr.bf16.mxu1 %v14859_v36 }
 0x6bf   :  { %11179 = vmatpush1.bf16.msra.mxu1 %v14857_v14 }
 0x6c0   :  { %11180 = vmatprep.subr.bf16.mxu1 %v14862_v18 }
 0x6c3   :  { %11181 = vmatpush1.bf16.msra.mxu1 %v14860_v13 }
 0x6c4   :  { %11182 = vmatprep.subr.bf16.mxu1 %v14865_v3 }
 0x6c7   :  { %11183 = vmatpush1.bf16.msra.mxu1 %v14863_v50 }
 0x6c8   :  { %11184 = vmatprep.subr.bf16.mxu1 %v14868_v27 }
 0x6cb   :  { %11185 = vmatpush1.bf16.msra.mxu1 %v14866_v62 }
 0x6ce   :  { %11187 = vmatmul.mubr.bf16.vlgmr.msra.gmra.mrb[0].mxu1 %v16190_v19 }
 0x6cf   :  { %11196 = vmatprep.mubr.bf16.mxu1 %v16198_v4  ;;  %v12542_v4 = vld [vmem:[#allocation12] ss:$0 sm:$0xff] }
 0x6d6   :  { %11197 = vmatmul.mubr.bf16.gmra.mrb[4].mxu1 %v16188_v38 }
 0x7a1   :  { %v11188_v8 = vpop.f32.mrb[0].mxu1 }
 0x7a2   :  { %v12937_v57 = vadd.f32 %v16251_v28, %v11188_v8  ;;  %v11190_v39 = vpop.f32.mrb[1].mxu1 }
 0x7a3   :  { %v12939_v15 = vadd.f32 %v12938_v53, %v11190_v39  ;;  %v11192_v29 = vpop.f32.mrb[2].mxu1 }
 0x7a4   :  { %v12941_v19 = vadd.f32 %v16256_v59, %v11192_v29  ;;  %v11194_v45 = vpop.f32.mrb[3].mxu1 }
 0x7a5   :  { %v11207_v12 = vmax.f32 %v12939_v15, 0.0  ;;  %v12943_v38 = vadd.f32 %v12942_v51, %v11194_v45 }
 0x7a7   :  { %v11208_v55 = vmax.f32 %v12943_v38, 0.0  ;;  %v11218_v56 = vmul.f32 %v12542_v4, %v11207_v12 }
 0x7a9   :  { %v11198_v11 = vpop.f32.mrb[4].mxu1  ;;  %11222 = vadd.xlane.f32.xlu0 %v11218_v56  ;;  %v11219_v58 = vmul.f32 %v12542_v4, %v11208_v55 }
 0x7aa   :  { %v12945_v30 = vadd.f32 %v16261_v43, %v11198_v11  ;;  %v11200_v28 = vpop.f32.mrb[5].mxu1  ;;  %v11231_v43 = vstv %s16317_s6 }
 0x7ab   :  { %v12947_v37 = vadd.f32 %v12946_v41, %v11200_v28  ;;  %v11202_v23 = vpop.f32.mrb[6].mxu1 }
 0x7ac   :  { %v12949_v59 = vadd.f32 %v16266_v48, %v11202_v23  ;;  %v11204_v54 = vpop.f32.mrb[7].mxu1  ;;  %v11241_v48 = vand.u32 127, %v4381_v7 }
 0x7ad   :  { %v11209_v42 = vmax.f32 %v12947_v37, 0.0  ;;  %v12951_v20 = vadd.f32 %v12950_v6, %v11204_v54  ;;  %11224 = vadd.xlane.f32.xlu0 %v11219_v58 }
 0x7ae   :  { %vm11242_vm2 = vcmp.eq.s32.totalorder %v11241_v48, 64 }
 0x7af   :  { %v11210_v24 = vmax.f32 %v12951_v20, 0.0  ;;  %v11220_v31 = vmul.f32 %v12542_v4, %v11209_v42 }
 0x7b1   :  { %11226 = vadd.xlane.f32.xlu1 %v11220_v31  ;;  %v11221_v33 = vmul.f32 %v12542_v4, %v11210_v24 }
 0x7b5   :  { %11228 = vadd.xlane.f32.xlu1 %v11221_v33 }
 0x836   :  { %v11223_v22 = vpop.xlane.xlu0 %11222 }
 0x837   :  { %v11232_v63 = vadd.f32 %v11231_v43, %v11223_v22 }
 0x839   :  { %14869 = vtanh.f32 %v11232_v63 }
 0x83a   :  { %v11225_v32 = vpop.xlane.xlu0 %11224 }
 0x83b   :  { %v11233_v21 = vadd.f32 %v11231_v43, %v11225_v32 }
 0x83d   :  { %14871 = vtanh.f32 %v11233_v21 }
 0x83e   :  { %v11227_v26 = vpop.xlane.xlu1 %11226 }
 0x83f   :  { %v11234_v40 = vadd.f32 %v11231_v43, %v11227_v26 }
 0x841   :  { %14873 = vtanh.f32 %v11234_v40 }
 0x842   :  { %v11229_v25 = vpop.xlane.xlu1 %11228 }
 0x843   :  { %v14870_v34 = vpop.eup %14869  ;;  %v11235_v60 = vadd.f32 %v11231_v43, %v11229_v25 }
 0x844   :  { %v11243_v10 = vsel %vm11242_vm2, %v14870_v34, %v12937_v57 }
 0x845   :  { %11247 = vst [vmem:[%s16318_s7] sm:$0xff] %v11243_v10  ;;  %14875 = vtanh.f32 %v11235_v60 }
 0x847   :  { %v14872_v0 = vpop.eup %14871 }
 0x848   :  { %v11244_v61 = vsel %vm11242_vm2, %v14872_v0, %v12941_v19 }
 0x849   :  { %11248 = vst [vmem:[%s16318_s7 + $0x8] sm:$0xff] %v11244_v61 }
 0x84b   :  { %v14874_v7 = vpop.eup %14873 }
 0x84c   :  { %v11245_v17 = vsel %vm11242_vm2, %v14874_v7, %v12945_v30 }
 0x84d   :  { %11249 = vst [vmem:[%s16318_s7 + $0x10] sm:$0xff] %v11245_v17 }
 0x84f   :  { %v14876_v44 = vpop.eup %14875 }
 0x850   :  { %v11246_v52 = vsel %vm11242_vm2, %v14876_v44, %v12949_v59 }
 0x851   :  { %11250 = vst [vmem:[%s16318_s7 + $0x18] sm:$0xff] %v11246_v52 }
 0x852   :  { %11255 = vsyncpa [#allocation6], 1 }
 0x853   :  { %11256 = vsyncpa [#allocation8], 1 }
 0x854   :  { %11257 = vsyncpa [#allocation11], 1 }

</bundles_post_ra>
